<compile_context>
chip_gen: v7x
topology: tpu7x:2x2x1
jax: 0.10.0
libtpu: 0.0.40
codegen_flags: <defaults>
</compile_context>

<pallas_src>
import functools

import numpy as np

import jax
import jax.numpy as jnp
from jax.experimental import pallas as pl
from jax.experimental.pallas import tpu as pltpu

BN_EPS = 1e-5


# ---------------------------------------------------------------------------
# Fused kernel: all stages in one call, activations never leave VMEM.
# Stage L inputs (all VMEM refs):
#   S_ref     (T, M_out, M_in)  bf16   0/1 patch/row-selection matrices
#   W_ref     (T, C_in, C_out)  bf16   BN-folded per-tap weights
#   shift_ref (1, C_out)        f32    BN-folded bias/shift
# ---------------------------------------------------------------------------
def _es_fused_kernel(tap_counts, x_ref, *refs):
    o_ref = refs[-1]
    stage_refs = refs[:-1]

    x = x_ref[...]  # (B*H*W, C_in) bf16
    n_stages = len(tap_counts)

    for li in range(n_stages):
        s_ref = stage_refs[3 * li + 0]
        w_ref = stage_refs[3 * li + 1]
        shift_ref = stage_refs[3 * li + 2]

        acc = None
        for t in range(tap_counts[li]):
            # Gather the stride-2 3x3 patch rows (or fc spatial taps) on the MXU.
            p = jnp.dot(s_ref[t], x, preferred_element_type=jnp.float32)
            y = jnp.dot(p.astype(jnp.bfloat16), w_ref[t],
                        preferred_element_type=jnp.float32)
            acc = y if acc is None else acc + y

        y = acc + shift_ref[...]  # folded bias + eval-mode BatchNorm shift

        if li + 1 < n_stages:
            # ELU(alpha=1) in f32, recast to bf16 for the next MXU stage.
            x = jnp.where(y > 0.0, y,
                          jnp.exp(jnp.minimum(y, 0.0)) - 1.0).astype(jnp.bfloat16)
        else:
            # Row softmax (exact f32 division so rows sum to 1 tightly).
            m = jnp.max(y, axis=-1, keepdims=True)
            e = jnp.exp(y - m)
            o_ref[...] = (e / jnp.sum(e, axis=-1, keepdims=True)).astype(o_ref.dtype)


def es_forward(x_nchw, operands):
    """operands: list of (S_stack bf16, W_stack bf16, shift f32) per stage."""
    b, c, h, w = x_nchw.shape
    # rows = (batch, h, w), cols = channels; single tiny layout op before the kernel
    x_rows = jnp.transpose(x_nchw, (0, 2, 3, 1)).reshape(b * h * w, c)
    x_rows = x_rows.astype(jnp.bfloat16)

    tap_counts = tuple(int(st[0].shape[0]) for st in operands)
    num_outputs = int(operands[-1][1].shape[-1])

    flat_inputs = [x_rows]
    for st in operands:
        flat_inputs.extend(st)

    vmem = pl.BlockSpec(memory_space=pltpu.MemorySpace.VMEM)
    return pl.pallas_call(
        functools.partial(_es_fused_kernel, tap_counts),
        out_shape=jax.ShapeDtypeStruct((b, num_outputs), jnp.float32),
        in_specs=[vmem] * len(flat_inputs),
        out_specs=vmem,
    )(*flat_inputs)


# ---------------------------------------------------------------------------
# Parameter construction (deterministic, matches ES.__init__ shapes / init:
# normal(std=0.05) weights & BN gammas, zero biases/betas, eval-mode BN stats).
# ---------------------------------------------------------------------------
def make_params(key, num_inputs, hw, num_outputs):
    conv_channels = [num_inputs, 32, 32, 32, 32]
    keys = jax.random.split(key, 16)
    ki = 0
    convs = []
    h = w = hw
    for li in range(4):
        cin, cout = conv_channels[li], conv_channels[li + 1]
        w_hwio = 0.05 * jax.random.normal(keys[ki], (3, 3, cin, cout), jnp.float32)
        ki += 1
        gamma = 0.05 * jax.random.normal(keys[ki], (cout,), jnp.float32)
        ki += 1
        convs.append(dict(w=w_hwio,
                          b=jnp.zeros((cout,), jnp.float32),
                          gamma=gamma,
                          beta=jnp.zeros((cout,), jnp.float32),
                          mean=jnp.zeros((cout,), jnp.float32),
                          var=jnp.ones((cout,), jnp.float32)))
        h = (h - 1) // 2 + 1
        w = (w - 1) // 2 + 1
    num_conv_outputs = 32 * h * w

    def fc(kw_, kg_, fan_in, fan_out):
        return dict(w=0.05 * jax.random.normal(kw_, (fan_in, fan_out), jnp.float32),
                    b=jnp.zeros((fan_out,), jnp.float32),
                    gamma=0.05 * jax.random.normal(kg_, (fan_out,), jnp.float32),
                    beta=jnp.zeros((fan_out,), jnp.float32),
                    mean=jnp.zeros((fan_out,), jnp.float32),
                    var=jnp.ones((fan_out,), jnp.float32))

    fc1 = fc(keys[ki], keys[ki + 1], num_conv_outputs, 256)
    ki += 2
    fc2 = fc(keys[ki], keys[ki + 1], 256, num_outputs)
    return {"convs": convs, "fc1": fc1, "fc2": fc2,
            "num_conv_outputs": num_conv_outputs,
            "final_hw": (h, w)}


# ---------------------------------------------------------------------------
# Structural constants + folded weights, built ONCE per (params, batch, hw).
# ---------------------------------------------------------------------------
def _conv_selectors(batch, h, w):
    """9 block-diagonal 0/1 matrices mapping (b,ih,iw) rows -> (b,oh,ow) rows
    for a 3x3 / stride-2 / pad-1 conv."""
    ho = (h - 1) // 2 + 1
    wo = (w - 1) // 2 + 1
    mats = np.zeros((9, batch * ho * wo, batch * h * w), np.float32)
    for kh in range(3):
        for kw in range(3):
            t = kh * 3 + kw
            for b in range(batch):
                for oh in range(ho):
                    ih = 2 * oh + kh - 1
                    if ih < 0 or ih >= h:
                        continue
                    for ow in range(wo):
                        iw = 2 * ow + kw - 1
                        if iw < 0 or iw >= w:
                            continue
                        mats[t,
                             b * ho * wo + oh * wo + ow,
                             b * h * w + ih * w + iw] = 1.0
    return mats, (ho, wo)


def build_kernel_operands(params, batch, hw):
    """Returns [(S_stack bf16, W_stack bf16, shift f32), ...] for the 6 stages."""
    stages = []
    h = w = hw

    # conv1..conv4: 9 taps each, BN folded into per-tap weights.
    for conv in params["convs"]:
        cin, cout = conv["w"].shape[2], conv["w"].shape[3]
        sel, (ho, wo) = _conv_selectors(batch, h, w)
        scale = conv["gamma"] / jnp.sqrt(conv["var"] + BN_EPS)
        w_taps = conv["w"].reshape(9, cin, cout) * scale[None, None, :]
        shift = ((conv["b"] - conv["mean"]) * scale + conv["beta"]).reshape(1, -1)
        stages.append((jnp.asarray(sel, jnp.bfloat16),
                       w_taps.astype(jnp.bfloat16),
                       shift.astype(jnp.float32)))
        h, w = ho, wo

    hw4 = h * w
    c4 = params["convs"][-1]["w"].shape[3]

    # fc1: one tap per remaining spatial position; the NCHW flatten of the
    # reference is folded into the tap layout of the weight (row permutation).
    fc1 = params["fc1"]
    scale1 = fc1["gamma"] / jnp.sqrt(fc1["var"] + BN_EPS)
    w1_taps = (fc1["w"].reshape(c4, hw4, fc1["w"].shape[1])
               .transpose(1, 0, 2) * scale1[None, None, :])
    shift1 = ((fc1["b"] - fc1["mean"]) * scale1 + fc1["beta"]).reshape(1, -1)
    sel_fc1 = np.zeros((hw4, batch, batch * hw4), np.float32)
    for p in range(hw4):
        for b in range(batch):
            sel_fc1[p, b, b * hw4 + p] = 1.0
    stages.append((jnp.asarray(sel_fc1, jnp.bfloat16),
                   w1_taps.astype(jnp.bfloat16),
                   shift1.astype(jnp.float32)))

    # fc2: single tap, identity selector (keeps the kernel stage-uniform).
    fc2 = params["fc2"]
    scale2 = fc2["gamma"] / jnp.sqrt(fc2["var"] + BN_EPS)
    w2_taps = (fc2["w"] * scale2[None, :])[None]
    shift2 = ((fc2["b"] - fc2["mean"]) * scale2 + fc2["beta"]).reshape(1, -1)
    sel_fc2 = np.eye(batch, dtype=np.float32)[None]
    stages.append((jnp.asarray(sel_fc2, jnp.bfloat16),
                   w2_taps.astype(jnp.bfloat16),
                   shift2.astype(jnp.float32)))
    return stages


if __name__ == "__main__":
    key = jax.random.PRNGKey(0)
    k_param, k_x = jax.random.split(key)

    batch, num_inputs, hw, num_outputs = 2, 4, 16, 6
    params = make_params(k_param, num_inputs, hw, num_outputs)
    operands = build_kernel_operands(params, batch, hw)   # built once, reused per forward

    x = jax.random.normal(k_x, (batch, num_inputs, hw, hw), jnp.float32)  # NCHW

    out = jax.jit(es_forward)(x, operands)
    out = jax.block_until_ready(out)

    assert out.shape == (batch, num_outputs)
    # softmax rows must sum to ~1
    assert bool(jnp.all(jnp.abs(jnp.sum(out, axis=-1) - 1.0) < 1e-4))
    print("KERNEL_OK")
</pallas_src>

<mosaic_0001>
module attributes {stable_mosaic.version = 11 : i64} {
  func.func @_es_fused_kernel(%arg0: memref<512x4xbf16, #tpu.memory_space<vmem>>, %arg1: memref<9x128x512xbf16, #tpu.memory_space<vmem>>, %arg2: memref<9x4x32xbf16, #tpu.memory_space<vmem>>, %arg3: memref<1x32xf32, #tpu.memory_space<vmem>>, %arg4: memref<9x32x128xbf16, #tpu.memory_space<vmem>>, %arg5: memref<9x32x32xbf16, #tpu.memory_space<vmem>>, %arg6: memref<1x32xf32, #tpu.memory_space<vmem>>, %arg7: memref<9x8x32xbf16, #tpu.memory_space<vmem>>, %arg8: memref<9x32x32xbf16, #tpu.memory_space<vmem>>, %arg9: memref<1x32xf32, #tpu.memory_space<vmem>>, %arg10: memref<9x2x8xbf16, #tpu.memory_space<vmem>>, %arg11: memref<9x32x32xbf16, #tpu.memory_space<vmem>>, %arg12: memref<1x32xf32, #tpu.memory_space<vmem>>, %arg13: memref<1x2x2xbf16, #tpu.memory_space<vmem>>, %arg14: memref<1x32x256xbf16, #tpu.memory_space<vmem>>, %arg15: memref<1x256xf32, #tpu.memory_space<vmem>>, %arg16: memref<1x2x2xbf16, #tpu.memory_space<vmem>>, %arg17: memref<1x256x6xbf16, #tpu.memory_space<vmem>>, %arg18: memref<1x6xf32, #tpu.memory_space<vmem>>, %arg19: memref<2x6xf32, #tpu.memory_space<vmem>>) attributes {dimension_semantics = [], scalar_prefetch = 0 : i64, scratch_operands = 0 : i64, tpu.core_type = #tpu.core_type<tc>} {
    %c0 = arith.constant 0 : index
    %c0_0 = arith.constant 0 : index
    %0 = vector.load %arg0[%c0, %c0_0] : memref<512x4xbf16, #tpu.memory_space<vmem>>, vector<512x4xbf16>
    %c0_1 = arith.constant 0 : index
    %c0_2 = arith.constant 0 : index
    %c0_3 = arith.constant 0 : index
    %1 = vector.load %arg1[%c0_1, %c0_2, %c0_3] : memref<9x128x512xbf16, #tpu.memory_space<vmem>>, vector<1x128x512xbf16>
    %2 = vector.shape_cast %1 : vector<1x128x512xbf16> to vector<128x512xbf16>
    %cst = arith.constant dense<0.000000e+00> : vector<128x4xf32>
    %3 = tpu.matmul %2, %0, %cst {dimension_numbers = #tpu.dot_dimension_numbers<[1], [0], [0], [1], [0, 0, 1, 1], [], []>} : vector<128x512xbf16>, vector<512x4xbf16>, vector<128x4xf32> -> vector<128x4xf32>
    %4 = arith.truncf %3 : vector<128x4xf32> to vector<128x4xbf16>
    %c0_4 = arith.constant 0 : index
    %c0_5 = arith.constant 0 : index
    %c0_6 = arith.constant 0 : index
    %5 = vector.load %arg2[%c0_4, %c0_5, %c0_6] : memref<9x4x32xbf16, #tpu.memory_space<vmem>>, vector<1x4x32xbf16>
    %6 = vector.shape_cast %5 : vector<1x4x32xbf16> to vector<4x32xbf16>
    %cst_7 = arith.constant dense<0.000000e+00> : vector<128x32xf32>
    %7 = tpu.matmul %4, %6, %cst_7 {dimension_numbers = #tpu.dot_dimension_numbers<[1], [0], [0], [1], [0, 0, 1, 1], [], []>} : vector<128x4xbf16>, vector<4x32xbf16>, vector<128x32xf32> -> vector<128x32xf32>
    %c1 = arith.constant 1 : index
    %c0_8 = arith.constant 0 : index
    %c0_9 = arith.constant 0 : index
    %8 = vector.load %arg1[%c1, %c0_8, %c0_9] : memref<9x128x512xbf16, #tpu.memory_space<vmem>>, vector<1x128x512xbf16>
    %9 = vector.shape_cast %8 : vector<1x128x512xbf16> to vector<128x512xbf16>
    %cst_10 = arith.constant dense<0.000000e+00> : vector<128x4xf32>
    %10 = tpu.matmul %9, %0, %cst_10 {dimension_numbers = #tpu.dot_dimension_numbers<[1], [0], [0], [1], [0, 0, 1, 1], [], []>} : vector<128x512xbf16>, vector<512x4xbf16>, vector<128x4xf32> -> vector<128x4xf32>
    %11 = arith.truncf %10 : vector<128x4xf32> to vector<128x4xbf16>
    %c1_11 = arith.constant 1 : index
    %c0_12 = arith.constant 0 : index
    %c0_13 = arith.constant 0 : index
    %12 = vector.load %arg2[%c1_11, %c0_12, %c0_13] : memref<9x4x32xbf16, #tpu.memory_space<vmem>>, vector<1x4x32xbf16>
    %13 = vector.shape_cast %12 : vector<1x4x32xbf16> to vector<4x32xbf16>
    %cst_14 = arith.constant dense<0.000000e+00> : vector<128x32xf32>
    %14 = tpu.matmul %11, %13, %cst_14 {dimension_numbers = #tpu.dot_dimension_numbers<[1], [0], [0], [1], [0, 0, 1, 1], [], []>} : vector<128x4xbf16>, vector<4x32xbf16>, vector<128x32xf32> -> vector<128x32xf32>
    %15 = arith.addf %7, %14 : vector<128x32xf32>
    %c2 = arith.constant 2 : index
    %c0_15 = arith.constant 0 : index
    %c0_16 = arith.constant 0 : index
    %16 = vector.load %arg1[%c2, %c0_15, %c0_16] : memref<9x128x512xbf16, #tpu.memory_space<vmem>>, vector<1x128x512xbf16>
    %17 = vector.shape_cast %16 : vector<1x128x512xbf16> to vector<128x512xbf16>
    %cst_17 = arith.constant dense<0.000000e+00> : vector<128x4xf32>
    %18 = tpu.matmul %17, %0, %cst_17 {dimension_numbers = #tpu.dot_dimension_numbers<[1], [0], [0], [1], [0, 0, 1, 1], [], []>} : vector<128x512xbf16>, vector<512x4xbf16>, vector<128x4xf32> -> vector<128x4xf32>
    %19 = arith.truncf %18 : vector<128x4xf32> to vector<128x4xbf16>
    %c2_18 = arith.constant 2 : index
    %c0_19 = arith.constant 0 : index
    %c0_20 = arith.constant 0 : index
    %20 = vector.load %arg2[%c2_18, %c0_19, %c0_20] : memref<9x4x32xbf16, #tpu.memory_space<vmem>>, vector<1x4x32xbf16>
    %21 = vector.shape_cast %20 : vector<1x4x32xbf16> to vector<4x32xbf16>
    %cst_21 = arith.constant dense<0.000000e+00> : vector<128x32xf32>
    %22 = tpu.matmul %19, %21, %cst_21 {dimension_numbers = #tpu.dot_dimension_numbers<[1], [0], [0], [1], [0, 0, 1, 1], [], []>} : vector<128x4xbf16>, vector<4x32xbf16>, vector<128x32xf32> -> vector<128x32xf32>
    %23 = arith.addf %15, %22 : vector<128x32xf32>
    %c3 = arith.constant 3 : index
    %c0_22 = arith.constant 0 : index
    %c0_23 = arith.constant 0 : index
    %24 = vector.load %arg1[%c3, %c0_22, %c0_23] : memref<9x128x512xbf16, #tpu.memory_space<vmem>>, vector<1x128x512xbf16>
    %25 = vector.shape_cast %24 : vector<1x128x512xbf16> to vector<128x512xbf16>
    %cst_24 = arith.constant dense<0.000000e+00> : vector<128x4xf32>
    %26 = tpu.matmul %25, %0, %cst_24 {dimension_numbers = #tpu.dot_dimension_numbers<[1], [0], [0], [1], [0, 0, 1, 1], [], []>} : vector<128x512xbf16>, vector<512x4xbf16>, vector<128x4xf32> -> vector<128x4xf32>
    %27 = arith.truncf %26 : vector<128x4xf32> to vector<128x4xbf16>
    %c3_25 = arith.constant 3 : index
    %c0_26 = arith.constant 0 : index
    %c0_27 = arith.constant 0 : index
    %28 = vector.load %arg2[%c3_25, %c0_26, %c0_27] : memref<9x4x32xbf16, #tpu.memory_space<vmem>>, vector<1x4x32xbf16>
    %29 = vector.shape_cast %28 : vector<1x4x32xbf16> to vector<4x32xbf16>
    %cst_28 = arith.constant dense<0.000000e+00> : vector<128x32xf32>
    %30 = tpu.matmul %27, %29, %cst_28 {dimension_numbers = #tpu.dot_dimension_numbers<[1], [0], [0], [1], [0, 0, 1, 1], [], []>} : vector<128x4xbf16>, vector<4x32xbf16>, vector<128x32xf32> -> vector<128x32xf32>
    %31 = arith.addf %23, %30 : vector<128x32xf32>
    %c4 = arith.constant 4 : index
    %c0_29 = arith.constant 0 : index
    %c0_30 = arith.constant 0 : index
    %32 = vector.load %arg1[%c4, %c0_29, %c0_30] : memref<9x128x512xbf16, #tpu.memory_space<vmem>>, vector<1x128x512xbf16>
    %33 = vector.shape_cast %32 : vector<1x128x512xbf16> to vector<128x512xbf16>
    %cst_31 = arith.constant dense<0.000000e+00> : vector<128x4xf32>
    %34 = tpu.matmul %33, %0, %cst_31 {dimension_numbers = #tpu.dot_dimension_numbers<[1], [0], [0], [1], [0, 0, 1, 1], [], []>} : vector<128x512xbf16>, vector<512x4xbf16>, vector<128x4xf32> -> vector<128x4xf32>
    %35 = arith.truncf %34 : vector<128x4xf32> to vector<128x4xbf16>
    %c4_32 = arith.constant 4 : index
    %c0_33 = arith.constant 0 : index
    %c0_34 = arith.constant 0 : index
    %36 = vector.load %arg2[%c4_32, %c0_33, %c0_34] : memref<9x4x32xbf16, #tpu.memory_space<vmem>>, vector<1x4x32xbf16>
    %37 = vector.shape_cast %36 : vector<1x4x32xbf16> to vector<4x32xbf16>
    %cst_35 = arith.constant dense<0.000000e+00> : vector<128x32xf32>
    %38 = tpu.matmul %35, %37, %cst_35 {dimension_numbers = #tpu.dot_dimension_numbers<[1], [0], [0], [1], [0, 0, 1, 1], [], []>} : vector<128x4xbf16>, vector<4x32xbf16>, vector<128x32xf32> -> vector<128x32xf32>
    %39 = arith.addf %31, %38 : vector<128x32xf32>
    %c5 = arith.constant 5 : index
    %c0_36 = arith.constant 0 : index
    %c0_37 = arith.constant 0 : index
    %40 = vector.load %arg1[%c5, %c0_36, %c0_37] : memref<9x128x512xbf16, #tpu.memory_space<vmem>>, vector<1x128x512xbf16>
    %41 = vector.shape_cast %40 : vector<1x128x512xbf16> to vector<128x512xbf16>
    %cst_38 = arith.constant dense<0.000000e+00> : vector<128x4xf32>
    %42 = tpu.matmul %41, %0, %cst_38 {dimension_numbers = #tpu.dot_dimension_numbers<[1], [0], [0], [1], [0, 0, 1, 1], [], []>} : vector<128x512xbf16>, vector<512x4xbf16>, vector<128x4xf32> -> vector<128x4xf32>
    %43 = arith.truncf %42 : vector<128x4xf32> to vector<128x4xbf16>
    %c5_39 = arith.constant 5 : index
    %c0_40 = arith.constant 0 : index
    %c0_41 = arith.constant 0 : index
    %44 = vector.load %arg2[%c5_39, %c0_40, %c0_41] : memref<9x4x32xbf16, #tpu.memory_space<vmem>>, vector<1x4x32xbf16>
    %45 = vector.shape_cast %44 : vector<1x4x32xbf16> to vector<4x32xbf16>
    %cst_42 = arith.constant dense<0.000000e+00> : vector<128x32xf32>
    %46 = tpu.matmul %43, %45, %cst_42 {dimension_numbers = #tpu.dot_dimension_numbers<[1], [0], [0], [1], [0, 0, 1, 1], [], []>} : vector<128x4xbf16>, vector<4x32xbf16>, vector<128x32xf32> -> vector<128x32xf32>
    %47 = arith.addf %39, %46 : vector<128x32xf32>
    %c6 = arith.constant 6 : index
    %c0_43 = arith.constant 0 : index
    %c0_44 = arith.constant 0 : index
    %48 = vector.load %arg1[%c6, %c0_43, %c0_44] : memref<9x128x512xbf16, #tpu.memory_space<vmem>>, vector<1x128x512xbf16>
    %49 = vector.shape_cast %48 : vector<1x128x512xbf16> to vector<128x512xbf16>
    %cst_45 = arith.constant dense<0.000000e+00> : vector<128x4xf32>
    %50 = tpu.matmul %49, %0, %cst_45 {dimension_numbers = #tpu.dot_dimension_numbers<[1], [0], [0], [1], [0, 0, 1, 1], [], []>} : vector<128x512xbf16>, vector<512x4xbf16>, vector<128x4xf32> -> vector<128x4xf32>
    %51 = arith.truncf %50 : vector<128x4xf32> to vector<128x4xbf16>
    %c6_46 = arith.constant 6 : index
    %c0_47 = arith.constant 0 : index
    %c0_48 = arith.constant 0 : index
    %52 = vector.load %arg2[%c6_46, %c0_47, %c0_48] : memref<9x4x32xbf16, #tpu.memory_space<vmem>>, vector<1x4x32xbf16>
    %53 = vector.shape_cast %52 : vector<1x4x32xbf16> to vector<4x32xbf16>
    %cst_49 = arith.constant dense<0.000000e+00> : vector<128x32xf32>
    %54 = tpu.matmul %51, %53, %cst_49 {dimension_numbers = #tpu.dot_dimension_numbers<[1], [0], [0], [1], [0, 0, 1, 1], [], []>} : vector<128x4xbf16>, vector<4x32xbf16>, vector<128x32xf32> -> vector<128x32xf32>
    %55 = arith.addf %47, %54 : vector<128x32xf32>
    %c7 = arith.constant 7 : index
    %c0_50 = arith.constant 0 : index
    %c0_51 = arith.constant 0 : index
    %56 = vector.load %arg1[%c7, %c0_50, %c0_51] : memref<9x128x512xbf16, #tpu.memory_space<vmem>>, vector<1x128x512xbf16>
    %57 = vector.shape_cast %56 : vector<1x128x512xbf16> to vector<128x512xbf16>
    %cst_52 = arith.constant dense<0.000000e+00> : vector<128x4xf32>
    %58 = tpu.matmul %57, %0, %cst_52 {dimension_numbers = #tpu.dot_dimension_numbers<[1], [0], [0], [1], [0, 0, 1, 1], [], []>} : vector<128x512xbf16>, vector<512x4xbf16>, vector<128x4xf32> -> vector<128x4xf32>
    %59 = arith.truncf %58 : vector<128x4xf32> to vector<128x4xbf16>
    %c7_53 = arith.constant 7 : index
    %c0_54 = arith.constant 0 : index
    %c0_55 = arith.constant 0 : index
    %60 = vector.load %arg2[%c7_53, %c0_54, %c0_55] : memref<9x4x32xbf16, #tpu.memory_space<vmem>>, vector<1x4x32xbf16>
    %61 = vector.shape_cast %60 : vector<1x4x32xbf16> to vector<4x32xbf16>
    %cst_56 = arith.constant dense<0.000000e+00> : vector<128x32xf32>
    %62 = tpu.matmul %59, %61, %cst_56 {dimension_numbers = #tpu.dot_dimension_numbers<[1], [0], [0], [1], [0, 0, 1, 1], [], []>} : vector<128x4xbf16>, vector<4x32xbf16>, vector<128x32xf32> -> vector<128x32xf32>
    %63 = arith.addf %55, %62 : vector<128x32xf32>
    %c8 = arith.constant 8 : index
    %c0_57 = arith.constant 0 : index
    %c0_58 = arith.constant 0 : index
    %64 = vector.load %arg1[%c8, %c0_57, %c0_58] : memref<9x128x512xbf16, #tpu.memory_space<vmem>>, vector<1x128x512xbf16>
    %65 = vector.shape_cast %64 : vector<1x128x512xbf16> to vector<128x512xbf16>
    %cst_59 = arith.constant dense<0.000000e+00> : vector<128x4xf32>
    %66 = tpu.matmul %65, %0, %cst_59 {dimension_numbers = #tpu.dot_dimension_numbers<[1], [0], [0], [1], [0, 0, 1, 1], [], []>} : vector<128x512xbf16>, vector<512x4xbf16>, vector<128x4xf32> -> vector<128x4xf32>
    %67 = arith.truncf %66 : vector<128x4xf32> to vector<128x4xbf16>
    %c8_60 = arith.constant 8 : index
    %c0_61 = arith.constant 0 : index
    %c0_62 = arith.constant 0 : index
    %68 = vector.load %arg2[%c8_60, %c0_61, %c0_62] : memref<9x4x32xbf16, #tpu.memory_space<vmem>>, vector<1x4x32xbf16>
    %69 = vector.shape_cast %68 : vector<1x4x32xbf16> to vector<4x32xbf16>
    %cst_63 = arith.constant dense<0.000000e+00> : vector<128x32xf32>
    %70 = tpu.matmul %67, %69, %cst_63 {dimension_numbers = #tpu.dot_dimension_numbers<[1], [0], [0], [1], [0, 0, 1, 1], [], []>} : vector<128x4xbf16>, vector<4x32xbf16>, vector<128x32xf32> -> vector<128x32xf32>
    %71 = arith.addf %63, %70 : vector<128x32xf32>
    %c0_64 = arith.constant 0 : index
    %c0_65 = arith.constant 0 : index
    %72 = vector.load %arg3[%c0_64, %c0_65] : memref<1x32xf32, #tpu.memory_space<vmem>>, vector<1x32xf32>
    %73 = vector.broadcast %72 : vector<1x32xf32> to vector<128x32xf32>
    %74 = arith.addf %71, %73 : vector<128x32xf32>
    %cst_66 = arith.constant 0.000000e+00 : f32
    %75 = vector.broadcast %cst_66 : f32 to vector<128x32xf32>
    %76 = arith.cmpf ogt, %74, %75 : vector<128x32xf32>
    %cst_67 = arith.constant 0.000000e+00 : f32
    %77 = vector.broadcast %cst_67 : f32 to vector<128x32xf32>
    %78 = arith.minimumf %74, %77 : vector<128x32xf32>
    %79 = math.exp %78 : vector<128x32xf32>
    %cst_68 = arith.constant 1.000000e+00 : f32
    %80 = vector.broadcast %cst_68 : f32 to vector<128x32xf32>
    %81 = arith.subf %79, %80 : vector<128x32xf32>
    %82 = arith.select %76, %74, %81 : vector<128x32xi1>, vector<128x32xf32>
    %83 = arith.truncf %82 : vector<128x32xf32> to vector<128x32xbf16>
    %c0_69 = arith.constant 0 : index
    %c0_70 = arith.constant 0 : index
    %c0_71 = arith.constant 0 : index
    %84 = vector.load %arg4[%c0_69, %c0_70, %c0_71] : memref<9x32x128xbf16, #tpu.memory_space<vmem>>, vector<1x32x128xbf16>
    %85 = vector.shape_cast %84 : vector<1x32x128xbf16> to vector<32x128xbf16>
    %cst_72 = arith.constant dense<0.000000e+00> : vector<32x32xf32>
    %86 = tpu.matmul %85, %83, %cst_72 {dimension_numbers = #tpu.dot_dimension_numbers<[1], [0], [0], [1], [0, 0, 1, 1], [], []>} : vector<32x128xbf16>, vector<128x32xbf16>, vector<32x32xf32> -> vector<32x32xf32>
    %87 = arith.truncf %86 : vector<32x32xf32> to vector<32x32xbf16>
    %c0_73 = arith.constant 0 : index
    %c0_74 = arith.constant 0 : index
    %c0_75 = arith.constant 0 : index
    %88 = vector.load %arg5[%c0_73, %c0_74, %c0_75] : memref<9x32x32xbf16, #tpu.memory_space<vmem>>, vector<1x32x32xbf16>
    %89 = vector.shape_cast %88 : vector<1x32x32xbf16> to vector<32x32xbf16>
    %cst_76 = arith.constant dense<0.000000e+00> : vector<32x32xf32>
    %90 = tpu.matmul %87, %89, %cst_76 {dimension_numbers = #tpu.dot_dimension_numbers<[1], [0], [0], [1], [0, 0, 1, 1], [], []>} : vector<32x32xbf16>, vector<32x32xbf16>, vector<32x32xf32> -> vector<32x32xf32>
    %c1_77 = arith.constant 1 : index
    %c0_78 = arith.constant 0 : index
    %c0_79 = arith.constant 0 : index
    %91 = vector.load %arg4[%c1_77, %c0_78, %c0_79] : memref<9x32x128xbf16, #tpu.memory_space<vmem>>, vector<1x32x128xbf16>
    %92 = vector.shape_cast %91 : vector<1x32x128xbf16> to vector<32x128xbf16>
    %cst_80 = arith.constant dense<0.000000e+00> : vector<32x32xf32>
    %93 = tpu.matmul %92, %83, %cst_80 {dimension_numbers = #tpu.dot_dimension_numbers<[1], [0], [0], [1], [0, 0, 1, 1], [], []>} : vector<32x128xbf16>, vector<128x32xbf16>, vector<32x32xf32> -> vector<32x32xf32>
    %94 = arith.truncf %93 : vector<32x32xf32> to vector<32x32xbf16>
    %c1_81 = arith.constant 1 : index
    %c0_82 = arith.constant 0 : index
    %c0_83 = arith.constant 0 : index
    %95 = vector.load %arg5[%c1_81, %c0_82, %c0_83] : memref<9x32x32xbf16, #tpu.memory_space<vmem>>, vector<1x32x32xbf16>
    %96 = vector.shape_cast %95 : vector<1x32x32xbf16> to vector<32x32xbf16>
    %cst_84 = arith.constant dense<0.000000e+00> : vector<32x32xf32>
    %97 = tpu.matmul %94, %96, %cst_84 {dimension_numbers = #tpu.dot_dimension_numbers<[1], [0], [0], [1], [0, 0, 1, 1], [], []>} : vector<32x32xbf16>, vector<32x32xbf16>, vector<32x32xf32> -> vector<32x32xf32>
    %98 = arith.addf %90, %97 : vector<32x32xf32>
    %c2_85 = arith.constant 2 : index
    %c0_86 = arith.constant 0 : index
    %c0_87 = arith.constant 0 : index
    %99 = vector.load %arg4[%c2_85, %c0_86, %c0_87] : memref<9x32x128xbf16, #tpu.memory_space<vmem>>, vector<1x32x128xbf16>
    %100 = vector.shape_cast %99 : vector<1x32x128xbf16> to vector<32x128xbf16>
    %cst_88 = arith.constant dense<0.000000e+00> : vector<32x32xf32>
    %101 = tpu.matmul %100, %83, %cst_88 {dimension_numbers = #tpu.dot_dimension_numbers<[1], [0], [0], [1], [0, 0, 1, 1], [], []>} : vector<32x128xbf16>, vector<128x32xbf16>, vector<32x32xf32> -> vector<32x32xf32>
    %102 = arith.truncf %101 : vector<32x32xf32> to vector<32x32xbf16>
    %c2_89 = arith.constant 2 : index
    %c0_90 = arith.constant 0 : index
    %c0_91 = arith.constant 0 : index
    %103 = vector.load %arg5[%c2_89, %c0_90, %c0_91] : memref<9x32x32xbf16, #tpu.memory_space<vmem>>, vector<1x32x32xbf16>
    %104 = vector.shape_cast %103 : vector<1x32x32xbf16> to vector<32x32xbf16>
    %cst_92 = arith.constant dense<0.000000e+00> : vector<32x32xf32>
    %105 = tpu.matmul %102, %104, %cst_92 {dimension_numbers = #tpu.dot_dimension_numbers<[1], [0], [0], [1], [0, 0, 1, 1], [], []>} : vector<32x32xbf16>, vector<32x32xbf16>, vector<32x32xf32> -> vector<32x32xf32>
    %106 = arith.addf %98, %105 : vector<32x32xf32>
    %c3_93 = arith.constant 3 : index
    %c0_94 = arith.constant 0 : index
    %c0_95 = arith.constant 0 : index
    %107 = vector.load %arg4[%c3_93, %c0_94, %c0_95] : memref<9x32x128xbf16, #tpu.memory_space<vmem>>, vector<1x32x128xbf16>
    %108 = vector.shape_cast %107 : vector<1x32x128xbf16> to vector<32x128xbf16>
    %cst_96 = arith.constant dense<0.000000e+00> : vector<32x32xf32>
    %109 = tpu.matmul %108, %83, %cst_96 {dimension_numbers = #tpu.dot_dimension_numbers<[1], [0], [0], [1], [0, 0, 1, 1], [], []>} : vector<32x128xbf16>, vector<128x32xbf16>, vector<32x32xf32> -> vector<32x32xf32>
    %110 = arith.truncf %109 : vector<32x32xf32> to vector<32x32xbf16>
    %c3_97 = arith.constant 3 : index
    %c0_98 = arith.constant 0 : index
    %c0_99 = arith.constant 0 : index
    %111 = vector.load %arg5[%c3_97, %c0_98, %c0_99] : memref<9x32x32xbf16, #tpu.memory_space<vmem>>, vector<1x32x32xbf16>
    %112 = vector.shape_cast %111 : vector<1x32x32xbf16> to vector<32x32xbf16>
    %cst_100 = arith.constant dense<0.000000e+00> : vector<32x32xf32>
    %113 = tpu.matmul %110, %112, %cst_100 {dimension_numbers = #tpu.dot_dimension_numbers<[1], [0], [0], [1], [0, 0, 1, 1], [], []>} : vector<32x32xbf16>, vector<32x32xbf16>, vector<32x32xf32> -> vector<32x32xf32>
    %114 = arith.addf %106, %113 : vector<32x32xf32>
    %c4_101 = arith.constant 4 : index
    %c0_102 = arith.constant 0 : index
    %c0_103 = arith.constant 0 : index
    %115 = vector.load %arg4[%c4_101, %c0_102, %c0_103] : memref<9x32x128xbf16, #tpu.memory_space<vmem>>, vector<1x32x128xbf16>
    %116 = vector.shape_cast %115 : vector<1x32x128xbf16> to vector<32x128xbf16>
    %cst_104 = arith.constant dense<0.000000e+00> : vector<32x32xf32>
    %117 = tpu.matmul %116, %83, %cst_104 {dimension_numbers = #tpu.dot_dimension_numbers<[1], [0], [0], [1], [0, 0, 1, 1], [], []>} : vector<32x128xbf16>, vector<128x32xbf16>, vector<32x32xf32> -> vector<32x32xf32>
    %118 = arith.truncf %117 : vector<32x32xf32> to vector<32x32xbf16>
    %c4_105 = arith.constant 4 : index
    %c0_106 = arith.constant 0 : index
    %c0_107 = arith.constant 0 : index
    %119 = vector.load %arg5[%c4_105, %c0_106, %c0_107] : memref<9x32x32xbf16, #tpu.memory_space<vmem>>, vector<1x32x32xbf16>
    %120 = vector.shape_cast %119 : vector<1x32x32xbf16> to vector<32x32xbf16>
    %cst_108 = arith.constant dense<0.000000e+00> : vector<32x32xf32>
    %121 = tpu.matmul %118, %120, %cst_108 {dimension_numbers = #tpu.dot_dimension_numbers<[1], [0], [0], [1], [0, 0, 1, 1], [], []>} : vector<32x32xbf16>, vector<32x32xbf16>, vector<32x32xf32> -> vector<32x32xf32>
    %122 = arith.addf %114, %121 : vector<32x32xf32>
    %c5_109 = arith.constant 5 : index
    %c0_110 = arith.constant 0 : index
    %c0_111 = arith.constant 0 : index
    %123 = vector.load %arg4[%c5_109, %c0_110, %c0_111] : memref<9x32x128xbf16, #tpu.memory_space<vmem>>, vector<1x32x128xbf16>
    %124 = vector.shape_cast %123 : vector<1x32x128xbf16> to vector<32x128xbf16>
    %cst_112 = arith.constant dense<0.000000e+00> : vector<32x32xf32>
    %125 = tpu.matmul %124, %83, %cst_112 {dimension_numbers = #tpu.dot_dimension_numbers<[1], [0], [0], [1], [0, 0, 1, 1], [], []>} : vector<32x128xbf16>, vector<128x32xbf16>, vector<32x32xf32> -> vector<32x32xf32>
    %126 = arith.truncf %125 : vector<32x32xf32> to vector<32x32xbf16>
    %c5_113 = arith.constant 5 : index
    %c0_114 = arith.constant 0 : index
    %c0_115 = arith.constant 0 : index
    %127 = vector.load %arg5[%c5_113, %c0_114, %c0_115] : memref<9x32x32xbf16, #tpu.memory_space<vmem>>, vector<1x32x32xbf16>
    %128 = vector.shape_cast %127 : vector<1x32x32xbf16> to vector<32x32xbf16>
    %cst_116 = arith.constant dense<0.000000e+00> : vector<32x32xf32>
    %129 = tpu.matmul %126, %128, %cst_116 {dimension_numbers = #tpu.dot_dimension_numbers<[1], [0], [0], [1], [0, 0, 1, 1], [], []>} : vector<32x32xbf16>, vector<32x32xbf16>, vector<32x32xf32> -> vector<32x32xf32>
    %130 = arith.addf %122, %129 : vector<32x32xf32>
    %c6_117 = arith.constant 6 : index
    %c0_118 = arith.constant 0 : index
    %c0_119 = arith.constant 0 : index
    %131 = vector.load %arg4[%c6_117, %c0_118, %c0_119] : memref<9x32x128xbf16, #tpu.memory_space<vmem>>, vector<1x32x128xbf16>
    %132 = vector.shape_cast %131 : vector<1x32x128xbf16> to vector<32x128xbf16>
    %cst_120 = arith.constant dense<0.000000e+00> : vector<32x32xf32>
    %133 = tpu.matmul %132, %83, %cst_120 {dimension_numbers = #tpu.dot_dimension_numbers<[1], [0], [0], [1], [0, 0, 1, 1], [], []>} : vector<32x128xbf16>, vector<128x32xbf16>, vector<32x32xf32> -> vector<32x32xf32>
    %134 = arith.truncf %133 : vector<32x32xf32> to vector<32x32xbf16>
    %c6_121 = arith.constant 6 : index
    %c0_122 = arith.constant 0 : index
    %c0_123 = arith.constant 0 : index
    %135 = vector.load %arg5[%c6_121, %c0_122, %c0_123] : memref<9x32x32xbf16, #tpu.memory_space<vmem>>, vector<1x32x32xbf16>
    %136 = vector.shape_cast %135 : vector<1x32x32xbf16> to vector<32x32xbf16>
    %cst_124 = arith.constant dense<0.000000e+00> : vector<32x32xf32>
    %137 = tpu.matmul %134, %136, %cst_124 {dimension_numbers = #tpu.dot_dimension_numbers<[1], [0], [0], [1], [0, 0, 1, 1], [], []>} : vector<32x32xbf16>, vector<32x32xbf16>, vector<32x32xf32> -> vector<32x32xf32>
    %138 = arith.addf %130, %137 : vector<32x32xf32>
    %c7_125 = arith.constant 7 : index
    %c0_126 = arith.constant 0 : index
    %c0_127 = arith.constant 0 : index
    %139 = vector.load %arg4[%c7_125, %c0_126, %c0_127] : memref<9x32x128xbf16, #tpu.memory_space<vmem>>, vector<1x32x128xbf16>
    %140 = vector.shape_cast %139 : vector<1x32x128xbf16> to vector<32x128xbf16>
    %cst_128 = arith.constant dense<0.000000e+00> : vector<32x32xf32>
    %141 = tpu.matmul %140, %83, %cst_128 {dimension_numbers = #tpu.dot_dimension_numbers<[1], [0], [0], [1], [0, 0, 1, 1], [], []>} : vector<32x128xbf16>, vector<128x32xbf16>, vector<32x32xf32> -> vector<32x32xf32>
    %142 = arith.truncf %141 : vector<32x32xf32> to vector<32x32xbf16>
    %c7_129 = arith.constant 7 : index
    %c0_130 = arith.constant 0 : index
    %c0_131 = arith.constant 0 : index
    %143 = vector.load %arg5[%c7_129, %c0_130, %c0_131] : memref<9x32x32xbf16, #tpu.memory_space<vmem>>, vector<1x32x32xbf16>
    %144 = vector.shape_cast %143 : vector<1x32x32xbf16> to vector<32x32xbf16>
    %cst_132 = arith.constant dense<0.000000e+00> : vector<32x32xf32>
    %145 = tpu.matmul %142, %144, %cst_132 {dimension_numbers = #tpu.dot_dimension_numbers<[1], [0], [0], [1], [0, 0, 1, 1], [], []>} : vector<32x32xbf16>, vector<32x32xbf16>, vector<32x32xf32> -> vector<32x32xf32>
    %146 = arith.addf %138, %145 : vector<32x32xf32>
    %c8_133 = arith.constant 8 : index
    %c0_134 = arith.constant 0 : index
    %c0_135 = arith.constant 0 : index
    %147 = vector.load %arg4[%c8_133, %c0_134, %c0_135] : memref<9x32x128xbf16, #tpu.memory_space<vmem>>, vector<1x32x128xbf16>
    %148 = vector.shape_cast %147 : vector<1x32x128xbf16> to vector<32x128xbf16>
    %cst_136 = arith.constant dense<0.000000e+00> : vector<32x32xf32>
    %149 = tpu.matmul %148, %83, %cst_136 {dimension_numbers = #tpu.dot_dimension_numbers<[1], [0], [0], [1], [0, 0, 1, 1], [], []>} : vector<32x128xbf16>, vector<128x32xbf16>, vector<32x32xf32> -> vector<32x32xf32>
    %150 = arith.truncf %149 : vector<32x32xf32> to vector<32x32xbf16>
    %c8_137 = arith.constant 8 : index
    %c0_138 = arith.constant 0 : index
    %c0_139 = arith.constant 0 : index
    %151 = vector.load %arg5[%c8_137, %c0_138, %c0_139] : memref<9x32x32xbf16, #tpu.memory_space<vmem>>, vector<1x32x32xbf16>
    %152 = vector.shape_cast %151 : vector<1x32x32xbf16> to vector<32x32xbf16>
    %cst_140 = arith.constant dense<0.000000e+00> : vector<32x32xf32>
    %153 = tpu.matmul %150, %152, %cst_140 {dimension_numbers = #tpu.dot_dimension_numbers<[1], [0], [0], [1], [0, 0, 1, 1], [], []>} : vector<32x32xbf16>, vector<32x32xbf16>, vector<32x32xf32> -> vector<32x32xf32>
    %154 = arith.addf %146, %153 : vector<32x32xf32>
    %c0_141 = arith.constant 0 : index
    %c0_142 = arith.constant 0 : index
    %155 = vector.load %arg6[%c0_141, %c0_142] : memref<1x32xf32, #tpu.memory_space<vmem>>, vector<1x32xf32>
    %156 = vector.broadcast %155 : vector<1x32xf32> to vector<32x32xf32>
    %157 = arith.addf %154, %156 : vector<32x32xf32>
    %cst_143 = arith.constant 0.000000e+00 : f32
    %158 = vector.broadcast %cst_143 : f32 to vector<32x32xf32>
    %159 = arith.cmpf ogt, %157, %158 : vector<32x32xf32>
    %cst_144 = arith.constant 0.000000e+00 : f32
    %160 = vector.broadcast %cst_144 : f32 to vector<32x32xf32>
    %161 = arith.minimumf %157, %160 : vector<32x32xf32>
    %162 = math.exp %161 : vector<32x32xf32>
    %cst_145 = arith.constant 1.000000e+00 : f32
    %163 = vector.broadcast %cst_145 : f32 to vector<32x32xf32>
    %164 = arith.subf %162, %163 : vector<32x32xf32>
    %165 = arith.select %159, %157, %164 : vector<32x32xi1>, vector<32x32xf32>
    %166 = arith.truncf %165 : vector<32x32xf32> to vector<32x32xbf16>
    %c0_146 = arith.constant 0 : index
    %c0_147 = arith.constant 0 : index
    %c0_148 = arith.constant 0 : index
    %167 = vector.load %arg7[%c0_146, %c0_147, %c0_148] : memref<9x8x32xbf16, #tpu.memory_space<vmem>>, vector<1x8x32xbf16>
    %168 = vector.shape_cast %167 : vector<1x8x32xbf16> to vector<8x32xbf16>
    %cst_149 = arith.constant dense<0.000000e+00> : vector<8x32xf32>
    %169 = tpu.matmul %168, %166, %cst_149 {dimension_numbers = #tpu.dot_dimension_numbers<[1], [0], [0], [1], [0, 0, 1, 1], [], []>} : vector<8x32xbf16>, vector<32x32xbf16>, vector<8x32xf32> -> vector<8x32xf32>
    %170 = arith.truncf %169 : vector<8x32xf32> to vector<8x32xbf16>
    %c0_150 = arith.constant 0 : index
    %c0_151 = arith.constant 0 : index
    %c0_152 = arith.constant 0 : index
    %171 = vector.load %arg8[%c0_150, %c0_151, %c0_152] : memref<9x32x32xbf16, #tpu.memory_space<vmem>>, vector<1x32x32xbf16>
    %172 = vector.shape_cast %171 : vector<1x32x32xbf16> to vector<32x32xbf16>
    %cst_153 = arith.constant dense<0.000000e+00> : vector<8x32xf32>
    %173 = tpu.matmul %170, %172, %cst_153 {dimension_numbers = #tpu.dot_dimension_numbers<[1], [0], [0], [1], [0, 0, 1, 1], [], []>} : vector<8x32xbf16>, vector<32x32xbf16>, vector<8x32xf32> -> vector<8x32xf32>
    %c1_154 = arith.constant 1 : index
    %c0_155 = arith.constant 0 : index
    %c0_156 = arith.constant 0 : index
    %174 = vector.load %arg7[%c1_154, %c0_155, %c0_156] : memref<9x8x32xbf16, #tpu.memory_space<vmem>>, vector<1x8x32xbf16>
    %175 = vector.shape_cast %174 : vector<1x8x32xbf16> to vector<8x32xbf16>
    %cst_157 = arith.constant dense<0.000000e+00> : vector<8x32xf32>
    %176 = tpu.matmul %175, %166, %cst_157 {dimension_numbers = #tpu.dot_dimension_numbers<[1], [0], [0], [1], [0, 0, 1, 1], [], []>} : vector<8x32xbf16>, vector<32x32xbf16>, vector<8x32xf32> -> vector<8x32xf32>
    %177 = arith.truncf %176 : vector<8x32xf32> to vector<8x32xbf16>
    %c1_158 = arith.constant 1 : index
    %c0_159 = arith.constant 0 : index
    %c0_160 = arith.constant 0 : index
    %178 = vector.load %arg8[%c1_158, %c0_159, %c0_160] : memref<9x32x32xbf16, #tpu.memory_space<vmem>>, vector<1x32x32xbf16>
    %179 = vector.shape_cast %178 : vector<1x32x32xbf16> to vector<32x32xbf16>
    %cst_161 = arith.constant dense<0.000000e+00> : vector<8x32xf32>
    %180 = tpu.matmul %177, %179, %cst_161 {dimension_numbers = #tpu.dot_dimension_numbers<[1], [0], [0], [1], [0, 0, 1, 1], [], []>} : vector<8x32xbf16>, vector<32x32xbf16>, vector<8x32xf32> -> vector<8x32xf32>
    %181 = arith.addf %173, %180 : vector<8x32xf32>
    %c2_162 = arith.constant 2 : index
    %c0_163 = arith.constant 0 : index
    %c0_164 = arith.constant 0 : index
    %182 = vector.load %arg7[%c2_162, %c0_163, %c0_164] : memref<9x8x32xbf16, #tpu.memory_space<vmem>>, vector<1x8x32xbf16>
    %183 = vector.shape_cast %182 : vector<1x8x32xbf16> to vector<8x32xbf16>
    %cst_165 = arith.constant dense<0.000000e+00> : vector<8x32xf32>
    %184 = tpu.matmul %183, %166, %cst_165 {dimension_numbers = #tpu.dot_dimension_numbers<[1], [0], [0], [1], [0, 0, 1, 1], [], []>} : vector<8x32xbf16>, vector<32x32xbf16>, vector<8x32xf32> -> vector<8x32xf32>
    %185 = arith.truncf %184 : vector<8x32xf32> to vector<8x32xbf16>
    %c2_166 = arith.constant 2 : index
    %c0_167 = arith.constant 0 : index
    %c0_168 = arith.constant 0 : index
    %186 = vector.load %arg8[%c2_166, %c0_167, %c0_168] : memref<9x32x32xbf16, #tpu.memory_space<vmem>>, vector<1x32x32xbf16>
    %187 = vector.shape_cast %186 : vector<1x32x32xbf16> to vector<32x32xbf16>
    %cst_169 = arith.constant dense<0.000000e+00> : vector<8x32xf32>
    %188 = tpu.matmul %185, %187, %cst_169 {dimension_numbers = #tpu.dot_dimension_numbers<[1], [0], [0], [1], [0, 0, 1, 1], [], []>} : vector<8x32xbf16>, vector<32x32xbf16>, vector<8x32xf32> -> vector<8x32xf32>
    %189 = arith.addf %181, %188 : vector<8x32xf32>
    %c3_170 = arith.constant 3 : index
    %c0_171 = arith.constant 0 : index
    %c0_172 = arith.constant 0 : index
    %190 = vector.load %arg7[%c3_170, %c0_171, %c0_172] : memref<9x8x32xbf16, #tpu.memory_space<vmem>>, vector<1x8x32xbf16>
    %191 = vector.shape_cast %190 : vector<1x8x32xbf16> to vector<8x32xbf16>
    %cst_173 = arith.constant dense<0.000000e+00> : vector<8x32xf32>
    %192 = tpu.matmul %191, %166, %cst_173 {dimension_numbers = #tpu.dot_dimension_numbers<[1], [0], [0], [1], [0, 0, 1, 1], [], []>} : vector<8x32xbf16>, vector<32x32xbf16>, vector<8x32xf32> -> vector<8x32xf32>
    %193 = arith.truncf %192 : vector<8x32xf32> to vector<8x32xbf16>
    %c3_174 = arith.constant 3 : index
    %c0_175 = arith.constant 0 : index
    %c0_176 = arith.constant 0 : index
    %194 = vector.load %arg8[%c3_174, %c0_175, %c0_176] : memref<9x32x32xbf16, #tpu.memory_space<vmem>>, vector<1x32x32xbf16>
    %195 = vector.shape_cast %194 : vector<1x32x32xbf16> to vector<32x32xbf16>
    %cst_177 = arith.constant dense<0.000000e+00> : vector<8x32xf32>
    %196 = tpu.matmul %193, %195, %cst_177 {dimension_numbers = #tpu.dot_dimension_numbers<[1], [0], [0], [1], [0, 0, 1, 1], [], []>} : vector<8x32xbf16>, vector<32x32xbf16>, vector<8x32xf32> -> vector<8x32xf32>
    %197 = arith.addf %189, %196 : vector<8x32xf32>
    %c4_178 = arith.constant 4 : index
    %c0_179 = arith.constant 0 : index
    %c0_180 = arith.constant 0 : index
    %198 = vector.load %arg7[%c4_178, %c0_179, %c0_180] : memref<9x8x32xbf16, #tpu.memory_space<vmem>>, vector<1x8x32xbf16>
    %199 = vector.shape_cast %198 : vector<1x8x32xbf16> to vector<8x32xbf16>
    %cst_181 = arith.constant dense<0.000000e+00> : vector<8x32xf32>
    %200 = tpu.matmul %199, %166, %cst_181 {dimension_numbers = #tpu.dot_dimension_numbers<[1], [0], [0], [1], [0, 0, 1, 1], [], []>} : vector<8x32xbf16>, vector<32x32xbf16>, vector<8x32xf32> -> vector<8x32xf32>
    %201 = arith.truncf %200 : vector<8x32xf32> to vector<8x32xbf16>
    %c4_182 = arith.constant 4 : index
    %c0_183 = arith.constant 0 : index
    %c0_184 = arith.constant 0 : index
    %202 = vector.load %arg8[%c4_182, %c0_183, %c0_184] : memref<9x32x32xbf16, #tpu.memory_space<vmem>>, vector<1x32x32xbf16>
    %203 = vector.shape_cast %202 : vector<1x32x32xbf16> to vector<32x32xbf16>
    %cst_185 = arith.constant dense<0.000000e+00> : vector<8x32xf32>
    %204 = tpu.matmul %201, %203, %cst_185 {dimension_numbers = #tpu.dot_dimension_numbers<[1], [0], [0], [1], [0, 0, 1, 1], [], []>} : vector<8x32xbf16>, vector<32x32xbf16>, vector<8x32xf32> -> vector<8x32xf32>
    %205 = arith.addf %197, %204 : vector<8x32xf32>
    %c5_186 = arith.constant 5 : index
    %c0_187 = arith.constant 0 : index
    %c0_188 = arith.constant 0 : index
    %206 = vector.load %arg7[%c5_186, %c0_187, %c0_188] : memref<9x8x32xbf16, #tpu.memory_space<vmem>>, vector<1x8x32xbf16>
    %207 = vector.shape_cast %206 : vector<1x8x32xbf16> to vector<8x32xbf16>
    %cst_189 = arith.constant dense<0.000000e+00> : vector<8x32xf32>
    %208 = tpu.matmul %207, %166, %cst_189 {dimension_numbers = #tpu.dot_dimension_numbers<[1], [0], [0], [1], [0, 0, 1, 1], [], []>} : vector<8x32xbf16>, vector<32x32xbf16>, vector<8x32xf32> -> vector<8x32xf32>
    %209 = arith.truncf %208 : vector<8x32xf32> to vector<8x32xbf16>
    %c5_190 = arith.constant 5 : index
    %c0_191 = arith.constant 0 : index
    %c0_192 = arith.constant 0 : index
    %210 = vector.load %arg8[%c5_190, %c0_191, %c0_192] : memref<9x32x32xbf16, #tpu.memory_space<vmem>>, vector<1x32x32xbf16>
    %211 = vector.shape_cast %210 : vector<1x32x32xbf16> to vector<32x32xbf16>
    %cst_193 = arith.constant dense<0.000000e+00> : vector<8x32xf32>
    %212 = tpu.matmul %209, %211, %cst_193 {dimension_numbers = #tpu.dot_dimension_numbers<[1], [0], [0], [1], [0, 0, 1, 1], [], []>} : vector<8x32xbf16>, vector<32x32xbf16>, vector<8x32xf32> -> vector<8x32xf32>
    %213 = arith.addf %205, %212 : vector<8x32xf32>
    %c6_194 = arith.constant 6 : index
    %c0_195 = arith.constant 0 : index
    %c0_196 = arith.constant 0 : index
    %214 = vector.load %arg7[%c6_194, %c0_195, %c0_196] : memref<9x8x32xbf16, #tpu.memory_space<vmem>>, vector<1x8x32xbf16>
    %215 = vector.shape_cast %214 : vector<1x8x32xbf16> to vector<8x32xbf16>
    %cst_197 = arith.constant dense<0.000000e+00> : vector<8x32xf32>
    %216 = tpu.matmul %215, %166, %cst_197 {dimension_numbers = #tpu.dot_dimension_numbers<[1], [0], [0], [1], [0, 0, 1, 1], [], []>} : vector<8x32xbf16>, vector<32x32xbf16>, vector<8x32xf32> -> vector<8x32xf32>
    %217 = arith.truncf %216 : vector<8x32xf32> to vector<8x32xbf16>
    %c6_198 = arith.constant 6 : index
    %c0_199 = arith.constant 0 : index
    %c0_200 = arith.constant 0 : index
    %218 = vector.load %arg8[%c6_198, %c0_199, %c0_200] : memref<9x32x32xbf16, #tpu.memory_space<vmem>>, vector<1x32x32xbf16>
    %219 = vector.shape_cast %218 : vector<1x32x32xbf16> to vector<32x32xbf16>
    %cst_201 = arith.constant dense<0.000000e+00> : vector<8x32xf32>
    %220 = tpu.matmul %217, %219, %cst_201 {dimension_numbers = #tpu.dot_dimension_numbers<[1], [0], [0], [1], [0, 0, 1, 1], [], []>} : vector<8x32xbf16>, vector<32x32xbf16>, vector<8x32xf32> -> vector<8x32xf32>
    %221 = arith.addf %213, %220 : vector<8x32xf32>
    %c7_202 = arith.constant 7 : index
    %c0_203 = arith.constant 0 : index
    %c0_204 = arith.constant 0 : index
    %222 = vector.load %arg7[%c7_202, %c0_203, %c0_204] : memref<9x8x32xbf16, #tpu.memory_space<vmem>>, vector<1x8x32xbf16>
    %223 = vector.shape_cast %222 : vector<1x8x32xbf16> to vector<8x32xbf16>
    %cst_205 = arith.constant dense<0.000000e+00> : vector<8x32xf32>
    %224 = tpu.matmul %223, %166, %cst_205 {dimension_numbers = #tpu.dot_dimension_numbers<[1], [0], [0], [1], [0, 0, 1, 1], [], []>} : vector<8x32xbf16>, vector<32x32xbf16>, vector<8x32xf32> -> vector<8x32xf32>
    %225 = arith.truncf %224 : vector<8x32xf32> to vector<8x32xbf16>
    %c7_206 = arith.constant 7 : index
    %c0_207 = arith.constant 0 : index
    %c0_208 = arith.constant 0 : index
    %226 = vector.load %arg8[%c7_206, %c0_207, %c0_208] : memref<9x32x32xbf16, #tpu.memory_space<vmem>>, vector<1x32x32xbf16>
    %227 = vector.shape_cast %226 : vector<1x32x32xbf16> to vector<32x32xbf16>
    %cst_209 = arith.constant dense<0.000000e+00> : vector<8x32xf32>
    %228 = tpu.matmul %225, %227, %cst_209 {dimension_numbers = #tpu.dot_dimension_numbers<[1], [0], [0], [1], [0, 0, 1, 1], [], []>} : vector<8x32xbf16>, vector<32x32xbf16>, vector<8x32xf32> -> vector<8x32xf32>
    %229 = arith.addf %221, %228 : vector<8x32xf32>
    %c8_210 = arith.constant 8 : index
    %c0_211 = arith.constant 0 : index
    %c0_212 = arith.constant 0 : index
    %230 = vector.load %arg7[%c8_210, %c0_211, %c0_212] : memref<9x8x32xbf16, #tpu.memory_space<vmem>>, vector<1x8x32xbf16>
    %231 = vector.shape_cast %230 : vector<1x8x32xbf16> to vector<8x32xbf16>
    %cst_213 = arith.constant dense<0.000000e+00> : vector<8x32xf32>
    %232 = tpu.matmul %231, %166, %cst_213 {dimension_numbers = #tpu.dot_dimension_numbers<[1], [0], [0], [1], [0, 0, 1, 1], [], []>} : vector<8x32xbf16>, vector<32x32xbf16>, vector<8x32xf32> -> vector<8x32xf32>
    %233 = arith.truncf %232 : vector<8x32xf32> to vector<8x32xbf16>
    %c8_214 = arith.constant 8 : index
    %c0_215 = arith.constant 0 : index
    %c0_216 = arith.constant 0 : index
    %234 = vector.load %arg8[%c8_214, %c0_215, %c0_216] : memref<9x32x32xbf16, #tpu.memory_space<vmem>>, vector<1x32x32xbf16>
    %235 = vector.shape_cast %234 : vector<1x32x32xbf16> to vector<32x32xbf16>
    %cst_217 = arith.constant dense<0.000000e+00> : vector<8x32xf32>
    %236 = tpu.matmul %233, %235, %cst_217 {dimension_numbers = #tpu.dot_dimension_numbers<[1], [0], [0], [1], [0, 0, 1, 1], [], []>} : vector<8x32xbf16>, vector<32x32xbf16>, vector<8x32xf32> -> vector<8x32xf32>
    %237 = arith.addf %229, %236 : vector<8x32xf32>
    %c0_218 = arith.constant 0 : index
    %c0_219 = arith.constant 0 : index
    %238 = vector.load %arg9[%c0_218, %c0_219] : memref<1x32xf32, #tpu.memory_space<vmem>>, vector<1x32xf32>
    %239 = vector.broadcast %238 : vector<1x32xf32> to vector<8x32xf32>
    %240 = arith.addf %237, %239 : vector<8x32xf32>
    %cst_220 = arith.constant 0.000000e+00 : f32
    %241 = vector.broadcast %cst_220 : f32 to vector<8x32xf32>
    %242 = arith.cmpf ogt, %240, %241 : vector<8x32xf32>
    %cst_221 = arith.constant 0.000000e+00 : f32
    %243 = vector.broadcast %cst_221 : f32 to vector<8x32xf32>
    %244 = arith.minimumf %240, %243 : vector<8x32xf32>
    %245 = math.exp %244 : vector<8x32xf32>
    %cst_222 = arith.constant 1.000000e+00 : f32
    %246 = vector.broadcast %cst_222 : f32 to vector<8x32xf32>
    %247 = arith.subf %245, %246 : vector<8x32xf32>
    %248 = arith.select %242, %240, %247 : vector<8x32xi1>, vector<8x32xf32>
    %249 = arith.truncf %248 : vector<8x32xf32> to vector<8x32xbf16>
    %c0_223 = arith.constant 0 : index
    %c0_224 = arith.constant 0 : index
    %c0_225 = arith.constant 0 : index
    %250 = vector.load %arg10[%c0_223, %c0_224, %c0_225] : memref<9x2x8xbf16, #tpu.memory_space<vmem>>, vector<1x2x8xbf16>
    %251 = vector.shape_cast %250 : vector<1x2x8xbf16> to vector<2x8xbf16>
    %cst_226 = arith.constant dense<0.000000e+00> : vector<2x32xf32>
    %252 = tpu.matmul %251, %249, %cst_226 {dimension_numbers = #tpu.dot_dimension_numbers<[1], [0], [0], [1], [0, 0, 1, 1], [], []>} : vector<2x8xbf16>, vector<8x32xbf16>, vector<2x32xf32> -> vector<2x32xf32>
    %253 = arith.truncf %252 : vector<2x32xf32> to vector<2x32xbf16>
    %c0_227 = arith.constant 0 : index
    %c0_228 = arith.constant 0 : index
    %c0_229 = arith.constant 0 : index
    %254 = vector.load %arg11[%c0_227, %c0_228, %c0_229] : memref<9x32x32xbf16, #tpu.memory_space<vmem>>, vector<1x32x32xbf16>
    %255 = vector.shape_cast %254 : vector<1x32x32xbf16> to vector<32x32xbf16>
    %cst_230 = arith.constant dense<0.000000e+00> : vector<2x32xf32>
    %256 = tpu.matmul %253, %255, %cst_230 {dimension_numbers = #tpu.dot_dimension_numbers<[1], [0], [0], [1], [0, 0, 1, 1], [], []>} : vector<2x32xbf16>, vector<32x32xbf16>, vector<2x32xf32> -> vector<2x32xf32>
    %c1_231 = arith.constant 1 : index
    %c0_232 = arith.constant 0 : index
    %c0_233 = arith.constant 0 : index
    %257 = vector.load %arg10[%c1_231, %c0_232, %c0_233] : memref<9x2x8xbf16, #tpu.memory_space<vmem>>, vector<1x2x8xbf16>
    %258 = vector.shape_cast %257 : vector<1x2x8xbf16> to vector<2x8xbf16>
    %cst_234 = arith.constant dense<0.000000e+00> : vector<2x32xf32>
    %259 = tpu.matmul %258, %249, %cst_234 {dimension_numbers = #tpu.dot_dimension_numbers<[1], [0], [0], [1], [0, 0, 1, 1], [], []>} : vector<2x8xbf16>, vector<8x32xbf16>, vector<2x32xf32> -> vector<2x32xf32>
    %260 = arith.truncf %259 : vector<2x32xf32> to vector<2x32xbf16>
    %c1_235 = arith.constant 1 : index
    %c0_236 = arith.constant 0 : index
    %c0_237 = arith.constant 0 : index
    %261 = vector.load %arg11[%c1_235, %c0_236, %c0_237] : memref<9x32x32xbf16, #tpu.memory_space<vmem>>, vector<1x32x32xbf16>
    %262 = vector.shape_cast %261 : vector<1x32x32xbf16> to vector<32x32xbf16>
    %cst_238 = arith.constant dense<0.000000e+00> : vector<2x32xf32>
    %263 = tpu.matmul %260, %262, %cst_238 {dimension_numbers = #tpu.dot_dimension_numbers<[1], [0], [0], [1], [0, 0, 1, 1], [], []>} : vector<2x32xbf16>, vector<32x32xbf16>, vector<2x32xf32> -> vector<2x32xf32>
    %264 = arith.addf %256, %263 : vector<2x32xf32>
    %c2_239 = arith.constant 2 : index
    %c0_240 = arith.constant 0 : index
    %c0_241 = arith.constant 0 : index
    %265 = vector.load %arg10[%c2_239, %c0_240, %c0_241] : memref<9x2x8xbf16, #tpu.memory_space<vmem>>, vector<1x2x8xbf16>
    %266 = vector.shape_cast %265 : vector<1x2x8xbf16> to vector<2x8xbf16>
    %cst_242 = arith.constant dense<0.000000e+00> : vector<2x32xf32>
    %267 = tpu.matmul %266, %249, %cst_242 {dimension_numbers = #tpu.dot_dimension_numbers<[1], [0], [0], [1], [0, 0, 1, 1], [], []>} : vector<2x8xbf16>, vector<8x32xbf16>, vector<2x32xf32> -> vector<2x32xf32>
    %268 = arith.truncf %267 : vector<2x32xf32> to vector<2x32xbf16>
    %c2_243 = arith.constant 2 : index
    %c0_244 = arith.constant 0 : index
    %c0_245 = arith.constant 0 : index
    %269 = vector.load %arg11[%c2_243, %c0_244, %c0_245] : memref<9x32x32xbf16, #tpu.memory_space<vmem>>, vector<1x32x32xbf16>
    %270 = vector.shape_cast %269 : vector<1x32x32xbf16> to vector<32x32xbf16>
    %cst_246 = arith.constant dense<0.000000e+00> : vector<2x32xf32>
    %271 = tpu.matmul %268, %270, %cst_246 {dimension_numbers = #tpu.dot_dimension_numbers<[1], [0], [0], [1], [0, 0, 1, 1], [], []>} : vector<2x32xbf16>, vector<32x32xbf16>, vector<2x32xf32> -> vector<2x32xf32>
    %272 = arith.addf %264, %271 : vector<2x32xf32>
    %c3_247 = arith.constant 3 : index
    %c0_248 = arith.constant 0 : index
    %c0_249 = arith.constant 0 : index
    %273 = vector.load %arg10[%c3_247, %c0_248, %c0_249] : memref<9x2x8xbf16, #tpu.memory_space<vmem>>, vector<1x2x8xbf16>
    %274 = vector.shape_cast %273 : vector<1x2x8xbf16> to vector<2x8xbf16>
    %cst_250 = arith.constant dense<0.000000e+00> : vector<2x32xf32>
    %275 = tpu.matmul %274, %249, %cst_250 {dimension_numbers = #tpu.dot_dimension_numbers<[1], [0], [0], [1], [0, 0, 1, 1], [], []>} : vector<2x8xbf16>, vector<8x32xbf16>, vector<2x32xf32> -> vector<2x32xf32>
    %276 = arith.truncf %275 : vector<2x32xf32> to vector<2x32xbf16>
    %c3_251 = arith.constant 3 : index
    %c0_252 = arith.constant 0 : index
    %c0_253 = arith.constant 0 : index
    %277 = vector.load %arg11[%c3_251, %c0_252, %c0_253] : memref<9x32x32xbf16, #tpu.memory_space<vmem>>, vector<1x32x32xbf16>
    %278 = vector.shape_cast %277 : vector<1x32x32xbf16> to vector<32x32xbf16>
    %cst_254 = arith.constant dense<0.000000e+00> : vector<2x32xf32>
    %279 = tpu.matmul %276, %278, %cst_254 {dimension_numbers = #tpu.dot_dimension_numbers<[1], [0], [0], [1], [0, 0, 1, 1], [], []>} : vector<2x32xbf16>, vector<32x32xbf16>, vector<2x32xf32> -> vector<2x32xf32>
    %280 = arith.addf %272, %279 : vector<2x32xf32>
    %c4_255 = arith.constant 4 : index
    %c0_256 = arith.constant 0 : index
    %c0_257 = arith.constant 0 : index
    %281 = vector.load %arg10[%c4_255, %c0_256, %c0_257] : memref<9x2x8xbf16, #tpu.memory_space<vmem>>, vector<1x2x8xbf16>
    %282 = vector.shape_cast %281 : vector<1x2x8xbf16> to vector<2x8xbf16>
    %cst_258 = arith.constant dense<0.000000e+00> : vector<2x32xf32>
    %283 = tpu.matmul %282, %249, %cst_258 {dimension_numbers = #tpu.dot_dimension_numbers<[1], [0], [0], [1], [0, 0, 1, 1], [], []>} : vector<2x8xbf16>, vector<8x32xbf16>, vector<2x32xf32> -> vector<2x32xf32>
    %284 = arith.truncf %283 : vector<2x32xf32> to vector<2x32xbf16>
    %c4_259 = arith.constant 4 : index
    %c0_260 = arith.constant 0 : index
    %c0_261 = arith.constant 0 : index
    %285 = vector.load %arg11[%c4_259, %c0_260, %c0_261] : memref<9x32x32xbf16, #tpu.memory_space<vmem>>, vector<1x32x32xbf16>
    %286 = vector.shape_cast %285 : vector<1x32x32xbf16> to vector<32x32xbf16>
    %cst_262 = arith.constant dense<0.000000e+00> : vector<2x32xf32>
    %287 = tpu.matmul %284, %286, %cst_262 {dimension_numbers = #tpu.dot_dimension_numbers<[1], [0], [0], [1], [0, 0, 1, 1], [], []>} : vector<2x32xbf16>, vector<32x32xbf16>, vector<2x32xf32> -> vector<2x32xf32>
    %288 = arith.addf %280, %287 : vector<2x32xf32>
    %c5_263 = arith.constant 5 : index
    %c0_264 = arith.constant 0 : index
    %c0_265 = arith.constant 0 : index
    %289 = vector.load %arg10[%c5_263, %c0_264, %c0_265] : memref<9x2x8xbf16, #tpu.memory_space<vmem>>, vector<1x2x8xbf16>
    %290 = vector.shape_cast %289 : vector<1x2x8xbf16> to vector<2x8xbf16>
    %cst_266 = arith.constant dense<0.000000e+00> : vector<2x32xf32>
    %291 = tpu.matmul %290, %249, %cst_266 {dimension_numbers = #tpu.dot_dimension_numbers<[1], [0], [0], [1], [0, 0, 1, 1], [], []>} : vector<2x8xbf16>, vector<8x32xbf16>, vector<2x32xf32> -> vector<2x32xf32>
    %292 = arith.truncf %291 : vector<2x32xf32> to vector<2x32xbf16>
    %c5_267 = arith.constant 5 : index
    %c0_268 = arith.constant 0 : index
    %c0_269 = arith.constant 0 : index
    %293 = vector.load %arg11[%c5_267, %c0_268, %c0_269] : memref<9x32x32xbf16, #tpu.memory_space<vmem>>, vector<1x32x32xbf16>
    %294 = vector.shape_cast %293 : vector<1x32x32xbf16> to vector<32x32xbf16>
    %cst_270 = arith.constant dense<0.000000e+00> : vector<2x32xf32>
    %295 = tpu.matmul %292, %294, %cst_270 {dimension_numbers = #tpu.dot_dimension_numbers<[1], [0], [0], [1], [0, 0, 1, 1], [], []>} : vector<2x32xbf16>, vector<32x32xbf16>, vector<2x32xf32> -> vector<2x32xf32>
    %296 = arith.addf %288, %295 : vector<2x32xf32>
    %c6_271 = arith.constant 6 : index
    %c0_272 = arith.constant 0 : index
    %c0_273 = arith.constant 0 : index
    %297 = vector.load %arg10[%c6_271, %c0_272, %c0_273] : memref<9x2x8xbf16, #tpu.memory_space<vmem>>, vector<1x2x8xbf16>
    %298 = vector.shape_cast %297 : vector<1x2x8xbf16> to vector<2x8xbf16>
    %cst_274 = arith.constant dense<0.000000e+00> : vector<2x32xf32>
    %299 = tpu.matmul %298, %249, %cst_274 {dimension_numbers = #tpu.dot_dimension_numbers<[1], [0], [0], [1], [0, 0, 1, 1], [], []>} : vector<2x8xbf16>, vector<8x32xbf16>, vector<2x32xf32> -> vector<2x32xf32>
    %300 = arith.truncf %299 : vector<2x32xf32> to vector<2x32xbf16>
    %c6_275 = arith.constant 6 : index
    %c0_276 = arith.constant 0 : index
    %c0_277 = arith.constant 0 : index
    %301 = vector.load %arg11[%c6_275, %c0_276, %c0_277] : memref<9x32x32xbf16, #tpu.memory_space<vmem>>, vector<1x32x32xbf16>
    %302 = vector.shape_cast %301 : vector<1x32x32xbf16> to vector<32x32xbf16>
    %cst_278 = arith.constant dense<0.000000e+00> : vector<2x32xf32>
    %303 = tpu.matmul %300, %302, %cst_278 {dimension_numbers = #tpu.dot_dimension_numbers<[1], [0], [0], [1], [0, 0, 1, 1], [], []>} : vector<2x32xbf16>, vector<32x32xbf16>, vector<2x32xf32> -> vector<2x32xf32>
    %304 = arith.addf %296, %303 : vector<2x32xf32>
    %c7_279 = arith.constant 7 : index
    %c0_280 = arith.constant 0 : index
    %c0_281 = arith.constant 0 : index
    %305 = vector.load %arg10[%c7_279, %c0_280, %c0_281] : memref<9x2x8xbf16, #tpu.memory_space<vmem>>, vector<1x2x8xbf16>
    %306 = vector.shape_cast %305 : vector<1x2x8xbf16> to vector<2x8xbf16>
    %cst_282 = arith.constant dense<0.000000e+00> : vector<2x32xf32>
    %307 = tpu.matmul %306, %249, %cst_282 {dimension_numbers = #tpu.dot_dimension_numbers<[1], [0], [0], [1], [0, 0, 1, 1], [], []>} : vector<2x8xbf16>, vector<8x32xbf16>, vector<2x32xf32> -> vector<2x32xf32>
    %308 = arith.truncf %307 : vector<2x32xf32> to vector<2x32xbf16>
    %c7_283 = arith.constant 7 : index
    %c0_284 = arith.constant 0 : index
    %c0_285 = arith.constant 0 : index
    %309 = vector.load %arg11[%c7_283, %c0_284, %c0_285] : memref<9x32x32xbf16, #tpu.memory_space<vmem>>, vector<1x32x32xbf16>
    %310 = vector.shape_cast %309 : vector<1x32x32xbf16> to vector<32x32xbf16>
    %cst_286 = arith.constant dense<0.000000e+00> : vector<2x32xf32>
    %311 = tpu.matmul %308, %310, %cst_286 {dimension_numbers = #tpu.dot_dimension_numbers<[1], [0], [0], [1], [0, 0, 1, 1], [], []>} : vector<2x32xbf16>, vector<32x32xbf16>, vector<2x32xf32> -> vector<2x32xf32>
    %312 = arith.addf %304, %311 : vector<2x32xf32>
    %c8_287 = arith.constant 8 : index
    %c0_288 = arith.constant 0 : index
    %c0_289 = arith.constant 0 : index
    %313 = vector.load %arg10[%c8_287, %c0_288, %c0_289] : memref<9x2x8xbf16, #tpu.memory_space<vmem>>, vector<1x2x8xbf16>
    %314 = vector.shape_cast %313 : vector<1x2x8xbf16> to vector<2x8xbf16>
    %cst_290 = arith.constant dense<0.000000e+00> : vector<2x32xf32>
    %315 = tpu.matmul %314, %249, %cst_290 {dimension_numbers = #tpu.dot_dimension_numbers<[1], [0], [0], [1], [0, 0, 1, 1], [], []>} : vector<2x8xbf16>, vector<8x32xbf16>, vector<2x32xf32> -> vector<2x32xf32>
    %316 = arith.truncf %315 : vector<2x32xf32> to vector<2x32xbf16>
    %c8_291 = arith.constant 8 : index
    %c0_292 = arith.constant 0 : index
    %c0_293 = arith.constant 0 : index
    %317 = vector.load %arg11[%c8_291, %c0_292, %c0_293] : memref<9x32x32xbf16, #tpu.memory_space<vmem>>, vector<1x32x32xbf16>
    %318 = vector.shape_cast %317 : vector<1x32x32xbf16> to vector<32x32xbf16>
    %cst_294 = arith.constant dense<0.000000e+00> : vector<2x32xf32>
    %319 = tpu.matmul %316, %318, %cst_294 {dimension_numbers = #tpu.dot_dimension_numbers<[1], [0], [0], [1], [0, 0, 1, 1], [], []>} : vector<2x32xbf16>, vector<32x32xbf16>, vector<2x32xf32> -> vector<2x32xf32>
    %320 = arith.addf %312, %319 : vector<2x32xf32>
    %c0_295 = arith.constant 0 : index
    %c0_296 = arith.constant 0 : index
    %321 = vector.load %arg12[%c0_295, %c0_296] : memref<1x32xf32, #tpu.memory_space<vmem>>, vector<1x32xf32>
    %322 = vector.broadcast %321 : vector<1x32xf32> to vector<2x32xf32>
    %323 = arith.addf %320, %322 : vector<2x32xf32>
    %cst_297 = arith.constant 0.000000e+00 : f32
    %324 = vector.broadcast %cst_297 : f32 to vector<2x32xf32>
    %325 = arith.cmpf ogt, %323, %324 : vector<2x32xf32>
    %cst_298 = arith.constant 0.000000e+00 : f32
    %326 = vector.broadcast %cst_298 : f32 to vector<2x32xf32>
    %327 = arith.minimumf %323, %326 : vector<2x32xf32>
    %328 = math.exp %327 : vector<2x32xf32>
    %cst_299 = arith.constant 1.000000e+00 : f32
    %329 = vector.broadcast %cst_299 : f32 to vector<2x32xf32>
    %330 = arith.subf %328, %329 : vector<2x32xf32>
    %331 = arith.select %325, %323, %330 : vector<2x32xi1>, vector<2x32xf32>
    %332 = arith.truncf %331 : vector<2x32xf32> to vector<2x32xbf16>
    %c0_300 = arith.constant 0 : index
    %c0_301 = arith.constant 0 : index
    %c0_302 = arith.constant 0 : index
    %333 = vector.load %arg13[%c0_300, %c0_301, %c0_302] : memref<1x2x2xbf16, #tpu.memory_space<vmem>>, vector<1x2x2xbf16>
    %334 = vector.shape_cast %333 : vector<1x2x2xbf16> to vector<2x2xbf16>
    %cst_303 = arith.constant dense<0.000000e+00> : vector<2x32xf32>
    %335 = tpu.matmul %334, %332, %cst_303 {dimension_numbers = #tpu.dot_dimension_numbers<[1], [0], [0], [1], [0, 0, 1, 1], [], []>} : vector<2x2xbf16>, vector<2x32xbf16>, vector<2x32xf32> -> vector<2x32xf32>
    %336 = arith.truncf %335 : vector<2x32xf32> to vector<2x32xbf16>
    %c0_304 = arith.constant 0 : index
    %c0_305 = arith.constant 0 : index
    %c0_306 = arith.constant 0 : index
    %337 = vector.load %arg14[%c0_304, %c0_305, %c0_306] : memref<1x32x256xbf16, #tpu.memory_space<vmem>>, vector<1x32x256xbf16>
    %338 = vector.shape_cast %337 : vector<1x32x256xbf16> to vector<32x256xbf16>
    %cst_307 = arith.constant dense<0.000000e+00> : vector<2x256xf32>
    %339 = tpu.matmul %336, %338, %cst_307 {dimension_numbers = #tpu.dot_dimension_numbers<[1], [0], [0], [1], [0, 0, 1, 1], [], []>} : vector<2x32xbf16>, vector<32x256xbf16>, vector<2x256xf32> -> vector<2x256xf32>
    %c0_308 = arith.constant 0 : index
    %c0_309 = arith.constant 0 : index
    %340 = vector.load %arg15[%c0_308, %c0_309] : memref<1x256xf32, #tpu.memory_space<vmem>>, vector<1x256xf32>
    %341 = vector.broadcast %340 : vector<1x256xf32> to vector<2x256xf32>
    %342 = arith.addf %339, %341 : vector<2x256xf32>
    %cst_310 = arith.constant 0.000000e+00 : f32
    %343 = vector.broadcast %cst_310 : f32 to vector<2x256xf32>
    %344 = arith.cmpf ogt, %342, %343 : vector<2x256xf32>
    %cst_311 = arith.constant 0.000000e+00 : f32
    %345 = vector.broadcast %cst_311 : f32 to vector<2x256xf32>
    %346 = arith.minimumf %342, %345 : vector<2x256xf32>
    %347 = math.exp %346 : vector<2x256xf32>
    %cst_312 = arith.constant 1.000000e+00 : f32
    %348 = vector.broadcast %cst_312 : f32 to vector<2x256xf32>
    %349 = arith.subf %347, %348 : vector<2x256xf32>
    %350 = arith.select %344, %342, %349 : vector<2x256xi1>, vector<2x256xf32>
    %351 = arith.truncf %350 : vector<2x256xf32> to vector<2x256xbf16>
    %c0_313 = arith.constant 0 : index
    %c0_314 = arith.constant 0 : index
    %c0_315 = arith.constant 0 : index
    %352 = vector.load %arg16[%c0_313, %c0_314, %c0_315] : memref<1x2x2xbf16, #tpu.memory_space<vmem>>, vector<1x2x2xbf16>
    %353 = vector.shape_cast %352 : vector<1x2x2xbf16> to vector<2x2xbf16>
    %cst_316 = arith.constant dense<0.000000e+00> : vector<2x256xf32>
    %354 = tpu.matmul %353, %351, %cst_316 {dimension_numbers = #tpu.dot_dimension_numbers<[1], [0], [0], [1], [0, 0, 1, 1], [], []>} : vector<2x2xbf16>, vector<2x256xbf16>, vector<2x256xf32> -> vector<2x256xf32>
    %355 = arith.truncf %354 : vector<2x256xf32> to vector<2x256xbf16>
    %c0_317 = arith.constant 0 : index
    %c0_318 = arith.constant 0 : index
    %c0_319 = arith.constant 0 : index
    %356 = vector.load %arg17[%c0_317, %c0_318, %c0_319] : memref<1x256x6xbf16, #tpu.memory_space<vmem>>, vector<1x256x6xbf16>
    %357 = vector.shape_cast %356 : vector<1x256x6xbf16> to vector<256x6xbf16>
    %cst_320 = arith.constant dense<0.000000e+00> : vector<2x6xf32>
    %358 = tpu.matmul %355, %357, %cst_320 {dimension_numbers = #tpu.dot_dimension_numbers<[1], [0], [0], [1], [0, 0, 1, 1], [], []>} : vector<2x256xbf16>, vector<256x6xbf16>, vector<2x6xf32> -> vector<2x6xf32>
    %c0_321 = arith.constant 0 : index
    %c0_322 = arith.constant 0 : index
    %359 = vector.load %arg18[%c0_321, %c0_322] : memref<1x6xf32, #tpu.memory_space<vmem>>, vector<1x6xf32>
    %360 = vector.broadcast %359 : vector<1x6xf32> to vector<2x6xf32>
    %361 = arith.addf %358, %360 : vector<2x6xf32>
    %cst_323 = arith.constant dense<0xFF800000> : vector<2xf32>
    %362 = vector.multi_reduction <maximumf>, %361, %cst_323 [1] : vector<2x6xf32> to vector<2xf32>
    %363 = vector.shape_cast %362 : vector<2xf32> to vector<2x1xf32>
    %364 = vector.broadcast %363 : vector<2x1xf32> to vector<2x6xf32>
    %365 = arith.subf %361, %364 : vector<2x6xf32>
    %366 = math.exp %365 : vector<2x6xf32>
    %cst_324 = arith.constant dense<0.000000e+00> : vector<2xf32>
    %367 = vector.multi_reduction <add>, %366, %cst_324 [1] : vector<2x6xf32> to vector<2xf32>
    %368 = vector.shape_cast %367 : vector<2xf32> to vector<2x1xf32>
    %369 = vector.broadcast %368 : vector<2x1xf32> to vector<2x6xf32>
    %370 = arith.divf %366, %369 : vector<2x6xf32>
    %c0_325 = arith.constant 0 : index
    %c0_326 = arith.constant 0 : index
    %371 = vector.load %arg19[%c0_325, %c0_326] : memref<2x6xf32, #tpu.memory_space<vmem>>, vector<2x6xf32>
    tpu.vector_store %arg19[%c0_325, %c0_326], %370 {strides = array<i32>} : memref<2x6xf32, #tpu.memory_space<vmem>>, vector<2x6xf32>,
    return
  }
}

</mosaic_0001>

<bundles_post_ra>
// kernel: es_forward.1
= control target key start
LH: loop header
LB: loop body
LE: loop exit
PB: predicated region body
PF: predicated region fallthrough
CT: control target
= control target key end

     0   :  { %s15433_s0 = inlined_call_operand.vmem [shape: bf16[512,4], index: 0, kind: input, shape index: {}]   ;;  %s15434_s1 = inlined_call_operand.hbm [shape: bf16[9,128,512], index: 1, kind: input, shape index: {}]   ;;  %s15435_s2 = inlined_call_operand.hbm [shape: bf16[9,4,32], index: 2, kind: input, shape index: {}]   ;;  %s15436_s3 = inlined_call_operand.hbm [shape: f32[1,32], index: 3, kind: input, shape index: {}]   ;;  %s15437_s4 = inlined_call_operand.hbm [shape: bf16[9,32,128], index: 4, kind: input, shape index: {}]   ;;  %s15438_s5 = inlined_call_operand.hbm [shape: bf16[9,32,32], index: 5, kind: input, shape index: {}]   ;;  %s15439_s6 = inlined_call_operand.hbm [shape: f32[1,32], index: 6, kind: input, shape index: {}]   ;;  %s15440_s7 = inlined_call_operand.hbm [shape: bf16[9,8,32], index: 7, kind: input, shape index: {}]   ;;  %s15441_s8 = inlined_call_operand.hbm [shape: bf16[9,32,32], index: 8, kind: input, shape index: {}]   ;;  %s15442_s9 = inlined_call_operand.hbm [shape: f32[1,32], index: 9, kind: input, shape index: {}]   ;;  %s15443_s10 = inlined_call_operand.vmem [shape: bf16[9,2,8], index: 10, kind: input, shape index: {}]   ;;  %s15444_s11 = inlined_call_operand.hbm [shape: bf16[9,32,32], index: 11, kind: input, shape index: {}]   ;;  %s15445_s12 = inlined_call_operand.hbm [shape: f32[1,32], index: 12, kind: input, shape index: {}]   ;;  %s15446_s13 = inlined_call_operand.hbm [shape: bf16[1,2,2], index: 13, kind: input, shape index: {}]   ;;  %s15447_s14 = inlined_call_operand.hbm [shape: bf16[1,32,256], index: 14, kind: input, shape index: {}]   ;;  %s15448_s15 = inlined_call_operand.hbm [shape: f32[1,256], index: 15, kind: input, shape index: {}]   ;;  %s15449_s16 = inlined_call_operand.hbm [shape: bf16[1,2,2], index: 16, kind: input, shape index: {}]   ;;  %s15450_s17 = inlined_call_operand.vmem [shape: bf16[1,256,6], index: 17, kind: input, shape index: {}]   ;;  %s15451_s18 = inlined_call_operand.hbm [shape: f32[1,6], index: 18, kind: input, shape index: {}]   ;;  %s15452_s19 = inlined_call_operand.hbm [shape: f32[2,6], index: 19, kind: output, shape index: {}]  }
   0x1   :  { %15458 = sst [smem:[#allocation39_spill]] %s15433_s0 }
   0x2   :  { %15459 = sst [smem:[#allocation40_spill]] %s15434_s1 }
   0x3   :  { %15460 = sst [smem:[#allocation41_spill]] %s15435_s2 }
   0x4   :  { %15461 = sst [smem:[#allocation42_spill]] %s15436_s3 }
   0x5   :  { %15462 = sst [smem:[#allocation43_spill]] %s15452_s19 }
   0x6   :  { %24 = vsyncpa [#allocation3], 0 }
   0x7   :  { %25 = vsyncpa [#allocation6], 0 }
   0x8   :  { %26 = vsyncpa [#allocation9], 0 }
   0x9   :  { %27 = vsyncpa [#allocation12], 0 }
   0xa   :  { %28 = vsyncpa [#allocation15], 0 }
   0xb   :  { %29 = vsyncpa [#allocation18], 0 }
   0xc   :  { %30 = vsyncpa [#allocation21], 0 }
   0xd   :  { %31 = vsyncpa [#allocation24], 0 }
   0xe   :  { %32 = vsyncpa [#allocation27], 0 }
   0xf   :  { %33 = vsyncpa [#allocation4], 0  ;;  %s13166_s0 = smov [#allocation5]   ;;  %s15463_s1 = sld [smem:[#allocation41_spill]] }
  0x10   :  { %s53_s30 = sshll.u32 %s13166_s0, 4  ;;  %s54_s30 = int_to_ptr.vmem [resolvable:$true] %s53_s30 }
  0x15   :  { %s12772_s22 = scalar_lea.hbm %s15463_s1, 288 }
  0x16   :  { %p12773_p0 = scmp.ne.s32.totalorder %s15463_s1, %s12772_s22  ;;  %p12776_p1 = scmp.lt.u32.totalorder %s12772_s22, %s15463_s1 }
  0x18   :  { %p12778_p2 = pnand %p12776_p1, %p12773_p0 }
  0x1a   :  { %12781 = shalt.err (!%p12778_p2)
}
  0x1b   :  { %s12782_s3 = scalar_lea.vmem %s54_s30, 288  ;;  %p12787_p4 = scmp.lt.s32.totalorder %s54_s30, %s54_s30 }
  0x1c   :  { %p12783_p3 = scmp.ne.s32.totalorder %s54_s30, %s12782_s3  ;;  %p12788_p5 = scmp.lt.s32.totalorder %s12782_s3, %s12782_s3 }
  0x1e   :  { %p12789_p6 = por %p12788_p5, %p12787_p4 }
  0x20   :  { %p12790_p7 = pnand %p12789_p6, %p12783_p3 }
  0x22   :  { %12793 = shalt.err (!%p12790_p7)
}
  0x23   :  { %s13167_s26 = smov 32   ;;  %s13168_s27 = smov 2  }
  0x24   :  { %59 = dma.hbm_to_vmem [thread:$0]  %s15463_s1, 288, %s54_s30, [#allocation6], %s13167_s26, %s13167_s26, %s13168_s27  }
  0x25   :  { %s13169_s0 = smov [#allocation8]   ;;  %s12794_s2 = scalar_lea.hbm %s15437_s4, 2304 }
  0x26   :  { %s75_s20 = sshll.u32 %s13169_s0, 4  ;;  %p12795_p8 = scmp.ne.s32.totalorder %s15437_s4, %s12794_s2  ;;  %s76_s20 = int_to_ptr.vmem [resolvable:$true] %s75_s20 }
  0x27   :  { %p12798_p9 = scmp.lt.u32.totalorder %s12794_s2, %s15437_s4 }
  0x29   :  { %p12800_p10 = pnand %p12798_p9, %p12795_p8 }
  0x2b   :  { %12803 = shalt.err (!%p12800_p10)
}
  0x2c   :  { %s12804_s19 = scalar_lea.vmem %s76_s20, 2304  ;;  %p12809_p12 = scmp.lt.s32.totalorder %s76_s20, %s76_s20 }
  0x2d   :  { %p12805_p11 = scmp.ne.s32.totalorder %s76_s20, %s12804_s19  ;;  %p12810_p13 = scmp.lt.s32.totalorder %s12804_s19, %s12804_s19 }
  0x2f   :  { %p12811_p0 = por %p12810_p13, %p12809_p12 }
  0x31   :  { %p12812_p1 = pnand %p12811_p0, %p12805_p11 }
  0x33   :  { %12815 = shalt.err (!%p12812_p1)
}
  0x34   :  { %s13170_s30 = smov 64   ;;  %s13171_s1 = smov 4  }
  0x35   :  { %81 = dma.hbm_to_vmem [thread:$0]  %s15437_s4, 2304, %s76_s20, [#allocation9], %s13170_s30, %s13170_s30, %s13171_s1  }
  0x36   :  { %s13172_s28 = smov [#allocation11]   ;;  %s13173_s0 = smov [#allocation14]  }
  0x37   :  { %s100_s29 = sshll.u32 %s13172_s28, 4  ;;  %s121_s21 = sshll.u32 %s13173_s0, 4  ;;  %s101_s29 = int_to_ptr.vmem [resolvable:$true] %s100_s29  ;;  %s13321_s21 = int_to_ptr.vmem [resolvable:$true] %s121_s21 }
  0x38   :  { %s12816_s2 = scalar_lea.hbm %s15439_s6, 16 }
  0x39   :  { %p12817_p2 = scmp.ne.s32.totalorder %s15439_s6, %s12816_s2  ;;  %p12820_p3 = scmp.lt.u32.totalorder %s12816_s2, %s15439_s6 }
  0x3b   :  { %p12822_p4 = pnand %p12820_p3, %p12817_p2 }
  0x3d   :  { %12825 = shalt.err (!%p12822_p4)
}
  0x3e   :  { %s12826_s4 = scalar_lea.vmem %s101_s29, 16  ;;  %s12830_s20 = scalar_lea.vmem %s101_s29, 32 }
  0x3f   :  { %p12827_p5 = scmp.ne.s32.totalorder %s101_s29, %s12826_s4  ;;  %p12831_p6 = scmp.lt.s32.totalorder %s101_s29, %s101_s29 }
  0x40   :  { %p12832_p7 = scmp.lt.s32.totalorder %s12830_s20, %s12826_s4 }
  0x42   :  { %p12833_p8 = por %p12832_p7, %p12831_p6 }
  0x44   :  { %p12834_p9 = pnand %p12833_p8, %p12827_p5 }
  0x46   :  { %12837 = shalt.err (!%p12834_p9)
}
  0x47   :  { %103 = dma.hbm_to_vmem [thread:$0]  %s15439_s6, 16, %s101_s29, [#allocation12]  }
  0x48   :  { %s12838_s19 = scalar_lea.hbm %s15441_s8, 2304 }
  0x49   :  { %p12839_p10 = scmp.ne.s32.totalorder %s15441_s8, %s12838_s19  ;;  %p12842_p11 = scmp.lt.u32.totalorder %s12838_s19, %s15441_s8 }
  0x4b   :  { %p12844_p12 = pnand %p12842_p11, %p12839_p10 }
  0x4d   :  { %12847 = shalt.err (!%p12844_p12)
}
  0x4e   :  { %s12848_s25 = scalar_lea.vmem %s13321_s21, 2304  ;;  %p12853_p0 = scmp.lt.s32.totalorder %s13321_s21, %s13321_s21 }
  0x4f   :  { %p12849_p13 = scmp.ne.s32.totalorder %s13321_s21, %s12848_s25  ;;  %p12854_p1 = scmp.lt.s32.totalorder %s12848_s25, %s12848_s25 }
  0x51   :  { %p12855_p2 = por %p12854_p1, %p12853_p0 }
  0x53   :  { %p12856_p3 = pnand %p12855_p2, %p12849_p13 }
  0x55   :  { %12859 = shalt.err (!%p12856_p3)
}
  0x56   :  { %127 = dma.hbm_to_vmem [thread:$0]  %s15441_s8, 2304, %s13321_s21, [#allocation15], %s13170_s30, %s13170_s30, %s13171_s1  }
  0x57   :  { %s13174_s3 = smov [#allocation17]   ;;  %s13175_s20 = smov [#allocation20]  }
  0x58   :  { %s145_s4 = sshll.u32 %s13174_s3, 4  ;;  %s168_s26 = sshll.u32 %s13175_s20, 4  ;;  %s146_s4 = int_to_ptr.vmem [resolvable:$true] %s145_s4  ;;  %s169_s26 = int_to_ptr.vmem [resolvable:$true] %s168_s26 }
  0x59   :  { %s12860_s0 = scalar_lea.hbm %s15444_s11, 2304 }
  0x5a   :  { %p12861_p4 = scmp.ne.s32.totalorder %s15444_s11, %s12860_s0  ;;  %p12864_p5 = scmp.lt.u32.totalorder %s12860_s0, %s15444_s11 }
  0x5c   :  { %p12866_p6 = pnand %p12864_p5, %p12861_p4 }
  0x5e   :  { %12869 = shalt.err (!%p12866_p6)
}
  0x5f   :  { %s12870_s8 = scalar_lea.vmem %s146_s4, 2304  ;;  %p12875_p8 = scmp.lt.s32.totalorder %s146_s4, %s146_s4 }
  0x60   :  { %p12871_p7 = scmp.ne.s32.totalorder %s146_s4, %s12870_s8  ;;  %p12876_p9 = scmp.lt.s32.totalorder %s12870_s8, %s12870_s8 }
  0x62   :  { %p12877_p10 = por %p12876_p9, %p12875_p8 }
  0x64   :  { %p12878_p11 = pnand %p12877_p10, %p12871_p7 }
  0x66   :  { %12881 = shalt.err (!%p12878_p11)
}
  0x67   :  { %151 = dma.hbm_to_vmem [thread:$0]  %s15444_s11, 2304, %s146_s4, [#allocation18], %s13170_s30, %s13170_s30, %s13171_s1  }
  0x68   :  { %s12882_s29 = scalar_lea.hbm %s15446_s13, 16 }
  0x69   :  { %p12883_p12 = scmp.ne.s32.totalorder %s15446_s13, %s12882_s29  ;;  %p12886_p13 = scmp.lt.u32.totalorder %s12882_s29, %s15446_s13 }
  0x6b   :  { %p12888_p0 = pnand %p12886_p13, %p12883_p12 }
  0x6d   :  { %12891 = shalt.err (!%p12888_p0)
}
  0x6e   :  { %s12892_s0 = scalar_lea.vmem %s169_s26, 16  ;;  %s12896_s19 = scalar_lea.vmem %s169_s26, 32 }
  0x6f   :  { %p12893_p1 = scmp.ne.s32.totalorder %s169_s26, %s12892_s0  ;;  %p12897_p2 = scmp.lt.s32.totalorder %s169_s26, %s169_s26 }
  0x70   :  { %p12898_p3 = scmp.lt.s32.totalorder %s12896_s19, %s12892_s0 }
  0x72   :  { %p12899_p4 = por %p12898_p3, %p12897_p2 }
  0x74   :  { %p12900_p5 = pnand %p12899_p4, %p12893_p1 }
  0x76   :  { %12903 = shalt.err (!%p12900_p5)
}
  0x77   :  { %171 = dma.hbm_to_vmem [thread:$0]  %s15446_s13, 16, %s169_s26, [#allocation21]  }
  0x78   :  { %s13176_s22 = smov [#allocation23]   ;;  %s13177_s23 = smov [#allocation2]  }
  0x79   :  { %s190_s2 = sshll.u32 %s13176_s22, 4  ;;  %s41_s8 = sshll.u32 %s13177_s23, 4  ;;  %s191_s2 = int_to_ptr.vmem [resolvable:$true] %s190_s2  ;;  %s13382_s8 = int_to_ptr.vmem [resolvable:$true] %s41_s8 }
  0x7a   :  { %s12904_s25 = scalar_lea.hbm %s15448_s15, 32 }
  0x7b   :  { %p12905_p6 = scmp.ne.s32.totalorder %s15448_s15, %s12904_s25  ;;  %p12908_p7 = scmp.lt.u32.totalorder %s12904_s25, %s15448_s15 }
  0x7d   :  { %p12910_p8 = pnand %p12908_p7, %p12905_p6 }
  0x7f   :  { %12913 = shalt.err (!%p12910_p8)
}
  0x80   :  { %s12914_s13 = scalar_lea.vmem %s191_s2, 32  ;;  %p12919_p10 = scmp.lt.s32.totalorder %s191_s2, %s191_s2 }
  0x81   :  { %p12915_p9 = scmp.ne.s32.totalorder %s191_s2, %s12914_s13  ;;  %p12920_p11 = scmp.lt.s32.totalorder %s12914_s13, %s12914_s13 }
  0x83   :  { %p12921_p12 = por %p12920_p11, %p12919_p10 }
  0x85   :  { %p12922_p13 = pnand %p12921_p12, %p12915_p9 }
  0x87   :  { %12925 = shalt.err (!%p12922_p13)
}
  0x88   :  { %193 = dma.hbm_to_vmem [thread:$0]  %s15448_s15, 32, %s191_s2, [#allocation24]  }
  0x89   :  { %s15464_s19 = sld [smem:[#allocation40_spill]] }
  0x8f   :  { %s12926_s11 = scalar_lea.hbm %s15464_s19, 36864 }
  0x90   :  { %p12927_p0 = scmp.ne.s32.totalorder %s15464_s19, %s12926_s11  ;;  %p12930_p1 = scmp.lt.u32.totalorder %s12926_s11, %s15464_s19 }
  0x92   :  { %p12932_p2 = pnand %p12930_p1, %p12927_p0 }
  0x94   :  { %12935 = shalt.err (!%p12932_p2)
}
  0x95   :  { %s12936_s24 = scalar_lea.vmem %s13382_s8, 36864  ;;  %p12941_p4 = scmp.lt.s32.totalorder %s13382_s8, %s13382_s8 }
  0x96   :  { %p12937_p3 = scmp.ne.s32.totalorder %s13382_s8, %s12936_s24  ;;  %p12942_p5 = scmp.lt.s32.totalorder %s12936_s24, %s12936_s24 }
  0x98   :  { %p12943_p6 = por %p12942_p5, %p12941_p4 }
  0x9a   :  { %p12944_p7 = pnand %p12943_p6, %p12937_p3 }
  0x9c   :  { %12947 = shalt.err (!%p12944_p7)
}
  0x9d   :  { %s13178_s15 = smov 256   ;;  %s13179_s2 = smov 16  }
  0x9e   :  { %47 = dma.hbm_to_vmem [thread:$0]  %s15464_s19, 36864, %s13382_s8, [#allocation3], %s13178_s15, %s13178_s15, %s13179_s2  }
  0x9f   :  { %s13180_s29 = smov [#allocation7]   ;;  %s13181_s20 = smov [#allocation10]  }
  0xa0   :  { %s66_s3 = sshll.u32 %s13180_s29, 4  ;;  %s87_s13 = sshll.u32 %s13181_s20, 4  ;;  %s67_s3 = int_to_ptr.vmem [resolvable:$true] %s66_s3  ;;  %s13413_s13 = int_to_ptr.vmem [resolvable:$true] %s87_s13 }
  0xa1   :  { %s15465_s28 = sld [smem:[#allocation42_spill]] }
  0xa7   :  { %s12948_s0 = scalar_lea.hbm %s15465_s28, 16 }
  0xa8   :  { %p12949_p8 = scmp.ne.s32.totalorder %s15465_s28, %s12948_s0  ;;  %p12952_p9 = scmp.lt.u32.totalorder %s12948_s0, %s15465_s28 }
  0xaa   :  { %p12954_p10 = pnand %p12952_p9, %p12949_p8 }
  0xac   :  { %12957 = shalt.err (!%p12954_p10)
}
  0xad   :  { %s12958_s8 = scalar_lea.vmem %s67_s3, 16  ;;  %s12962_s19 = scalar_lea.vmem %s67_s3, 32 }
  0xae   :  { %p12959_p11 = scmp.ne.s32.totalorder %s67_s3, %s12958_s8  ;;  %p12963_p12 = scmp.lt.s32.totalorder %s67_s3, %s67_s3 }
  0xaf   :  { %p12964_p13 = scmp.lt.s32.totalorder %s12962_s19, %s12958_s8 }
  0xb1   :  { %p12965_p0 = por %p12964_p13, %p12963_p12 }
  0xb3   :  { %p12966_p1 = pnand %p12965_p0, %p12959_p11 }
  0xb5   :  { %12969 = shalt.err (!%p12966_p1)
}
  0xb6   :  { %69 = dma.hbm_to_vmem [thread:$0]  %s15465_s28, 16, %s67_s3, [#allocation6]  }
  0xb7   :  { %s12970_s25 = scalar_lea.hbm %s15438_s5, 2304 }
  0xb8   :  { %p12971_p2 = scmp.ne.s32.totalorder %s15438_s5, %s12970_s25  ;;  %p12974_p3 = scmp.lt.u32.totalorder %s12970_s25, %s15438_s5 }
  0xba   :  { %p12976_p4 = pnand %p12974_p3, %p12971_p2 }
  0xbc   :  { %12979 = shalt.err (!%p12976_p4)
}
  0xbd   :  { %s12980_s27 = scalar_lea.vmem %s13413_s13, 2304  ;;  %p12985_p6 = scmp.lt.s32.totalorder %s13413_s13, %s13413_s13 }
  0xbe   :  { %p12981_p5 = scmp.ne.s32.totalorder %s13413_s13, %s12980_s27  ;;  %p12986_p7 = scmp.lt.s32.totalorder %s12980_s27, %s12980_s27 }
  0xc0   :  { %p12987_p8 = por %p12986_p7, %p12985_p6 }
  0xc2   :  { %p12988_p9 = pnand %p12987_p8, %p12981_p5 }
  0xc4   :  { %12991 = shalt.err (!%p12988_p9)
}
  0xc5   :  { %93 = dma.hbm_to_vmem [thread:$0]  %s15438_s5, 2304, %s13413_s13, [#allocation9], %s13170_s30, %s13170_s30, %s13171_s1  }
  0xc6   :  { %s13182_s0 = smov [#allocation13]   ;;  %s13183_s4 = smov [#allocation16]  }
  0xc7   :  { %s109_s11 = sshll.u32 %s13182_s0, 4  ;;  %s134_s22 = sshll.u32 %s13183_s4, 4  ;;  %s110_s11 = int_to_ptr.vmem [resolvable:$true] %s109_s11  ;;  %s135_s22 = int_to_ptr.vmem [resolvable:$true] %s134_s22 }
  0xc8   :  { %s12992_s19 = scalar_lea.hbm %s15440_s7, 576 }
  0xc9   :  { %p12993_p10 = scmp.ne.s32.totalorder %s15440_s7, %s12992_s19  ;;  %p12996_p11 = scmp.lt.u32.totalorder %s12992_s19, %s15440_s7 }
  0xcb   :  { %p12998_p12 = pnand %p12996_p11, %p12993_p10 }
  0xcd   :  { %13001 = shalt.err (!%p12998_p12)
}
  0xce   :  { %s13002_s5 = scalar_lea.vmem %s110_s11, 576  ;;  %p13007_p0 = scmp.lt.s32.totalorder %s110_s11, %s110_s11 }
  0xcf   :  { %p13003_p13 = scmp.ne.s32.totalorder %s110_s11, %s13002_s5  ;;  %p13008_p1 = scmp.lt.s32.totalorder %s13002_s5, %s13002_s5 }
  0xd1   :  { %p13009_p2 = por %p13008_p1, %p13007_p0 }
  0xd3   :  { %p13010_p3 = pnand %p13009_p2, %p13003_p13 }
  0xd5   :  { %13013 = shalt.err (!%p13010_p3)
}
  0xd6   :  { %115 = dma.hbm_to_vmem [thread:$0]  %s15440_s7, 576, %s110_s11, [#allocation12], %s13170_s30, %s13170_s30, %s13171_s1  }
  0xd7   :  { %s13014_s20 = scalar_lea.hbm %s15442_s9, 16 }
  0xd8   :  { %p13015_p4 = scmp.ne.s32.totalorder %s15442_s9, %s13014_s20  ;;  %p13018_p5 = scmp.lt.u32.totalorder %s13014_s20, %s15442_s9 }
  0xda   :  { %p13020_p6 = pnand %p13018_p5, %p13015_p4 }
  0xdc   :  { %13023 = shalt.err (!%p13020_p6)
}
  0xdd   :  { %s13024_s0 = scalar_lea.vmem %s135_s22, 16  ;;  %s13028_s4 = scalar_lea.vmem %s135_s22, 32 }
  0xde   :  { %p13025_p7 = scmp.ne.s32.totalorder %s135_s22, %s13024_s0  ;;  %p13029_p8 = scmp.lt.s32.totalorder %s135_s22, %s135_s22 }
  0xdf   :  { %p13030_p9 = scmp.lt.s32.totalorder %s13028_s4, %s13024_s0 }
  0xe1   :  { %p13031_p10 = por %p13030_p9, %p13029_p8 }
  0xe3   :  { %p13032_p11 = pnand %p13031_p10, %p13025_p7 }
  0xe5   :  { %13035 = shalt.err (!%p13032_p11)
}
  0xe6   :  { %137 = dma.hbm_to_vmem [thread:$0]  %s15442_s9, 16, %s135_s22, [#allocation15]  }
  0xe7   :  { %s13184_s1 = smov [#allocation19]   ;;  %s13185_s23 = smov [#allocation22]  }
  0xe8   :  { %s158_s11 = sshll.u32 %s13184_s1, 4  ;;  %s177_s8 = sshll.u32 %s13185_s23, 4  ;;  %s159_s11 = int_to_ptr.vmem [resolvable:$true] %s158_s11  ;;  %s13474_s8 = int_to_ptr.vmem [resolvable:$true] %s177_s8 }
  0xe9   :  { %s13036_s24 = scalar_lea.hbm %s15445_s12, 16 }
  0xea   :  { %p13037_p12 = scmp.ne.s32.totalorder %s15445_s12, %s13036_s24  ;;  %p13040_p13 = scmp.lt.u32.totalorder %s13036_s24, %s15445_s12 }
  0xec   :  { %p13042_p0 = pnand %p13040_p13, %p13037_p12 }
  0xee   :  { %13045 = shalt.err (!%p13042_p0)
}
  0xef   :  { %s13046_s9 = scalar_lea.vmem %s159_s11, 16  ;;  %s13050_s22 = scalar_lea.vmem %s159_s11, 32 }
  0xf0   :  { %p13047_p1 = scmp.ne.s32.totalorder %s159_s11, %s13046_s9  ;;  %p13051_p2 = scmp.lt.s32.totalorder %s159_s11, %s159_s11 }
  0xf1   :  { %p13052_p3 = scmp.lt.s32.totalorder %s13050_s22, %s13046_s9 }
  0xf3   :  { %p13053_p4 = por %p13052_p3, %p13051_p2 }
  0xf5   :  { %p13054_p5 = pnand %p13053_p4, %p13047_p1 }
  0xf7   :  { %13057 = shalt.err (!%p13054_p5)
}
  0xf8   :  { %161 = dma.hbm_to_vmem [thread:$0]  %s15445_s12, 16, %s159_s11, [#allocation18]  }
  0xf9   :  { %s13058_s26 = scalar_lea.hbm %s15447_s14, 512 }
  0xfa   :  { %p13059_p6 = scmp.ne.s32.totalorder %s15447_s14, %s13058_s26  ;;  %p13062_p7 = scmp.lt.u32.totalorder %s13058_s26, %s15447_s14 }
  0xfc   :  { %p13064_p8 = pnand %p13062_p7, %p13059_p6 }
  0xfe   :  { %13067 = shalt.err (!%p13064_p8)
}
  0xff   :  { %s13068_s4 = scalar_lea.vmem %s13474_s8, 512  ;;  %p13073_p10 = scmp.lt.s32.totalorder %s13474_s8, %s13474_s8 }
 0x100   :  { %p13069_p9 = scmp.ne.s32.totalorder %s13474_s8, %s13068_s4  ;;  %p13074_p11 = scmp.lt.s32.totalorder %s13068_s4, %s13068_s4 }
 0x102   :  { %p13075_p12 = por %p13074_p11, %p13073_p10 }
 0x104   :  { %p13076_p13 = pnand %p13075_p12, %p13069_p9 }
 0x106   :  { %13079 = shalt.err (!%p13076_p13)
}
 0x107   :  { %s13186_s12 = smov 128   ;;  %s13187_s7 = smov 8  }
 0x108   :  { %183 = dma.hbm_to_vmem [thread:$0]  %s15447_s14, 512, %s13474_s8, [#allocation21], %s13186_s12, %s13186_s12, %s13187_s7  }
 0x109   :  { %s13188_s11 = smov [#allocation25]   ;;  %s13189_s19 = smov [#allocation26]  }
 0x10a   :  { %s200_s23 = sshll.u32 %s13188_s11, 4  ;;  %s212_s21 = sshll.u32 %s13189_s19, 4  ;;  %s201_s23 = int_to_ptr.vmem [resolvable:$true] %s200_s23  ;;  %s213_s21 = int_to_ptr.vmem [resolvable:$true] %s212_s21 }
 0x10b   :  { %s13080_s2 = scalar_lea.hbm %s15449_s16, 16 }
 0x10c   :  { %p13081_p0 = scmp.ne.s32.totalorder %s15449_s16, %s13080_s2  ;;  %p13084_p1 = scmp.lt.u32.totalorder %s13080_s2, %s15449_s16 }
 0x10e   :  { %p13086_p2 = pnand %p13084_p1, %p13081_p0 }
 0x110   :  { %13089 = shalt.err (!%p13086_p2)
}
 0x111   :  { %s13090_s14 = scalar_lea.vmem %s201_s23, 16  ;;  %s13094_s8 = scalar_lea.vmem %s201_s23, 32 }
 0x112   :  { %p13091_p3 = scmp.ne.s32.totalorder %s201_s23, %s13090_s14  ;;  %p13095_p4 = scmp.lt.s32.totalorder %s201_s23, %s201_s23 }
 0x113   :  { %p13096_p5 = scmp.lt.s32.totalorder %s13094_s8, %s13090_s14 }
 0x115   :  { %p13097_p6 = por %p13096_p5, %p13095_p4 }
 0x117   :  { %p13098_p7 = pnand %p13097_p6, %p13091_p3 }
 0x119   :  { %13101 = shalt.err (!%p13098_p7)
}
 0x11a   :  { %203 = dma.hbm_to_vmem [thread:$0]  %s15449_s16, 16, %s201_s23, [#allocation24]  }
 0x11b   :  { %s13102_s26 = scalar_lea.hbm %s15451_s18, 16 }
 0x11c   :  { %p13103_p8 = scmp.ne.s32.totalorder %s15451_s18, %s13102_s26  ;;  %p13106_p9 = scmp.lt.u32.totalorder %s13102_s26, %s15451_s18 }
 0x11e   :  { %p13108_p10 = pnand %p13106_p9, %p13103_p8 }
 0x120   :  { %13111 = shalt.err (!%p13108_p10)
}
 0x121   :  { %s13112_s4 = scalar_lea.vmem %s213_s21, 16  ;;  %s13116_s12 = scalar_lea.vmem %s213_s21, 32 }
 0x122   :  { %p13113_p11 = scmp.ne.s32.totalorder %s213_s21, %s13112_s4  ;;  %p13117_p12 = scmp.lt.s32.totalorder %s213_s21, %s213_s21 }
 0x123   :  { %p13118_p13 = scmp.lt.s32.totalorder %s13116_s12, %s13112_s4 }
 0x125   :  { %p13119_p0 = por %p13118_p13, %p13117_p12 }
 0x127   :  { %p13120_p1 = pnand %p13119_p0, %p13113_p11 }
 0x129   :  { %13123 = shalt.err (!%p13120_p1)
}
 0x12a   :  { %215 = dma.hbm_to_vmem [thread:$0]  %s15451_s18, 16, %s213_s21, [#allocation27]  }
 0x12b   :  { %13146 = dma.done.wait [#allocation3], 36864  }
 0x12c   :  { %13147 = vsyncadd [#allocation3], 4294930432 }
 0x12d   :  { %13148 = dma.done.wait [#allocation6], 304  }
 0x12e   :  { %13149 = vsyncadd [#allocation6], 4294966992 }
 0x12f   :  { %13150 = dma.done.wait [#allocation9], 4608  }
 0x130   :  { %13151 = vsyncadd [#allocation9], 4294962688 }
 0x131   :  { %13152 = dma.done.wait [#allocation12], 592  }
 0x132   :  { %13153 = vsyncadd [#allocation12], 4294966704 }
 0x133   :  { %13154 = dma.done.wait [#allocation15], 2320  }
 0x134   :  { %13155 = vsyncadd [#allocation15], 4294964976 }
 0x135   :  { %13156 = dma.done.wait [#allocation18], 2320  }
 0x136   :  { %13157 = vsyncadd [#allocation18], 4294964976 }
 0x137   :  { %13158 = dma.done.wait [#allocation21], 528  }
 0x138   :  { %13159 = vsyncadd [#allocation21], 4294966768 }
 0x139   :  { %13160 = dma.done.wait [#allocation24], 48  }
 0x13a   :  { %13161 = vsyncadd [#allocation24], 4294967248 }
 0x13b   :  { %13162 = dma.done.wait [#allocation27], 16  }
 0x13c   :  { %13163 = vsyncadd [#allocation27], 4294967280  ;;  %s15466_s1 = sld [smem:[#allocation39_spill]]  ;;  %v12114_v32 = vld [vmem:[#allocation2] ss:$16 sps:$4 sm:$0xff]   ;;  %vm1338_vm0 = vcmask 1041408  }
 0x13d   :  { %v12116_v33 = vld [vmem:[#allocation2 + $0x4] ss:$16 sps:$4 sm:$0xff]   ;;  %v12117_v34 = vld [vmem:[#allocation2 + $0x8] ss:$16 sps:$4 sm:$0xff]   ;;  %v12119_v35 = vld [vmem:[#allocation2 + $0xc] ss:$16 sps:$4 sm:$0xff]  }
 0x13e   :  { %745 = vmatprep.mubr.bf16.mxu0 %v12116_v33  ;;  %v12120_v36 = vld [vmem:[#allocation2 + $0x24] ss:$16 sps:$4 sm:$0xff]   ;;  %842 = vmatprep.mubr.bf16.mxu1 %v12119_v35  ;;  %v12122_v37 = vld [vmem:[#allocation2 + $0x2c] ss:$16 sps:$4 sm:$0xff]   ;;  %v12124_v38 = vld [vmem:[#allocation2 + $0x20] ss:$16 sps:$4 sm:$0xff]  }
 0x13f   :  { %v12125_v39 = vld [vmem:[#allocation2 + $0x28] ss:$16 sps:$4 sm:$0xff]   ;;  %v12126_v40 = vld [vmem:[#allocation2 + $0x44] ss:$16 sps:$4 sm:$0xff]   ;;  %v12128_v41 = vld [vmem:[#allocation2 + $0x4c] ss:$16 sps:$4 sm:$0xff]  }
 0x140   :  { %v12130_v42 = vld [vmem:[#allocation2 + $0x40] ss:$16 sps:$4 sm:$0xff]   ;;  %v12131_v43 = vld [vmem:[#allocation2 + $0x48] ss:$16 sps:$4 sm:$0xff]   ;;  %v12132_v44 = vld [vmem:[#allocation2 + $0x64] ss:$16 sps:$4 sm:$0xff]  }
 0x141   :  { %v12134_v45 = vld [vmem:[#allocation2 + $0x6c] ss:$16 sps:$4 sm:$0xff]   ;;  %v12136_v46 = vld [vmem:[#allocation2 + $0x60] ss:$16 sps:$4 sm:$0xff]   ;;  %v12137_v47 = vld [vmem:[#allocation2 + $0x68] ss:$16 sps:$4 sm:$0xff]  }
 0x142   :  { %v13532_v0 = vld [vmem:[%s15466_s1 + $0x40] sm:$0xff]   ;;  %v13555_v4 = vld [vmem:[%s15466_s1 + $0x48] sm:$0xff]   ;;  %v13579_v8 = vld [vmem:[%s15466_s1 + $0x50] sm:$0xff]   ;;  %vm1313_vm1 = vcmask 31744  }
 0x143   :  { %v13537_v1 = vld [vmem:[%s15466_s1 + $0xc0] sm:$0xff]   ;;  %9713 = vmatprep.subr.bf16.mxu0 %v13532_v0  ;;  %v13561_v5 = vld [vmem:[%s15466_s1 + $0xc8] sm:$0xff]   ;;  %v13585_v9 = vld [vmem:[%s15466_s1 + $0xd0] sm:$0xff]  }
 0x144   :  { %v13543_v2 = vld [vmem:[%s15466_s1] sm:$0xff]   ;;  %9777 = vmatprep.subr.bf16.mxu1 %v13537_v1  ;;  %v13567_v6 = vld [vmem:[%s15466_s1 + $0x8] sm:$0xff]   ;;  %v13591_v10 = vld [vmem:[%s15466_s1 + $0x10] sm:$0xff]  }
 0x145   :  { %v13549_v3 = vld [vmem:[%s15466_s1 + $0x80] sm:$0xff]   ;;  %9714 = vmatpush3.bf16.msra.mxu0 %v13543_v2  ;;  %v13573_v7 = vld [vmem:[%s15466_s1 + $0x88] sm:$0xff]   ;;  %v13597_v11 = vld [vmem:[%s15466_s1 + $0x90] sm:$0xff]  }
 0x146   :  { %9778 = vmatpush3.bf16.msra.mxu1 %v13549_v3  ;;  %9715 = vmatprep.subr.bf16.mxu0 %v13555_v4  ;;  %v13603_v12 = vld [vmem:[%s15466_s1 + $0x58] sm:$0xff]   ;;  %v13627_v16 = vld [vmem:[%s15466_s1 + $0x60] sm:$0xff]   ;;  %v13651_v20 = vld [vmem:[%s15466_s1 + $0x68] sm:$0xff]  }
 0x147   :  { %9779 = vmatprep.subr.bf16.mxu1 %v13561_v5  ;;  %v13609_v13 = vld [vmem:[%s15466_s1 + $0xd8] sm:$0xff]   ;;  %v13633_v17 = vld [vmem:[%s15466_s1 + $0xe0] sm:$0xff]   ;;  %v13657_v21 = vld [vmem:[%s15466_s1 + $0xe8] sm:$0xff]  }
 0x148   :  { %v13615_v14 = vld [vmem:[%s15466_s1 + $0x18] sm:$0xff]   ;;  %v13639_v18 = vld [vmem:[%s15466_s1 + $0x20] sm:$0xff]   ;;  %v13663_v22 = vld [vmem:[%s15466_s1 + $0x28] sm:$0xff]  }
 0x149   :  { %9716 = vmatpush3.bf16.msra.mxu0 %v13567_v6  ;;  %v13621_v15 = vld [vmem:[%s15466_s1 + $0x98] sm:$0xff]   ;;  %v13645_v19 = vld [vmem:[%s15466_s1 + $0xa0] sm:$0xff]   ;;  %v13669_v23 = vld [vmem:[%s15466_s1 + $0xa8] sm:$0xff]  }
 0x14a   :  { %9780 = vmatpush3.bf16.msra.mxu1 %v13573_v7  ;;  %9717 = vmatprep.subr.bf16.mxu0 %v13579_v8  ;;  %v13675_v24 = vld [vmem:[%s15466_s1 + $0x70] sm:$0xff]   ;;  %v13699_v28 = vld [vmem:[%s15466_s1 + $0x78] sm:$0xff]   ;;  %v12692_v35 = vld [vmem:[%s15466_s1] sm:$0xff]  }
 0x14b   :  { %9781 = vmatprep.subr.bf16.mxu1 %v13585_v9  ;;  %v13681_v25 = vld [vmem:[%s15466_s1 + $0xf0] sm:$0xff]   ;;  %v13705_v29 = vld [vmem:[%s15466_s1 + $0xf8] sm:$0xff]  }
 0x14c   :  { %v13687_v26 = vld [vmem:[%s15466_s1 + $0x30] sm:$0xff]   ;;  %v13711_v30 = vld [vmem:[%s15466_s1 + $0x38] sm:$0xff]  }
 0x14d   :  { %9718 = vmatpush3.bf16.msra.mxu0 %v13591_v10  ;;  %v13693_v27 = vld [vmem:[%s15466_s1 + $0xb0] sm:$0xff]   ;;  %v13717_v31 = vld [vmem:[%s15466_s1 + $0xb8] sm:$0xff]  }
 0x14e   :  { %9782 = vmatpush3.bf16.msra.mxu1 %v13597_v11  ;;  %9719 = vmatprep.subr.bf16.mxu0 %v13603_v12  ;;  %v12138_v48 = vld [vmem:[#allocation2 + $0x84] ss:$16 sps:$4 sm:$0xff]   ;;  %v12140_v49 = vld [vmem:[#allocation2 + $0x8c] ss:$16 sps:$4 sm:$0xff]   ;;  %v12142_v50 = vld [vmem:[#allocation2 + $0x80] ss:$16 sps:$4 sm:$0xff]  }
 0x14f   :  { %9783 = vmatprep.subr.bf16.mxu1 %v13609_v13  ;;  %v12143_v51 = vld [vmem:[#allocation2 + $0x88] ss:$16 sps:$4 sm:$0xff]   ;;  %v12144_v52 = vld [vmem:[#allocation2 + $0xa4] ss:$16 sps:$4 sm:$0xff]   ;;  %v12146_v53 = vld [vmem:[#allocation2 + $0xac] ss:$16 sps:$4 sm:$0xff]  }
 0x150   :  { %v12148_v54 = vld [vmem:[#allocation2 + $0xa0] ss:$16 sps:$4 sm:$0xff]   ;;  %v12149_v55 = vld [vmem:[#allocation2 + $0xa8] ss:$16 sps:$4 sm:$0xff]   ;;  %v12150_v56 = vld [vmem:[#allocation2 + $0xc4] ss:$16 sps:$4 sm:$0xff]  }
 0x151   :  { %9720 = vmatpush3.bf16.msra.mxu0 %v13615_v14  ;;  %v12152_v57 = vld [vmem:[#allocation2 + $0xcc] ss:$16 sps:$4 sm:$0xff]   ;;  %v12154_v58 = vld [vmem:[#allocation2 + $0xc0] ss:$16 sps:$4 sm:$0xff]   ;;  %v12155_v59 = vld [vmem:[#allocation2 + $0xc8] ss:$16 sps:$4 sm:$0xff]  }
 0x152   :  { %9784 = vmatpush3.bf16.msra.mxu1 %v13621_v15  ;;  %9721 = vmatprep.subr.bf16.mxu0 %v13627_v16  ;;  %v12156_v60 = vld [vmem:[#allocation2 + $0xe4] ss:$16 sps:$4 sm:$0xff]   ;;  %v12158_v61 = vld [vmem:[#allocation2 + $0xec] ss:$16 sps:$4 sm:$0xff]   ;;  %v12160_v62 = vld [vmem:[#allocation2 + $0xe0] ss:$16 sps:$4 sm:$0xff]  }
 0x153   :  { %9785 = vmatprep.subr.bf16.mxu1 %v13633_v17  ;;  %v12161_v63 = vld [vmem:[#allocation2 + $0xe8] ss:$16 sps:$4 sm:$0xff]   ;;  %v12210_v33 = vld [vmem:[#allocation2 + $0x200] ss:$16 sps:$4 sm:$0xff]  }
 0x155   :  { %9722 = vmatpush3.bf16.msra.mxu0 %v13639_v18 }
 0x156   :  { %9786 = vmatpush3.bf16.msra.mxu1 %v13645_v19  ;;  %9723 = vmatprep.subr.bf16.mxu0 %v13651_v20 }
 0x157   :  { %9787 = vmatprep.subr.bf16.mxu1 %v13657_v21 }
 0x159   :  { %9724 = vmatpush3.bf16.msra.mxu0 %v13663_v22 }
 0x15a   :  { %9788 = vmatpush3.bf16.msra.mxu1 %v13669_v23  ;;  %9725 = vmatprep.subr.bf16.mxu0 %v13675_v24 }
 0x15b   :  { %9789 = vmatprep.subr.bf16.mxu1 %v13681_v25 }
 0x15d   :  { %9726 = vmatpush3.bf16.msra.mxu0 %v13687_v26 }
 0x15e   :  { %9790 = vmatpush3.bf16.msra.mxu1 %v13693_v27  ;;  %9727 = vmatprep.subr.bf16.mxu0 %v13699_v28 }
 0x15f   :  { %9791 = vmatprep.subr.bf16.mxu1 %v13705_v29 }
 0x161   :  { %9728 = vmatpush3.bf16.msra.mxu0 %v13711_v30 }
 0x162   :  { %9792 = vmatpush3.bf16.msra.mxu1 %v13717_v31  ;;  %9841 = vmatprep.subr.bf16.mxu0 %v13532_v0 }
 0x163   :  { %9905 = vmatprep.subr.bf16.mxu1 %v13537_v1  ;;  %v12164_v1 = vld [vmem:[#allocation2 + $0x104] ss:$16 sps:$4 sm:$0xff]  }
 0x164   :  { %746 = vmatmul.mubr.bf16.vlgmr.msra.gmra.mrb[0].mxu0 %v12114_v32  ;;  %v12212_v32 = vld [vmem:[#allocation2 + $0x204] ss:$16 sps:$4 sm:$0xff]  }
 0x165   :  { %843 = vmatmul.mubr.bf16.vlgmr.msra.gmra.mrb[0].mxu1 %v12117_v34  ;;  %9842 = vmatpush3.bf16.msra.mxu0 %v13543_v2  ;;  %v12213_v34 = vld [vmem:[#allocation2 + $0x224] ss:$16 sps:$4 sm:$0xff]  }
 0x166   :  { %9906 = vmatpush3.bf16.msra.mxu1 %v13549_v3  ;;  %753 = vmatprep.mubr.bf16.mxu0 %v12120_v36  ;;  %v12167_v3 = vld [vmem:[#allocation2 + $0x10c] ss:$16 sps:$4 sm:$0xff]   ;;  %v1312_v36 = vld [vmem:[#allocation5 + $0x2] sm:$0x3] }
 0x167   :  { %850 = vmatprep.mubr.bf16.mxu1 %v12122_v37  ;;  %9843 = vmatprep.subr.bf16.mxu0 %v13555_v4  ;;  %v12215_v37 = vld [vmem:[#allocation2 + $0x220] ss:$16 sps:$4 sm:$0xff]  }
 0x168   :  { %9907 = vmatprep.subr.bf16.mxu1 %v13561_v5  ;;  %v12162_v5 = vld [vmem:[#allocation2 + $0x100] ss:$16 sps:$4 sm:$0xff]  }
 0x169   :  { %9844 = vmatpush3.bf16.msra.mxu0 %v13567_v6 }
 0x16a   :  { %9908 = vmatpush3.bf16.msra.mxu1 %v13573_v7  ;;  %9845 = vmatprep.subr.bf16.mxu0 %v13579_v8  ;;  %v12165_v7 = vld [vmem:[#allocation2 + $0x108] ss:$16 sps:$4 sm:$0xff]  }
 0x16b   :  { %9909 = vmatprep.subr.bf16.mxu1 %v13585_v9  ;;  %v12168_v9 = vld [vmem:[#allocation2 + $0x124] ss:$16 sps:$4 sm:$0xff]  }
 0x16c   :  { %754 = vmatmul.mubr.bf16.gmra.mrb[4].mxu0 %v12124_v38  ;;  %v12693_v38 = vld [vmem:[%s15466_s1 + $0x48] sm:$0xff]  }
 0x16d   :  { %851 = vmatmul.mubr.bf16.gmra.mrb[4].mxu1 %v12125_v39  ;;  %761 = vmatprep.mubr.bf16.mxu0 %v12126_v40  ;;  %v1340_v39 = vsel %vm1338_vm0, %v1312_v36, 0  ;;  %v12216_v40 = vld [vmem:[#allocation2 + $0x244] ss:$16 sps:$4 sm:$0xff]  }
 0x16e   :  { %858 = vmatprep.mubr.bf16.mxu1 %v12128_v41  ;;  %9846 = vmatpush3.bf16.msra.mxu0 %v13591_v10  ;;  %v12694_v41 = vld [vmem:[%s15466_s1 + $0x8] sm:$0xff]  }
 0x16f   :  { %9910 = vmatpush3.bf16.msra.mxu1 %v13597_v11  ;;  %9847 = vmatprep.subr.bf16.mxu0 %v13603_v12  ;;  %v12170_v11 = vld [vmem:[#allocation2 + $0x12c] ss:$16 sps:$4 sm:$0xff]  }
 0x170   :  { %9911 = vmatprep.subr.bf16.mxu1 %v13609_v13  ;;  %v12172_v13 = vld [vmem:[#allocation2 + $0x120] ss:$16 sps:$4 sm:$0xff]  }
 0x172   :  { %9848 = vmatpush3.bf16.msra.mxu0 %v13615_v14 }
 0x173   :  { %9912 = vmatpush3.bf16.msra.mxu1 %v13621_v15  ;;  %9849 = vmatprep.subr.bf16.mxu0 %v13627_v16  ;;  %v12173_v15 = vld [vmem:[#allocation2 + $0x128] ss:$16 sps:$4 sm:$0xff]  }
 0x174   :  { %762 = vmatmul.mubr.bf16.gmra.mrb[8].mxu0 %v12130_v42  ;;  %9913 = vmatprep.subr.bf16.mxu1 %v13633_v17  ;;  %v12174_v17 = vld [vmem:[#allocation2 + $0x144] ss:$16 sps:$4 sm:$0xff]  }
 0x175   :  { %859 = vmatmul.mubr.bf16.gmra.mrb[8].mxu1 %v12131_v43  ;;  %769 = vmatprep.mubr.bf16.mxu0 %v12132_v44  ;;  %v12695_v42 = vld [vmem:[%s15466_s1 + $0x50] sm:$0xff]  }
 0x176   :  { %866 = vmatprep.mubr.bf16.mxu1 %v12134_v45  ;;  %9850 = vmatpush3.bf16.msra.mxu0 %v13639_v18  ;;  %v12696_v43 = vld [vmem:[%s15466_s1 + $0x10] sm:$0xff]   ;;  %v12697_v45 = vld [vmem:[%s15466_s1 + $0x58] sm:$0xff]  }
 0x177   :  { %9914 = vmatpush3.bf16.msra.mxu1 %v13645_v19  ;;  %9851 = vmatprep.subr.bf16.mxu0 %v13651_v20  ;;  %v12176_v19 = vld [vmem:[#allocation2 + $0x14c] ss:$16 sps:$4 sm:$0xff]   ;;  %v12218_v44 = vld [vmem:[#allocation2 + $0x240] ss:$16 sps:$4 sm:$0xff]  }
 0x178   :  { %9915 = vmatprep.subr.bf16.mxu1 %v13657_v21  ;;  %v12178_v21 = vld [vmem:[#allocation2 + $0x140] ss:$16 sps:$4 sm:$0xff]  }
 0x17a   :  { %9852 = vmatpush3.bf16.msra.mxu0 %v13663_v22 }
 0x17b   :  { %9916 = vmatpush3.bf16.msra.mxu1 %v13669_v23  ;;  %9853 = vmatprep.subr.bf16.mxu0 %v13675_v24  ;;  %v12179_v23 = vld [vmem:[#allocation2 + $0x148] ss:$16 sps:$4 sm:$0xff]  }
 0x17c   :  { %770 = vmatmul.mubr.bf16.gmra.mrb[12].mxu0 %v12136_v46  ;;  %9917 = vmatprep.subr.bf16.mxu1 %v13681_v25  ;;  %v12180_v25 = vld [vmem:[#allocation2 + $0x164] ss:$16 sps:$4 sm:$0xff]  }
 0x17d   :  { %867 = vmatmul.mubr.bf16.gmra.mrb[12].mxu1 %v12137_v47  ;;  %777 = vmatprep.mubr.bf16.mxu0 %v12138_v48  ;;  %v12219_v46 = vld [vmem:[#allocation2 + $0x264] ss:$16 sps:$4 sm:$0xff]   ;;  %v12698_v47 = vld [vmem:[%s15466_s1 + $0x18] sm:$0xff]  }
 0x17e   :  { %874 = vmatprep.mubr.bf16.mxu1 %v12140_v49  ;;  %9854 = vmatpush3.bf16.msra.mxu0 %v13687_v26  ;;  %v12699_v48 = vld [vmem:[%s15466_s1 + $0x60] sm:$0xff]  }
 0x17f   :  { %9918 = vmatpush3.bf16.msra.mxu1 %v13693_v27  ;;  %9855 = vmatprep.subr.bf16.mxu0 %v13699_v28  ;;  %v12200_v27 = vld [vmem:[#allocation2 + $0x1cc] ss:$16 sps:$4 sm:$0xff]   ;;  %v12700_v49 = vld [vmem:[%s15466_s1 + $0x20] sm:$0xff]  }
 0x180   :  { %9919 = vmatprep.subr.bf16.mxu1 %v13705_v29  ;;  %v12203_v29 = vld [vmem:[#allocation2 + $0x1c8] ss:$16 sps:$4 sm:$0xff]  }
 0x182   :  { %9856 = vmatpush3.bf16.msra.mxu0 %v13711_v30 }
 0x183   :  { %9920 = vmatpush3.bf16.msra.mxu1 %v13717_v31  ;;  %v12206_v31 = vld [vmem:[#allocation2 + $0x1ec] ss:$16 sps:$4 sm:$0xff]   ;;  %12045 = vmatprep.subr.msk.bf16.mxu0 %vm1338_vm0, %v1312_v36 }
 0x184   :  { %778 = vmatmul.mubr.bf16.gmra.mrb[16].mxu0 %v12142_v50  ;;  %9987 = vmatprep.subr.bf16.mxu1 %v13532_v0  ;;  %v12221_v50 = vld [vmem:[#allocation2 + $0x260] ss:$16 sps:$4 sm:$0xff]  }
 0x185   :  { %875 = vmatmul.mubr.bf16.gmra.mrb[16].mxu1 %v12143_v51  ;;  %785 = vmatprep.mubr.bf16.mxu0 %v12144_v52  ;;  %v12701_v51 = vld [vmem:[%s15466_s1 + $0x68] sm:$0xff]   ;;  %v12222_v52 = vld [vmem:[#allocation2 + $0x284] ss:$16 sps:$4 sm:$0xff]  }
 0x186   :  { %882 = vmatprep.mubr.bf16.mxu1 %v12146_v53  ;;  %v12702_v53 = vld [vmem:[%s15466_s1 + $0x28] sm:$0xff]  }
 0x18c   :  { %786 = vmatmul.mubr.bf16.gmra.mrb[20].mxu0 %v12148_v54  ;;  %v12703_v54 = vld [vmem:[%s15466_s1 + $0x70] sm:$0xff]  }
 0x18d   :  { %883 = vmatmul.mubr.bf16.gmra.mrb[20].mxu1 %v12149_v55  ;;  %793 = vmatprep.mubr.bf16.mxu0 %v12150_v56  ;;  %v12704_v55 = vld [vmem:[%s15466_s1 + $0x30] sm:$0xff]  }
 0x18e   :  { %890 = vmatprep.mubr.bf16.mxu1 %v12152_v57  ;;  %v12224_v56 = vld [vmem:[#allocation2 + $0x280] ss:$16 sps:$4 sm:$0xff]   ;;  %v12705_v57 = vld [vmem:[%s15466_s1 + $0x78] sm:$0xff]  }
 0x194   :  { %794 = vmatmul.mubr.bf16.gmra.mrb[24].mxu0 %v12154_v58  ;;  %v12225_v58 = vld [vmem:[#allocation2 + $0x2a4] ss:$16 sps:$4 sm:$0xff]  }
 0x195   :  { %891 = vmatmul.mubr.bf16.gmra.mrb[24].mxu1 %v12155_v59  ;;  %801 = vmatprep.mubr.bf16.mxu0 %v12156_v60  ;;  %v12706_v59 = vld [vmem:[%s15466_s1 + $0x38] sm:$0xff]   ;;  %v13820_v60 = vld [vmem:[%s15466_s1 + $0xc0] sm:$0xff]  }
 0x196   :  { %898 = vmatprep.mubr.bf16.mxu1 %v12158_v61  ;;  %v12227_v61 = vld [vmem:[#allocation2 + $0x2a0] ss:$16 sps:$4 sm:$0xff]  }
 0x19c   :  { %802 = vmatmul.mubr.bf16.gmra.mrb[28].mxu0 %v12160_v62  ;;  %v12228_v62 = vld [vmem:[#allocation2 + $0x2c4] ss:$16 sps:$4 sm:$0xff]  }
 0x19d   :  { %899 = vmatmul.mubr.bf16.gmra.mrb[28].mxu1 %v12161_v63  ;;  %1141 = vmatprep.mubr.bf16.mxu0 %v12164_v1  ;;  %v12230_v63 = vld [vmem:[#allocation2 + $0x2c0] ss:$16 sps:$4 sm:$0xff]   ;;  %v12231_v1 = vld [vmem:[#allocation2 + $0x2e4] ss:$16 sps:$4 sm:$0xff]  }
 0x19e   :  { %1238 = vmatprep.mubr.bf16.mxu1 %v12167_v3  ;;  %v12233_v3 = vld [vmem:[#allocation2 + $0x2e0] ss:$16 sps:$4 sm:$0xff]  }
 0x1a4   :  { %1142 = vmatmul.mubr.bf16.vlgmr.msra.gmra.mrb[32].mxu0 %v12162_v5  ;;  %v12236_v5 = vld [vmem:[#allocation2 + $0x304] ss:$16 sps:$4 sm:$0xff]  }
 0x1a5   :  { %1239 = vmatmul.mubr.bf16.vlgmr.msra.gmra.mrb[32].mxu1 %v12165_v7  ;;  %1149 = vmatprep.mubr.bf16.mxu0 %v12168_v9  ;;  %v12234_v7 = vld [vmem:[#allocation2 + $0x300] ss:$16 sps:$4 sm:$0xff]   ;;  %v12237_v9 = vld [vmem:[#allocation2 + $0x324] ss:$16 sps:$4 sm:$0xff]  }
 0x1a6   :  { %1246 = vmatprep.mubr.bf16.mxu1 %v12170_v11  ;;  %9988 = vmatpush3.bf16.msra.mxu1 %v13543_v2  ;;  %v12182_v2 = vld [vmem:[#allocation2 + $0x16c] ss:$16 sps:$4 sm:$0xff]   ;;  %v13826_v11 = vld [vmem:[%s15466_s1 + $0x80] sm:$0xff]  }
 0x1a7   :  { %9989 = vmatprep.subr.bf16.mxu1 %v13555_v4  ;;  %v12184_v4 = vld [vmem:[#allocation2 + $0x160] ss:$16 sps:$4 sm:$0xff]   ;;  %11196 = vmatpush3.bf16.msra.mxu0 %v1340_v39 }
 0x1aa   :  { %9990 = vmatpush3.bf16.msra.mxu1 %v13567_v6  ;;  %v12185_v6 = vld [vmem:[#allocation2 + $0x168] ss:$16 sps:$4 sm:$0xff]  }
 0x1ab   :  { %9991 = vmatprep.subr.bf16.mxu1 %v13579_v8  ;;  %v12186_v8 = vld [vmem:[#allocation2 + $0x184] ss:$16 sps:$4 sm:$0xff]  }
 0x1ac   :  { %1150 = vmatmul.mubr.bf16.gmra.mrb[36].mxu0 %v12172_v13  ;;  %v13829_v13 = vld [vmem:[#allocation5] sm:$0x3] }
 0x1ad   :  { %1247 = vmatmul.mubr.bf16.gmra.mrb[36].mxu1 %v12173_v15  ;;  %1157 = vmatprep.mubr.bf16.mxu0 %v12174_v17  ;;  %v13834_v15 = vld [vmem:[%s15466_s1 + $0xc8] sm:$0xff]   ;;  %v12239_v17 = vld [vmem:[#allocation2 + $0x320] ss:$16 sps:$4 sm:$0xff]  }
 0x1ae   :  { %1254 = vmatprep.mubr.bf16.mxu1 %v12176_v19  ;;  %9992 = vmatpush3.bf16.msra.mxu1 %v13591_v10  ;;  %v12188_v10 = vld [vmem:[#allocation2 + $0x18c] ss:$16 sps:$4 sm:$0xff]   ;;  %v12240_v19 = vld [vmem:[#allocation2 + $0x344] ss:$16 sps:$4 sm:$0xff]  }
 0x1af   :  { %9993 = vmatprep.subr.bf16.mxu1 %v13603_v12  ;;  %v12190_v12 = vld [vmem:[#allocation2 + $0x180] ss:$16 sps:$4 sm:$0xff]   ;;  %12046 = vmatprep.subr.msk.bf16.mxu0 %vm1338_vm0, %v13829_v13 }
 0x1b2   :  { %9994 = vmatpush3.bf16.msra.mxu1 %v13615_v14  ;;  %v12191_v14 = vld [vmem:[#allocation2 + $0x188] ss:$16 sps:$4 sm:$0xff]  }
 0x1b3   :  { %9995 = vmatprep.subr.bf16.mxu1 %v13627_v16  ;;  %v12192_v16 = vld [vmem:[#allocation2 + $0x1a4] ss:$16 sps:$4 sm:$0xff]  }
 0x1b4   :  { %1158 = vmatmul.mubr.bf16.gmra.mrb[40].mxu0 %v12178_v21  ;;  %v13842_v21 = vld [vmem:[%s15466_s1 + $0x88] sm:$0xff]  }
 0x1b5   :  { %1255 = vmatmul.mubr.bf16.gmra.mrb[40].mxu1 %v12179_v23  ;;  %1165 = vmatprep.mubr.bf16.mxu0 %v12180_v25  ;;  %v13848_v23 = vld [vmem:[%s15466_s1 + $0xd0] sm:$0xff]  }
 0x1b6   :  { %1262 = vmatprep.mubr.bf16.mxu1 %v12182_v2  ;;  %9996 = vmatpush3.bf16.msra.mxu1 %v13639_v18  ;;  %v12194_v18 = vld [vmem:[#allocation2 + $0x1ac] ss:$16 sps:$4 sm:$0xff]   ;;  %v13854_v25 = vld [vmem:[%s15466_s1 + $0x90] sm:$0xff]  }
 0x1b7   :  { %9997 = vmatprep.subr.bf16.mxu1 %v13651_v20  ;;  %v12196_v20 = vld [vmem:[#allocation2 + $0x1a0] ss:$16 sps:$4 sm:$0xff]   ;;  %v13860_v2 = vld [vmem:[%s15466_s1 + $0xd8] sm:$0xff]  }
 0x1ba   :  { %9998 = vmatpush3.bf16.msra.mxu1 %v13663_v22  ;;  %v12197_v22 = vld [vmem:[#allocation2 + $0x1a8] ss:$16 sps:$4 sm:$0xff]  }
 0x1bb   :  { %9999 = vmatprep.subr.bf16.mxu1 %v13675_v24  ;;  %v12198_v24 = vld [vmem:[#allocation2 + $0x1c4] ss:$16 sps:$4 sm:$0xff]  }
 0x1bc   :  { %1166 = vmatmul.mubr.bf16.gmra.mrb[44].mxu0 %v12184_v4  ;;  %v12242_v4 = vld [vmem:[#allocation2 + $0x340] ss:$16 sps:$4 sm:$0xff]  }
 0x1bd   :  { %1263 = vmatmul.mubr.bf16.gmra.mrb[44].mxu1 %v12185_v6  ;;  %1173 = vmatprep.mubr.bf16.mxu0 %v12186_v8  ;;  %v12243_v6 = vld [vmem:[#allocation2 + $0x364] ss:$16 sps:$4 sm:$0xff]   ;;  %v13866_v8 = vld [vmem:[%s15466_s1 + $0x98] sm:$0xff]  }
 0x1be   :  { %1270 = vmatprep.mubr.bf16.mxu1 %v12188_v10  ;;  %10000 = vmatpush3.bf16.msra.mxu1 %v13687_v26  ;;  %v12202_v26 = vld [vmem:[#allocation2 + $0x1c0] ss:$16 sps:$4 sm:$0xff]  }
 0x1bf   :  { %10001 = vmatprep.subr.bf16.mxu1 %v13699_v28  ;;  %v12204_v28 = vld [vmem:[#allocation2 + $0x1e4] ss:$16 sps:$4 sm:$0xff]  }
 0x1c0   :  { %v13872_v10 = vld [vmem:[%s15466_s1 + $0xe0] sm:$0xff]  }
 0x1c2   :  { %10002 = vmatpush3.bf16.msra.mxu1 %v13711_v30  ;;  %v12209_v30 = vld [vmem:[#allocation2 + $0x1e8] ss:$16 sps:$4 sm:$0xff]  }
 0x1c3   :  { %10124 = vmatprep.subr.bf16.mxu1 %v13532_v0  ;;  %v12208_v0 = vld [vmem:[#allocation2 + $0x1e0] ss:$16 sps:$4 sm:$0xff]  }
 0x1c4   :  { %1174 = vmatmul.mubr.bf16.gmra.mrb[48].mxu0 %v12190_v12  ;;  %v13878_v12 = vld [vmem:[%s15466_s1 + $0xa0] sm:$0xff]  }
 0x1c5   :  { %1271 = vmatmul.mubr.bf16.gmra.mrb[48].mxu1 %v12191_v14  ;;  %1181 = vmatprep.mubr.bf16.mxu0 %v12192_v16  ;;  %v13884_v16 = vld [vmem:[%s15466_s1 + $0xe8] sm:$0xff]  }
 0x1c6   :  { %1278 = vmatprep.mubr.bf16.mxu1 %v12194_v18 }
 0x1cc   :  { %1182 = vmatmul.mubr.bf16.gmra.mrb[52].mxu0 %v12196_v20 }
 0x1cd   :  { %1279 = vmatmul.mubr.bf16.gmra.mrb[52].mxu1 %v12197_v22  ;;  %1189 = vmatprep.mubr.bf16.mxu0 %v12198_v24 }
 0x1ce   :  { %1286 = vmatprep.mubr.bf16.mxu1 %v12200_v27 }
 0x1d4   :  { %1190 = vmatmul.mubr.bf16.gmra.mrb[56].mxu0 %v12202_v26  ;;  %v12245_v26 = vld [vmem:[#allocation2 + $0x360] ss:$16 sps:$4 sm:$0xff]  }
 0x1d5   :  { %1287 = vmatmul.mubr.bf16.gmra.mrb[56].mxu1 %v12203_v29  ;;  %1197 = vmatprep.mubr.bf16.mxu0 %v12204_v28 }
 0x1d6   :  { %1294 = vmatprep.mubr.bf16.mxu1 %v12206_v31 }
 0x1dc   :  { %1198 = vmatmul.mubr.bf16.gmra.mrb[60].mxu0 %v12208_v0  ;;  %v12246_v0 = vld [vmem:[#allocation2 + $0x384] ss:$16 sps:$4 sm:$0xff]  }
 0x1dd   :  { %1295 = vmatmul.mubr.bf16.gmra.mrb[60].mxu1 %v12209_v30  ;;  %v13890_v30 = vld [vmem:[%s15466_s1 + $0xa8] sm:$0xff]  }
 0x1de   :  { %1788 = vmatprep.mubr.bf16.mxu1 %v12212_v32 }
 0x1e5   :  { %1789 = vmatmul.mubr.bf16.vlgmr.msra.gmra.mrb[64].mxu1 %v12210_v33 }
 0x1e6   :  { %1796 = vmatprep.mubr.bf16.mxu1 %v12213_v34  ;;  %10125 = vmatpush3.bf16.msra.mxu1 %v12692_v35  ;;  %v13896_v34 = vld [vmem:[%s15466_s1 + $0xf0] sm:$0xff]  }
 0x1e7   :  { %10126 = vmatprep.subr.bf16.mxu1 %v12693_v38  ;;  %v13906_v38 = vld [vmem:[%s15466_s1 + $0xb0] sm:$0xff]  }
 0x1ea   :  { %10127 = vmatpush3.bf16.msra.mxu1 %v12694_v41 }
 0x1eb   :  { %10128 = vmatprep.subr.bf16.mxu1 %v12695_v42 }
 0x1ed   :  { %1797 = vmatmul.mubr.bf16.gmra.mrb[68].mxu1 %v12215_v37 }
 0x1ee   :  { %1804 = vmatprep.mubr.bf16.mxu1 %v12216_v40  ;;  %10129 = vmatpush3.bf16.msra.mxu1 %v12696_v43  ;;  %v13912_v40 = vld [vmem:[%s15466_s1 + $0xf8] sm:$0xff]  }
 0x1ef   :  { %10130 = vmatprep.subr.bf16.mxu1 %v12697_v45 }
 0x1f2   :  { %10131 = vmatpush3.bf16.msra.mxu1 %v12698_v47  ;;  %v12248_v47 = vld [vmem:[#allocation2 + $0x380] ss:$16 sps:$4 sm:$0xff]  }
 0x1f3   :  { %10132 = vmatprep.subr.bf16.mxu1 %v12699_v48 }
 0x1f5   :  { %1805 = vmatmul.mubr.bf16.gmra.mrb[72].mxu1 %v12218_v44 }
 0x1f6   :  { %1812 = vmatprep.mubr.bf16.mxu1 %v12219_v46  ;;  %10133 = vmatpush3.bf16.msra.mxu1 %v12700_v49 }
 0x1f7   :  { %10134 = vmatprep.subr.bf16.mxu1 %v12701_v51  ;;  %v12249_v51 = vld [vmem:[#allocation2 + $0x3a4] ss:$16 sps:$4 sm:$0xff]  }
 0x1fa   :  { %10135 = vmatpush3.bf16.msra.mxu1 %v12702_v53 }
 0x1fb   :  { %10136 = vmatprep.subr.bf16.mxu1 %v12703_v54 }
 0x1fd   :  { %1813 = vmatmul.mubr.bf16.gmra.mrb[76].mxu1 %v12221_v50 }
 0x1fe   :  { %1820 = vmatprep.mubr.bf16.mxu1 %v12222_v52  ;;  %10137 = vmatpush3.bf16.msra.mxu1 %v12704_v55  ;;  %v13920_v52 = vld [vmem:[%s15466_s1 + $0xb8] sm:$0xff]  }
 0x1ff   :  { %10138 = vmatprep.subr.bf16.mxu1 %v12705_v57 }
 0x202   :  { %10139 = vmatpush3.bf16.msra.mxu1 %v12706_v59 }
 0x203   :  { %10188 = vmatprep.subr.bf16.mxu1 %v13820_v60 }
 0x205   :  { %1821 = vmatmul.mubr.bf16.gmra.mrb[80].mxu1 %v12224_v56 }
 0x206   :  { %1828 = vmatprep.mubr.bf16.mxu1 %v12225_v58 }
 0x20d   :  { %1829 = vmatmul.mubr.bf16.gmra.mrb[84].mxu1 %v12227_v61 }
 0x20e   :  { %1836 = vmatprep.mubr.bf16.mxu1 %v12228_v62 }
 0x215   :  { %1837 = vmatmul.mubr.bf16.gmra.mrb[88].mxu1 %v12230_v63 }
 0x216   :  { %1844 = vmatprep.mubr.bf16.mxu1 %v12231_v1 }
 0x21d   :  { %1845 = vmatmul.mubr.bf16.gmra.mrb[92].mxu1 %v12233_v3 }
 0x21e   :  { %2325 = vmatprep.mubr.bf16.mxu1 %v12236_v5  ;;  %v12251_v5 = vld [vmem:[#allocation2 + $0x3a0] ss:$16 sps:$4 sm:$0xff]  }
 0x225   :  { %2326 = vmatmul.mubr.bf16.vlgmr.msra.gmra.mrb[96].mxu1 %v12234_v7 }
 0x226   :  { %2333 = vmatprep.mubr.bf16.mxu1 %v12237_v9  ;;  %10189 = vmatpush3.bf16.msra.mxu1 %v13826_v11 }
 0x227   :  { %10190 = vmatprep.subr.bf16.mxu1 %v13834_v15 }
 0x22a   :  { %10191 = vmatpush3.bf16.msra.mxu1 %v13842_v21 }
 0x22b   :  { %10192 = vmatprep.subr.bf16.mxu1 %v13848_v23 }
 0x22d   :  { %2334 = vmatmul.mubr.bf16.gmra.mrb[100].mxu1 %v12239_v17 }
 0x22e   :  { %2341 = vmatprep.mubr.bf16.mxu1 %v12240_v19  ;;  %10193 = vmatpush3.bf16.msra.mxu1 %v13854_v25  ;;  %v12252_v19 = vld [vmem:[#allocation2 + $0x3c4] ss:$16 sps:$4 sm:$0xff]  }
 0x22f   :  { %10194 = vmatprep.subr.bf16.mxu1 %v13860_v2 }
 0x232   :  { %10195 = vmatpush3.bf16.msra.mxu1 %v13866_v8 }
 0x233   :  { %10196 = vmatprep.subr.bf16.mxu1 %v13872_v10 }
 0x235   :  { %2342 = vmatmul.mubr.bf16.gmra.mrb[104].mxu1 %v12242_v4 }
 0x236   :  { %2349 = vmatprep.mubr.bf16.mxu1 %v12243_v6  ;;  %10197 = vmatpush3.bf16.msra.mxu1 %v13878_v12 }
 0x237   :  { %v9729_v14 = vpop.f32.mrb[0].mxu0  ;;  %10198 = vmatprep.subr.bf16.mxu1 %v13884_v16 }
 0x238   :  { %v9793_v18 = vpop.f32.mrb[0].mxu1  ;;  %v9730_v20 = vpop.f32.mrb[1].mxu0 }
 0x239   :  { %v9731_v22 = vadd.f32 %v9730_v20, %v9729_v14  ;;  %v9794_v24 = vpop.f32.mrb[1].mxu1  ;;  %v9732_v27 = vpop.f32.mrb[2].mxu0 }
 0x23a   :  { %v9795_v29 = vadd.f32 %v9794_v24, %v9793_v18  ;;  %v9796_v28 = vpop.f32.mrb[2].mxu1  ;;  %v9733_v31 = vpop.f32.mrb[3].mxu0  ;;  %10199 = vmatpush3.bf16.msra.mxu1 %v13890_v30 }
 0x23b   :  { %v9734_v32 = vadd.f32 %v9733_v31, %v9732_v27  ;;  %v9797_v33 = vpop.f32.mrb[3].mxu1  ;;  %10200 = vmatprep.subr.bf16.mxu1 %v13896_v34 }
 0x23c   :  { %v13899_v35 = vadd.f32 %v9795_v29, %v9731_v22  ;;  %v9798_v36 = vadd.f32 %v9797_v33, %v9796_v28 }
 0x23d   :  { %2350 = vmatmul.mubr.bf16.gmra.mrb[108].mxu1 %v12245_v26 }
 0x23e   :  { %v13901_v37 = vadd.f32 %v9798_v36, %v9734_v32  ;;  %2357 = vmatprep.mubr.bf16.mxu1 %v12246_v0  ;;  %10201 = vmatpush3.bf16.msra.mxu1 %v13906_v38  ;;  %v12254_v0 = vld [vmem:[#allocation2 + $0x3c0] ss:$16 sps:$4 sm:$0xff]  }
 0x23f   :  { %v9735_v39 = vpop.f32.mrb[4].mxu0  ;;  %10202 = vmatprep.subr.bf16.mxu1 %v13912_v40 }
 0x240   :  { %v9799_v41 = vpop.f32.mrb[4].mxu1  ;;  %v9736_v42 = vpop.f32.mrb[5].mxu0  ;;  %v907_v43 = vpack.c.bf16 %v13901_v37, %v13899_v35 }
 0x241   :  { %v9737_v44 = vadd.f32 %v9736_v42, %v9735_v39  ;;  %v9800_v45 = vpop.f32.mrb[5].mxu1  ;;  %v9738_v46 = vpop.f32.mrb[6].mxu0  ;;  %v12255_v39 = vld [vmem:[#allocation2 + $0x3e4] ss:$16 sps:$4 sm:$0xff]  }
 0x242   :  { %v9801_v48 = vadd.f32 %v9800_v45, %v9799_v41  ;;  %v9802_v49 = vpop.f32.mrb[6].mxu1  ;;  %v9739_v50 = vpop.f32.mrb[7].mxu0  ;;  %10203 = vmatpush3.bf16.msra.mxu1 %v13920_v52 }
 0x243   :  { %v9740_v53 = vadd.f32 %v9739_v50, %v9738_v46  ;;  %v9803_v54 = vpop.f32.mrb[7].mxu1  ;;  %10325 = vmatprep.subr.bf16.mxu1 %v13820_v60 }
 0x244   :  { %v13924_v55 = vadd.f32 %v9801_v48, %v9737_v44  ;;  %v9804_v56 = vadd.f32 %v9803_v54, %v9802_v49 }
 0x245   :  { %2358 = vmatmul.mubr.bf16.gmra.mrb[112].mxu1 %v12248_v47 }
 0x246   :  { %v13926_v57 = vadd.f32 %v9804_v56, %v9740_v53  ;;  %2365 = vmatprep.mubr.bf16.mxu1 %v12249_v51  ;;  %v12257_v56 = vld [vmem:[#allocation2 + $0x3e0] ss:$16 sps:$4 sm:$0xff]  }
 0x247   :  { %v9741_v58 = vpop.f32.mrb[8].mxu0 }
 0x248   :  { %v908_v59 = vpack.c.bf16 %v13926_v57, %v13924_v55  ;;  %v9805_v61 = vpop.f32.mrb[8].mxu1  ;;  %v9742_v62 = vpop.f32.mrb[9].mxu0 }
 0x249   :  { %v9743_v63 = vadd.f32 %v9742_v62, %v9741_v58  ;;  %v9806_v1 = vpop.f32.mrb[9].mxu1  ;;  %v9744_v3 = vpop.f32.mrb[10].mxu0 }
 0x24a   :  { %v9807_v7 = vadd.f32 %v9806_v1, %v9805_v61  ;;  %v9808_v9 = vpop.f32.mrb[10].mxu1  ;;  %v9745_v17 = vpop.f32.mrb[11].mxu0 }
 0x24b   :  { %v9746_v4 = vadd.f32 %v9745_v17, %v9744_v3  ;;  %v9809_v6 = vpop.f32.mrb[11].mxu1 }
 0x24c   :  { %v13930_v14 = vadd.f32 %v9807_v7, %v9743_v63  ;;  %v9810_v18 = vadd.f32 %v9809_v6, %v9808_v9  ;;  %v12260_v63 = vld [vmem:[#allocation2 + $0x30c] ss:$16 sps:$4 sm:$0xff]  }
 0x24d   :  { %2366 = vmatmul.mubr.bf16.gmra.mrb[116].mxu1 %v12251_v5 }
 0x24e   :  { %v13932_v20 = vadd.f32 %v9810_v18, %v9746_v4  ;;  %2373 = vmatprep.mubr.bf16.mxu1 %v12252_v19 }
 0x24f   :  { %v9747_v22 = vpop.f32.mrb[12].mxu0 }
 0x250   :  { %v9811_v24 = vpop.f32.mrb[12].mxu1  ;;  %v9748_v27 = vpop.f32.mrb[13].mxu0  ;;  %v909_v26 = vpack.c.bf16 %v13932_v20, %v13930_v14 }
 0x251   :  { %v9749_v29 = vadd.f32 %v9748_v27, %v9747_v22  ;;  %v9812_v28 = vpop.f32.mrb[13].mxu1  ;;  %v9750_v31 = vpop.f32.mrb[14].mxu0  ;;  %v12258_v27 = vld [vmem:[#allocation2 + $0x308] ss:$16 sps:$4 sm:$0xff]  }
 0x252   :  { %v9813_v32 = vadd.f32 %v9812_v28, %v9811_v24  ;;  %v9814_v33 = vpop.f32.mrb[14].mxu1  ;;  %v9751_v36 = vpop.f32.mrb[15].mxu0 }
 0x253   :  { %v9752_v41 = vadd.f32 %v9751_v36, %v9750_v31  ;;  %v9815_v42 = vpop.f32.mrb[15].mxu1 }
 0x254   :  { %v13936_v44 = vadd.f32 %v9813_v32, %v9749_v29  ;;  %v9816_v45 = vadd.f32 %v9815_v42, %v9814_v33 }
 0x255   :  { %2374 = vmatmul.mubr.bf16.gmra.mrb[120].mxu1 %v12254_v0  ;;  %v12261_v0 = vld [vmem:[#allocation2 + $0x32c] ss:$16 sps:$4 sm:$0xff]  }
 0x256   :  { %v13938_v46 = vadd.f32 %v9816_v45, %v9752_v41  ;;  %2381 = vmatprep.mubr.bf16.mxu1 %v12255_v39 }
 0x257   :  { %v9753_v47 = vpop.f32.mrb[16].mxu0 }
 0x258   :  { %v9817_v48 = vpop.f32.mrb[16].mxu1  ;;  %v9754_v49 = vpop.f32.mrb[17].mxu0  ;;  %v910_v50 = vpack.c.bf16 %v13938_v46, %v13936_v44  ;;  %v1959_v46 = vld [vmem:[#allocation5 + $0x4] sm:$0x3] }
 0x259   :  { %v9755_v51 = vadd.f32 %v9754_v49, %v9753_v47  ;;  %v9818_v53 = vpop.f32.mrb[17].mxu1  ;;  %v9756_v54 = vpop.f32.mrb[18].mxu0 }
 0x25a   :  { %v9819_v58 = vadd.f32 %v9818_v53, %v9817_v48  ;;  %v9820_v61 = vpop.f32.mrb[18].mxu1  ;;  %v9757_v62 = vpop.f32.mrb[19].mxu0 }
 0x25b   :  { %v9758_v1 = vadd.f32 %v9757_v62, %v9756_v54  ;;  %v9821_v3 = vpop.f32.mrb[19].mxu1  ;;  %v12263_v54 = vld [vmem:[#allocation2 + $0x328] ss:$16 sps:$4 sm:$0xff]   ;;  %v12264_v62 = vld [vmem:[#allocation2 + $0x34c] ss:$16 sps:$4 sm:$0xff]  }
 0x25c   :  { %v13942_v5 = vadd.f32 %v9819_v58, %v9755_v51  ;;  %v9822_v7 = vadd.f32 %v9821_v3, %v9820_v61 }
 0x25d   :  { %2382 = vmatmul.mubr.bf16.gmra.mrb[124].mxu1 %v12257_v56 }
 0x25e   :  { %v13944_v9 = vadd.f32 %v9822_v7, %v9758_v1  ;;  %2422 = vmatprep.mubr.bf16.mxu1 %v12260_v63 }
 0x25f   :  { %v9759_v17 = vpop.f32.mrb[20].mxu0 }
 0x260   :  { %v9823_v19 = vpop.f32.mrb[20].mxu1  ;;  %v9760_v4 = vpop.f32.mrb[21].mxu0  ;;  %v911_v6 = vpack.c.bf16 %v13944_v9, %v13942_v5  ;;  %v1985_v9 = vsel %vm1338_vm0, %v1959_v46, 0 }
 0x261   :  { %v9761_v18 = vadd.f32 %v9760_v4, %v9759_v17  ;;  %v9824_v22 = vpop.f32.mrb[21].mxu1  ;;  %v9762_v24 = vpop.f32.mrb[22].mxu0 }
 0x262   :  { %v9825_v29 = vadd.f32 %v9824_v22, %v9823_v19  ;;  %v9826_v28 = vpop.f32.mrb[22].mxu1  ;;  %v9763_v31 = vpop.f32.mrb[23].mxu0 }
 0x263   :  { %v9764_v32 = vadd.f32 %v9763_v31, %v9762_v24  ;;  %v9827_v33 = vpop.f32.mrb[23].mxu1 }
 0x264   :  { %v13948_v36 = vadd.f32 %v9825_v29, %v9761_v18  ;;  %v9828_v39 = vadd.f32 %v9827_v33, %v9826_v28  ;;  %v12266_v28 = vld [vmem:[#allocation2 + $0x348] ss:$16 sps:$4 sm:$0xff]   ;;  %v12267_v33 = vld [vmem:[#allocation2 + $0x36c] ss:$16 sps:$4 sm:$0xff]  }
 0x265   :  { %2423 = vmatmul.mubr.bf16.vlgmr.msra.gmra.mrb[128].mxu1 %v12258_v27 }
 0x266   :  { %v13950_v41 = vadd.f32 %v9828_v39, %v9764_v32  ;;  %2430 = vmatprep.mubr.bf16.mxu1 %v12261_v0  ;;  %10326 = vmatpush3.bf16.msra.mxu1 %v13826_v11 }
 0x267   :  { %v9765_v42 = vpop.f32.mrb[24].mxu0  ;;  %10327 = vmatprep.subr.bf16.mxu1 %v13834_v15 }
 0x268   :  { %v9829_v45 = vpop.f32.mrb[24].mxu1  ;;  %v9766_v47 = vpop.f32.mrb[25].mxu0  ;;  %v912_v48 = vpack.c.bf16 %v13950_v41, %v13948_v36 }
 0x269   :  { %v9767_v49 = vadd.f32 %v9766_v47, %v9765_v42  ;;  %v9830_v51 = vpop.f32.mrb[25].mxu1  ;;  %v9768_v53 = vpop.f32.mrb[26].mxu0 }
 0x26a   :  { %v9831_v56 = vadd.f32 %v9830_v51, %v9829_v45  ;;  %v9832_v58 = vpop.f32.mrb[26].mxu1  ;;  %v9769_v61 = vpop.f32.mrb[27].mxu0  ;;  %10328 = vmatpush3.bf16.msra.mxu1 %v13842_v21 }
 0x26b   :  { %v9770_v63 = vadd.f32 %v9769_v61, %v9768_v53  ;;  %v9833_v1 = vpop.f32.mrb[27].mxu1  ;;  %10329 = vmatprep.subr.bf16.mxu1 %v13848_v23 }
 0x26c   :  { %v13958_v3 = vadd.f32 %v9831_v56, %v9767_v49  ;;  %v9834_v7 = vadd.f32 %v9833_v1, %v9832_v58 }
 0x26d   :  { %2431 = vmatmul.mubr.bf16.gmra.mrb[132].mxu1 %v12263_v54 }
 0x26e   :  { %v13960_v17 = vadd.f32 %v9834_v7, %v9770_v63  ;;  %2438 = vmatprep.mubr.bf16.mxu1 %v12264_v62  ;;  %10330 = vmatpush3.bf16.msra.mxu1 %v13854_v25  ;;  %v12269_v63 = vld [vmem:[#allocation2 + $0x368] ss:$16 sps:$4 sm:$0xff]  }
 0x26f   :  { %v9771_v19 = vpop.f32.mrb[28].mxu0  ;;  %10331 = vmatprep.subr.bf16.mxu1 %v13860_v2 }
 0x270   :  { %v9835_v4 = vpop.f32.mrb[28].mxu1  ;;  %v9772_v18 = vpop.f32.mrb[29].mxu0  ;;  %v913_v22 = vpack.c.bf16 %v13960_v17, %v13958_v3  ;;  %v12285_v3 = vld [vmem:[#allocation2 + $0x24c] ss:$16 sps:$4 sm:$0xff]  }
 0x271   :  { %v9773_v24 = vadd.f32 %v9772_v18, %v9771_v19  ;;  %v9836_v27 = vpop.f32.mrb[29].mxu1  ;;  %v9774_v29 = vpop.f32.mrb[30].mxu0 }
 0x272   :  { %v9837_v31 = vadd.f32 %v9836_v27, %v9835_v4  ;;  %v9838_v0 = vpop.f32.mrb[30].mxu1  ;;  %v9775_v32 = vpop.f32.mrb[31].mxu0  ;;  %10332 = vmatpush3.bf16.msra.mxu1 %v13866_v8  ;;  %v12270_v4 = vld [vmem:[#allocation2 + $0x38c] ss:$16 sps:$4 sm:$0xff]  }
 0x273   :  { %v9776_v39 = vadd.f32 %v9775_v32, %v9774_v29  ;;  %v9839_v42 = vpop.f32.mrb[31].mxu1  ;;  %10333 = vmatprep.subr.bf16.mxu1 %v13872_v10 }
 0x274   :  { %v13968_v45 = vadd.f32 %v9837_v31, %v9773_v24  ;;  %v9840_v47 = vadd.f32 %v9839_v42, %v9838_v0 }
 0x275   :  { %2439 = vmatmul.mubr.bf16.gmra.mrb[136].mxu1 %v12266_v28 }
 0x276   :  { %v13970_v49 = vadd.f32 %v9840_v47, %v9776_v39  ;;  %2446 = vmatprep.mubr.bf16.mxu1 %v12267_v33  ;;  %10334 = vmatpush3.bf16.msra.mxu1 %v13878_v12 }
 0x277   :  { %v9857_v51 = vpop.f32.mrb[32].mxu0  ;;  %10335 = vmatprep.subr.bf16.mxu1 %v13884_v16 }
 0x278   :  { %v9921_v53 = vpop.f32.mrb[32].mxu1  ;;  %v9858_v54 = vpop.f32.mrb[33].mxu0  ;;  %v914_v56 = vpack.c.bf16 %v13970_v49, %v13968_v45 }
 0x279   :  { %v9859_v58 = vadd.f32 %v9858_v54, %v9857_v51  ;;  %v9922_v61 = vpop.f32.mrb[33].mxu1  ;;  %v9860_v62 = vpop.f32.mrb[34].mxu0  ;;  %v12272_v51 = vld [vmem:[#allocation2 + $0x388] ss:$16 sps:$4 sm:$0xff]  }
 0x27a   :  { %v9923_v1 = vadd.f32 %v9922_v61, %v9921_v53  ;;  %v9924_v7 = vpop.f32.mrb[34].mxu1  ;;  %v9861_v19 = vpop.f32.mrb[35].mxu0  ;;  %10336 = vmatpush3.bf16.msra.mxu1 %v13890_v30  ;;  %v12276_v61 = vld [vmem:[#allocation2 + $0x3ac] ss:$16 sps:$4 sm:$0xff]  }
 0x27b   :  { %v9862_v18 = vadd.f32 %v9861_v19, %v9860_v62  ;;  %v9925_v24 = vpop.f32.mrb[35].mxu1  ;;  %10337 = vmatprep.subr.bf16.mxu1 %v13896_v34 }
 0x27c   :  { %v1241_v27 = vadd.f32 %v9923_v1, %v9859_v58  ;;  %v9926_v29 = vadd.f32 %v9925_v24, %v9924_v7  ;;  %v13985_v1 = vld [vmem:[%s15466_s1 + $0x40] sm:$0xff]  }
 0x27d   :  { %2447 = vmatmul.mubr.bf16.gmra.mrb[140].mxu1 %v12269_v63 }
 0x27e   :  { %v1244_v28 = vadd.f32 %v9926_v29, %v9862_v18  ;;  %2454 = vmatprep.mubr.bf16.mxu1 %v12270_v4  ;;  %10338 = vmatpush3.bf16.msra.mxu1 %v13906_v38 }
 0x27f   :  { %v9863_v31 = vpop.f32.mrb[36].mxu0  ;;  %10339 = vmatprep.subr.bf16.mxu1 %v13912_v40 }
 0x280   :  { %v9927_v0 = vpop.f32.mrb[36].mxu1  ;;  %v9864_v32 = vpop.f32.mrb[37].mxu0  ;;  %v1303_v33 = vpack.c.bf16 %v1244_v28, %v1241_v27  ;;  %v1464_v28 = vsel %vm1338_vm0, %v13829_v13, 0 }
 0x281   :  { %v9865_v39 = vadd.f32 %v9864_v32, %v9863_v31  ;;  %v9928_v42 = vpop.f32.mrb[37].mxu1  ;;  %v9866_v47 = vpop.f32.mrb[38].mxu0 }
 0x282   :  { %v9929_v53 = vadd.f32 %v9928_v42, %v9927_v0  ;;  %v9930_v54 = vpop.f32.mrb[38].mxu1  ;;  %11197 = vmatprep.mubr.msk.bf16.mxu0 %vm1313_vm1, %v1303_v33  ;;  %v9867_v58 = vpop.f32.mrb[39].mxu0  ;;  %10340 = vmatpush3.bf16.msra.mxu1 %v13920_v52  ;;  %v12278_v33 = vld [vmem:[#allocation2 + $0x3a8] ss:$16 sps:$4 sm:$0xff]  }
 0x283   :  { %v9868_v62 = vadd.f32 %v9867_v58, %v9866_v47  ;;  %v9931_v63 = vpop.f32.mrb[39].mxu1  ;;  %10398 = vmatprep.subr.bf16.mxu1 %v13985_v1 }
 0x284   :  { %v1249_v7 = vadd.f32 %v9929_v53, %v9865_v39  ;;  %v9932_v19 = vadd.f32 %v9931_v63, %v9930_v54  ;;  %v12282_v53 = vld [vmem:[#allocation2 + $0x3cc] ss:$16 sps:$4 sm:$0xff]  }
 0x285   :  { %2455 = vmatmul.mubr.bf16.gmra.mrb[144].mxu1 %v12272_v51 }
 0x286   :  { %v1252_v4 = vadd.f32 %v9932_v19, %v9868_v62  ;;  %2462 = vmatprep.mubr.bf16.mxu1 %v12276_v61 }
 0x287   :  { %v9869_v18 = vpop.f32.mrb[40].mxu0 }
 0x288   :  { %v1304_v24 = vpack.c.bf16 %v1252_v4, %v1249_v7  ;;  %v9933_v27 = vpop.f32.mrb[40].mxu1  ;;  %v9870_v29 = vpop.f32.mrb[41].mxu0 }
 0x289   :  { %v9871_v31 = vadd.f32 %v9870_v29, %v9869_v18  ;;  %v9934_v0 = vpop.f32.mrb[41].mxu1  ;;  %v9872_v32 = vpop.f32.mrb[42].mxu0 }
 0x28a   :  { %v9935_v42 = vadd.f32 %v9934_v0, %v9933_v27  ;;  %v9936_v47 = vpop.f32.mrb[42].mxu1  ;;  %11198 = vmatmul.mubr.msk.bf16.vlgmr.msra.gmra.mrb[64].mxu0 %vm1313_vm1, %v1304_v24  ;;  %v9873_v39 = vpop.f32.mrb[43].mxu0  ;;  %v12284_v24 = vld [vmem:[#allocation2 + $0x3c8] ss:$16 sps:$4 sm:$0xff]  }
 0x28b   :  { %v9874_v51 = vadd.f32 %v9873_v39, %v9872_v32  ;;  %v9937_v54 = vpop.f32.mrb[43].mxu1  ;;  %11214 = vmatpush3.bf16.msra.mxu0 %v1464_v28 }
 0x28c   :  { %v1257_v58 = vadd.f32 %v9935_v42, %v9871_v31  ;;  %v9938_v61 = vadd.f32 %v9937_v54, %v9936_v47  ;;  %10051 = vmatprep.subr.bf16.mxu0 %v13820_v60  ;;  %v12288_v31 = vld [vmem:[#allocation2 + $0x3ec] ss:$16 sps:$4 sm:$0xff]  }
 0x28d   :  { %2463 = vmatmul.mubr.bf16.gmra.mrb[148].mxu1 %v12278_v33 }
 0x28e   :  { %v1260_v62 = vadd.f32 %v9938_v61, %v9874_v51  ;;  %2470 = vmatprep.mubr.bf16.mxu1 %v12282_v53 }
 0x28f   :  { %v9875_v13 = vpop.f32.mrb[44].mxu0 }
 0x290   :  { %v9939_v63 = vpop.f32.mrb[44].mxu1  ;;  %v9876_v7 = vpop.f32.mrb[45].mxu0  ;;  %v1305_v19 = vpack.c.bf16 %v1260_v62, %v1257_v58 }
 0x291   :  { %v9877_v4 = vadd.f32 %v9876_v7, %v9875_v13  ;;  %v9940_v18 = vpop.f32.mrb[45].mxu1  ;;  %v9878_v27 = vpop.f32.mrb[46].mxu0  ;;  %v12290_v13 = vld [vmem:[#allocation2 + $0x3e8] ss:$16 sps:$4 sm:$0xff]  }
 0x292   :  { %v9941_v29 = vadd.f32 %v9940_v18, %v9939_v63  ;;  %v9942_v0 = vpop.f32.mrb[46].mxu1  ;;  %11201 = vmatprep.mubr.msk.bf16.mxu0 %vm1313_vm1, %v1305_v19  ;;  %v9879_v28 = vpop.f32.mrb[47].mxu0 }
 0x293   :  { %v9880_v32 = vadd.f32 %v9879_v28, %v9878_v27  ;;  %v9943_v42 = vpop.f32.mrb[47].mxu1 }
 0x294   :  { %v1265_v60 = vadd.f32 %v9941_v29, %v9877_v4  ;;  %v9944_v33 = vadd.f32 %v9943_v42, %v9942_v0 }
 0x295   :  { %2471 = vmatmul.mubr.bf16.gmra.mrb[152].mxu1 %v12284_v24 }
 0x296   :  { %v1268_v47 = vadd.f32 %v9944_v33, %v9880_v32  ;;  %2478 = vmatprep.mubr.bf16.mxu1 %v12288_v31 }
 0x297   :  { %v9881_v39 = vpop.f32.mrb[48].mxu0 }
 0x298   :  { %v9945_v53 = vpop.f32.mrb[48].mxu1  ;;  %v9882_v51 = vpop.f32.mrb[49].mxu0  ;;  %v1306_v54 = vpack.c.bf16 %v1268_v47, %v1265_v60 }
 0x299   :  { %v9883_v58 = vadd.f32 %v9882_v51, %v9881_v39  ;;  %v9946_v61 = vpop.f32.mrb[49].mxu1  ;;  %v9884_v62 = vpop.f32.mrb[50].mxu0 }
 0x29a   :  { %v9947_v63 = vadd.f32 %v9946_v61, %v9945_v53  ;;  %v9948_v7 = vpop.f32.mrb[50].mxu1  ;;  %11202 = vmatmul.mubr.msk.bf16.gmra.mrb[68].mxu0 %vm1313_vm1, %v1306_v54  ;;  %v9885_v19 = vpop.f32.mrb[51].mxu0 }
 0x29b   :  { %v9886_v18 = vadd.f32 %v9885_v19, %v9884_v62  ;;  %v9949_v27 = vpop.f32.mrb[51].mxu1 }
 0x29c   :  { %v1273_v4 = vadd.f32 %v9947_v63, %v9883_v58  ;;  %v9950_v29 = vadd.f32 %v9949_v27, %v9948_v7 }
 0x29d   :  { %2479 = vmatmul.mubr.bf16.gmra.mrb[156].mxu1 %v12290_v13 }
 0x29e   :  { %v1276_v24 = vadd.f32 %v9950_v29, %v9886_v18 }
 0x29f   :  { %v9887_v0 = vpop.f32.mrb[52].mxu0 }
 0x2a0   :  { %v9951_v28 = vpop.f32.mrb[52].mxu1  ;;  %v9888_v31 = vpop.f32.mrb[53].mxu0  ;;  %v1307_v32 = vpack.c.bf16 %v1276_v24, %v1273_v4 }
 0x2a1   :  { %v9889_v42 = vadd.f32 %v9888_v31, %v9887_v0  ;;  %v9952_v60 = vpop.f32.mrb[53].mxu1  ;;  %v9890_v33 = vpop.f32.mrb[54].mxu0 }
 0x2a2   :  { %v9953_v47 = vadd.f32 %v9952_v60, %v9951_v28  ;;  %v9954_v39 = vpop.f32.mrb[54].mxu1  ;;  %11205 = vmatprep.mubr.msk.bf16.mxu0 %vm1313_vm1, %v1307_v32  ;;  %v9891_v53 = vpop.f32.mrb[55].mxu0 }
 0x2a3   :  { %v9892_v51 = vadd.f32 %v9891_v53, %v9890_v33  ;;  %v9955_v54 = vpop.f32.mrb[55].mxu1 }
 0x2a4   :  { %v1281_v61 = vadd.f32 %v9953_v47, %v9889_v42  ;;  %v9956_v62 = vadd.f32 %v9955_v54, %v9954_v39 }
 0x2a6   :  { %v1284_v58 = vadd.f32 %v9956_v62, %v9892_v51 }
 0x2a7   :  { %v9893_v63 = vpop.f32.mrb[56].mxu0 }
 0x2a8   :  { %v9957_v13 = vpop.f32.mrb[56].mxu1  ;;  %v9894_v7 = vpop.f32.mrb[57].mxu0  ;;  %v1308_v19 = vpack.c.bf16 %v1284_v58, %v1281_v61 }
 0x2a9   :  { %v9895_v18 = vadd.f32 %v9894_v7, %v9893_v63  ;;  %v9958_v27 = vpop.f32.mrb[57].mxu1  ;;  %v9896_v4 = vpop.f32.mrb[58].mxu0 }
 0x2aa   :  { %v9959_v29 = vadd.f32 %v9958_v27, %v9957_v13  ;;  %v9960_v24 = vpop.f32.mrb[58].mxu1  ;;  %11206 = vmatmul.mubr.msk.bf16.gmra.mrb[72].mxu0 %vm1313_vm1, %v1308_v19  ;;  %v9897_v0 = vpop.f32.mrb[59].mxu0 }
 0x2ab   :  { %v9898_v28 = vadd.f32 %v9897_v0, %v9896_v4  ;;  %v9961_v31 = vpop.f32.mrb[59].mxu1 }
 0x2ac   :  { %v1289_v32 = vadd.f32 %v9959_v29, %v9895_v18  ;;  %v9962_v60 = vadd.f32 %v9961_v31, %v9960_v24 }
 0x2ae   :  { %v1292_v33 = vadd.f32 %v9962_v60, %v9898_v28 }
 0x2af   :  { %v9899_v42 = vpop.f32.mrb[60].mxu0 }
 0x2b0   :  { %v9963_v47 = vpop.f32.mrb[60].mxu1  ;;  %v9900_v39 = vpop.f32.mrb[61].mxu0  ;;  %v1309_v53 = vpack.c.bf16 %v1292_v33, %v1289_v32 }
 0x2b1   :  { %v9901_v51 = vadd.f32 %v9900_v39, %v9899_v42  ;;  %v9964_v54 = vpop.f32.mrb[61].mxu1  ;;  %v9902_v61 = vpop.f32.mrb[62].mxu0  ;;  %v12287_v39 = vld [vmem:[#allocation2 + $0x248] ss:$16 sps:$4 sm:$0xff]  }
 0x2b2   :  { %v9965_v62 = vadd.f32 %v9964_v54, %v9963_v47  ;;  %v9966_v58 = vpop.f32.mrb[62].mxu1  ;;  %11209 = vmatprep.mubr.msk.bf16.mxu0 %vm1313_vm1, %v1309_v53  ;;  %v9903_v63 = vpop.f32.mrb[63].mxu0  ;;  %v12291_v53 = vld [vmem:[#allocation2 + $0x26c] ss:$16 sps:$4 sm:$0xff]  }
 0x2b3   :  { %v9904_v13 = vadd.f32 %v9903_v63, %v9902_v61  ;;  %v9967_v7 = vpop.f32.mrb[63].mxu1 }
 0x2b4   :  { %v1297_v19 = vadd.f32 %v9965_v62, %v9901_v51  ;;  %v9968_v27 = vadd.f32 %v9967_v7, %v9966_v58  ;;  %v12294_v7 = vld [vmem:[#allocation2 + $0x28c] ss:$16 sps:$4 sm:$0xff]  }
 0x2b6   :  { %v1300_v4 = vadd.f32 %v9968_v27, %v9904_v13  ;;  %v12293_v13 = vld [vmem:[#allocation2 + $0x268] ss:$16 sps:$4 sm:$0xff]  }
 0x2b8   :  { %v1310_v18 = vpack.c.bf16 %v1300_v4, %v1297_v19  ;;  %v10003_v29 = vpop.f32.mrb[64].mxu1 }
 0x2b9   :  { %v10004_v24 = vpop.f32.mrb[65].mxu1 }
 0x2ba   :  { %11210 = vmatmul.mubr.msk.bf16.gmra.mrb[76].mxu0 %vm1313_vm1, %v1310_v18  ;;  %v13998_v0 = vadd.f32 %v10004_v24, %v10003_v29  ;;  %v10006_v28 = vpop.f32.mrb[66].mxu1 }
 0x2bb   :  { %11215 = vmatprep.mubr.msk.bf16.mxu0 %vm1313_vm1, %v907_v43  ;;  %v10007_v31 = vpop.f32.mrb[67].mxu1 }
 0x2bc   :  { %v14004_v32 = vadd.f32 %v10007_v31, %v10006_v28  ;;  %v12296_v28 = vld [vmem:[#allocation2 + $0x288] ss:$16 sps:$4 sm:$0xff]   ;;  %v12297_v31 = vld [vmem:[#allocation2 + $0x2ac] ss:$16 sps:$4 sm:$0xff]  }
 0x2c0   :  { %v10009_v60 = vpop.f32.mrb[68].mxu1 }
 0x2c1   :  { %v10010_v33 = vpop.f32.mrb[69].mxu1 }
 0x2c2   :  { %11216 = vmatmul.mubr.msk.bf16.vlgmr.msra.gmra.mrb[64].mxu0 %vm1313_vm1, %v908_v59  ;;  %v14010_v42 = vadd.f32 %v10010_v33, %v10009_v60  ;;  %v10012_v47 = vpop.f32.mrb[70].mxu1 }
 0x2c3   :  { %11219 = vmatprep.mubr.msk.bf16.mxu0 %vm1313_vm1, %v909_v26  ;;  %10052 = vmatpush3.bf16.msra.mxu0 %v13826_v11  ;;  %v10013_v35 = vpop.f32.mrb[71].mxu1 }
 0x2c4   :  { %10053 = vmatprep.subr.bf16.mxu0 %v13834_v15  ;;  %v14018_v37 = vadd.f32 %v10013_v35, %v10012_v47 }
 0x2c7   :  { %10054 = vmatpush3.bf16.msra.mxu0 %v13842_v21 }
 0x2c8   :  { %10055 = vmatprep.subr.bf16.mxu0 %v13848_v23  ;;  %v10015_v43 = vpop.f32.mrb[72].mxu1 }
 0x2c9   :  { %v10016_v55 = vpop.f32.mrb[73].mxu1 }
 0x2ca   :  { %11220 = vmatmul.mubr.msk.bf16.gmra.mrb[68].mxu0 %vm1313_vm1, %v910_v50  ;;  %v14026_v57 = vadd.f32 %v10016_v55, %v10015_v43  ;;  %v10018_v59 = vpop.f32.mrb[74].mxu1  ;;  %v12279_v50 = vld [vmem:[#allocation2 + $0x22c] ss:$16 sps:$4 sm:$0xff]  }
 0x2cb   :  { %11223 = vmatprep.mubr.msk.bf16.mxu0 %vm1313_vm1, %v911_v6  ;;  %10056 = vmatpush3.bf16.msra.mxu0 %v13854_v25  ;;  %v10019_v11 = vpop.f32.mrb[75].mxu1 }
 0x2cc   :  { %10057 = vmatprep.subr.bf16.mxu0 %v13860_v2  ;;  %v14034_v15 = vadd.f32 %v10019_v11, %v10018_v59  ;;  %v12299_v59 = vld [vmem:[#allocation2 + $0x2a8] ss:$16 sps:$4 sm:$0xff]   ;;  %v12300_v11 = vld [vmem:[#allocation2 + $0x2cc] ss:$16 sps:$4 sm:$0xff]  }
 0x2cf   :  { %10058 = vmatpush3.bf16.msra.mxu0 %v13866_v8  ;;  %v12275_v8 = vld [vmem:[#allocation2 + $0x20c] ss:$16 sps:$4 sm:$0xff]  }
 0x2d0   :  { %10059 = vmatprep.subr.bf16.mxu0 %v13872_v10  ;;  %v10021_v21 = vpop.f32.mrb[76].mxu1 }
 0x2d1   :  { %v10022_v23 = vpop.f32.mrb[77].mxu1 }
 0x2d2   :  { %11224 = vmatmul.mubr.msk.bf16.gmra.mrb[72].mxu0 %vm1313_vm1, %v912_v48  ;;  %v14042_v14 = vadd.f32 %v10022_v23, %v10021_v21  ;;  %v10024_v20 = vpop.f32.mrb[78].mxu1  ;;  %v12281_v48 = vld [vmem:[#allocation2 + $0x228] ss:$16 sps:$4 sm:$0xff]  }
 0x2d3   :  { %11227 = vmatprep.mubr.msk.bf16.mxu0 %vm1313_vm1, %v913_v22  ;;  %10060 = vmatpush3.bf16.msra.mxu0 %v13878_v12  ;;  %v10025_v25 = vpop.f32.mrb[79].mxu1 }
 0x2d4   :  { %10061 = vmatprep.subr.bf16.mxu0 %v13884_v16  ;;  %v14050_v2 = vadd.f32 %v10025_v25, %v10024_v20 }
 0x2d7   :  { %10062 = vmatpush3.bf16.msra.mxu0 %v13890_v30 }
 0x2d8   :  { %10063 = vmatprep.subr.bf16.mxu0 %v13896_v34  ;;  %v10027_v10 = vpop.f32.mrb[80].mxu1  ;;  %v12273_v34 = vld [vmem:[#allocation2 + $0x208] ss:$16 sps:$4 sm:$0xff]  }
 0x2d9   :  { %v10028_v26 = vpop.f32.mrb[81].mxu1 }
 0x2da   :  { %11228 = vmatmul.mubr.msk.bf16.gmra.mrb[76].mxu0 %vm1313_vm1, %v914_v56  ;;  %v14058_v44 = vadd.f32 %v10028_v26, %v10027_v10  ;;  %v10030_v12 = vpop.f32.mrb[82].mxu1  ;;  %v12302_v26 = vld [vmem:[#allocation2 + $0x2c8] ss:$16 sps:$4 sm:$0xff]  }
 0x2db   :  { %10064 = vmatpush3.bf16.msra.mxu0 %v13906_v38  ;;  %1885 = vmatprep.mubr.bf16.mxu0 %v12275_v8  ;;  %v10031_v16 = vpop.f32.mrb[83].mxu1 }
 0x2dc   :  { %10065 = vmatprep.subr.bf16.mxu0 %v13912_v40  ;;  %v14062_v30 = vadd.f32 %v10031_v16, %v10030_v12  ;;  %v12303_v12 = vld [vmem:[#allocation2 + $0x2ec] ss:$16 sps:$4 sm:$0xff]  }
 0x2df   :  { %10066 = vmatpush3.bf16.msra.mxu0 %v13920_v52 }
 0x2e0   :  { %v10033_v5 = vpop.f32.mrb[84].mxu1  ;;  %12047 = vmatprep.subr.msk.bf16.mxu0 %vm1338_vm0, %v1959_v46 }
 0x2e1   :  { %v10034_v6 = vpop.f32.mrb[85].mxu1 }
 0x2e2   :  { %1886 = vmatmul.mubr.bf16.vlgmr.msra.gmra.mrb[80].mxu0 %v12273_v34  ;;  %v14067_v36 = vadd.f32 %v10034_v6, %v10033_v5  ;;  %v10036_v38 = vpop.f32.mrb[86].mxu1  ;;  %v12305_v6 = vld [vmem:[#allocation2 + $0x2e8] ss:$16 sps:$4 sm:$0xff]  }
 0x2e3   :  { %1893 = vmatprep.mubr.bf16.mxu0 %v12279_v50  ;;  %v10037_v41 = vpop.f32.mrb[87].mxu1  ;;  %11232 = vmatpush3.bf16.msra.mxu0 %v1985_v9 }
 0x2e4   :  { %v14069_v40 = vadd.f32 %v10037_v41, %v10036_v38 }
 0x2e8   :  { %v10039_v17 = vpop.f32.mrb[88].mxu1 }
 0x2e9   :  { %v10040_v52 = vpop.f32.mrb[89].mxu1 }
 0x2ea   :  { %1894 = vmatmul.mubr.bf16.gmra.mrb[84].mxu0 %v12281_v48  ;;  %v14071_v22 = vadd.f32 %v10040_v52, %v10039_v17  ;;  %v10042_v45 = vpop.f32.mrb[90].mxu1 }
 0x2eb   :  { %1901 = vmatprep.mubr.bf16.mxu0 %v12285_v3  ;;  %v10043_v49 = vpop.f32.mrb[91].mxu1 }
 0x2ec   :  { %v14073_v56 = vadd.f32 %v10043_v49, %v10042_v45 }
 0x2f0   :  { %v10045_v51 = vpop.f32.mrb[92].mxu1 }
 0x2f1   :  { %v10046_v54 = vpop.f32.mrb[93].mxu1 }
 0x2f2   :  { %1902 = vmatmul.mubr.bf16.gmra.mrb[88].mxu0 %v12287_v39  ;;  %v14075_v61 = vadd.f32 %v10046_v54, %v10045_v51  ;;  %v10048_v62 = vpop.f32.mrb[94].mxu1 }
 0x2f3   :  { %1909 = vmatprep.mubr.bf16.mxu0 %v12291_v53  ;;  %v10049_v58 = vpop.f32.mrb[95].mxu1 }
 0x2f4   :  { %v14077_v63 = vadd.f32 %v10049_v58, %v10048_v62 }
 0x2f8   :  { %v10140_v19 = vpop.f32.mrb[96].mxu1 }
 0x2f9   :  { %v10141_v27 = vpop.f32.mrb[97].mxu1 }
 0x2fa   :  { %1910 = vmatmul.mubr.bf16.gmra.mrb[92].mxu0 %v12293_v13  ;;  %v14079_v4 = vadd.f32 %v10141_v27, %v10140_v19  ;;  %v10143_v18 = vpop.f32.mrb[98].mxu1 }
 0x2fb   :  { %1917 = vmatprep.mubr.bf16.mxu0 %v12294_v7  ;;  %v10144_v29 = vpop.f32.mrb[99].mxu1 }
 0x2fc   :  { %v14081_v24 = vadd.f32 %v10144_v29, %v10143_v18 }
 0x300   :  { %v10146_v60 = vpop.f32.mrb[100].mxu1 }
 0x301   :  { %v10147_v33 = vpop.f32.mrb[101].mxu1 }
 0x302   :  { %1918 = vmatmul.mubr.bf16.gmra.mrb[96].mxu0 %v12296_v28  ;;  %v10149_v47 = vpop.f32.mrb[102].mxu1  ;;  %v14083_v35 = vadd.f32 %v10147_v33, %v10146_v60 }
 0x303   :  { %1925 = vmatprep.mubr.bf16.mxu0 %v12297_v31  ;;  %v10150_v43 = vpop.f32.mrb[103].mxu1 }
 0x304   :  { %v14085_v55 = vadd.f32 %v10150_v43, %v10149_v47 }
 0x308   :  { %v10152_v21 = vpop.f32.mrb[104].mxu1 }
 0x309   :  { %v10153_v23 = vpop.f32.mrb[105].mxu1 }
 0x30a   :  { %1926 = vmatmul.mubr.bf16.gmra.mrb[100].mxu0 %v12299_v59  ;;  %v14087_v20 = vadd.f32 %v10153_v23, %v10152_v21  ;;  %v10155_v25 = vpop.f32.mrb[106].mxu1 }
 0x30b   :  { %1933 = vmatprep.mubr.bf16.mxu0 %v12300_v11  ;;  %v10156_v8 = vpop.f32.mrb[107].mxu1 }
 0x30c   :  { %v10157_v10 = vadd.f32 %v10156_v8, %v10155_v25 }
 0x310   :  { %v10158_v16 = vpop.f32.mrb[108].mxu1 }
 0x311   :  { %v10159_v46 = vpop.f32.mrb[109].mxu1 }
 0x312   :  { %1934 = vmatmul.mubr.bf16.gmra.mrb[104].mxu0 %v12302_v26  ;;  %v14089_v34 = vadd.f32 %v10159_v46, %v10158_v16  ;;  %v10161_v50 = vpop.f32.mrb[110].mxu1 }
 0x313   :  { %1941 = vmatprep.mubr.bf16.mxu0 %v12303_v12  ;;  %v10162_v5 = vpop.f32.mrb[111].mxu1 }
 0x314   :  { %v10163_v9 = vadd.f32 %v10162_v5, %v10161_v50 }
 0x318   :  { %v10164_v38 = vpop.f32.mrb[112].mxu1 }
 0x319   :  { %v10165_v41 = vpop.f32.mrb[113].mxu1 }
 0x31a   :  { %1942 = vmatmul.mubr.bf16.gmra.mrb[108].mxu0 %v12305_v6  ;;  %v14091_v48 = vadd.f32 %v10165_v41, %v10164_v38  ;;  %v10167_v3 = vpop.f32.mrb[114].mxu1 }
 0x31b   :  { %v10168_v17 = vpop.f32.mrb[115].mxu1 }
 0x31c   :  { %v10169_v52 = vadd.f32 %v10168_v17, %v10167_v3 }
 0x320   :  { %v10170_v45 = vpop.f32.mrb[116].mxu1 }
 0x321   :  { %v10171_v49 = vpop.f32.mrb[117].mxu1 }
 0x322   :  { %v14093_v39 = vadd.f32 %v10171_v49, %v10170_v45  ;;  %v10173_v53 = vpop.f32.mrb[118].mxu1 }
 0x323   :  { %v10174_v51 = vpop.f32.mrb[119].mxu1 }
 0x324   :  { %v14095_v54 = vadd.f32 %v10174_v51, %v10173_v53 }
 0x328   :  { %v10176_v62 = vpop.f32.mrb[120].mxu1 }
 0x329   :  { %v10177_v58 = vpop.f32.mrb[121].mxu1 }
 0x32a   :  { %v14097_v13 = vadd.f32 %v10177_v58, %v10176_v62  ;;  %v10179_v7 = vpop.f32.mrb[122].mxu1 }
 0x32b   :  { %v10180_v19 = vpop.f32.mrb[123].mxu1 }
 0x32c   :  { %v14099_v27 = vadd.f32 %v10180_v19, %v10179_v7 }
 0x330   :  { %v10182_v18 = vpop.f32.mrb[124].mxu1 }
 0x331   :  { %v10183_v29 = vpop.f32.mrb[125].mxu1 }
 0x332   :  { %v14101_v28 = vadd.f32 %v10183_v29, %v10182_v18  ;;  %v10185_v31 = vpop.f32.mrb[126].mxu1 }
 0x333   :  { %v10186_v60 = vpop.f32.mrb[127].mxu1 }
 0x334   :  { %v14103_v33 = vadd.f32 %v10186_v60, %v10185_v31 }
 0x338   :  { %v10204_v47 = vpop.f32.mrb[128].mxu1 }
 0x339   :  { %v10205_v43 = vpop.f32.mrb[129].mxu1 }
 0x33a   :  { %v10206_v59 = vadd.f32 %v10205_v43, %v10204_v47  ;;  %v10207_v11 = vpop.f32.mrb[130].mxu1 }
 0x33b   :  { %v10208_v21 = vpop.f32.mrb[131].mxu1 }
 0x33c   :  { %v14106_v23 = vadd.f32 %v10206_v59, %v14079_v4  ;;  %v10209_v25 = vadd.f32 %v10208_v21, %v10207_v11 }
 0x33e   :  { %v14109_v8 = vadd.f32 %v10209_v25, %v14081_v24 }
 0x340   :  { %v10210_v26 = vpop.f32.mrb[132].mxu1 }
 0x341   :  { %v10211_v16 = vpop.f32.mrb[133].mxu1 }
 0x342   :  { %v10212_v46 = vadd.f32 %v10211_v16, %v10210_v26  ;;  %v10213_v50 = vpop.f32.mrb[134].mxu1 }
 0x343   :  { %v10214_v5 = vpop.f32.mrb[135].mxu1 }
 0x344   :  { %v14114_v6 = vadd.f32 %v10212_v46, %v14083_v35  ;;  %v10215_v38 = vadd.f32 %v10214_v5, %v10213_v50 }
 0x346   :  { %v14117_v41 = vadd.f32 %v10215_v38, %v14085_v55 }
 0x348   :  { %v10216_v24 = vpop.f32.mrb[136].mxu1 }
 0x349   :  { %v10217_v3 = vpop.f32.mrb[137].mxu1 }
 0x34a   :  { %v10218_v17 = vadd.f32 %v10217_v3, %v10216_v24  ;;  %v10219_v45 = vpop.f32.mrb[138].mxu1  ;;  %v14145_v3 = vld [vmem:[#allocation5 + $0x6] sm:$0x3] }
 0x34b   :  { %v10220_v49 = vpop.f32.mrb[139].mxu1  ;;  %12048 = vmatprep.subr.msk.bf16.mxu0 %vm1338_vm0, %v14145_v3 }
 0x34c   :  { %v14122_v53 = vadd.f32 %v10218_v17, %v14087_v20  ;;  %v10221_v51 = vadd.f32 %v10220_v49, %v10219_v45 }
 0x34e   :  { %v14124_v62 = vadd.f32 %v10221_v51, %v10157_v10 }
 0x350   :  { %v10222_v35 = vpop.f32.mrb[140].mxu1 }
 0x351   :  { %v10223_v55 = vpop.f32.mrb[141].mxu1 }
 0x352   :  { %v10224_v7 = vadd.f32 %v10223_v55, %v10222_v35  ;;  %v10225_v19 = vpop.f32.mrb[142].mxu1 }
 0x353   :  { %v10226_v18 = vpop.f32.mrb[143].mxu1 }
 0x354   :  { %v14129_v29 = vadd.f32 %v10224_v7, %v14089_v34  ;;  %v10227_v31 = vadd.f32 %v10226_v18, %v10225_v19  ;;  %v14258_v19 = vld [vmem:[%s15466_s1 + $0x38] sm:$0xff]  }
 0x356   :  { %v14131_v60 = vadd.f32 %v10227_v31, %v10163_v9 }
 0x358   :  { %v10228_v47 = vpop.f32.mrb[144].mxu1 }
 0x359   :  { %v10229_v10 = vpop.f32.mrb[145].mxu1 }
 0x35a   :  { %v10230_v43 = vadd.f32 %v10229_v10, %v10228_v47  ;;  %v10231_v59 = vpop.f32.mrb[146].mxu1 }
 0x35b   :  { %v10232_v11 = vpop.f32.mrb[147].mxu1 }
 0x35c   :  { %v14136_v21 = vadd.f32 %v10230_v43, %v14091_v48  ;;  %v10233_v25 = vadd.f32 %v10232_v11, %v10231_v59 }
 0x35e   :  { %v14138_v26 = vadd.f32 %v10233_v25, %v10169_v52  ;;  %v12308_v25 = vld [vmem:[#allocation2 + $0x40c] ss:$16 sps:$4 sm:$0xff]  }
 0x35f   :  { %2959 = vmatprep.mubr.bf16.mxu1 %v12308_v25  ;;  %v14251_v25 = vld [vmem:[%s15466_s1 + $0x78] sm:$0xff]  }
 0x360   :  { %v10234_v16 = vpop.f32.mrb[148].mxu1 }
 0x361   :  { %v10235_v9 = vpop.f32.mrb[149].mxu1 }
 0x362   :  { %v10236_v46 = vadd.f32 %v10235_v9, %v10234_v16  ;;  %v10237_v50 = vpop.f32.mrb[150].mxu1  ;;  %v14173_v16 = vld [vmem:[%s15466_s1] sm:$0xff]   ;;  %v12314_v9 = vld [vmem:[#allocation2 + $0x428] ss:$16 sps:$4 sm:$0xff]  }
 0x363   :  { %v10238_v5 = vpop.f32.mrb[151].mxu1 }
 0x364   :  { %v14143_v38 = vadd.f32 %v10236_v46, %v14093_v39  ;;  %v10239_v24 = vadd.f32 %v10238_v5, %v10237_v50  ;;  %v14185_v46 = vld [vmem:[%s15466_s1 + $0x8] sm:$0xff]   ;;  %v14191_v50 = vld [vmem:[%s15466_s1 + $0x50] sm:$0xff]  }
 0x365   :  { %v14197_v5 = vld [vmem:[%s15466_s1 + $0x10] sm:$0xff]  }
 0x366   :  { %v14148_v48 = vadd.f32 %v10239_v24, %v14095_v54  ;;  %v14203_v24 = vld [vmem:[%s15466_s1 + $0x58] sm:$0xff]  }
 0x368   :  { %v10240_v52 = vpop.f32.mrb[152].mxu1 }
 0x369   :  { %v10241_v45 = vpop.f32.mrb[153].mxu1 }
 0x36a   :  { %v10242_v49 = vadd.f32 %v10241_v45, %v10240_v52  ;;  %v10243_v51 = vpop.f32.mrb[154].mxu1  ;;  %v12318_v52 = vld [vmem:[#allocation2 + $0x44c] ss:$16 sps:$4 sm:$0xff]   ;;  %v12320_v45 = vld [vmem:[#allocation2 + $0x448] ss:$16 sps:$4 sm:$0xff]  }
 0x36b   :  { %v10244_v35 = vpop.f32.mrb[155].mxu1 }
 0x36c   :  { %v14155_v39 = vadd.f32 %v10242_v49, %v14097_v13  ;;  %v10245_v55 = vadd.f32 %v10244_v35, %v10243_v51  ;;  %v14209_v49 = vld [vmem:[%s15466_s1 + $0x18] sm:$0xff]   ;;  %v14215_v51 = vld [vmem:[%s15466_s1 + $0x60] sm:$0xff]  }
 0x36d   :  { %v14221_v35 = vld [vmem:[%s15466_s1 + $0x20] sm:$0xff]  }
 0x36e   :  { %v14158_v7 = vadd.f32 %v10245_v55, %v14099_v27  ;;  %v12306_v27 = vld [vmem:[#allocation2 + $0x408] ss:$16 sps:$4 sm:$0xff]  }
 0x36f   :  { %2960 = vmatmul.mubr.bf16.vlgmr.msra.gmra.mrb[160].mxu1 %v12306_v27  ;;  %v14227_v55 = vld [vmem:[%s15466_s1 + $0x68] sm:$0xff]  }
 0x370   :  { %v10246_v54 = vpop.f32.mrb[156].mxu1  ;;  %10399 = vmatpush3.bf16.msra.mxu1 %v14173_v16 }
 0x371   :  { %v10247_v18 = vpop.f32.mrb[157].mxu1 }
 0x372   :  { %v10248_v31 = vadd.f32 %v10247_v18, %v10246_v54  ;;  %v10249_v47 = vpop.f32.mrb[158].mxu1  ;;  %v12324_v54 = vld [vmem:[#allocation2 + $0x46c] ss:$16 sps:$4 sm:$0xff]   ;;  %v12326_v18 = vld [vmem:[#allocation2 + $0x468] ss:$16 sps:$4 sm:$0xff]  }
 0x373   :  { %v10250_v10 = vpop.f32.mrb[159].mxu1 }
 0x374   :  { %v14163_v43 = vadd.f32 %v10248_v31, %v14101_v28  ;;  %v10251_v59 = vadd.f32 %v10250_v10, %v10249_v47  ;;  %v14179_v28 = vld [vmem:[%s15466_s1 + $0x48] sm:$0xff]   ;;  %v14239_v47 = vld [vmem:[%s15466_s1 + $0x70] sm:$0xff]  }
 0x375   :  { %10400 = vmatprep.subr.bf16.mxu1 %v14179_v28  ;;  %v14233_v31 = vld [vmem:[%s15466_s1 + $0x28] sm:$0xff]  }
 0x376   :  { %v14166_v11 = vadd.f32 %v10251_v59, %v14103_v33  ;;  %v12312_v33 = vld [vmem:[#allocation2 + $0x42c] ss:$16 sps:$4 sm:$0xff]   ;;  %10401 = vmatpush3.bf16.msra.mxu1 %v14185_v46  ;;  %v14245_v59 = vld [vmem:[%s15466_s1 + $0x30] sm:$0xff]  }
 0x377   :  { %2967 = vmatprep.mubr.bf16.mxu1 %v12312_v33  ;;  %10402 = vmatprep.subr.bf16.mxu1 %v14191_v50 }
 0x378   :  { %2968 = vmatmul.mubr.bf16.gmra.mrb[164].mxu1 %v12314_v9 }
 0x379   :  { %2975 = vmatprep.mubr.bf16.mxu1 %v12318_v52  ;;  %v12330_v52 = vld [vmem:[#allocation2 + $0x48c] ss:$16 sps:$4 sm:$0xff]  }
 0x37a   :  { %10403 = vmatpush3.bf16.msra.mxu1 %v14197_v5 }
 0x37b   :  { %10404 = vmatprep.subr.bf16.mxu1 %v14203_v24 }
 0x37e   :  { %10405 = vmatpush3.bf16.msra.mxu1 %v14209_v49 }
 0x37f   :  { %10406 = vmatprep.subr.bf16.mxu1 %v14215_v51 }
 0x380   :  { %2976 = vmatmul.mubr.bf16.gmra.mrb[168].mxu1 %v12320_v45 }
 0x381   :  { %2983 = vmatprep.mubr.bf16.mxu1 %v12324_v54  ;;  %v12332_v54 = vld [vmem:[#allocation2 + $0x488] ss:$16 sps:$4 sm:$0xff]  }
 0x382   :  { %10407 = vmatpush3.bf16.msra.mxu1 %v14221_v35 }
 0x383   :  { %10408 = vmatprep.subr.bf16.mxu1 %v14227_v55 }
 0x386   :  { %10409 = vmatpush3.bf16.msra.mxu1 %v14233_v31 }
 0x387   :  { %10410 = vmatprep.subr.bf16.mxu1 %v14239_v47 }
 0x388   :  { %2984 = vmatmul.mubr.bf16.gmra.mrb[172].mxu1 %v12326_v18 }
 0x389   :  { %2991 = vmatprep.mubr.bf16.mxu1 %v12330_v52 }
 0x38a   :  { %10411 = vmatpush3.bf16.msra.mxu1 %v14245_v59 }
 0x38b   :  { %10412 = vmatprep.subr.bf16.mxu1 %v14251_v25 }
 0x38e   :  { %10413 = vmatpush3.bf16.msra.mxu1 %v14258_v19 }
 0x38f   :  { %10535 = vmatprep.subr.bf16.mxu1 %v13985_v1 }
 0x390   :  { %2992 = vmatmul.mubr.bf16.gmra.mrb[176].mxu1 %v12332_v54 }
 0x3b5   :  { %v10067_v10 = vpop.f32.mrb[80].mxu0 }
 0x3b6   :  { %v10068_v27 = vpop.f32.mrb[81].mxu0 }
 0x3b7   :  { %v10069_v33 = vadd.f32 %v10068_v27, %v10067_v10  ;;  %v10070_v9 = vpop.f32.mrb[82].mxu0 }
 0x3b8   :  { %v10071_v45 = vpop.f32.mrb[83].mxu0 }
 0x3b9   :  { %v1888_v18 = vadd.f32 %v10069_v33, %v13998_v0  ;;  %v10072_v13 = vadd.f32 %v10071_v45, %v10070_v9  ;;  %v12336_v0 = vld [vmem:[#allocation2 + $0x4ac] ss:$16 sps:$4 sm:$0xff]   ;;  %v12338_v9 = vld [vmem:[#allocation2 + $0x4a8] ss:$16 sps:$4 sm:$0xff]  }
 0x3ba   :  { %2999 = vmatprep.mubr.bf16.mxu1 %v12336_v0 }
 0x3bb   :  { %v1891_v17 = vadd.f32 %v10072_v13, %v14004_v32  ;;  %3000 = vmatmul.mubr.bf16.gmra.mrb[180].mxu1 %v12338_v9 }
 0x3bd   :  { %v10073_v10 = vpop.f32.mrb[84].mxu0  ;;  %v1950_v27 = vpack.c.bf16 %v1891_v17, %v1888_v18  ;;  %v2522_v17 = vsel %vm1338_vm0, %v14145_v3, 0  ;;  %v12342_v18 = vld [vmem:[#allocation2 + $0x4cc] ss:$16 sps:$4 sm:$0xff]  }
 0x3be   :  { %v10074_v34 = vpop.f32.mrb[85].mxu0  ;;  %3007 = vmatprep.mubr.bf16.mxu1 %v12342_v18 }
 0x3bf   :  { %v10075_v20 = vadd.f32 %v10074_v34, %v10073_v10  ;;  %v10076_v58 = vpop.f32.mrb[86].mxu0  ;;  %11233 = vmatprep.mubr.msk.bf16.mxu0 %vm1313_vm1, %v1950_v27  ;;  %v12344_v27 = vld [vmem:[#allocation2 + $0x4c8] ss:$16 sps:$4 sm:$0xff]  }
 0x3c0   :  { %v10077_v33 = vpop.f32.mrb[87].mxu0 }
 0x3c1   :  { %v1896_v52 = vadd.f32 %v10075_v20, %v14010_v42  ;;  %v10078_v45 = vadd.f32 %v10077_v33, %v10076_v58 }
 0x3c3   :  { %v1899_v4 = vadd.f32 %v10078_v45, %v14018_v37  ;;  %3008 = vmatmul.mubr.bf16.gmra.mrb[184].mxu1 %v12344_v27 }
 0x3c5   :  { %v1951_v12 = vpack.c.bf16 %v1899_v4, %v1896_v52  ;;  %v10079_v32 = vpop.f32.mrb[88].mxu0  ;;  %v12350_v52 = vld [vmem:[#allocation2 + $0x4e8] ss:$16 sps:$4 sm:$0xff]  }
 0x3c6   :  { %v10080_v13 = vpop.f32.mrb[89].mxu0 }
 0x3c7   :  { %v10081_v34 = vadd.f32 %v10080_v13, %v10079_v32  ;;  %v10082_v54 = vpop.f32.mrb[90].mxu0  ;;  %11234 = vmatmul.mubr.msk.bf16.vlgmr.msra.gmra.mrb[64].mxu0 %vm1313_vm1, %v1951_v12  ;;  %v12348_v12 = vld [vmem:[#allocation2 + $0x4ec] ss:$16 sps:$4 sm:$0xff]  }
 0x3c8   :  { %v10083_v10 = vpop.f32.mrb[91].mxu0  ;;  %11250 = vmatpush3.bf16.msra.mxu0 %v2522_v17  ;;  %3015 = vmatprep.mubr.bf16.mxu1 %v12348_v12 }
 0x3c9   :  { %v1904_v42 = vadd.f32 %v10081_v34, %v14026_v57  ;;  %v10084_v58 = vadd.f32 %v10083_v10, %v10082_v54  ;;  %10261 = vmatprep.subr.bf16.mxu0 %v13985_v1 }
 0x3cb   :  { %v1907_v37 = vadd.f32 %v10084_v58, %v14034_v15  ;;  %3016 = vmatmul.mubr.bf16.gmra.mrb[188].mxu1 %v12350_v52 }
 0x3cd   :  { %v10085_v4 = vpop.f32.mrb[92].mxu0  ;;  %v1952_v20 = vpack.c.bf16 %v1907_v37, %v1904_v42 }
 0x3ce   :  { %v10086_v3 = vpop.f32.mrb[93].mxu0 }
 0x3cf   :  { %v10087_v0 = vadd.f32 %v10086_v3, %v10085_v4  ;;  %v10088_v33 = vpop.f32.mrb[94].mxu0  ;;  %11237 = vmatprep.mubr.msk.bf16.mxu0 %vm1313_vm1, %v1952_v20 }
 0x3d0   :  { %v10089_v9 = vpop.f32.mrb[95].mxu0 }
 0x3d1   :  { %v1912_v45 = vadd.f32 %v10087_v0, %v14042_v14  ;;  %v10090_v57 = vadd.f32 %v10089_v9, %v10088_v33 }
 0x3d3   :  { %v1915_v1 = vadd.f32 %v10090_v57, %v14050_v2 }
 0x3d5   :  { %v10091_v32 = vpop.f32.mrb[96].mxu0  ;;  %v1953_v15 = vpack.c.bf16 %v1915_v1, %v1912_v45 }
 0x3d6   :  { %v10092_v17 = vpop.f32.mrb[97].mxu0 }
 0x3d7   :  { %v10093_v13 = vadd.f32 %v10092_v17, %v10091_v32  ;;  %v10094_v34 = vpop.f32.mrb[98].mxu0  ;;  %11238 = vmatmul.mubr.msk.bf16.gmra.mrb[68].mxu0 %vm1313_vm1, %v1953_v15 }
 0x3d8   :  { %v10095_v54 = vpop.f32.mrb[99].mxu0 }
 0x3d9   :  { %v1920_v18 = vadd.f32 %v10093_v13, %v14058_v44  ;;  %v10096_v10 = vadd.f32 %v10095_v54, %v10094_v34 }
 0x3db   :  { %v1923_v27 = vadd.f32 %v10096_v10, %v14062_v30 }
 0x3dd   :  { %v1954_v42 = vpack.c.bf16 %v1923_v27, %v1920_v18  ;;  %v10097_v14 = vpop.f32.mrb[100].mxu0  ;;  %v15469_v27 = vpack.c.bf16 %v14124_v62, %v14122_v53  ;;  %v3033_v53 = vld [vmem:[#allocation5 + $0x8] sm:$0x3]  ;;  %v12309_v62 = vld [vmem:[#allocation2 + $0x400] ss:$16 sps:$4 sm:$0xff]  }
 0x3de   :  { %v10098_v58 = vpop.f32.mrb[101].mxu0 }
 0x3df   :  { %v10099_v37 = vadd.f32 %v10098_v58, %v10097_v14  ;;  %v10100_v4 = vpop.f32.mrb[102].mxu0  ;;  %11241 = vmatprep.mubr.msk.bf16.mxu0 %vm1313_vm1, %v1954_v42  ;;  %v12339_v42 = vld [vmem:[#allocation2 + $0x4a4] ss:$16 sps:$4 sm:$0xff]   ;;  %v12341_v14 = vld [vmem:[#allocation2 + $0x4a0] ss:$16 sps:$4 sm:$0xff]  }
 0x3e0   :  { %v10101_v2 = vpop.f32.mrb[103].mxu0  ;;  %v12345_v58 = vld [vmem:[#allocation2 + $0x4c4] ss:$16 sps:$4 sm:$0xff]  }
 0x3e1   :  { %v1928_v20 = vadd.f32 %v10099_v37, %v14067_v36  ;;  %v10102_v3 = vadd.f32 %v10101_v2, %v10100_v4  ;;  %v12347_v37 = vld [vmem:[#allocation2 + $0x4c0] ss:$16 sps:$4 sm:$0xff]   ;;  %v12351_v4 = vld [vmem:[#allocation2 + $0x4e4] ss:$16 sps:$4 sm:$0xff]  }
 0x3e2   :  { %v12353_v2 = vld [vmem:[#allocation2 + $0x4e0] ss:$16 sps:$4 sm:$0xff]  }
 0x3e3   :  { %v1931_v0 = vadd.f32 %v10102_v3, %v14069_v40 }
 0x3e5   :  { %v1955_v33 = vpack.c.bf16 %v1931_v0, %v1928_v20  ;;  %v10103_v12 = vpop.f32.mrb[104].mxu0 }
 0x3e6   :  { %v10104_v9 = vpop.f32.mrb[105].mxu0 }
 0x3e7   :  { %v10105_v44 = vadd.f32 %v10104_v9, %v10103_v12  ;;  %v10106_v52 = vpop.f32.mrb[106].mxu0  ;;  %11242 = vmatmul.mubr.msk.bf16.gmra.mrb[72].mxu0 %vm1313_vm1, %v1955_v33 }
 0x3e8   :  { %v10107_v30 = vpop.f32.mrb[107].mxu0 }
 0x3e9   :  { %v1936_v45 = vadd.f32 %v10105_v44, %v14071_v22  ;;  %v10108_v57 = vadd.f32 %v10107_v30, %v10106_v52  ;;  %v15467_v22 = vpack.c.bf16 %v14109_v8, %v14106_v23  ;;  %v15472_v23 = vpack.c.bf16 %v14148_v48, %v14143_v38  ;;  %v12321_v38 = vld [vmem:[#allocation2 + $0x444] ss:$16 sps:$4 sm:$0xff]   ;;  %v12323_v48 = vld [vmem:[#allocation2 + $0x440] ss:$16 sps:$4 sm:$0xff]  }
 0x3ea   :  { %v15473_v8 = vpack.c.bf16 %v14158_v7, %v14155_v39  ;;  %v12327_v39 = vld [vmem:[#allocation2 + $0x464] ss:$16 sps:$4 sm:$0xff]   ;;  %v12329_v7 = vld [vmem:[#allocation2 + $0x460] ss:$16 sps:$4 sm:$0xff]  }
 0x3eb   :  { %v1939_v1 = vadd.f32 %v10108_v57, %v14073_v56  ;;  %v15468_v56 = vpack.c.bf16 %v14117_v41, %v14114_v6  ;;  %v12311_v6 = vld [vmem:[#allocation2 + $0x404] ss:$16 sps:$4 sm:$0xff]   ;;  %v15474_v41 = vpack.c.bf16 %v14166_v11, %v14163_v43  ;;  %v12335_v11 = vld [vmem:[#allocation2 + $0x480] ss:$16 sps:$4 sm:$0xff]  }
 0x3ec   :  { %v12333_v43 = vld [vmem:[#allocation2 + $0x484] ss:$16 sps:$4 sm:$0xff]  }
 0x3ed   :  { %v1956_v32 = vpack.c.bf16 %v1939_v1, %v1936_v45  ;;  %v10109_v15 = vpop.f32.mrb[108].mxu0 }
 0x3ee   :  { %v10110_v17 = vpop.f32.mrb[109].mxu0 }
 0x3ef   :  { %v10111_v36 = vadd.f32 %v10110_v17, %v10109_v15  ;;  %v10112_v13 = vpop.f32.mrb[110].mxu0  ;;  %11245 = vmatprep.mubr.msk.bf16.mxu0 %vm1313_vm1, %v1956_v32 }
 0x3f0   :  { %v10113_v40 = vpop.f32.mrb[111].mxu0 }
 0x3f1   :  { %v1944_v34 = vadd.f32 %v10111_v36, %v14075_v61  ;;  %v10114_v54 = vadd.f32 %v10113_v40, %v10112_v13  ;;  %v15470_v61 = vpack.c.bf16 %v14131_v60, %v14129_v29  ;;  %v12315_v29 = vld [vmem:[#allocation2 + $0x424] ss:$16 sps:$4 sm:$0xff]   ;;  %v3059_v60 = vsel %vm1338_vm0, %v3033_v53, 0 }
 0x3f3   :  { %v1947_v18 = vadd.f32 %v10114_v54, %v14077_v63  ;;  %v15471_v63 = vpack.c.bf16 %v14138_v26, %v14136_v21  ;;  %v14340_v21 = vld [vmem:[%s15466_s1 + $0xc0] sm:$0xff]  }
 0x3f4   :  { %v12317_v26 = vld [vmem:[#allocation2 + $0x420] ss:$16 sps:$4 sm:$0xff]  }
 0x3f5   :  { %v1957_v10 = vpack.c.bf16 %v1947_v18, %v1944_v34 }
 0x3f7   :  { %11246 = vmatmul.mubr.msk.bf16.gmra.mrb[76].mxu0 %vm1313_vm1, %v1957_v10 }
 0x3f8   :  { %11251 = vmatprep.mubr.msk.bf16.mxu0 %vm1313_vm1, %v15467_v22 }
 0x3ff   :  { %11252 = vmatmul.mubr.msk.bf16.vlgmr.msra.gmra.mrb[64].mxu0 %vm1313_vm1, %v15468_v56 }
 0x400   :  { %11255 = vmatprep.mubr.msk.bf16.mxu0 %vm1313_vm1, %v15469_v27  ;;  %10262 = vmatpush3.bf16.msra.mxu0 %v14173_v16 }
 0x401   :  { %10263 = vmatprep.subr.bf16.mxu0 %v14179_v28 }
 0x404   :  { %10264 = vmatpush3.bf16.msra.mxu0 %v14185_v46 }
 0x405   :  { %10265 = vmatprep.subr.bf16.mxu0 %v14191_v50 }
 0x407   :  { %11256 = vmatmul.mubr.msk.bf16.gmra.mrb[68].mxu0 %vm1313_vm1, %v15470_v61 }
 0x408   :  { %11259 = vmatprep.mubr.msk.bf16.mxu0 %vm1313_vm1, %v15471_v63  ;;  %10266 = vmatpush3.bf16.msra.mxu0 %v14197_v5 }
 0x409   :  { %10267 = vmatprep.subr.bf16.mxu0 %v14203_v24 }
 0x40c   :  { %10268 = vmatpush3.bf16.msra.mxu0 %v14209_v49 }
 0x40d   :  { %10269 = vmatprep.subr.bf16.mxu0 %v14215_v51 }
 0x40f   :  { %11260 = vmatmul.mubr.msk.bf16.gmra.mrb[72].mxu0 %vm1313_vm1, %v15472_v23 }
 0x410   :  { %11263 = vmatprep.mubr.msk.bf16.mxu0 %vm1313_vm1, %v15473_v8  ;;  %10270 = vmatpush3.bf16.msra.mxu0 %v14221_v35 }
 0x411   :  { %10271 = vmatprep.subr.bf16.mxu0 %v14227_v55 }
 0x414   :  { %10272 = vmatpush3.bf16.msra.mxu0 %v14233_v31 }
 0x415   :  { %10273 = vmatprep.subr.bf16.mxu0 %v14239_v47 }
 0x417   :  { %11264 = vmatmul.mubr.msk.bf16.gmra.mrb[76].mxu0 %vm1313_vm1, %v15474_v41 }
 0x418   :  { %10274 = vmatpush3.bf16.msra.mxu0 %v14245_v59  ;;  %2862 = vmatprep.mubr.bf16.mxu0 %v12311_v6 }
 0x419   :  { %10275 = vmatprep.subr.bf16.mxu0 %v14251_v25 }
 0x41c   :  { %10276 = vmatpush3.bf16.msra.mxu0 %v14258_v19 }
 0x41d   :  { %12049 = vmatprep.subr.msk.bf16.mxu0 %vm1338_vm0, %v3033_v53 }
 0x41f   :  { %2863 = vmatmul.mubr.bf16.vlgmr.msra.gmra.mrb[112].mxu0 %v12309_v62 }
 0x420   :  { %2870 = vmatprep.mubr.bf16.mxu0 %v12315_v29  ;;  %11268 = vmatpush3.bf16.msra.mxu0 %v3059_v60 }
 0x421   :  { %10462 = vmatprep.subr.bf16.mxu0 %v14340_v21 }
 0x427   :  { %2871 = vmatmul.mubr.bf16.gmra.mrb[116].mxu0 %v12317_v26 }
 0x428   :  { %2878 = vmatprep.mubr.bf16.mxu0 %v12321_v38 }
 0x42f   :  { %2879 = vmatmul.mubr.bf16.gmra.mrb[120].mxu0 %v12323_v48 }
 0x430   :  { %2886 = vmatprep.mubr.bf16.mxu0 %v12327_v39 }
 0x437   :  { %2887 = vmatmul.mubr.bf16.gmra.mrb[124].mxu0 %v12329_v7 }
 0x438   :  { %2894 = vmatprep.mubr.bf16.mxu0 %v12333_v43 }
 0x43f   :  { %2895 = vmatmul.mubr.bf16.gmra.mrb[128].mxu0 %v12335_v11 }
 0x440   :  { %2902 = vmatprep.mubr.bf16.mxu0 %v12339_v42 }
 0x442   :  { %v10341_v20 = vpop.f32.mrb[160].mxu1 }
 0x443   :  { %v10342_v3 = vpop.f32.mrb[161].mxu1 }
 0x444   :  { %v14343_v0 = vadd.f32 %v10342_v3, %v10341_v20  ;;  %v10344_v33 = vpop.f32.mrb[162].mxu1  ;;  %v12354_v20 = vld [vmem:[#allocation2 + $0x500] ss:$16 sps:$4 sm:$0xff]   ;;  %v12356_v3 = vld [vmem:[#allocation2 + $0x504] ss:$16 sps:$4 sm:$0xff]  }
 0x445   :  { %v10345_v12 = vpop.f32.mrb[163].mxu1  ;;  %3399 = vmatprep.mubr.bf16.mxu1 %v12356_v3 }
 0x446   :  { %v14345_v9 = vadd.f32 %v10345_v12, %v10344_v33  ;;  %3400 = vmatmul.mubr.bf16.vlgmr.msra.gmra.mrb[192].mxu1 %v12354_v20  ;;  %v12360_v33 = vld [vmem:[#allocation2 + $0x524] ss:$16 sps:$4 sm:$0xff]   ;;  %v12362_v12 = vld [vmem:[#allocation2 + $0x520] ss:$16 sps:$4 sm:$0xff]  }
 0x447   :  { %2903 = vmatmul.mubr.bf16.gmra.mrb[132].mxu0 %v12341_v14  ;;  %10536 = vmatpush3.bf16.msra.mxu1 %v14173_v16 }
 0x448   :  { %2910 = vmatprep.mubr.bf16.mxu0 %v12345_v58  ;;  %10537 = vmatprep.subr.bf16.mxu1 %v14179_v28 }
 0x449   :  { %3407 = vmatprep.mubr.bf16.mxu1 %v12360_v33  ;;  %v12408_v33 = vld [vmem:[#allocation2 + $0x644] ss:$16 sps:$4 sm:$0xff]  }
 0x44b   :  { %v10347_v44 = vpop.f32.mrb[164].mxu1  ;;  %10538 = vmatpush3.bf16.msra.mxu1 %v14185_v46 }
 0x44c   :  { %v10348_v52 = vpop.f32.mrb[165].mxu1  ;;  %10539 = vmatprep.subr.bf16.mxu1 %v14191_v50 }
 0x44d   :  { %v10350_v30 = vpop.f32.mrb[166].mxu1  ;;  %v14347_v45 = vadd.f32 %v10348_v52, %v10347_v44  ;;  %v12366_v44 = vld [vmem:[#allocation2 + $0x544] ss:$16 sps:$4 sm:$0xff]   ;;  %v12368_v52 = vld [vmem:[#allocation2 + $0x540] ss:$16 sps:$4 sm:$0xff]  }
 0x44e   :  { %v10351_v57 = vpop.f32.mrb[167].mxu1  ;;  %3408 = vmatmul.mubr.bf16.gmra.mrb[196].mxu1 %v12362_v12 }
 0x44f   :  { %2911 = vmatmul.mubr.bf16.gmra.mrb[136].mxu0 %v12347_v37  ;;  %v14349_v1 = vadd.f32 %v10351_v57, %v10350_v30  ;;  %10540 = vmatpush3.bf16.msra.mxu1 %v14197_v5  ;;  %v12372_v30 = vld [vmem:[#allocation2 + $0x564] ss:$16 sps:$4 sm:$0xff]   ;;  %v12374_v57 = vld [vmem:[#allocation2 + $0x560] ss:$16 sps:$4 sm:$0xff]  }
 0x450   :  { %2918 = vmatprep.mubr.bf16.mxu0 %v12351_v4  ;;  %10541 = vmatprep.subr.bf16.mxu1 %v14203_v24 }
 0x451   :  { %3415 = vmatprep.mubr.bf16.mxu1 %v12366_v44 }
 0x453   :  { %v10353_v32 = vpop.f32.mrb[168].mxu1  ;;  %10542 = vmatpush3.bf16.msra.mxu1 %v14209_v49 }
 0x454   :  { %v10354_v15 = vpop.f32.mrb[169].mxu1  ;;  %10543 = vmatprep.subr.bf16.mxu1 %v14215_v51 }
 0x455   :  { %v10356_v17 = vpop.f32.mrb[170].mxu1  ;;  %v14351_v36 = vadd.f32 %v10354_v15, %v10353_v32  ;;  %v12378_v32 = vld [vmem:[#allocation2 + $0x584] ss:$16 sps:$4 sm:$0xff]   ;;  %v12380_v15 = vld [vmem:[#allocation2 + $0x580] ss:$16 sps:$4 sm:$0xff]  }
 0x456   :  { %v10357_v13 = vpop.f32.mrb[171].mxu1  ;;  %3416 = vmatmul.mubr.bf16.gmra.mrb[200].mxu1 %v12368_v52 }
 0x457   :  { %2919 = vmatmul.mubr.bf16.gmra.mrb[140].mxu0 %v12353_v2  ;;  %v14353_v40 = vadd.f32 %v10357_v13, %v10356_v17  ;;  %10544 = vmatpush3.bf16.msra.mxu1 %v14221_v35  ;;  %v12740_v17 = vld [vmem:[%s15466_s1 + $0x40] sm:$0xff]  }
 0x458   :  { %10545 = vmatprep.subr.bf16.mxu1 %v14227_v55  ;;  %3423 = vmatprep.mubr.bf16.mxu1 %v12372_v30  ;;  %v12384_v13 = vld [vmem:[#allocation2 + $0x5a4] ss:$16 sps:$4 sm:$0xff]   ;;  %v12410_v30 = vld [vmem:[#allocation2 + $0x640] ss:$16 sps:$4 sm:$0xff]  }
 0x45b   :  { %v10359_v34 = vpop.f32.mrb[172].mxu1  ;;  %10546 = vmatpush3.bf16.msra.mxu1 %v14233_v31 }
 0x45c   :  { %v10360_v54 = vpop.f32.mrb[173].mxu1  ;;  %10547 = vmatprep.subr.bf16.mxu1 %v14239_v47 }
 0x45d   :  { %v10362_v18 = vpop.f32.mrb[174].mxu1  ;;  %v14355_v10 = vadd.f32 %v10360_v54, %v10359_v34  ;;  %v12386_v34 = vld [vmem:[#allocation2 + $0x5a0] ss:$16 sps:$4 sm:$0xff]   ;;  %v12390_v54 = vld [vmem:[#allocation2 + $0x5c4] ss:$16 sps:$4 sm:$0xff]  }
 0x45e   :  { %v10363_v22 = vpop.f32.mrb[175].mxu1  ;;  %3424 = vmatmul.mubr.bf16.gmra.mrb[204].mxu1 %v12374_v57 }
 0x45f   :  { %v14357_v56 = vadd.f32 %v10363_v22, %v10362_v18  ;;  %10548 = vmatpush3.bf16.msra.mxu1 %v14245_v59  ;;  %3431 = vmatprep.mubr.bf16.mxu1 %v12378_v32  ;;  %v12392_v18 = vld [vmem:[#allocation2 + $0x5c0] ss:$16 sps:$4 sm:$0xff]   ;;  %v12396_v22 = vld [vmem:[#allocation2 + $0x5e4] ss:$16 sps:$4 sm:$0xff]   ;;  %v14417_v32 = vld [vmem:[%s15466_s1 + $0xc8] sm:$0xff]  }
 0x460   :  { %10549 = vmatprep.subr.bf16.mxu1 %v14251_v25 }
 0x463   :  { %v10365_v27 = vpop.f32.mrb[176].mxu1  ;;  %10550 = vmatpush3.bf16.msra.mxu1 %v14258_v19 }
 0x464   :  { %v10366_v61 = vpop.f32.mrb[177].mxu1  ;;  %10672 = vmatprep.subr.bf16.mxu1 %v12740_v17  ;;  %v14432_v17 = vld [vmem:[%s15466_s1 + $0xd0] sm:$0xff]  }
 0x465   :  { %v10368_v63 = vpop.f32.mrb[178].mxu1  ;;  %v14359_v23 = vadd.f32 %v10366_v61, %v10365_v27  ;;  %v12398_v27 = vld [vmem:[#allocation2 + $0x5e0] ss:$16 sps:$4 sm:$0xff]  }
 0x466   :  { %v10369_v8 = vpop.f32.mrb[179].mxu1  ;;  %3432 = vmatmul.mubr.bf16.gmra.mrb[208].mxu1 %v12380_v15 }
 0x467   :  { %v14361_v6 = vadd.f32 %v10369_v8, %v10368_v63  ;;  %3439 = vmatprep.mubr.bf16.mxu1 %v12384_v13 }
 0x46e   :  { %3440 = vmatmul.mubr.bf16.gmra.mrb[212].mxu1 %v12386_v34 }
 0x46f   :  { %3447 = vmatprep.mubr.bf16.mxu1 %v12390_v54  ;;  %v12414_v54 = vld [vmem:[#allocation2 + $0x684] ss:$16 sps:$4 sm:$0xff]  }
 0x476   :  { %3448 = vmatmul.mubr.bf16.gmra.mrb[216].mxu1 %v12392_v18 }
 0x477   :  { %3455 = vmatprep.mubr.bf16.mxu1 %v12396_v22 }
 0x47e   :  { %3456 = vmatmul.mubr.bf16.gmra.mrb[220].mxu1 %v12398_v27 }
 0x48e   :  { %v10371_v41 = vpop.f32.mrb[180].mxu1 }
 0x48f   :  { %v10372_v53 = vpop.f32.mrb[181].mxu1 }
 0x490   :  { %v10374_v62 = vpop.f32.mrb[182].mxu1  ;;  %v14363_v29 = vadd.f32 %v10372_v53, %v10371_v41  ;;  %v12402_v53 = vld [vmem:[#allocation2 + $0x600] ss:$16 sps:$4 sm:$0xff]  }
 0x491   :  { %v10375_v60 = vpop.f32.mrb[183].mxu1 }
 0x492   :  { %v14365_v26 = vadd.f32 %v10375_v60, %v10374_v62  ;;  %v12404_v62 = vld [vmem:[#allocation2 + $0x604] ss:$16 sps:$4 sm:$0xff]  }
 0x493   :  { %3936 = vmatprep.mubr.bf16.mxu1 %v12404_v62  ;;  %v12417_v62 = vld [vmem:[#allocation2 + $0x6a4] ss:$16 sps:$4 sm:$0xff]  }
 0x494   :  { %3937 = vmatmul.mubr.bf16.vlgmr.msra.gmra.mrb[224].mxu1 %v12402_v53 }
 0x495   :  { %10673 = vmatpush3.bf16.msra.mxu1 %v14173_v16 }
 0x496   :  { %v10377_v38 = vpop.f32.mrb[184].mxu1  ;;  %10674 = vmatprep.subr.bf16.mxu1 %v14179_v28 }
 0x497   :  { %v10378_v48 = vpop.f32.mrb[185].mxu1 }
 0x498   :  { %v10380_v39 = vpop.f32.mrb[186].mxu1  ;;  %v14367_v7 = vadd.f32 %v10378_v48, %v10377_v38  ;;  %v12405_v38 = vld [vmem:[#allocation2 + $0x624] ss:$16 sps:$4 sm:$0xff]  }
 0x499   :  { %v10381_v43 = vpop.f32.mrb[187].mxu1  ;;  %3944 = vmatprep.mubr.bf16.mxu1 %v12405_v38  ;;  %10675 = vmatpush3.bf16.msra.mxu1 %v14185_v46 }
 0x49a   :  { %v14369_v11 = vadd.f32 %v10381_v43, %v10380_v39  ;;  %10676 = vmatprep.subr.bf16.mxu1 %v14191_v50  ;;  %v12411_v50 = vld [vmem:[#allocation2 + $0x664] ss:$16 sps:$4 sm:$0xff]  }
 0x49d   :  { %10677 = vmatpush3.bf16.msra.mxu1 %v14197_v5 }
 0x49e   :  { %v10383_v42 = vpop.f32.mrb[188].mxu1  ;;  %10678 = vmatprep.subr.bf16.mxu1 %v14203_v24 }
 0x49f   :  { %v10384_v14 = vpop.f32.mrb[189].mxu1 }
 0x4a0   :  { %v10386_v58 = vpop.f32.mrb[190].mxu1  ;;  %v14371_v37 = vadd.f32 %v10384_v14, %v10383_v42 }
 0x4a1   :  { %v10387_v4 = vpop.f32.mrb[191].mxu1  ;;  %10679 = vmatpush3.bf16.msra.mxu1 %v14209_v49 }
 0x4a2   :  { %v14373_v2 = vadd.f32 %v10387_v4, %v10386_v58  ;;  %v12407_v4 = vld [vmem:[#allocation2 + $0x620] ss:$16 sps:$4 sm:$0xff]   ;;  %10680 = vmatprep.subr.bf16.mxu1 %v14215_v51  ;;  %v14425_v51 = vld [vmem:[%s15466_s1 + $0x88] sm:$0xff]  }
 0x4a3   :  { %3945 = vmatmul.mubr.bf16.gmra.mrb[228].mxu1 %v12407_v4  ;;  %v12419_v4 = vld [vmem:[#allocation2 + $0x6a0] ss:$16 sps:$4 sm:$0xff]  }
 0x4a4   :  { %3952 = vmatprep.mubr.bf16.mxu1 %v12408_v33 }
 0x4a5   :  { %10681 = vmatpush3.bf16.msra.mxu1 %v14221_v35  ;;  %v12413_v35 = vld [vmem:[#allocation2 + $0x660] ss:$16 sps:$4 sm:$0xff]  }
 0x4a6   :  { %10682 = vmatprep.subr.bf16.mxu1 %v14227_v55  ;;  %v14440_v55 = vld [vmem:[%s15466_s1 + $0x90] sm:$0xff]  }
 0x4a9   :  { %10683 = vmatpush3.bf16.msra.mxu1 %v14233_v31 }
 0x4aa   :  { %10684 = vmatprep.subr.bf16.mxu1 %v14239_v47  ;;  %v14456_v47 = vld [vmem:[%s15466_s1 + $0x98] sm:$0xff]  }
 0x4ab   :  { %3953 = vmatmul.mubr.bf16.gmra.mrb[232].mxu1 %v12410_v30 }
 0x4ac   :  { %3960 = vmatprep.mubr.bf16.mxu1 %v12411_v50 }
 0x4ad   :  { %10685 = vmatpush3.bf16.msra.mxu1 %v14245_v59  ;;  %v12416_v59 = vld [vmem:[#allocation2 + $0x680] ss:$16 sps:$4 sm:$0xff]  }
 0x4ae   :  { %10686 = vmatprep.subr.bf16.mxu1 %v14251_v25  ;;  %v14471_v25 = vld [vmem:[%s15466_s1 + $0xa0] sm:$0xff]  }
 0x4b1   :  { %10687 = vmatpush3.bf16.msra.mxu1 %v14258_v19 }
 0x4b2   :  { %10736 = vmatprep.subr.bf16.mxu1 %v14340_v21 }
 0x4b3   :  { %3961 = vmatmul.mubr.bf16.gmra.mrb[236].mxu1 %v12413_v35 }
 0x4b4   :  { %3968 = vmatprep.mubr.bf16.mxu1 %v12414_v54 }
 0x4bb   :  { %3969 = vmatmul.mubr.bf16.gmra.mrb[240].mxu1 %v12416_v59  ;;  %v12357_v59 = vld [vmem:[#allocation2 + $0x508] ss:$16 sps:$4 sm:$0xff]  }
 0x4bc   :  { %3976 = vmatprep.mubr.bf16.mxu1 %v12417_v62  ;;  %v12365_v62 = vld [vmem:[#allocation2 + $0x528] ss:$16 sps:$4 sm:$0xff]  }
 0x4c3   :  { %3977 = vmatmul.mubr.bf16.gmra.mrb[244].mxu1 %v12419_v4  ;;  %v12381_v4 = vld [vmem:[#allocation2 + $0x58c] ss:$16 sps:$4 sm:$0xff]  }
 0x4f2   :  { %v10277_v61 = vpop.f32.mrb[112].mxu0 }
 0x4f3   :  { %v10278_v63 = vpop.f32.mrb[113].mxu0 }
 0x4f4   :  { %v10279_v8 = vadd.f32 %v10278_v63, %v10277_v61  ;;  %v10280_v41 = vpop.f32.mrb[114].mxu0  ;;  %v14448_v61 = vld [vmem:[%s15466_s1 + $0xd8] sm:$0xff]  }
 0x4f5   :  { %v10281_v60 = vpop.f32.mrb[115].mxu0 }
 0x4f6   :  { %v2962_v48 = vadd.f32 %v14343_v0, %v10279_v8  ;;  %v10282_v39 = vadd.f32 %v10281_v60, %v10280_v41  ;;  %v14463_v8 = vld [vmem:[%s15466_s1 + $0xe0] sm:$0xff]  }
 0x4f8   :  { %v2965_v43 = vadd.f32 %v14345_v9, %v10282_v39  ;;  %v14479_v39 = vld [vmem:[%s15466_s1 + $0xe8] sm:$0xff]  }
 0x4fa   :  { %v3024_v42 = vpack.c.bf16 %v2965_v43, %v2962_v48  ;;  %v10283_v14 = vpop.f32.mrb[116].mxu0  ;;  %v14486_v43 = vld [vmem:[%s15466_s1 + $0xa8] sm:$0xff]  }
 0x4fb   :  { %v10284_v58 = vpop.f32.mrb[117].mxu0 }
 0x4fc   :  { %v10285_v20 = vadd.f32 %v10284_v58, %v10283_v14  ;;  %v10286_v3 = vpop.f32.mrb[118].mxu0  ;;  %11269 = vmatprep.mubr.msk.bf16.mxu0 %vm1313_vm1, %v3024_v42  ;;  %v14492_v14 = vld [vmem:[%s15466_s1 + $0xf0] sm:$0xff]  }
 0x4fd   :  { %v10287_v0 = vpop.f32.mrb[119].mxu0 }
 0x4fe   :  { %v2970_v9 = vadd.f32 %v14347_v45, %v10285_v20  ;;  %v10288_v12 = vadd.f32 %v10287_v0, %v10286_v3  ;;  %v12420_v3 = vld [vmem:[#allocation2 + $0x6c4] ss:$16 sps:$4 sm:$0xff]  }
 0x4ff   :  { %v14499_v0 = vld [vmem:[%s15466_s1 + $0xb0] sm:$0xff]   ;;  %3984 = vmatprep.mubr.bf16.mxu1 %v12420_v3  ;;  %v12389_v3 = vld [vmem:[#allocation2 + $0x5a8] ss:$16 sps:$4 sm:$0xff]  }
 0x500   :  { %v2973_v16 = vadd.f32 %v14349_v1, %v10288_v12  ;;  %v14409_v1 = vld [vmem:[%s15466_s1 + $0x80] sm:$0xff]  }
 0x502   :  { %v3025_v28 = vpack.c.bf16 %v2973_v16, %v2970_v9  ;;  %v10289_v44 = vpop.f32.mrb[120].mxu0  ;;  %v14506_v16 = vld [vmem:[%s15466_s1 + $0xf8] sm:$0xff]  }
 0x503   :  { %v10290_v52 = vpop.f32.mrb[121].mxu0 }
 0x504   :  { %v10291_v57 = vadd.f32 %v10290_v52, %v10289_v44  ;;  %v10292_v46 = vpop.f32.mrb[122].mxu0  ;;  %11270 = vmatmul.mubr.msk.bf16.vlgmr.msra.gmra.mrb[64].mxu0 %vm1313_vm1, %v3025_v28  ;;  %v3570_v28 = vld [vmem:[#allocation5 + $0xa] sm:$0x3]  ;;  %v14513_v52 = vld [vmem:[%s15466_s1 + $0xb8] sm:$0xff]  }
 0x505   :  { %v10293_v45 = vpop.f32.mrb[123].mxu0  ;;  %10463 = vmatpush3.bf16.msra.mxu0 %v14409_v1 }
 0x506   :  { %v2978_v5 = vadd.f32 %v14351_v36, %v10291_v57  ;;  %v10294_v24 = vadd.f32 %v10293_v45, %v10292_v46  ;;  %10464 = vmatprep.subr.bf16.mxu0 %v14417_v32  ;;  %v12422_v46 = vld [vmem:[#allocation2 + $0x6c0] ss:$16 sps:$4 sm:$0xff]  }
 0x507   :  { %3985 = vmatmul.mubr.bf16.gmra.mrb[248].mxu1 %v12422_v46 }
 0x508   :  { %v2981_v49 = vadd.f32 %v14353_v40, %v10294_v24 }
 0x509   :  { %10465 = vmatpush3.bf16.msra.mxu0 %v14425_v51 }
 0x50a   :  { %v3026_v36 = vpack.c.bf16 %v2981_v49, %v2978_v5  ;;  %v10295_v15 = vpop.f32.mrb[124].mxu0  ;;  %10466 = vmatprep.subr.bf16.mxu0 %v14432_v17  ;;  %v12423_v5 = vld [vmem:[#allocation2 + $0x6e4] ss:$16 sps:$4 sm:$0xff]  }
 0x50b   :  { %v10296_v40 = vpop.f32.mrb[125].mxu0  ;;  %3992 = vmatprep.mubr.bf16.mxu1 %v12423_v5  ;;  %v12438_v5 = vld [vmem:[#allocation2 + $0x780] ss:$16 sps:$4 sm:$0xff]  }
 0x50c   :  { %v10297_v13 = vadd.f32 %v10296_v40, %v10295_v15  ;;  %v10298_v34 = vpop.f32.mrb[126].mxu0  ;;  %11273 = vmatprep.mubr.msk.bf16.mxu0 %vm1313_vm1, %v3026_v36 }
 0x50d   :  { %v10299_v18 = vpop.f32.mrb[127].mxu0  ;;  %10467 = vmatpush3.bf16.msra.mxu0 %v14440_v55 }
 0x50e   :  { %v2986_v22 = vadd.f32 %v14355_v10, %v10297_v13  ;;  %v10300_v27 = vadd.f32 %v10299_v18, %v10298_v34  ;;  %10468 = vmatprep.subr.bf16.mxu0 %v14448_v61  ;;  %v12425_v13 = vld [vmem:[#allocation2 + $0x6e0] ss:$16 sps:$4 sm:$0xff]   ;;  %v12428_v18 = vld [vmem:[#allocation2 + $0x704] ss:$16 sps:$4 sm:$0xff]  }
 0x50f   :  { %3993 = vmatmul.mubr.bf16.gmra.mrb[252].mxu1 %v12425_v13  ;;  %v12441_v13 = vld [vmem:[#allocation2 + $0x7a0] ss:$16 sps:$4 sm:$0xff]  }
 0x510   :  { %v2989_v31 = vadd.f32 %v14357_v56, %v10300_v27  ;;  %4473 = vmatprep.mubr.bf16.mxu1 %v12428_v18 }
 0x511   :  { %10469 = vmatpush3.bf16.msra.mxu0 %v14456_v47 }
 0x512   :  { %v3027_v10 = vpack.c.bf16 %v2989_v31, %v2986_v22  ;;  %v10301_v63 = vpop.f32.mrb[128].mxu0  ;;  %10470 = vmatprep.subr.bf16.mxu0 %v14463_v8 }
 0x513   :  { %v10302_v56 = vpop.f32.mrb[129].mxu0 }
 0x514   :  { %v10303_v41 = vadd.f32 %v10302_v56, %v10301_v63  ;;  %v10304_v53 = vpop.f32.mrb[130].mxu0  ;;  %11274 = vmatmul.mubr.msk.bf16.gmra.mrb[68].mxu0 %vm1313_vm1, %v3027_v10  ;;  %v12359_v10 = vld [vmem:[#allocation2 + $0x50c] ss:$16 sps:$4 sm:$0xff]   ;;  %v12426_v63 = vld [vmem:[#allocation2 + $0x700] ss:$16 sps:$4 sm:$0xff]  }
 0x515   :  { %v10305_v60 = vpop.f32.mrb[131].mxu0  ;;  %10471 = vmatpush3.bf16.msra.mxu0 %v14471_v25  ;;  %v12431_v56 = vld [vmem:[#allocation2 + $0x724] ss:$16 sps:$4 sm:$0xff]  }
 0x516   :  { %v2994_v38 = vadd.f32 %v14359_v23, %v10303_v41  ;;  %v10306_v48 = vadd.f32 %v10305_v60, %v10304_v53  ;;  %10472 = vmatprep.subr.bf16.mxu0 %v14479_v39  ;;  %v12363_v41 = vld [vmem:[#allocation2 + $0x52c] ss:$16 sps:$4 sm:$0xff]   ;;  %v12429_v53 = vld [vmem:[#allocation2 + $0x720] ss:$16 sps:$4 sm:$0xff]  }
 0x517   :  { %4474 = vmatmul.mubr.bf16.vlgmr.msra.gmra.mrb[0].mxu1 %v12426_v63  ;;  %v12369_v60 = vld [vmem:[#allocation2 + $0x54c] ss:$16 sps:$4 sm:$0xff]  }
 0x518   :  { %v2997_v19 = vadd.f32 %v14361_v6, %v10306_v48  ;;  %4481 = vmatprep.mubr.bf16.mxu1 %v12431_v56  ;;  %10737 = vmatpush3.bf16.msra.mxu1 %v14409_v1  ;;  %v12437_v48 = vld [vmem:[#allocation2 + $0x764] ss:$16 sps:$4 sm:$0xff]  }
 0x519   :  { %10473 = vmatpush3.bf16.msra.mxu0 %v14486_v43  ;;  %10738 = vmatprep.subr.bf16.mxu1 %v14417_v32 }
 0x51a   :  { %v3028_v23 = vpack.c.bf16 %v2997_v19, %v2994_v38  ;;  %v10307_v42 = vpop.f32.mrb[132].mxu0  ;;  %10474 = vmatprep.subr.bf16.mxu0 %v14492_v14  ;;  %v12432_v38 = vld [vmem:[#allocation2 + $0x740] ss:$16 sps:$4 sm:$0xff]   ;;  %v12371_v19 = vld [vmem:[#allocation2 + $0x548] ss:$16 sps:$4 sm:$0xff]  }
 0x51b   :  { %v10308_v58 = vpop.f32.mrb[133].mxu0 }
 0x51c   :  { %v10309_v6 = vadd.f32 %v10308_v58, %v10307_v42  ;;  %v10310_v20 = vpop.f32.mrb[134].mxu0  ;;  %11277 = vmatprep.mubr.msk.bf16.mxu0 %vm1313_vm1, %v3028_v23  ;;  %10739 = vmatpush3.bf16.msra.mxu1 %v14425_v51  ;;  %v12375_v23 = vld [vmem:[#allocation2 + $0x56c] ss:$16 sps:$4 sm:$0xff]   ;;  %v12435_v42 = vld [vmem:[#allocation2 + $0x760] ss:$16 sps:$4 sm:$0xff]  }
 0x51d   :  { %v10311_v33 = vpop.f32.mrb[135].mxu0  ;;  %10475 = vmatpush3.bf16.msra.mxu0 %v14499_v0  ;;  %10740 = vmatprep.subr.bf16.mxu1 %v14432_v17  ;;  %v12377_v58 = vld [vmem:[#allocation2 + $0x568] ss:$16 sps:$4 sm:$0xff]  }
 0x51e   :  { %v3002_v9 = vadd.f32 %v14363_v29, %v10309_v6  ;;  %v10312_v12 = vadd.f32 %v10311_v33, %v10310_v20  ;;  %10476 = vmatprep.subr.bf16.mxu0 %v14506_v16  ;;  %v12383_v6 = vld [vmem:[#allocation2 + $0x588] ss:$16 sps:$4 sm:$0xff]   ;;  %v12387_v20 = vld [vmem:[#allocation2 + $0x5ac] ss:$16 sps:$4 sm:$0xff]  }
 0x51f   :  { %4482 = vmatmul.mubr.bf16.gmra.mrb[4].mxu1 %v12429_v53  ;;  %v12393_v33 = vld [vmem:[#allocation2 + $0x5cc] ss:$16 sps:$4 sm:$0xff]  }
 0x520   :  { %v3005_v44 = vadd.f32 %v14365_v26, %v10312_v12  ;;  %10741 = vmatpush3.bf16.msra.mxu1 %v14440_v55  ;;  %v12399_v12 = vld [vmem:[#allocation2 + $0x5ec] ss:$16 sps:$4 sm:$0xff]  }
 0x521   :  { %10477 = vmatpush3.bf16.msra.mxu0 %v14513_v52  ;;  %10742 = vmatprep.subr.bf16.mxu1 %v14448_v61 }
 0x522   :  { %v3029_v29 = vpack.c.bf16 %v3005_v44, %v3002_v9  ;;  %v10313_v30 = vpop.f32.mrb[136].mxu0  ;;  %12050 = vmatprep.subr.msk.bf16.mxu0 %vm1338_vm0, %v3570_v28  ;;  %v12395_v9 = vld [vmem:[#allocation2 + $0x5c8] ss:$16 sps:$4 sm:$0xff]   ;;  %v10414_v44 = vpop.f32.mrb[192].mxu1 }
 0x523   :  { %v10314_v57 = vpop.f32.mrb[137].mxu0 }
 0x524   :  { %v10315_v50 = vadd.f32 %v10314_v57, %v10313_v30  ;;  %v10316_v45 = vpop.f32.mrb[138].mxu0  ;;  %11278 = vmatmul.mubr.msk.bf16.gmra.mrb[72].mxu0 %vm1313_vm1, %v3029_v29  ;;  %10743 = vmatpush3.bf16.msra.mxu1 %v14456_v47  ;;  %v10415_v29 = vpop.f32.mrb[193].mxu1 }
 0x525   :  { %v10317_v26 = vpop.f32.mrb[139].mxu0  ;;  %10744 = vmatprep.subr.bf16.mxu1 %v14463_v8  ;;  %v14542_v30 = vadd.f32 %v10415_v29, %v10414_v44  ;;  %v10417_v57 = vpop.f32.mrb[194].mxu1 }
 0x526   :  { %v3010_v24 = vadd.f32 %v14367_v7, %v10315_v50  ;;  %v10318_v49 = vadd.f32 %v10317_v26, %v10316_v45  ;;  %v12440_v50 = vld [vmem:[#allocation2 + $0x784] ss:$16 sps:$4 sm:$0xff]  }
 0x528   :  { %v3013_v36 = vadd.f32 %v14369_v11, %v10318_v49  ;;  %10745 = vmatpush3.bf16.msra.mxu1 %v14471_v25 }
 0x529   :  { %10746 = vmatprep.subr.bf16.mxu1 %v14479_v39 }
 0x52a   :  { %v3030_v15 = vpack.c.bf16 %v3013_v36, %v3010_v24  ;;  %v10319_v40 = vpop.f32.mrb[140].mxu0 }
 0x52b   :  { %v10320_v35 = vpop.f32.mrb[141].mxu0 }
 0x52c   :  { %v10321_v34 = vadd.f32 %v10320_v35, %v10319_v40  ;;  %v10322_v54 = vpop.f32.mrb[142].mxu0  ;;  %11281 = vmatprep.mubr.msk.bf16.mxu0 %vm1313_vm1, %v3030_v15  ;;  %10747 = vmatpush3.bf16.msra.mxu1 %v14486_v43  ;;  %v12443_v40 = vld [vmem:[#allocation2 + $0x7a4] ss:$16 sps:$4 sm:$0xff]  }
 0x52d   :  { %v10323_v22 = vpop.f32.mrb[143].mxu0  ;;  %10748 = vmatprep.subr.bf16.mxu1 %v14492_v14 }
 0x52e   :  { %v3018_v27 = vadd.f32 %v14371_v37, %v10321_v34  ;;  %v10324_v31 = vadd.f32 %v10323_v22, %v10322_v54  ;;  %v3596_v37 = vsel %vm1338_vm0, %v3570_v28, 0  ;;  %v12401_v28 = vld [vmem:[#allocation2 + $0x5e8] ss:$16 sps:$4 sm:$0xff]  }
 0x530   :  { %v3021_v7 = vadd.f32 %v14373_v2, %v10324_v31  ;;  %v12434_v2 = vld [vmem:[#allocation2 + $0x744] ss:$16 sps:$4 sm:$0xff]   ;;  %10749 = vmatpush3.bf16.msra.mxu1 %v14499_v0 }
 0x531   :  { %4489 = vmatprep.mubr.bf16.mxu1 %v12434_v2  ;;  %10750 = vmatprep.subr.bf16.mxu1 %v14506_v16  ;;  %v12446_v31 = vld [vmem:[#allocation2 + $0x7c4] ss:$16 sps:$4 sm:$0xff]   ;;  %v12447_v2 = vld [vmem:[#allocation2 + $0x7e0] ss:$16 sps:$4 sm:$0xff]  }
 0x532   :  { %v3031_v11 = vpack.c.bf16 %v3021_v7, %v3018_v27  ;;  %4490 = vmatmul.mubr.bf16.gmra.mrb[8].mxu1 %v12432_v38 }
 0x533   :  { %4497 = vmatprep.mubr.bf16.mxu1 %v12437_v48 }
 0x534   :  { %11282 = vmatmul.mubr.msk.bf16.gmra.mrb[76].mxu0 %vm1313_vm1, %v3031_v11  ;;  %10751 = vmatpush3.bf16.msra.mxu1 %v14513_v52 }
 0x535   :  { %3496 = vmatprep.mubr.bf16.mxu0 %v12359_v10  ;;  %10873 = vmatprep.subr.bf16.mxu1 %v14340_v21  ;;  %v12444_v10 = vld [vmem:[#allocation2 + $0x7c0] ss:$16 sps:$4 sm:$0xff]  }
 0x53a   :  { %4498 = vmatmul.mubr.bf16.gmra.mrb[12].mxu1 %v12435_v42 }
 0x53b   :  { %4505 = vmatprep.mubr.bf16.mxu1 %v12440_v50 }
 0x53c   :  { %3497 = vmatmul.mubr.bf16.vlgmr.msra.gmra.mrb[144].mxu0 %v12357_v59 }
 0x53d   :  { %3504 = vmatprep.mubr.bf16.mxu0 %v12363_v41  ;;  %11286 = vmatpush3.bf16.msra.mxu0 %v3596_v37  ;;  %v12449_v37 = vld [vmem:[#allocation2 + $0x7e4] ss:$16 sps:$4 sm:$0xff]  }
 0x53e   :  { %10599 = vmatprep.subr.bf16.mxu0 %v14340_v21  ;;  %v10418_v21 = vpop.f32.mrb[195].mxu1 }
 0x53f   :  { %v14544_v46 = vadd.f32 %v10418_v21, %v10417_v57  ;;  %v10420_v45 = vpop.f32.mrb[196].mxu1 }
 0x540   :  { %v10421_v26 = vpop.f32.mrb[197].mxu1 }
 0x541   :  { %v10423_v24 = vpop.f32.mrb[198].mxu1  ;;  %v14546_v49 = vadd.f32 %v10421_v26, %v10420_v45  ;;  %v12458_v45 = vld [vmem:[#allocation2 + $0x74c] ss:$16 sps:$4 sm:$0xff]   ;;  %v12456_v26 = vld [vmem:[#allocation2 + $0x748] ss:$16 sps:$4 sm:$0xff]  }
 0x542   :  { %4506 = vmatmul.mubr.bf16.gmra.mrb[16].mxu1 %v12438_v5  ;;  %v10424_v36 = vpop.f32.mrb[199].mxu1 }
 0x543   :  { %v14548_v15 = vadd.f32 %v10424_v36, %v10423_v24  ;;  %v10426_v35 = vpop.f32.mrb[200].mxu1  ;;  %4513 = vmatprep.mubr.bf16.mxu1 %v12443_v40 }
 0x544   :  { %3505 = vmatmul.mubr.bf16.gmra.mrb[148].mxu0 %v12365_v62  ;;  %v10427_v34 = vpop.f32.mrb[201].mxu1 }
 0x545   :  { %3512 = vmatprep.mubr.bf16.mxu0 %v12369_v60  ;;  %v10429_v54 = vpop.f32.mrb[202].mxu1  ;;  %v14550_v18 = vadd.f32 %v10427_v34, %v10426_v35  ;;  %v12461_v34 = vld [vmem:[#allocation2 + $0x76c] ss:$16 sps:$4 sm:$0xff]  }
 0x546   :  { %v10430_v22 = vpop.f32.mrb[203].mxu1 }
 0x547   :  { %v14552_v27 = vadd.f32 %v10430_v22, %v10429_v54  ;;  %v10432_v7 = vpop.f32.mrb[204].mxu1  ;;  %v12459_v54 = vld [vmem:[#allocation2 + $0x768] ss:$16 sps:$4 sm:$0xff]   ;;  %v12464_v22 = vld [vmem:[#allocation2 + $0x78c] ss:$16 sps:$4 sm:$0xff]  }
 0x548   :  { %v10433_v11 = vpop.f32.mrb[205].mxu1 }
 0x549   :  { %v10435_v63 = vpop.f32.mrb[206].mxu1  ;;  %v14554_v56 = vadd.f32 %v10433_v11, %v10432_v7  ;;  %v12470_v7 = vld [vmem:[#allocation2 + $0x7ac] ss:$16 sps:$4 sm:$0xff]  }
 0x54a   :  { %4514 = vmatmul.mubr.bf16.gmra.mrb[20].mxu1 %v12441_v13  ;;  %v10436_v59 = vpop.f32.mrb[207].mxu1  ;;  %v12476_v11 = vld [vmem:[#allocation2 + $0x7cc] ss:$16 sps:$4 sm:$0xff]  }
 0x54b   :  { %4521 = vmatprep.mubr.bf16.mxu1 %v12446_v31  ;;  %v14556_v41 = vadd.f32 %v10436_v59, %v10435_v63  ;;  %v10438_v53 = vpop.f32.mrb[208].mxu1  ;;  %v12462_v31 = vld [vmem:[#allocation2 + $0x788] ss:$16 sps:$4 sm:$0xff]   ;;  %v12482_v59 = vld [vmem:[#allocation2 + $0x7ec] ss:$16 sps:$4 sm:$0xff]  }
 0x54c   :  { %3513 = vmatmul.mubr.bf16.gmra.mrb[152].mxu0 %v12371_v19  ;;  %v10439_v62 = vpop.f32.mrb[209].mxu1  ;;  %v12474_v63 = vld [vmem:[#allocation2 + $0x7c8] ss:$16 sps:$4 sm:$0xff]  }
 0x54d   :  { %3520 = vmatprep.mubr.bf16.mxu0 %v12375_v23  ;;  %v10441_v60 = vpop.f32.mrb[210].mxu1  ;;  %v14558_v38 = vadd.f32 %v10439_v62, %v10438_v53  ;;  %v12452_v23 = vld [vmem:[#allocation2 + $0x70c] ss:$16 sps:$4 sm:$0xff]  }
 0x54e   :  { %v10442_v48 = vpop.f32.mrb[211].mxu1 }
 0x54f   :  { %v14560_v19 = vadd.f32 %v10442_v48, %v10441_v60  ;;  %v10444_v42 = vpop.f32.mrb[212].mxu1 }
 0x552   :  { %4522 = vmatmul.mubr.bf16.gmra.mrb[24].mxu1 %v12444_v10  ;;  %v12468_v10 = vld [vmem:[#allocation2 + $0x7a8] ss:$16 sps:$4 sm:$0xff]  }
 0x553   :  { %4529 = vmatprep.mubr.bf16.mxu1 %v12449_v37  ;;  %v12480_v37 = vld [vmem:[#allocation2 + $0x7e8] ss:$16 sps:$4 sm:$0xff]  }
 0x554   :  { %3521 = vmatmul.mubr.bf16.gmra.mrb[156].mxu0 %v12377_v58  ;;  %v12450_v58 = vld [vmem:[#allocation2 + $0x708] ss:$16 sps:$4 sm:$0xff]  }
 0x555   :  { %3528 = vmatprep.mubr.bf16.mxu0 %v12381_v4  ;;  %v10445_v4 = vpop.f32.mrb[213].mxu1 }
 0x55a   :  { %4530 = vmatmul.mubr.bf16.gmra.mrb[28].mxu1 %v12447_v2 }
 0x55b   :  { %4570 = vmatprep.mubr.bf16.mxu1 %v12452_v23 }
 0x55c   :  { %3529 = vmatmul.mubr.bf16.gmra.mrb[160].mxu0 %v12383_v6  ;;  %v10447_v6 = vpop.f32.mrb[214].mxu1 }
 0x55d   :  { %3536 = vmatprep.mubr.bf16.mxu0 %v12387_v20  ;;  %v14562_v20 = vadd.f32 %v10445_v4, %v10444_v42 }
 0x562   :  { %4571 = vmatmul.mubr.bf16.vlgmr.msra.gmra.mrb[32].mxu1 %v12450_v58 }
 0x563   :  { %10874 = vmatpush3.bf16.msra.mxu1 %v14409_v1 }
 0x564   :  { %3537 = vmatmul.mubr.bf16.gmra.mrb[164].mxu0 %v12389_v3  ;;  %v10448_v3 = vpop.f32.mrb[215].mxu1  ;;  %10875 = vmatprep.subr.bf16.mxu1 %v14417_v32 }
 0x565   :  { %3544 = vmatprep.mubr.bf16.mxu0 %v12393_v33  ;;  %v14565_v33 = vadd.f32 %v10448_v3, %v10447_v6 }
 0x567   :  { %10876 = vmatpush3.bf16.msra.mxu1 %v14425_v51 }
 0x568   :  { %10877 = vmatprep.subr.bf16.mxu1 %v14432_v17 }
 0x56b   :  { %10878 = vmatpush3.bf16.msra.mxu1 %v14440_v55 }
 0x56c   :  { %3545 = vmatmul.mubr.bf16.gmra.mrb[168].mxu0 %v12395_v9  ;;  %v12455_v9 = vld [vmem:[#allocation2 + $0x72c] ss:$16 sps:$4 sm:$0xff]   ;;  %10879 = vmatprep.subr.bf16.mxu1 %v14448_v61 }
 0x56d   :  { %3552 = vmatprep.mubr.bf16.mxu0 %v12399_v12  ;;  %v10450_v12 = vpop.f32.mrb[216].mxu1  ;;  %4578 = vmatprep.mubr.bf16.mxu1 %v12455_v9 }
 0x56e   :  { %v10451_v44 = vpop.f32.mrb[217].mxu1 }
 0x56f   :  { %v10453_v29 = vpop.f32.mrb[218].mxu1  ;;  %v14570_v57 = vadd.f32 %v10451_v44, %v10450_v12  ;;  %10880 = vmatpush3.bf16.msra.mxu1 %v14456_v47 }
 0x570   :  { %v10454_v21 = vpop.f32.mrb[219].mxu1  ;;  %10881 = vmatprep.subr.bf16.mxu1 %v14463_v8 }
 0x571   :  { %v14573_v50 = vadd.f32 %v10454_v21, %v10453_v29  ;;  %v10456_v5 = vpop.f32.mrb[220].mxu1 }
 0x572   :  { %v10457_v24 = vpop.f32.mrb[221].mxu1 }
 0x573   :  { %v10459_v36 = vpop.f32.mrb[222].mxu1  ;;  %v14578_v40 = vadd.f32 %v10457_v24, %v10456_v5  ;;  %10882 = vmatpush3.bf16.msra.mxu1 %v14471_v25 }
 0x574   :  { %3553 = vmatmul.mubr.bf16.gmra.mrb[172].mxu0 %v12401_v28  ;;  %v12453_v28 = vld [vmem:[#allocation2 + $0x728] ss:$16 sps:$4 sm:$0xff]   ;;  %v10460_v35 = vpop.f32.mrb[223].mxu1  ;;  %10883 = vmatprep.subr.bf16.mxu1 %v14479_v39 }
 0x575   :  { %4579 = vmatmul.mubr.bf16.gmra.mrb[36].mxu1 %v12453_v28  ;;  %v14581_v13 = vadd.f32 %v10460_v35, %v10459_v36  ;;  %v10551_v48 = vpop.f32.mrb[224].mxu1 }
 0x576   :  { %4586 = vmatprep.mubr.bf16.mxu1 %v12458_v45  ;;  %v10552_v42 = vpop.f32.mrb[225].mxu1 }
 0x577   :  { %10884 = vmatpush3.bf16.msra.mxu1 %v14486_v43  ;;  %v14590_v6 = vadd.f32 %v10552_v42, %v10551_v48  ;;  %v10554_v3 = vpop.f32.mrb[226].mxu1 }
 0x578   :  { %10885 = vmatprep.subr.bf16.mxu1 %v14492_v14  ;;  %v10555_v9 = vpop.f32.mrb[227].mxu1 }
 0x579   :  { %v14593_v28 = vadd.f32 %v10555_v9, %v10554_v3  ;;  %v10557_v44 = vpop.f32.mrb[228].mxu1 }
 0x57a   :  { %v10558_v29 = vpop.f32.mrb[229].mxu1 }
 0x57b   :  { %10886 = vmatpush3.bf16.msra.mxu1 %v14499_v0  ;;  %v14595_v5 = vadd.f32 %v10558_v29, %v10557_v44 }
 0x57c   :  { %10887 = vmatprep.subr.bf16.mxu1 %v14506_v16 }
 0x57d   :  { %4587 = vmatmul.mubr.bf16.gmra.mrb[40].mxu1 %v12456_v26  ;;  %v10560_v26 = vpop.f32.mrb[230].mxu1 }
 0x57e   :  { %4594 = vmatprep.mubr.bf16.mxu1 %v12461_v34  ;;  %v10561_v36 = vpop.f32.mrb[231].mxu1 }
 0x57f   :  { %10888 = vmatpush3.bf16.msra.mxu1 %v14513_v52  ;;  %v14598_v34 = vadd.f32 %v10561_v36, %v10560_v26 }
 0x585   :  { %4595 = vmatmul.mubr.bf16.gmra.mrb[44].mxu1 %v12459_v54  ;;  %v10563_v54 = vpop.f32.mrb[232].mxu1 }
 0x586   :  { %4602 = vmatprep.mubr.bf16.mxu1 %v12464_v22 }
 0x58d   :  { %4603 = vmatmul.mubr.bf16.gmra.mrb[48].mxu1 %v12462_v31 }
 0x58e   :  { %4610 = vmatprep.mubr.bf16.mxu1 %v12470_v7 }
 0x595   :  { %4611 = vmatmul.mubr.bf16.gmra.mrb[52].mxu1 %v12468_v10 }
 0x596   :  { %4618 = vmatprep.mubr.bf16.mxu1 %v12476_v11 }
 0x59d   :  { %4619 = vmatmul.mubr.bf16.gmra.mrb[56].mxu1 %v12474_v63 }
 0x59e   :  { %4626 = vmatprep.mubr.bf16.mxu1 %v12482_v59 }
 0x5a5   :  { %4627 = vmatmul.mubr.bf16.gmra.mrb[60].mxu1 %v12480_v37 }
 0x60f   :  { %v10478_v53 = vpop.f32.mrb[144].mxu0 }
 0x610   :  { %v10479_v2 = vpop.f32.mrb[145].mxu0 }
 0x611   :  { %v10480_v62 = vadd.f32 %v10479_v2, %v10478_v53  ;;  %v10481_v60 = vpop.f32.mrb[146].mxu0 }
 0x612   :  { %v10482_v23 = vpop.f32.mrb[147].mxu0 }
 0x613   :  { %v3499_v58 = vadd.f32 %v10480_v62, %v14542_v30  ;;  %v10483_v4 = vadd.f32 %v10482_v23, %v10481_v60 }
 0x615   :  { %v3502_v12 = vadd.f32 %v10483_v4, %v14544_v46  ;;  %v10564_v46 = vpop.f32.mrb[233].mxu1 }
 0x616   :  { %v14601_v10 = vadd.f32 %v10564_v46, %v10563_v54  ;;  %v10566_v11 = vpop.f32.mrb[234].mxu1 }
 0x617   :  { %v3561_v21 = vpack.c.bf16 %v3502_v12, %v3499_v58  ;;  %v10484_v45 = vpop.f32.mrb[148].mxu0  ;;  %v10567_v63 = vpop.f32.mrb[235].mxu1 }
 0x618   :  { %v10485_v24 = vpop.f32.mrb[149].mxu0  ;;  %v14604_v37 = vadd.f32 %v10567_v63, %v10566_v11  ;;  %v10569_v53 = vpop.f32.mrb[236].mxu1 }
 0x619   :  { %v10486_v35 = vadd.f32 %v10485_v24, %v10484_v45  ;;  %v10487_v30 = vpop.f32.mrb[150].mxu0  ;;  %11287 = vmatprep.mubr.msk.bf16.mxu0 %vm1313_vm1, %v3561_v21  ;;  %v10570_v2 = vpop.f32.mrb[237].mxu1 }
 0x61a   :  { %v10488_v22 = vpop.f32.mrb[151].mxu0  ;;  %v14606_v48 = vadd.f32 %v10570_v2, %v10569_v53  ;;  %v10572_v23 = vpop.f32.mrb[238].mxu1 }
 0x61b   :  { %v3507_v31 = vadd.f32 %v10486_v35, %v14546_v49  ;;  %v10489_v7 = vadd.f32 %v10488_v22, %v10487_v30  ;;  %v10573_v58 = vpop.f32.mrb[239].mxu1 }
 0x61c   :  { %v14609_v3 = vadd.f32 %v10573_v58, %v10572_v23  ;;  %v10575_v9 = vpop.f32.mrb[240].mxu1 }
 0x61d   :  { %v3510_v59 = vadd.f32 %v10489_v7, %v14548_v15  ;;  %v10576_v15 = vpop.f32.mrb[241].mxu1 }
 0x61e   :  { %v14614_v21 = vadd.f32 %v10576_v15, %v10575_v9  ;;  %v10578_v45 = vpop.f32.mrb[242].mxu1 }
 0x61f   :  { %v3562_v62 = vpack.c.bf16 %v3510_v59, %v3507_v31  ;;  %v10490_v60 = vpop.f32.mrb[152].mxu0  ;;  %v10579_v26 = vpop.f32.mrb[243].mxu1 }
 0x620   :  { %v10491_v42 = vpop.f32.mrb[153].mxu0  ;;  %v14617_v36 = vadd.f32 %v10579_v26, %v10578_v45  ;;  %v10581_v35 = vpop.f32.mrb[244].mxu1 }
 0x621   :  { %v10492_v4 = vadd.f32 %v10491_v42, %v10490_v60  ;;  %v10493_v49 = vpop.f32.mrb[154].mxu0  ;;  %11288 = vmatmul.mubr.msk.bf16.vlgmr.msra.gmra.mrb[64].mxu0 %vm1313_vm1, %v3562_v62  ;;  %v10582_v30 = vpop.f32.mrb[245].mxu1 }
 0x622   :  { %v10494_v12 = vpop.f32.mrb[155].mxu0  ;;  %10600 = vmatpush3.bf16.msra.mxu0 %v14409_v1  ;;  %v10584_v22 = vpop.f32.mrb[246].mxu1 }
 0x623   :  { %v3515_v44 = vadd.f32 %v10492_v4, %v14550_v18  ;;  %v10495_v29 = vadd.f32 %v10494_v12, %v10493_v49  ;;  %10601 = vmatprep.subr.bf16.mxu0 %v14417_v32  ;;  %v14621_v18 = vadd.f32 %v10582_v30, %v10581_v35  ;;  %v10585_v46 = vpop.f32.mrb[247].mxu1 }
 0x624   :  { %v10587_v11 = vpop.f32.mrb[248].mxu1 }
 0x625   :  { %v3518_v24 = vadd.f32 %v10495_v29, %v14552_v27  ;;  %v14624_v27 = vadd.f32 %v10585_v46, %v10584_v22 }
 0x626   :  { %10602 = vmatpush3.bf16.msra.mxu0 %v14425_v51  ;;  %v10588_v51 = vpop.f32.mrb[249].mxu1 }
 0x627   :  { %v3563_v54 = vpack.c.bf16 %v3518_v24, %v3515_v44  ;;  %v10496_v1 = vpop.f32.mrb[156].mxu0  ;;  %10603 = vmatprep.subr.bf16.mxu0 %v14432_v17  ;;  %v14629_v17 = vadd.f32 %v10588_v51, %v10587_v11  ;;  %v10590_v2 = vpop.f32.mrb[250].mxu1 }
 0x628   :  { %v10497_v32 = vpop.f32.mrb[157].mxu0  ;;  %v10591_v62 = vpop.f32.mrb[251].mxu1 }
 0x629   :  { %v10498_v31 = vadd.f32 %v10497_v32, %v10496_v1  ;;  %v10499_v7 = vpop.f32.mrb[158].mxu0  ;;  %11291 = vmatprep.mubr.msk.bf16.mxu0 %vm1313_vm1, %v3563_v54  ;;  %v14632_v23 = vadd.f32 %v10591_v62, %v10590_v2  ;;  %v10593_v42 = vpop.f32.mrb[252].mxu1 }
 0x62a   :  { %v10500_v63 = vpop.f32.mrb[159].mxu0  ;;  %10604 = vmatpush3.bf16.msra.mxu0 %v14440_v55  ;;  %v10594_v58 = vpop.f32.mrb[253].mxu1 }
 0x62b   :  { %v3523_v59 = vadd.f32 %v10498_v31, %v14554_v56  ;;  %v10501_v53 = vadd.f32 %v10500_v63, %v10499_v7  ;;  %10605 = vmatprep.subr.bf16.mxu0 %v14448_v61  ;;  %v14636_v56 = vadd.f32 %v10594_v58, %v10593_v42  ;;  %v10596_v49 = vpop.f32.mrb[254].mxu1 }
 0x62c   :  { %v10597_v9 = vpop.f32.mrb[255].mxu1 }
 0x62d   :  { %v3526_v60 = vadd.f32 %v10501_v53, %v14556_v41  ;;  %v14639_v41 = vadd.f32 %v10597_v9, %v10596_v49  ;;  %v10688_v44 = vpop.f32.mrb[0].mxu1 }
 0x62e   :  { %10606 = vmatpush3.bf16.msra.mxu0 %v14456_v47  ;;  %v10689_v47 = vpop.f32.mrb[1].mxu1 }
 0x62f   :  { %v3564_v4 = vpack.c.bf16 %v3526_v60, %v3523_v59  ;;  %v10502_v55 = vpop.f32.mrb[160].mxu0  ;;  %10607 = vmatprep.subr.bf16.mxu0 %v14463_v8  ;;  %v14644_v8 = vadd.f32 %v10689_v47, %v10688_v44  ;;  %v10691_v24 = vpop.f32.mrb[2].mxu1  ;;  %v4107_v60 = vld [vmem:[#allocation5 + $0xc] sm:$0x3] }
 0x630   :  { %v10503_v61 = vpop.f32.mrb[161].mxu0  ;;  %v10692_v35 = vpop.f32.mrb[3].mxu1 }
 0x631   :  { %v10504_v12 = vadd.f32 %v10503_v61, %v10502_v55  ;;  %v10505_v15 = vpop.f32.mrb[162].mxu0  ;;  %11292 = vmatmul.mubr.msk.bf16.gmra.mrb[68].mxu0 %vm1313_vm1, %v3564_v4  ;;  %v14647_v54 = vadd.f32 %v10692_v35, %v10691_v24  ;;  %v10694_v1 = vpop.f32.mrb[4].mxu1 }
 0x632   :  { %v10506_v29 = vpop.f32.mrb[163].mxu0  ;;  %10608 = vmatpush3.bf16.msra.mxu0 %v14471_v25  ;;  %v10695_v22 = vpop.f32.mrb[5].mxu1 }
 0x633   :  { %v3531_v45 = vadd.f32 %v10504_v12, %v14558_v38  ;;  %v10507_v26 = vadd.f32 %v10506_v29, %v10505_v15  ;;  %10609 = vmatprep.subr.bf16.mxu0 %v14479_v39  ;;  %v14651_v38 = vadd.f32 %v10695_v22, %v10694_v1  ;;  %v10697_v46 = vpop.f32.mrb[6].mxu1 }
 0x634   :  { %v10698_v31 = vpop.f32.mrb[7].mxu1 }
 0x635   :  { %v3534_v30 = vadd.f32 %v10507_v26, %v14560_v19  ;;  %v14654_v19 = vadd.f32 %v10698_v31, %v10697_v46  ;;  %v10700_v63 = vpop.f32.mrb[8].mxu1  ;;  %v12467_v46 = vld [vmem:[#allocation2 + $0x60c] ss:$16 sps:$4 sm:$0xff]   ;;  %v4133_v31 = vsel %vm1338_vm0, %v4107_v60, 0 }
 0x636   :  { %10610 = vmatpush3.bf16.msra.mxu0 %v14486_v43  ;;  %v10701_v43 = vpop.f32.mrb[9].mxu1 }
 0x637   :  { %v3565_v32 = vpack.c.bf16 %v3534_v30, %v3531_v45  ;;  %v10508_v25 = vpop.f32.mrb[164].mxu0  ;;  %10611 = vmatprep.subr.bf16.mxu0 %v14492_v14  ;;  %v14659_v14 = vadd.f32 %v10701_v43, %v10700_v63  ;;  %v10703_v2 = vpop.f32.mrb[10].mxu1  ;;  %v12483_v63 = vld [vmem:[#allocation2 + $0x66c] ss:$16 sps:$4 sm:$0xff]  }
 0x638   :  { %v10509_v39 = vpop.f32.mrb[165].mxu0  ;;  %v10704_v62 = vpop.f32.mrb[11].mxu1 }
 0x639   :  { %v10510_v7 = vadd.f32 %v10509_v39, %v10508_v25  ;;  %v10511_v11 = vpop.f32.mrb[166].mxu0  ;;  %11295 = vmatprep.mubr.msk.bf16.mxu0 %vm1313_vm1, %v3565_v32  ;;  %v14662_v58 = vadd.f32 %v10704_v62, %v10703_v2  ;;  %v10706_v4 = vpop.f32.mrb[12].mxu1  ;;  %v12485_v2 = vld [vmem:[#allocation2 + $0x668] ss:$16 sps:$4 sm:$0xff]  }
 0x63a   :  { %v10512_v51 = vpop.f32.mrb[167].mxu0  ;;  %10612 = vmatpush3.bf16.msra.mxu0 %v14499_v0  ;;  %v10707_v55 = vpop.f32.mrb[13].mxu1 }
 0x63b   :  { %v3539_v59 = vadd.f32 %v10510_v7, %v14562_v20  ;;  %v10513_v53 = vadd.f32 %v10512_v51, %v10511_v11  ;;  %10613 = vmatprep.subr.bf16.mxu0 %v14506_v16  ;;  %v14665_v61 = vadd.f32 %v10707_v55, %v10706_v4  ;;  %v10709_v20 = vpop.f32.mrb[14].mxu1  ;;  %v12473_v7 = vld [vmem:[#allocation2 + $0x628] ss:$16 sps:$4 sm:$0xff]   ;;  %v12477_v11 = vld [vmem:[#allocation2 + $0x64c] ss:$16 sps:$4 sm:$0xff]  }
 0x63c   :  { %v10710_v9 = vpop.f32.mrb[15].mxu1 }
 0x63d   :  { %v3542_v42 = vadd.f32 %v10513_v53, %v14565_v33  ;;  %v14669_v33 = vadd.f32 %v10710_v9, %v10709_v20  ;;  %v12488_v20 = vld [vmem:[#allocation2 + $0x688] ss:$16 sps:$4 sm:$0xff]   ;;  %v12489_v9 = vld [vmem:[#allocation2 + $0x6ac] ss:$16 sps:$4 sm:$0xff]  }
 0x63e   :  { %10614 = vmatpush3.bf16.msra.mxu0 %v14513_v52 }
 0x63f   :  { %v3566_v0 = vpack.c.bf16 %v3542_v42, %v3539_v59  ;;  %v10514_v49 = vpop.f32.mrb[168].mxu0  ;;  %12051 = vmatprep.subr.msk.bf16.mxu0 %vm1338_vm0, %v4107_v60  ;;  %v12486_v60 = vld [vmem:[#allocation2 + $0x68c] ss:$16 sps:$4 sm:$0xff]  }
 0x640   :  { %v10515_v16 = vpop.f32.mrb[169].mxu0 }
 0x641   :  { %v10516_v12 = vadd.f32 %v10515_v16, %v10514_v49  ;;  %v10517_v15 = vpop.f32.mrb[170].mxu0  ;;  %11296 = vmatmul.mubr.msk.bf16.gmra.mrb[72].mxu0 %vm1313_vm1, %v3566_v0 }
 0x642   :  { %v10518_v44 = vpop.f32.mrb[171].mxu0 }
 0x643   :  { %v3547_v29 = vadd.f32 %v10516_v12, %v14570_v57  ;;  %v10519_v52 = vadd.f32 %v10518_v44, %v10517_v15  ;;  %v12465_v57 = vld [vmem:[#allocation2 + $0x608] ss:$16 sps:$4 sm:$0xff]  }
 0x645   :  { %v3550_v47 = vadd.f32 %v10519_v52, %v14573_v50  ;;  %v12471_v50 = vld [vmem:[#allocation2 + $0x62c] ss:$16 sps:$4 sm:$0xff]  }
 0x647   :  { %v3567_v45 = vpack.c.bf16 %v3550_v47, %v3547_v29  ;;  %v10520_v26 = vpop.f32.mrb[172].mxu0  ;;  %v12491_v47 = vld [vmem:[#allocation2 + $0x6a8] ss:$16 sps:$4 sm:$0xff]  }
 0x648   :  { %v10521_v24 = vpop.f32.mrb[173].mxu0 }
 0x649   :  { %v10522_v35 = vadd.f32 %v10521_v24, %v10520_v26  ;;  %v10523_v30 = vpop.f32.mrb[174].mxu0  ;;  %11299 = vmatprep.mubr.msk.bf16.mxu0 %vm1313_vm1, %v3567_v45  ;;  %v12492_v26 = vld [vmem:[#allocation2 + $0x6cc] ss:$16 sps:$4 sm:$0xff]  }
 0x64a   :  { %v10524_v1 = vpop.f32.mrb[175].mxu0 }
 0x64b   :  { %v3555_v22 = vadd.f32 %v10522_v35, %v14578_v40  ;;  %v10525_v32 = vadd.f32 %v10524_v1, %v10523_v30  ;;  %v12479_v40 = vld [vmem:[#allocation2 + $0x648] ss:$16 sps:$4 sm:$0xff]  }
 0x64d   :  { %v3558_v25 = vadd.f32 %v10525_v32, %v14581_v13  ;;  %v10712_v13 = vpop.f32.mrb[16].mxu1  ;;  %v12494_v32 = vld [vmem:[#allocation2 + $0x6c8] ss:$16 sps:$4 sm:$0xff]  }
 0x64e   :  { %v10713_v51 = vpop.f32.mrb[17].mxu1 }
 0x64f   :  { %v3568_v39 = vpack.c.bf16 %v3558_v25, %v3555_v22  ;;  %v14678_v43 = vadd.f32 %v10713_v51, %v10712_v13  ;;  %v10715_v59 = vpop.f32.mrb[18].mxu1 }
 0x650   :  { %v10716_v53 = vpop.f32.mrb[19].mxu1 }
 0x651   :  { %11300 = vmatmul.mubr.msk.bf16.gmra.mrb[76].mxu0 %vm1313_vm1, %v3568_v39  ;;  %v14680_v62 = vadd.f32 %v10716_v53, %v10715_v59  ;;  %v10718_v42 = vpop.f32.mrb[20].mxu1 }
 0x652   :  { %4033 = vmatprep.mubr.bf16.mxu0 %v12467_v46  ;;  %v10719_v4 = vpop.f32.mrb[21].mxu1  ;;  %v12495_v46 = vld [vmem:[#allocation2 + $0x6ec] ss:$16 sps:$4 sm:$0xff]  }
 0x653   :  { %v14682_v55 = vadd.f32 %v10719_v4, %v10718_v42  ;;  %v10721_v0 = vpop.f32.mrb[22].mxu1 }
 0x654   :  { %v10722_v49 = vpop.f32.mrb[23].mxu1 }
 0x655   :  { %v14684_v16 = vadd.f32 %v10722_v49, %v10721_v0  ;;  %v10724_v12 = vpop.f32.mrb[24].mxu1 }
 0x656   :  { %v10725_v15 = vpop.f32.mrb[25].mxu1 }
 0x657   :  { %v14686_v44 = vadd.f32 %v10725_v15, %v10724_v12  ;;  %v10727_v29 = vpop.f32.mrb[26].mxu1 }
 0x658   :  { %v10728_v52 = vpop.f32.mrb[27].mxu1 }
 0x659   :  { %4034 = vmatmul.mubr.bf16.vlgmr.msra.gmra.mrb[176].mxu0 %v12465_v57  ;;  %v14688_v45 = vadd.f32 %v10728_v52, %v10727_v29  ;;  %v10730_v24 = vpop.f32.mrb[28].mxu1 }
 0x65a   :  { %4041 = vmatprep.mubr.bf16.mxu0 %v12471_v50  ;;  %11304 = vmatpush3.bf16.msra.mxu0 %v4133_v31  ;;  %v10731_v35 = vpop.f32.mrb[29].mxu1 }
 0x65b   :  { %v14690_v30 = vadd.f32 %v10731_v35, %v10730_v24  ;;  %v10733_v1 = vpop.f32.mrb[30].mxu1 }
 0x65c   :  { %v10734_v22 = vpop.f32.mrb[31].mxu1 }
 0x65d   :  { %v14692_v25 = vadd.f32 %v10734_v22, %v10733_v1  ;;  %v10752_v39 = vpop.f32.mrb[32].mxu1 }
 0x65e   :  { %v10753_v57 = vpop.f32.mrb[33].mxu1 }
 0x65f   :  { %v10754_v50 = vadd.f32 %v10753_v57, %v10752_v39  ;;  %v10755_v31 = vpop.f32.mrb[34].mxu1 }
 0x661   :  { %4042 = vmatmul.mubr.bf16.gmra.mrb[180].mxu0 %v12473_v7  ;;  %v10756_v7 = vpop.f32.mrb[35].mxu1 }
 0x662   :  { %4049 = vmatprep.mubr.bf16.mxu0 %v12477_v11  ;;  %v12497_v11 = vld [vmem:[#allocation2 + $0x6e8] ss:$16 sps:$4 sm:$0xff]   ;;  %v10758_v59 = vpop.f32.mrb[36].mxu1 }
 0x663   :  { %v10759_v53 = vpop.f32.mrb[37].mxu1 }
 0x669   :  { %4050 = vmatmul.mubr.bf16.gmra.mrb[184].mxu0 %v12479_v40  ;;  %v14695_v40 = vadd.f32 %v10754_v50, %v14644_v8 }
 0x66a   :  { %4057 = vmatprep.mubr.bf16.mxu0 %v12483_v63  ;;  %v10757_v63 = vadd.f32 %v10756_v7, %v10755_v31 }
 0x66c   :  { %v14698_v13 = vadd.f32 %v10757_v63, %v14647_v54 }
 0x66e   :  { %v4635_v51 = vpack.c.bf16 %v14698_v13, %v14695_v40  ;;  %v12761_v40 = vld [vmem:[%s15466_s1 + $0x10] sm:$0xff]   ;;  %v12762_v13 = vld [vmem:[%s15466_s1 + $0x58] sm:$0xff]  }
 0x671   :  { %4058 = vmatmul.mubr.bf16.gmra.mrb[188].mxu0 %v12485_v2  ;;  %v10760_v2 = vadd.f32 %v10759_v53, %v10758_v59 }
 0x672   :  { %4065 = vmatprep.mubr.bf16.mxu0 %v12486_v60  ;;  %v10761_v60 = vpop.f32.mrb[38].mxu1 }
 0x673   :  { %v10762_v42 = vpop.f32.mrb[39].mxu1  ;;  %v14703_v4 = vadd.f32 %v10760_v2, %v14651_v38 }
 0x674   :  { %v10763_v0 = vadd.f32 %v10762_v42, %v10761_v60  ;;  %v10764_v49 = vpop.f32.mrb[40].mxu1 }
 0x676   :  { %v14706_v8 = vadd.f32 %v10763_v0, %v14654_v19 }
 0x678   :  { %v4636_v54 = vpack.c.bf16 %v14706_v8, %v14703_v4  ;;  %v12764_v4 = vld [vmem:[%s15466_s1 + $0x60] sm:$0xff]  }
 0x679   :  { %4066 = vmatmul.mubr.bf16.gmra.mrb[192].mxu0 %v12488_v20  ;;  %v10765_v20 = vpop.f32.mrb[41].mxu1  ;;  %v12765_v8 = vld [vmem:[%s15466_s1 + $0x20] sm:$0xff]  }
 0x67a   :  { %4073 = vmatprep.mubr.bf16.mxu0 %v12489_v9  ;;  %v10766_v9 = vadd.f32 %v10765_v20, %v10764_v49  ;;  %v10767_v12 = vpop.f32.mrb[42].mxu1 }
 0x67b   :  { %v10768_v15 = vpop.f32.mrb[43].mxu1 }
 0x67c   :  { %v14711_v29 = vadd.f32 %v10766_v9, %v14659_v14  ;;  %v10769_v52 = vadd.f32 %v10768_v15, %v10767_v12  ;;  %v10770_v19 = vpop.f32.mrb[44].mxu1 }
 0x681   :  { %4074 = vmatmul.mubr.bf16.gmra.mrb[196].mxu0 %v12491_v47  ;;  %v14714_v47 = vadd.f32 %v10769_v52, %v14662_v58 }
 0x682   :  { %4081 = vmatprep.mubr.bf16.mxu0 %v12492_v26  ;;  %v10771_v26 = vpop.f32.mrb[45].mxu1 }
 0x683   :  { %v4637_v38 = vpack.c.bf16 %v14714_v47, %v14711_v29  ;;  %v10772_v24 = vadd.f32 %v10771_v26, %v10770_v19  ;;  %v10773_v35 = vpop.f32.mrb[46].mxu1  ;;  %v12767_v29 = vld [vmem:[%s15466_s1 + $0x28] sm:$0xff]   ;;  %v12503_v47 = vld [vmem:[#allocation2 + $0x804] ss:$16 sps:$4 sm:$0xff]  }
 0x684   :  { %v10774_v1 = vpop.f32.mrb[47].mxu1 }
 0x685   :  { %v14719_v22 = vadd.f32 %v10772_v24, %v14665_v61  ;;  %v10776_v58 = vpop.f32.mrb[48].mxu1 }
 0x686   :  { %v10777_v39 = vpop.f32.mrb[49].mxu1 }
 0x687   :  { %v10778_v57 = vadd.f32 %v10777_v39, %v10776_v58  ;;  %v10779_v50 = vpop.f32.mrb[50].mxu1 }
 0x688   :  { %v10780_v31 = vpop.f32.mrb[51].mxu1 }
 0x689   :  { %4082 = vmatmul.mubr.bf16.gmra.mrb[200].mxu0 %v12494_v32  ;;  %v10775_v32 = vadd.f32 %v10774_v1, %v10773_v35  ;;  %v14727_v7 = vadd.f32 %v10778_v57, %v14678_v43 }
 0x68a   :  { %4089 = vmatprep.mubr.bf16.mxu0 %v12495_v46 }
 0x68b   :  { %v14722_v46 = vadd.f32 %v10775_v32, %v14669_v33  ;;  %v10782_v33 = vpop.f32.mrb[52].mxu1 }
 0x68c   :  { %v10783_v59 = vpop.f32.mrb[53].mxu1 }
 0x68d   :  { %v4638_v14 = vpack.c.bf16 %v14722_v46, %v14719_v22  ;;  %v10785_v53 = vpop.f32.mrb[54].mxu1  ;;  %v10784_v2 = vadd.f32 %v10783_v59, %v10782_v33  ;;  %v12504_v33 = vld [vmem:[#allocation2 + $0x828] ss:$16 sps:$4 sm:$0xff]   ;;  %v12512_v59 = vld [vmem:[#allocation2 + $0x84c] ss:$16 sps:$4 sm:$0xff]   ;;  %v12769_v22 = vld [vmem:[%s15466_s1 + $0x30] sm:$0xff]  }
 0x68e   :  { %v10786_v60 = vpop.f32.mrb[55].mxu1  ;;  %v12770_v46 = vld [vmem:[%s15466_s1 + $0x78] sm:$0xff]  }
 0x68f   :  { %v10787_v42 = vadd.f32 %v10786_v60, %v10785_v53  ;;  %v14735_v0 = vadd.f32 %v10784_v2, %v14682_v55  ;;  %v12516_v53 = vld [vmem:[#allocation2 + $0x868] ss:$16 sps:$4 sm:$0xff]  }
 0x691   :  { %4090 = vmatmul.mubr.bf16.gmra.mrb[204].mxu0 %v12497_v11  ;;  %v10781_v11 = vadd.f32 %v10780_v31, %v10779_v50  ;;  %v14738_v49 = vadd.f32 %v10787_v42, %v14684_v16  ;;  %v12498_v50 = vld [vmem:[#allocation2 + $0x808] ss:$16 sps:$4 sm:$0xff]   ;;  %v12500_v31 = vld [vmem:[#allocation2 + $0x80c] ss:$16 sps:$4 sm:$0xff]  }
 0x692   :  { %5107 = vmatprep.mubr.bf16.mxu1 %v12500_v31 }
 0x693   :  { %v14730_v63 = vadd.f32 %v10781_v11, %v14680_v62  ;;  %v4640_v43 = vpack.c.bf16 %v14738_v49, %v14735_v0  ;;  %v10788_v62 = vpop.f32.mrb[56].mxu1  ;;  %5108 = vmatmul.mubr.bf16.vlgmr.msra.gmra.mrb[64].mxu1 %v12498_v50  ;;  %v12506_v11 = vld [vmem:[#allocation2 + $0x82c] ss:$16 sps:$4 sm:$0xff]   ;;  %v12509_v49 = vld [vmem:[#allocation2 + $0x820] ss:$16 sps:$4 sm:$0xff]  }
 0x694   :  { %v10789_v20 = vpop.f32.mrb[57].mxu1  ;;  %5115 = vmatprep.mubr.bf16.mxu1 %v12506_v11  ;;  %v12530_v50 = vld [vmem:[#allocation2 + $0x8ac] ss:$16 sps:$4 sm:$0xff]   ;;  %v12528_v11 = vld [vmem:[#allocation2 + $0x8a8] ss:$16 sps:$4 sm:$0xff]  }
 0x695   :  { %v4639_v61 = vpack.c.bf16 %v14730_v63, %v14727_v7  ;;  %v10791_v9 = vpop.f32.mrb[58].mxu1  ;;  %v10790_v12 = vadd.f32 %v10789_v20, %v10788_v62  ;;  %v12524_v20 = vld [vmem:[#allocation2 + $0x88c] ss:$16 sps:$4 sm:$0xff]   ;;  %v12501_v7 = vld [vmem:[#allocation2 + $0x800] ss:$16 sps:$4 sm:$0xff]  }
 0x696   :  { %v10792_v15 = vpop.f32.mrb[59].mxu1  ;;  %v12771_v63 = vld [vmem:[%s15466_s1 + $0x38] sm:$0xff]  }
 0x697   :  { %v10793_v52 = vadd.f32 %v10792_v15, %v10791_v9  ;;  %v14743_v19 = vadd.f32 %v10790_v12, %v14686_v44  ;;  %v10794_v16 = vpop.f32.mrb[60].mxu1  ;;  %v12522_v12 = vld [vmem:[#allocation2 + $0x888] ss:$16 sps:$4 sm:$0xff]  }
 0x698   :  { %v10795_v24 = vpop.f32.mrb[61].mxu1 }
 0x699   :  { %v14746_v26 = vadd.f32 %v10793_v52, %v14688_v45  ;;  %v10797_v35 = vpop.f32.mrb[62].mxu1  ;;  %v10796_v1 = vadd.f32 %v10795_v24, %v10794_v16  ;;  %v4644_v45 = vld [vmem:[#allocation5 + $0xe] sm:$0x3] }
 0x69a   :  { %v10798_v32 = vpop.f32.mrb[63].mxu1  ;;  %12052 = vmatprep.subr.msk.bf16.mxu0 %vm1338_vm0, %v4644_v45 }
 0x69b   :  { %v4641_v55 = vpack.c.bf16 %v14746_v26, %v14743_v19  ;;  %v10799_v58 = vadd.f32 %v10798_v32, %v10797_v35  ;;  %v14751_v39 = vadd.f32 %v10796_v1, %v14690_v30  ;;  %5116 = vmatmul.mubr.bf16.gmra.mrb[68].mxu1 %v12504_v33  ;;  %v12510_v30 = vld [vmem:[#allocation2 + $0x848] ss:$16 sps:$4 sm:$0xff]   ;;  %v12515_v19 = vld [vmem:[#allocation2 + $0x840] ss:$16 sps:$4 sm:$0xff]   ;;  %v12519_v26 = vld [vmem:[#allocation2 + $0x864] ss:$16 sps:$4 sm:$0xff]  }
 0x69c   :  { %5123 = vmatprep.mubr.bf16.mxu1 %v12512_v59 }
 0x69d   :  { %v14754_v57 = vadd.f32 %v10799_v58, %v14692_v25  ;;  %v12518_v25 = vld [vmem:[#allocation2 + $0x86c] ss:$16 sps:$4 sm:$0xff]  }
 0x69f   :  { %v4642_v44 = vpack.c.bf16 %v14754_v57, %v14751_v39  ;;  %v12525_v39 = vld [vmem:[#allocation2 + $0x884] ss:$16 sps:$4 sm:$0xff]   ;;  %v12527_v57 = vld [vmem:[#allocation2 + $0x880] ss:$16 sps:$4 sm:$0xff]  }
 0x6a3   :  { %5124 = vmatmul.mubr.bf16.gmra.mrb[72].mxu1 %v12510_v30 }
 0x6a4   :  { %5131 = vmatprep.mubr.bf16.mxu1 %v12518_v25  ;;  %v4670_v25 = vsel %vm1338_vm0, %v4644_v45, 0 }
 0x6ab   :  { %5132 = vmatmul.mubr.bf16.gmra.mrb[76].mxu1 %v12516_v53 }
 0x6ac   :  { %5139 = vmatprep.mubr.bf16.mxu1 %v12524_v20  ;;  %v12534_v20 = vld [vmem:[#allocation2 + $0x8c8] ss:$16 sps:$4 sm:$0xff]  }
 0x6b3   :  { %5140 = vmatmul.mubr.bf16.gmra.mrb[80].mxu1 %v12522_v12 }
 0x6b4   :  { %5147 = vmatprep.mubr.bf16.mxu1 %v12530_v50 }
 0x6bb   :  { %5148 = vmatmul.mubr.bf16.gmra.mrb[84].mxu1 %v12528_v11 }
 0x72c   :  { %v10615_v2 = vpop.f32.mrb[176].mxu0 }
 0x72d   :  { %v10616_v60 = vpop.f32.mrb[177].mxu0 }
 0x72e   :  { %v10617_v42 = vadd.f32 %v10616_v60, %v10615_v2  ;;  %v10618_v62 = vpop.f32.mrb[178].mxu0 }
 0x72f   :  { %v10619_v9 = vpop.f32.mrb[179].mxu0 }
 0x730   :  { %v4036_v15 = vadd.f32 %v10617_v42, %v14590_v6  ;;  %v10620_v52 = vadd.f32 %v10619_v9, %v10618_v62  ;;  %v12536_v42 = vld [vmem:[#allocation2 + $0x8cc] ss:$16 sps:$4 sm:$0xff]  }
 0x731   :  { %5155 = vmatprep.mubr.bf16.mxu1 %v12536_v42 }
 0x732   :  { %v4039_v16 = vadd.f32 %v10620_v52, %v14593_v28  ;;  %5156 = vmatmul.mubr.bf16.gmra.mrb[88].mxu1 %v12534_v20 }
 0x734   :  { %v4098_v24 = vpack.c.bf16 %v4039_v16, %v4036_v15  ;;  %v10621_v35 = vpop.f32.mrb[180].mxu0 }
 0x735   :  { %v10622_v1 = vpop.f32.mrb[181].mxu0 }
 0x736   :  { %v10623_v32 = vadd.f32 %v10622_v1, %v10621_v35  ;;  %v10624_v58 = vpop.f32.mrb[182].mxu0  ;;  %11305 = vmatprep.mubr.msk.bf16.mxu0 %vm1313_vm1, %v4098_v24  ;;  %v12542_v35 = vld [vmem:[#allocation2 + $0x8ec] ss:$16 sps:$4 sm:$0xff]  }
 0x737   :  { %v10625_v31 = vpop.f32.mrb[183].mxu0  ;;  %5163 = vmatprep.mubr.bf16.mxu1 %v12542_v35 }
 0x738   :  { %v4044_v33 = vadd.f32 %v10623_v32, %v14595_v5  ;;  %v10626_v59 = vadd.f32 %v10625_v31, %v10624_v58 }
 0x73a   :  { %v4047_v6 = vadd.f32 %v10626_v59, %v14598_v34  ;;  %v12756_v34 = vld [vmem:[%s15466_s1 + $0x40] sm:$0xff]  }
 0x73c   :  { %v4099_v30 = vpack.c.bf16 %v4047_v6, %v4044_v33  ;;  %v10627_v28 = vpop.f32.mrb[184].mxu0 }
 0x73d   :  { %v10628_v53 = vpop.f32.mrb[185].mxu0 }
 0x73e   :  { %v10629_v2 = vadd.f32 %v10628_v53, %v10627_v28  ;;  %v10630_v60 = vpop.f32.mrb[186].mxu0  ;;  %11306 = vmatmul.mubr.msk.bf16.vlgmr.msra.gmra.mrb[64].mxu0 %vm1313_vm1, %v4099_v30 }
 0x73f   :  { %v10631_v62 = vpop.f32.mrb[187].mxu0  ;;  %11322 = vmatpush3.bf16.msra.mxu0 %v4670_v25 }
 0x740   :  { %v4052_v5 = vadd.f32 %v10629_v2, %v14601_v10  ;;  %v10632_v9 = vadd.f32 %v10631_v62, %v10630_v60  ;;  %10809 = vmatprep.subr.bf16.mxu0 %v12756_v34  ;;  %v12540_v10 = vld [vmem:[#allocation2 + $0x8e8] ss:$16 sps:$4 sm:$0xff]  }
 0x741   :  { %5164 = vmatmul.mubr.bf16.gmra.mrb[92].mxu1 %v12540_v10 }
 0x742   :  { %v4055_v45 = vadd.f32 %v10632_v9, %v14604_v37 }
 0x744   :  { %v4100_v12 = vpack.c.bf16 %v4055_v45, %v4052_v5  ;;  %v10633_v15 = vpop.f32.mrb[188].mxu0 }
 0x745   :  { %v10634_v52 = vpop.f32.mrb[189].mxu0 }
 0x746   :  { %v10635_v16 = vadd.f32 %v10634_v52, %v10633_v15  ;;  %v10636_v24 = vpop.f32.mrb[190].mxu0  ;;  %11309 = vmatprep.mubr.msk.bf16.mxu0 %vm1313_vm1, %v4100_v12 }
 0x747   :  { %v10637_v1 = vpop.f32.mrb[191].mxu0 }
 0x748   :  { %v4060_v32 = vadd.f32 %v10635_v16, %v14606_v48  ;;  %v10638_v58 = vadd.f32 %v10637_v1, %v10636_v24 }
 0x74a   :  { %v4063_v50 = vadd.f32 %v10638_v58, %v14609_v3 }
 0x74c   :  { %v4101_v31 = vpack.c.bf16 %v4063_v50, %v4060_v32  ;;  %v10639_v37 = vpop.f32.mrb[192].mxu0 }
 0x74d   :  { %v10640_v11 = vpop.f32.mrb[193].mxu0 }
 0x74e   :  { %v10641_v33 = vadd.f32 %v10640_v11, %v10639_v37  ;;  %v10642_v59 = vpop.f32.mrb[194].mxu0  ;;  %11310 = vmatmul.mubr.msk.bf16.gmra.mrb[68].mxu0 %vm1313_vm1, %v4101_v31  ;;  %v12533_v37 = vld [vmem:[#allocation2 + $0x8a0] ss:$16 sps:$4 sm:$0xff]   ;;  %v12537_v11 = vld [vmem:[#allocation2 + $0x8c4] ss:$16 sps:$4 sm:$0xff]  }
 0x74f   :  { %v10643_v6 = vpop.f32.mrb[195].mxu0 }
 0x750   :  { %v4068_v30 = vadd.f32 %v10641_v33, %v14614_v21  ;;  %v10644_v28 = vadd.f32 %v10643_v6, %v10642_v59  ;;  %v12539_v33 = vld [vmem:[#allocation2 + $0x8c0] ss:$16 sps:$4 sm:$0xff]   ;;  %v12543_v59 = vld [vmem:[#allocation2 + $0x8e4] ss:$16 sps:$4 sm:$0xff]  }
 0x751   :  { %v12545_v6 = vld [vmem:[#allocation2 + $0x8e0] ss:$16 sps:$4 sm:$0xff]  }
 0x752   :  { %v4071_v25 = vadd.f32 %v10644_v28, %v14617_v36 }
 0x754   :  { %v4102_v53 = vpack.c.bf16 %v4071_v25, %v4068_v30  ;;  %v10645_v48 = vpop.f32.mrb[196].mxu0 }
 0x755   :  { %v10646_v2 = vpop.f32.mrb[197].mxu0 }
 0x756   :  { %v10647_v60 = vadd.f32 %v10646_v2, %v10645_v48  ;;  %v10648_v42 = vpop.f32.mrb[198].mxu0  ;;  %11313 = vmatprep.mubr.msk.bf16.mxu0 %vm1313_vm1, %v4102_v53 }
 0x757   :  { %v10649_v3 = vpop.f32.mrb[199].mxu0 }
 0x758   :  { %v4076_v62 = vadd.f32 %v10647_v60, %v14621_v18  ;;  %v10650_v20 = vadd.f32 %v10649_v3, %v10648_v42 }
 0x75a   :  { %v4079_v5 = vadd.f32 %v10650_v20, %v14624_v27 }
 0x75c   :  { %v4103_v9 = vpack.c.bf16 %v4079_v5, %v4076_v62  ;;  %v10651_v34 = vpop.f32.mrb[200].mxu0 }
 0x75d   :  { %v10652_v45 = vpop.f32.mrb[201].mxu0 }
 0x75e   :  { %v10653_v21 = vadd.f32 %v10652_v45, %v10651_v34  ;;  %v10654_v12 = vpop.f32.mrb[202].mxu0  ;;  %11314 = vmatmul.mubr.msk.bf16.gmra.mrb[72].mxu0 %vm1313_vm1, %v4103_v9 }
 0x75f   :  { %v10655_v36 = vpop.f32.mrb[203].mxu0 }
 0x760   :  { %v4084_v15 = vadd.f32 %v10653_v21, %v14629_v17  ;;  %v10656_v52 = vadd.f32 %v10655_v36, %v10654_v12  ;;  %v12757_v17 = vld [vmem:[%s15466_s1] sm:$0xff]  }
 0x762   :  { %v4087_v16 = vadd.f32 %v10656_v52, %v14632_v23  ;;  %v12758_v23 = vld [vmem:[%s15466_s1 + $0x48] sm:$0xff]  }
 0x764   :  { %v4104_v24 = vpack.c.bf16 %v4087_v16, %v4084_v15  ;;  %v10657_v35 = vpop.f32.mrb[204].mxu0 }
 0x765   :  { %v10658_v1 = vpop.f32.mrb[205].mxu0 }
 0x766   :  { %v10659_v18 = vadd.f32 %v10658_v1, %v10657_v35  ;;  %v10660_v10 = vpop.f32.mrb[206].mxu0  ;;  %11317 = vmatprep.mubr.msk.bf16.mxu0 %vm1313_vm1, %v4104_v24  ;;  %v10889_v30 = vpop.f32.mrb[64].mxu1 }
 0x767   :  { %v10661_v27 = vpop.f32.mrb[207].mxu0  ;;  %v10890_v28 = vpop.f32.mrb[65].mxu1 }
 0x768   :  { %v4092_v32 = vadd.f32 %v10659_v18, %v14636_v56  ;;  %v10662_v58 = vadd.f32 %v10661_v27, %v10660_v10  ;;  %v12759_v56 = vld [vmem:[%s15466_s1 + $0x8] sm:$0xff]   ;;  %v10891_v25 = vadd.f32 %v10890_v28, %v10889_v30  ;;  %v10892_v53 = vpop.f32.mrb[66].mxu1 }
 0x769   :  { %v10893_v48 = vpop.f32.mrb[67].mxu1 }
 0x76a   :  { %v4095_v50 = vadd.f32 %v10662_v58, %v14639_v41  ;;  %v12760_v41 = vld [vmem:[%s15466_s1 + $0x50] sm:$0xff]   ;;  %v10894_v2 = vadd.f32 %v10893_v48, %v10892_v53 }
 0x76c   :  { %v4105_v31 = vpack.c.bf16 %v4095_v50, %v4092_v32 }
 0x76e   :  { %11318 = vmatmul.mubr.msk.bf16.gmra.mrb[76].mxu0 %vm1313_vm1, %v4105_v31  ;;  %v10895_v60 = vpop.f32.mrb[68].mxu1 }
 0x76f   :  { %11323 = vmatprep.mubr.msk.bf16.mxu0 %vm1313_vm1, %v4635_v51  ;;  %v12763_v51 = vld [vmem:[%s15466_s1 + $0x18] sm:$0xff]   ;;  %v10896_v42 = vpop.f32.mrb[69].mxu1 }
 0x770   :  { %v10898_v3 = vpop.f32.mrb[70].mxu1  ;;  %v10897_v62 = vadd.f32 %v10896_v42, %v10895_v60 }
 0x771   :  { %v10899_v20 = vpop.f32.mrb[71].mxu1 }
 0x772   :  { %v10900_v5 = vadd.f32 %v10899_v20, %v10898_v3 }
 0x776   :  { %11324 = vmatmul.mubr.msk.bf16.vlgmr.msra.gmra.mrb[64].mxu0 %vm1313_vm1, %v4636_v54  ;;  %v12766_v54 = vld [vmem:[%s15466_s1 + $0x68] sm:$0xff]   ;;  %v10901_v9 = vpop.f32.mrb[72].mxu1 }
 0x777   :  { %11327 = vmatprep.mubr.msk.bf16.mxu0 %vm1313_vm1, %v4637_v38  ;;  %10810 = vmatpush3.bf16.msra.mxu0 %v12757_v17  ;;  %v12768_v38 = vld [vmem:[%s15466_s1 + $0x70] sm:$0xff]   ;;  %v10902_v34 = vpop.f32.mrb[73].mxu1 }
 0x778   :  { %10811 = vmatprep.subr.bf16.mxu0 %v12758_v23  ;;  %v10904_v45 = vpop.f32.mrb[74].mxu1  ;;  %v10903_v21 = vadd.f32 %v10902_v34, %v10901_v9 }
 0x779   :  { %v10905_v12 = vpop.f32.mrb[75].mxu1 }
 0x77a   :  { %v10906_v36 = vadd.f32 %v10905_v12, %v10904_v45 }
 0x77b   :  { %10812 = vmatpush3.bf16.msra.mxu0 %v12759_v56 }
 0x77c   :  { %10813 = vmatprep.subr.bf16.mxu0 %v12760_v41 }
 0x77e   :  { %11328 = vmatmul.mubr.msk.bf16.gmra.mrb[68].mxu0 %vm1313_vm1, %v4638_v14  ;;  %v5181_v14 = vld [vmem:[#allocation5 + $0x10] sm:$0x3]  ;;  %v10907_v15 = vpop.f32.mrb[76].mxu1 }
 0x77f   :  { %11331 = vmatprep.mubr.msk.bf16.mxu0 %vm1313_vm1, %v4639_v61  ;;  %10814 = vmatpush3.bf16.msra.mxu0 %v12761_v40  ;;  %v12507_v61 = vld [vmem:[#allocation2 + $0x824] ss:$16 sps:$4 sm:$0xff]   ;;  %v5207_v0 = vsel %vm1338_vm0, %v5181_v14, 0  ;;  %v10908_v52 = vpop.f32.mrb[77].mxu1 }
 0x780   :  { %10815 = vmatprep.subr.bf16.mxu0 %v12762_v13  ;;  %v10910_v16 = vpop.f32.mrb[78].mxu1  ;;  %v10909_v24 = vadd.f32 %v10908_v52, %v10907_v15 }
 0x781   :  { %v10911_v35 = vpop.f32.mrb[79].mxu1 }
 0x782   :  { %v10912_v1 = vadd.f32 %v10911_v35, %v10910_v16 }
 0x783   :  { %10816 = vmatpush3.bf16.msra.mxu0 %v12763_v51 }
 0x784   :  { %10817 = vmatprep.subr.bf16.mxu0 %v12764_v4 }
 0x786   :  { %11332 = vmatmul.mubr.msk.bf16.gmra.mrb[72].mxu0 %vm1313_vm1, %v4640_v43  ;;  %v12513_v43 = vld [vmem:[#allocation2 + $0x844] ss:$16 sps:$4 sm:$0xff]   ;;  %v10913_v18 = vpop.f32.mrb[80].mxu1 }
 0x787   :  { %11335 = vmatprep.mubr.msk.bf16.mxu0 %vm1313_vm1, %v4641_v55  ;;  %10818 = vmatpush3.bf16.msra.mxu0 %v12765_v8  ;;  %v12521_v55 = vld [vmem:[#allocation2 + $0x860] ss:$16 sps:$4 sm:$0xff]   ;;  %v10914_v10 = vpop.f32.mrb[81].mxu1 }
 0x788   :  { %10819 = vmatprep.subr.bf16.mxu0 %v12766_v54  ;;  %v10916_v27 = vpop.f32.mrb[82].mxu1  ;;  %v14866_v32 = vadd.f32 %v10914_v10, %v10913_v18 }
 0x789   :  { %v10917_v58 = vpop.f32.mrb[83].mxu1 }
 0x78a   :  { %v14868_v50 = vadd.f32 %v10917_v58, %v10916_v27 }
 0x78b   :  { %10820 = vmatpush3.bf16.msra.mxu0 %v12767_v29 }
 0x78c   :  { %10821 = vmatprep.subr.bf16.mxu0 %v12768_v38 }
 0x78e   :  { %11336 = vmatmul.mubr.msk.bf16.gmra.mrb[76].mxu0 %vm1313_vm1, %v4642_v44  ;;  %v12531_v44 = vld [vmem:[#allocation2 + $0x8a4] ss:$16 sps:$4 sm:$0xff]   ;;  %v10919_v31 = vpop.f32.mrb[84].mxu1 }
 0x78f   :  { %10822 = vmatpush3.bf16.msra.mxu0 %v12769_v22  ;;  %5010 = vmatprep.mubr.bf16.mxu0 %v12503_v47  ;;  %v10920_v17 = vpop.f32.mrb[85].mxu1 }
 0x790   :  { %10823 = vmatprep.subr.bf16.mxu0 %v12770_v46  ;;  %v10922_v23 = vpop.f32.mrb[86].mxu1  ;;  %v14870_v56 = vadd.f32 %v10920_v17, %v10919_v31 }
 0x791   :  { %v10923_v41 = vpop.f32.mrb[87].mxu1 }
 0x792   :  { %v14872_v40 = vadd.f32 %v10923_v41, %v10922_v23 }
 0x793   :  { %10824 = vmatpush3.bf16.msra.mxu0 %v12771_v63 }
 0x794   :  { %12053 = vmatprep.subr.msk.bf16.mxu0 %vm1338_vm0, %v5181_v14 }
 0x796   :  { %5011 = vmatmul.mubr.bf16.vlgmr.msra.gmra.mrb[208].mxu0 %v12501_v7 }
 0x797   :  { %5018 = vmatprep.mubr.bf16.mxu0 %v12507_v61  ;;  %11340 = vmatpush3.bf16.msra.mxu0 %v5207_v0 }
 0x79e   :  { %5019 = vmatmul.mubr.bf16.gmra.mrb[212].mxu0 %v12509_v49 }
 0x79f   :  { %5026 = vmatprep.mubr.bf16.mxu0 %v12513_v43 }
 0x7a6   :  { %5027 = vmatmul.mubr.bf16.gmra.mrb[216].mxu0 %v12515_v19 }
 0x7a7   :  { %5034 = vmatprep.mubr.bf16.mxu0 %v12519_v26 }
 0x7ae   :  { %5035 = vmatmul.mubr.bf16.gmra.mrb[220].mxu0 %v12521_v55 }
 0x7af   :  { %5042 = vmatprep.mubr.bf16.mxu0 %v12525_v39 }
 0x7b6   :  { %5043 = vmatmul.mubr.bf16.gmra.mrb[224].mxu0 %v12527_v57 }
 0x7b7   :  { %5050 = vmatprep.mubr.bf16.mxu0 %v12531_v44 }
 0x7be   :  { %5051 = vmatmul.mubr.bf16.gmra.mrb[228].mxu0 %v12533_v37 }
 0x7bf   :  { %5058 = vmatprep.mubr.bf16.mxu0 %v12537_v11 }
 0x7c6   :  { %5059 = vmatmul.mubr.bf16.gmra.mrb[232].mxu0 %v12539_v33 }
 0x7c7   :  { %5066 = vmatprep.mubr.bf16.mxu0 %v12543_v59 }
 0x7ce   :  { %5067 = vmatmul.mubr.bf16.gmra.mrb[236].mxu0 %v12545_v6 }
 0x805   :  { %v10925_v13 = vpop.f32.mrb[88].mxu1 }
 0x806   :  { %v10926_v51 = vpop.f32.mrb[89].mxu1 }
 0x807   :  { %v10928_v4 = vpop.f32.mrb[90].mxu1  ;;  %v14874_v8 = vadd.f32 %v10926_v51, %v10925_v13 }
 0x808   :  { %v10929_v54 = vpop.f32.mrb[91].mxu1 }
 0x809   :  { %v14876_v29 = vadd.f32 %v10929_v54, %v10928_v4 }
 0x814   :  { %v10931_v47 = vpop.f32.mrb[92].mxu1 }
 0x815   :  { %v10932_v38 = vpop.f32.mrb[93].mxu1 }
 0x816   :  { %v10934_v22 = vpop.f32.mrb[94].mxu1  ;;  %v14878_v46 = vadd.f32 %v10932_v38, %v10931_v47 }
 0x817   :  { %v10935_v14 = vpop.f32.mrb[95].mxu1 }
 0x818   :  { %v14880_v7 = vadd.f32 %v10935_v14, %v10934_v22 }
 0x869   :  { %v10825_v63 = vpop.f32.mrb[208].mxu0 }
 0x86a   :  { %v10826_v61 = vpop.f32.mrb[209].mxu0 }
 0x86b   :  { %v10827_v0 = vadd.f32 %v10826_v61, %v10825_v63  ;;  %v10828_v49 = vpop.f32.mrb[210].mxu0 }
 0x86c   :  { %v10829_v43 = vpop.f32.mrb[211].mxu0 }
 0x86d   :  { %v5110_v19 = vadd.f32 %v10891_v25, %v10827_v0  ;;  %v10830_v26 = vadd.f32 %v10829_v43, %v10828_v49 }
 0x86f   :  { %v5113_v55 = vadd.f32 %v10894_v2, %v10830_v26 }
 0x871   :  { %v5172_v39 = vpack.c.bf16 %v5113_v55, %v5110_v19  ;;  %v10831_v57 = vpop.f32.mrb[212].mxu0 }
 0x872   :  { %v10832_v44 = vpop.f32.mrb[213].mxu0 }
 0x873   :  { %v10833_v37 = vadd.f32 %v10832_v44, %v10831_v57  ;;  %v10834_v11 = vpop.f32.mrb[214].mxu0  ;;  %11341 = vmatprep.mubr.msk.bf16.mxu0 %vm1313_vm1, %v5172_v39 }
 0x874   :  { %v10835_v33 = vpop.f32.mrb[215].mxu0 }
 0x875   :  { %v5118_v59 = vadd.f32 %v10897_v62, %v10833_v37  ;;  %v10836_v6 = vadd.f32 %v10835_v33, %v10834_v11  ;;  %v12548_v11 = vld [vmem:[#allocation8] sm:$0xff]  }
 0x876   :  { %11373 = vmatprep.mubr.bf16.mxu1 %v12548_v11 }
 0x877   :  { %v5121_v30 = vadd.f32 %v10900_v5, %v10836_v6 }
 0x879   :  { %v5173_v28 = vpack.c.bf16 %v5121_v30, %v5118_v59  ;;  %v10837_v53 = vpop.f32.mrb[216].mxu0 }
 0x87a   :  { %v10838_v48 = vpop.f32.mrb[217].mxu0 }
 0x87b   :  { %v10839_v60 = vadd.f32 %v10838_v48, %v10837_v53  ;;  %v10840_v42 = vpop.f32.mrb[218].mxu0  ;;  %11342 = vmatmul.mubr.msk.bf16.vlgmr.msra.gmra.mrb[64].mxu0 %vm1313_vm1, %v5173_v28 }
 0x87c   :  { %v10841_v25 = vpop.f32.mrb[219].mxu0 }
 0x87d   :  { %v5126_v2 = vadd.f32 %v10903_v21, %v10839_v60  ;;  %v10842_v3 = vadd.f32 %v10841_v25, %v10840_v42 }
 0x87f   :  { %v5129_v20 = vadd.f32 %v10906_v36, %v10842_v3 }
 0x881   :  { %v5174_v9 = vpack.c.bf16 %v5129_v20, %v5126_v2  ;;  %v10843_v34 = vpop.f32.mrb[220].mxu0 }
 0x882   :  { %v10844_v45 = vpop.f32.mrb[221].mxu0 }
 0x883   :  { %v10845_v12 = vadd.f32 %v10844_v45, %v10843_v34  ;;  %v10846_v15 = vpop.f32.mrb[222].mxu0  ;;  %11345 = vmatprep.mubr.msk.bf16.mxu0 %vm1313_vm1, %v5174_v9 }
 0x884   :  { %v10847_v62 = vpop.f32.mrb[223].mxu0 }
 0x885   :  { %v5134_v5 = vadd.f32 %v10909_v24, %v10845_v12  ;;  %v10848_v52 = vadd.f32 %v10847_v62, %v10846_v15 }
 0x887   :  { %v5137_v16 = vadd.f32 %v10912_v1, %v10848_v52 }
 0x889   :  { %v5175_v35 = vpack.c.bf16 %v5137_v16, %v5134_v5  ;;  %v10849_v18 = vpop.f32.mrb[224].mxu0 }
 0x88a   :  { %v10850_v10 = vpop.f32.mrb[225].mxu0 }
 0x88b   :  { %v10851_v27 = vadd.f32 %v10850_v10, %v10849_v18  ;;  %v10852_v58 = vpop.f32.mrb[226].mxu0  ;;  %11346 = vmatmul.mubr.msk.bf16.gmra.mrb[68].mxu0 %vm1313_vm1, %v5175_v35 }
 0x88c   :  { %v10853_v21 = vpop.f32.mrb[227].mxu0 }
 0x88d   :  { %v5142_v36 = vadd.f32 %v14866_v32, %v10851_v27  ;;  %v10854_v31 = vadd.f32 %v10853_v21, %v10852_v58 }
 0x88f   :  { %v5145_v17 = vadd.f32 %v14868_v50, %v10854_v31 }
 0x891   :  { %v5176_v23 = vpack.c.bf16 %v5145_v17, %v5142_v36  ;;  %v10855_v41 = vpop.f32.mrb[228].mxu0 }
 0x892   :  { %v10856_v13 = vpop.f32.mrb[229].mxu0 }
 0x893   :  { %v10857_v51 = vadd.f32 %v10856_v13, %v10855_v41  ;;  %v10858_v24 = vpop.f32.mrb[230].mxu0  ;;  %11349 = vmatprep.mubr.msk.bf16.mxu0 %vm1313_vm1, %v5176_v23 }
 0x894   :  { %v10859_v1 = vpop.f32.mrb[231].mxu0 }
 0x895   :  { %v5150_v4 = vadd.f32 %v14870_v56, %v10857_v51  ;;  %v10860_v54 = vadd.f32 %v10859_v1, %v10858_v24 }
 0x897   :  { %v5153_v47 = vadd.f32 %v14872_v40, %v10860_v54 }
 0x899   :  { %v5177_v38 = vpack.c.bf16 %v5153_v47, %v5150_v4  ;;  %v10861_v22 = vpop.f32.mrb[232].mxu0 }
 0x89a   :  { %v10862_v14 = vpop.f32.mrb[233].mxu0 }
 0x89b   :  { %v10863_v32 = vadd.f32 %v10862_v14, %v10861_v22  ;;  %v10864_v63 = vpop.f32.mrb[234].mxu0  ;;  %11350 = vmatmul.mubr.msk.bf16.gmra.mrb[72].mxu0 %vm1313_vm1, %v5177_v38 }
 0x89c   :  { %v10865_v50 = vpop.f32.mrb[235].mxu0 }
 0x89d   :  { %v5158_v61 = vadd.f32 %v14874_v8, %v10863_v32  ;;  %v10866_v0 = vadd.f32 %v10865_v50, %v10864_v63  ;;  %v12546_v8 = vld [vmem:[#allocation8 + $0x10] sm:$0xff]  }
 0x89f   :  { %v5161_v49 = vadd.f32 %v14876_v29, %v10866_v0  ;;  %v14898_v29 = vld [vmem:[#allocation7] ss:$0 sm:$0xff] }
 0x8a1   :  { %v5178_v43 = vpack.c.bf16 %v5161_v49, %v5158_v61  ;;  %v10867_v19 = vpop.f32.mrb[236].mxu0 }
 0x8a2   :  { %v10868_v26 = vpop.f32.mrb[237].mxu0 }
 0x8a3   :  { %v10869_v56 = vadd.f32 %v10868_v26, %v10867_v19  ;;  %v10870_v55 = vpop.f32.mrb[238].mxu0  ;;  %11353 = vmatprep.mubr.msk.bf16.mxu0 %vm1313_vm1, %v5178_v43 }
 0x8a4   :  { %v10871_v40 = vpop.f32.mrb[239].mxu0 }
 0x8a5   :  { %v5166_v39 = vadd.f32 %v14878_v46, %v10869_v56  ;;  %v10872_v57 = vadd.f32 %v10871_v40, %v10870_v55 }
 0x8a7   :  { %v5169_v44 = vadd.f32 %v14880_v7, %v10872_v57 }
 0x8a9   :  { %v5179_v37 = vpack.c.bf16 %v5169_v44, %v5166_v39 }
 0x8ab   :  { %11354 = vmatmul.mubr.msk.bf16.gmra.mrb[76].mxu0 %vm1313_vm1, %v5179_v37 }
 0x8ac   :  { %11393 = vmatprep.mubr.bf16.mxu0 %v12546_v8 }
 0x94e   :  { %v11343_v33 = vpop.f32.mrb[64].mxu0 }
 0x94f   :  { %v5331_v59 = vadd.f32 %v11343_v33, %v14898_v29  ;;  %v5243_v6 = vpop.f32.mrb[65].mxu0 }
 0x950   :  { %v5329_v30 = vadd.f32 %v14898_v29, %v5243_v6  ;;  %v11344_v28 = vpop.f32.mrb[66].mxu0 }
 0x951   :  { %v5363_v46 = vmin.f32 %v5331_v59, 0.0  ;;  %v5332_v53 = vadd.f32 %v11344_v28, %v14898_v29  ;;  %v5246_v7 = vpop.f32.mrb[67].mxu0  ;;  %vm5347_vm2 = vcmp.gt.f32.partialorder %v5331_v59, 0.0 }
 0x952   :  { %v5361_v48 = vmin.f32 %v5329_v30, 0.0  ;;  %v5330_v60 = vadd.f32 %v14898_v29, %v5246_v7  ;;  %vm5345_vm3 = vcmp.gt.f32.partialorder %v5329_v30, 0.0 }
 0x953   :  { %v5381_v42 = vmul.f32 1.442695, %v5363_v46  ;;  %v5364_v25 = vmin.f32 %v5332_v53, 0.0  ;;  %vm5348_vm4 = vcmp.gt.f32.partialorder %v5332_v53, 0.0 }
 0x954   :  { %v5377_v2 = vmul.f32 1.442695, %v5361_v48  ;;  %v5362_v3 = vmin.f32 %v5330_v60, 0.0  ;;  %vm5346_vm5 = vcmp.gt.f32.partialorder %v5330_v60, 0.0 }
 0x955   :  { %12640 = vpow2.f32 %v5381_v42  ;;  %v5383_v20 = vmul.f32 1.442695, %v5364_v25 }
 0x956   :  { %12642 = vpow2.f32 %v5377_v2  ;;  %v5379_v9 = vmul.f32 1.442695, %v5362_v3 }
 0x957   :  { %12644 = vpow2.f32 %v5383_v20 }
 0x958   :  { %12646 = vpow2.f32 %v5379_v9 }
 0x95e   :  { %v11347_v34 = vpop.f32.mrb[68].mxu0 }
 0x95f   :  { %v12641_v45 = vpop.eup %12640  ;;  %v14905_v12 = vadd.f32 %v11347_v34, %v14898_v29  ;;  %v5259_v15 = vpop.f32.mrb[69].mxu0 }
 0x960   :  { %v12643_v62 = vpop.eup %12642  ;;  %v9529_v5 = vadd.f32 -1.0, %v12641_v45  ;;  %v14908_v52 = vadd.f32 %v14898_v29, %v5259_v15  ;;  %v11348_v16 = vpop.f32.mrb[70].mxu0 }
 0x961   :  { %v12645_v35 = vpop.eup %12644  ;;  %v9527_v18 = vadd.f32 -1.0, %v12643_v62  ;;  %v5367_v10 = vmin.f32 %v14905_v12, 0.0  ;;  %v5336_v27 = vadd.f32 %v11348_v16, %v14898_v29  ;;  %v5262_v58 = vpop.f32.mrb[71].mxu0  ;;  %vm5351_vm6 = vcmp.gt.f32.partialorder %v14905_v12, 0.0 }
 0x962   :  { %v12647_v21 = vpop.eup %12646  ;;  %v9530_v36 = vadd.f32 -1.0, %v12645_v35  ;;  %v5365_v31 = vmin.f32 %v14908_v52, 0.0  ;;  %v5427_v17 = vsel %vm5347_vm2, %v5331_v59, %v9529_v5  ;;  %v5334_v1 = vadd.f32 %v14898_v29, %v5262_v58 }
 0x963   :  { %v9528_v23 = vadd.f32 -1.0, %v12647_v21  ;;  %v5389_v41 = vmul.f32 1.442695, %v5367_v10  ;;  %v5368_v24 = vmin.f32 %v5336_v27, 0.0  ;;  %v5425_v4 = vsel %vm5345_vm3, %v5329_v30, %v9527_v18 }
 0x964   :  { %v5428_v13 = vsel %vm5348_vm4, %v5332_v53, %v9530_v36  ;;  %v5385_v51 = vmul.f32 1.442695, %v5365_v31  ;;  %v5366_v14 = vmin.f32 %v5334_v1, 0.0  ;;  %vm5352_vm7 = vcmp.gt.f32.partialorder %v5336_v27, 0.0 }
 0x965   :  { %v14914_v54 = vpack.c.bf16 %v5428_v13, %v5427_v17  ;;  %v5426_v47 = vsel %vm5346_vm5, %v5330_v60, %v9528_v23  ;;  %12648 = vpow2.f32 %v5389_v41  ;;  %v5391_v22 = vmul.f32 1.442695, %v5368_v24 }
 0x966   :  { %v14916_v38 = vpack.c.bf16 %v5426_v47, %v5425_v4  ;;  %12650 = vpow2.f32 %v5385_v51  ;;  %v5387_v32 = vmul.f32 1.442695, %v5366_v14  ;;  %vm5349_vm8 = vcmp.gt.f32.partialorder %v14908_v52, 0.0 }
 0x967   :  { %12652 = vpow2.f32 %v5391_v22  ;;  %vm5350_vm9 = vcmp.gt.f32.partialorder %v5334_v1, 0.0  ;;  %vm5605_vm2 = vcmask 261120   ;;  %vm13191_vm3 = vmmov 0  }
 0x968   :  { %11357 = vmatprep.subr.bf16.mxu1 %v14916_v38  ;;  %11377 = vmatprep.subr.bf16.mxu0 %v14916_v38  ;;  %12654 = vpow2.f32 %v5387_v32 }
 0x969   :  { %11358 = vmatpush3.bf16.msra.mxu1 %v14916_v38  ;;  %11378 = vmatpush3.bf16.msra.mxu0 %v14916_v38 }
 0x96a   :  { %11359 = vmatprep.subr.bf16.mxu1 %v14914_v54  ;;  %11379 = vmatprep.subr.bf16.mxu0 %v14914_v54 }
 0x96d   :  { %11360 = vmatpush3.bf16.msra.mxu1 %v14914_v54  ;;  %11380 = vmatpush3.bf16.msra.mxu0 %v14914_v54 }
 0x96e   :  { %v11351_v63 = vpop.f32.mrb[72].mxu0 }
 0x96f   :  { %v12649_v50 = vpop.eup %12648  ;;  %v14927_v61 = vadd.f32 %v11351_v63, %v14898_v29  ;;  %v5275_v0 = vpop.f32.mrb[73].mxu0 }
 0x970   :  { %v14930_v49 = vadd.f32 %v14898_v29, %v5275_v0  ;;  %v11352_v43 = vpop.f32.mrb[74].mxu0  ;;  %v12651_v19 = vpop.eup %12650  ;;  %v9533_v26 = vadd.f32 -1.0, %v12649_v50 }
 0x971   :  { %v5371_v56 = vmin.f32 %v14927_v61, 0.0  ;;  %v14934_v55 = vadd.f32 %v11352_v43, %v14898_v29  ;;  %v5278_v40 = vpop.f32.mrb[75].mxu0  ;;  %v12653_v39 = vpop.eup %12652  ;;  %v9531_v11 = vadd.f32 -1.0, %v12651_v19  ;;  %vm5355_vm10 = vcmp.gt.f32.partialorder %v14927_v61, 0.0 }
 0x972   :  { %v5369_v57 = vmin.f32 %v14930_v49, 0.0  ;;  %v14938_v44 = vadd.f32 %v14898_v29, %v5278_v40  ;;  %v9534_v37 = vadd.f32 -1.0, %v12653_v39  ;;  %v12655_v30 = vpop.eup %12654  ;;  %v5431_v28 = vsel %vm5351_vm6, %v14905_v12, %v9533_v26 }
 0x973   :  { %v5397_v8 = vmul.f32 1.442695, %v5371_v56  ;;  %v5372_v59 = vmin.f32 %v14934_v55, 0.0  ;;  %v9532_v7 = vadd.f32 -1.0, %v12655_v30  ;;  %v5429_v42 = vsel %vm5349_vm8, %v14908_v52, %v9531_v11  ;;  %v12551_v11 = vld [vmem:[#allocation8 + $0x38] sm:$0xff]   ;;  %v12557_v30 = vld [vmem:[#allocation10 + $0x18] sm:$0xff]  }
 0x974   :  { %v5393_v33 = vmul.f32 1.442695, %v5369_v57  ;;  %v5370_v6 = vmin.f32 %v14938_v44, 0.0  ;;  %v5432_v46 = vsel %vm5352_vm7, %v5336_v27, %v9534_v37  ;;  %vm5353_vm11 = vcmp.gt.f32.partialorder %v14930_v49, 0.0  ;;  %v12547_v57 = vld [vmem:[#allocation8 + $0x18] sm:$0xff]   ;;  %v12550_v37 = vld [vmem:[#allocation8 + $0x30] sm:$0xff]  }
 0x975   :  { %12656 = vpow2.f32 %v5397_v8  ;;  %v14944_v53 = vpack.c.bf16 %v5432_v46, %v5431_v28  ;;  %v5399_v48 = vmul.f32 1.442695, %v5372_v59  ;;  %v5430_v25 = vsel %vm5350_vm9, %v5334_v1, %v9532_v7  ;;  %v12556_v8 = vld [vmem:[#allocation10 + $0x10] sm:$0xff]   ;;  %v12553_v59 = vld [vmem:[#allocation8 + $0x48] sm:$0xff]   ;;  %v12558_v28 = vld [vmem:[#allocation10] sm:$0xff]  }
 0x976   :  { %12658 = vpow2.f32 %v5393_v33  ;;  %v5395_v60 = vmul.f32 1.442695, %v5370_v6  ;;  %v14948_v2 = vpack.c.bf16 %v5430_v25, %v5429_v42  ;;  %vm5356_vm12 = vcmp.gt.f32.partialorder %v14934_v55, 0.0  ;;  %v12552_v33 = vld [vmem:[#allocation8 + $0x40] sm:$0xff]   ;;  %v12555_v46 = vld [vmem:[#allocation8 + $0x68] sm:$0xff]  }
 0x977   :  { %12660 = vpow2.f32 %v5399_v48  ;;  %vm5354_vm13 = vcmp.gt.f32.partialorder %v14938_v44, 0.0  ;;  %v12554_v6 = vld [vmem:[#allocation8 + $0x60] sm:$0xff]   ;;  %vm7752_vm9 = vcmask 1043456  }
 0x978   :  { %12662 = vpow2.f32 %v5395_v60  ;;  %11361 = vmatprep.subr.bf16.mxu1 %v14948_v2  ;;  %11381 = vmatprep.subr.bf16.mxu0 %v14948_v2 }
 0x979   :  { %11362 = vmatpush3.bf16.msra.mxu1 %v14948_v2  ;;  %11382 = vmatpush3.bf16.msra.mxu0 %v14948_v2 }
 0x97a   :  { %11363 = vmatprep.subr.bf16.mxu1 %v14944_v53  ;;  %11383 = vmatprep.subr.bf16.mxu0 %v14944_v53 }
 0x97d   :  { %11364 = vmatpush3.bf16.msra.mxu1 %v14944_v53  ;;  %11384 = vmatpush3.bf16.msra.mxu0 %v14944_v53 }
 0x97e   :  { %v11355_v3 = vpop.f32.mrb[76].mxu0 }
 0x97f   :  { %v12657_v20 = vpop.eup %12656  ;;  %v5343_v9 = vadd.f32 %v11355_v3, %v14898_v29  ;;  %v5291_v34 = vpop.f32.mrb[77].mxu0 }
 0x980   :  { %v12659_v45 = vpop.eup %12658  ;;  %v9537_v12 = vadd.f32 -1.0, %v12657_v20  ;;  %v5341_v15 = vadd.f32 %v14898_v29, %v5291_v34  ;;  %v11356_v62 = vpop.f32.mrb[78].mxu0 }
 0x981   :  { %v9535_v5 = vadd.f32 -1.0, %v12659_v45  ;;  %v5375_v52 = vmin.f32 %v5343_v9, 0.0  ;;  %v5344_v16 = vadd.f32 %v11356_v62, %v14898_v29  ;;  %v5294_v35 = vpop.f32.mrb[79].mxu0  ;;  %v12661_v18 = vpop.eup %12660  ;;  %vm5359_vm14 = vcmp.gt.f32.partialorder %v5343_v9, 0.0  ;;  %v12559_v62 = vld [vmem:[#allocation10 + $0x8] sm:$0xff]  }
 0x982   :  { %v5373_v10 = vmin.f32 %v5341_v15, 0.0  ;;  %v5342_v27 = vadd.f32 %v14898_v29, %v5294_v35  ;;  %v12663_v58 = vpop.eup %12662  ;;  %v9538_v21 = vadd.f32 -1.0, %v12661_v18  ;;  %v5435_v31 = vsel %vm5355_vm10, %v14927_v61, %v9537_v12 }
 0x983   :  { %v5405_v36 = vmul.f32 1.442695, %v5375_v52  ;;  %v9536_v17 = vadd.f32 -1.0, %v12663_v58  ;;  %v5376_v41 = vmin.f32 %v5344_v16, 0.0  ;;  %v5433_v13 = vsel %vm5353_vm11, %v14930_v49, %v9535_v5  ;;  %v12560_v5 = vld [vmem:[#allocation8 + $0x20] sm:$0xff]   ;;  %v12562_v58 = vld [vmem:[#allocation10 + $0x20] sm:$0xff]  }
 0x984   :  { %v5401_v23 = vmul.f32 1.442695, %v5373_v10  ;;  %v5436_v51 = vsel %vm5356_vm12, %v14934_v55, %v9538_v21  ;;  %v5374_v24 = vmin.f32 %v5342_v27, 0.0  ;;  %vm5360_vm15 = vcmp.gt.f32.partialorder %v5344_v16, 0.0  ;;  %v12561_v21 = vld [vmem:[#allocation8 + $0x28] sm:$0xff]  }
 0x985   :  { %12664 = vpow2.f32 %v5405_v36  ;;  %v14969_v1 = vpack.c.bf16 %v5436_v51, %v5435_v31  ;;  %v5434_v29 = vsel %vm5354_vm13, %v14938_v44, %v9536_v17  ;;  %v5407_v4 = vmul.f32 1.442695, %v5376_v41  ;;  %v12549_v44 = vld [vmem:[#allocation8 + $0x8] sm:$0xff]   ;;  %v12563_v36 = vld [vmem:[#allocation10 + $0x28] sm:$0xff]   ;;  %v12564_v31 = vld [vmem:[#allocation10 + $0x30] sm:$0xff]  }
 0x986   :  { %12666 = vpow2.f32 %v5401_v23  ;;  %v14972_v47 = vpack.c.bf16 %v5434_v29, %v5433_v13  ;;  %v5403_v22 = vmul.f32 1.442695, %v5374_v24  ;;  %vm5357_vm0 = vcmp.gt.f32.partialorder %v5341_v15, 0.0 }
 0x987   :  { %12668 = vpow2.f32 %v5407_v4  ;;  %vm5358_vm1 = vcmp.gt.f32.partialorder %v5342_v27, 0.0  ;;  %vm7748_vm10 = vcmask 64512   ;;  %vm8731_vm12 = vcmask 1040384  }
 0x988   :  { %12670 = vpow2.f32 %v5403_v22  ;;  %11365 = vmatprep.subr.bf16.mxu1 %v14972_v47  ;;  %11385 = vmatprep.subr.bf16.mxu0 %v14972_v47  ;;  %vm8727_vm13 = vcmask 15360  }
 0x989   :  { %11366 = vmatpush3.bf16.msra.mxu1 %v14972_v47  ;;  %11386 = vmatpush3.bf16.msra.mxu0 %v14972_v47 }
 0x98a   :  { %11367 = vmatprep.subr.bf16.mxu1 %v14969_v1  ;;  %11387 = vmatprep.subr.bf16.mxu0 %v14969_v1 }
 0x98d   :  { %11368 = vmatpush3.bf16.msra.mxu1 %v14969_v1  ;;  %11388 = vmatpush3.bf16.msra.mxu0 %v14969_v1 }
 0x98f   :  { %v12665_v14 = vpop.eup %12664 }
 0x990   :  { %v12667_v32 = vpop.eup %12666  ;;  %v9541_v63 = vadd.f32 -1.0, %v12665_v14 }
 0x991   :  { %v12669_v50 = vpop.eup %12668  ;;  %v9539_v61 = vadd.f32 -1.0, %v12667_v32 }
 0x992   :  { %v12671_v0 = vpop.eup %12670  ;;  %v9542_v49 = vadd.f32 -1.0, %v12669_v50  ;;  %v5439_v19 = vsel %vm5359_vm14, %v5343_v9, %v9541_v63  ;;  %v12565_v50 = vld [vmem:[#allocation10 + $0x38] sm:$0xff]  }
 0x993   :  { %v9540_v43 = vadd.f32 -1.0, %v12671_v0  ;;  %v5437_v56 = vsel %vm5357_vm0, %v5341_v15, %v9539_v61  ;;  %v12566_v61 = vld [vmem:[#allocation10 + $0x40] sm:$0xff]   ;;  %v12567_v0 = vld [vmem:[#allocation10 + $0x48] sm:$0xff]   ;;  %vm9098_vm0 = vcmask 41984  }
 0x994   :  { %v5440_v26 = vsel %vm5360_vm15, %v5344_v16, %v9542_v49  ;;  %v12568_v49 = vld [vmem:[#allocation8 + $0x50] sm:$0xff]  }
 0x995   :  { %v14982_v55 = vpack.c.bf16 %v5440_v26, %v5439_v19  ;;  %v5438_v40 = vsel %vm5358_vm1, %v5342_v27, %v9540_v43  ;;  %v12570_v43 = vld [vmem:[#allocation10 + $0x50] sm:$0xff]   ;;  %v12569_v19 = vld [vmem:[#allocation8 + $0x58] sm:$0xff]   ;;  %v12571_v26 = vld [vmem:[#allocation10 + $0x58] sm:$0xff]  }
 0x996   :  { %v14984_v39 = vpack.c.bf16 %v5438_v40, %v5437_v56  ;;  %v12572_v56 = vld [vmem:[#allocation10 + $0x60] sm:$0xff]  }
 0x998   :  { %11369 = vmatprep.subr.bf16.mxu1 %v14984_v39  ;;  %11389 = vmatprep.subr.bf16.mxu0 %v14984_v39 }
 0x999   :  { %11370 = vmatpush3.bf16.msra.mxu1 %v14984_v39  ;;  %11390 = vmatpush3.bf16.msra.mxu0 %v14984_v39 }
 0x99a   :  { %11371 = vmatprep.subr.bf16.mxu1 %v14982_v55  ;;  %11391 = vmatprep.subr.bf16.mxu0 %v14982_v55 }
 0x99d   :  { %11372 = vmatpush3.bf16.msra.mxu1 %v14982_v55  ;;  %11392 = vmatpush3.bf16.msra.mxu0 %v14982_v55 }
 0x99e   :  { %11441 = vmatprep.subr.bf16.mxu0 %v14916_v38  ;;  %11397 = vmatprep.subr.bf16.mxu1 %v12556_v8 }
 0x9a0   :  { %11394 = vmatmul.mubr.bf16.vlgmr.msra.gmra.mrb[240].mxu0 %v12547_v57  ;;  %11374 = vmatmul.mubr.bf16.vlgmr.msra.gmra.mrb[96].mxu1 %v12549_v44 }
 0x9a1   :  { %11442 = vmatpush3.bf16.msra.mxu0 %v14916_v38  ;;  %11457 = vmatprep.mubr.bf16.mxu0 %v12550_v37 }
 0x9a2   :  { %11443 = vmatprep.subr.bf16.mxu0 %v14914_v54  ;;  %11398 = vmatpush3.bf16.msra.mxu1 %v12556_v8 }
 0x9a3   :  { %11399 = vmatprep.subr.bf16.mxu1 %v12557_v30 }
 0x9a5   :  { %11444 = vmatpush3.bf16.msra.mxu0 %v14914_v54 }
 0x9a6   :  { %11445 = vmatprep.subr.bf16.mxu0 %v14948_v2  ;;  %11400 = vmatpush3.bf16.msra.mxu1 %v12557_v30 }
 0x9a7   :  { %11405 = vmatprep.subr.bf16.mxu1 %v12558_v28 }
 0x9a9   :  { %11446 = vmatpush3.bf16.msra.mxu0 %v14948_v2 }
 0x9aa   :  { %11447 = vmatprep.subr.bf16.mxu0 %v14944_v53 }
 0x9ad   :  { %11448 = vmatpush3.bf16.msra.mxu0 %v14944_v53 }
 0x9ae   :  { %11449 = vmatprep.subr.bf16.mxu0 %v14972_v47 }
 0x9b1   :  { %11450 = vmatpush3.bf16.msra.mxu0 %v14972_v47 }
 0x9b2   :  { %11451 = vmatprep.subr.bf16.mxu0 %v14969_v1 }
 0x9b5   :  { %11452 = vmatpush3.bf16.msra.mxu0 %v14969_v1 }
 0x9b6   :  { %11453 = vmatprep.subr.bf16.mxu0 %v14984_v39 }
 0x9b9   :  { %11454 = vmatpush3.bf16.msra.mxu0 %v14984_v39 }
 0x9ba   :  { %11455 = vmatprep.subr.bf16.mxu0 %v14982_v55 }
 0x9bd   :  { %11456 = vmatpush3.bf16.msra.mxu0 %v14982_v55 }
 0x9be   :  { %11469 = vmatprep.subr.bf16.mxu0 %v14916_v38 }
 0x9c0   :  { %11458 = vmatmul.mubr.bf16.vlgmr.msra.gmra.mrb[244].mxu0 %v12551_v11 }
 0x9c1   :  { %11470 = vmatpush3.bf16.msra.mxu0 %v14916_v38  ;;  %11485 = vmatprep.mubr.bf16.mxu0 %v12552_v33  ;;  %v12576_v33 = vld [vmem:[#allocation8 + $0x80] sm:$0xff]  }
 0x9c2   :  { %11471 = vmatprep.subr.bf16.mxu0 %v14914_v54 }
 0x9c5   :  { %11472 = vmatpush3.bf16.msra.mxu0 %v14914_v54 }
 0x9c6   :  { %11473 = vmatprep.subr.bf16.mxu0 %v14948_v2 }
 0x9c9   :  { %11474 = vmatpush3.bf16.msra.mxu0 %v14948_v2 }
 0x9ca   :  { %11475 = vmatprep.subr.bf16.mxu0 %v14944_v53 }
 0x9cd   :  { %11476 = vmatpush3.bf16.msra.mxu0 %v14944_v53 }
 0x9ce   :  { %11477 = vmatprep.subr.bf16.mxu0 %v14972_v47 }
 0x9d1   :  { %11478 = vmatpush3.bf16.msra.mxu0 %v14972_v47 }
 0x9d2   :  { %11479 = vmatprep.subr.bf16.mxu0 %v14969_v1 }
 0x9d5   :  { %11480 = vmatpush3.bf16.msra.mxu0 %v14969_v1 }
 0x9d6   :  { %11481 = vmatprep.subr.bf16.mxu0 %v14984_v39 }
 0x9d9   :  { %11482 = vmatpush3.bf16.msra.mxu0 %v14984_v39 }
 0x9da   :  { %11483 = vmatprep.subr.bf16.mxu0 %v14982_v55 }
 0x9dd   :  { %11484 = vmatpush3.bf16.msra.mxu0 %v14982_v55 }
 0x9de   :  { %11525 = vmatprep.subr.bf16.mxu0 %v14916_v38 }
 0x9e0   :  { %11486 = vmatmul.mubr.bf16.vlgmr.msra.gmra.mrb[248].mxu0 %v12553_v59  ;;  %v12577_v59 = vld [vmem:[#allocation8 + $0x88] sm:$0xff]  }
 0x9e1   :  { %11526 = vmatpush3.bf16.msra.mxu0 %v14916_v38  ;;  %11541 = vmatprep.mubr.bf16.mxu0 %v12554_v6 }
 0x9e2   :  { %11527 = vmatprep.subr.bf16.mxu0 %v14914_v54 }
 0x9e5   :  { %11528 = vmatpush3.bf16.msra.mxu0 %v14914_v54 }
 0x9e6   :  { %11529 = vmatprep.subr.bf16.mxu0 %v14948_v2 }
 0x9e9   :  { %11530 = vmatpush3.bf16.msra.mxu0 %v14948_v2 }
 0x9ea   :  { %11531 = vmatprep.subr.bf16.mxu0 %v14944_v53 }
 0x9ed   :  { %11532 = vmatpush3.bf16.msra.mxu0 %v14944_v53 }
 0x9ee   :  { %11533 = vmatprep.subr.bf16.mxu0 %v14972_v47 }
 0x9f1   :  { %11534 = vmatpush3.bf16.msra.mxu0 %v14972_v47 }
 0x9f2   :  { %11535 = vmatprep.subr.bf16.mxu0 %v14969_v1 }
 0x9f5   :  { %11536 = vmatpush3.bf16.msra.mxu0 %v14969_v1 }
 0x9f6   :  { %11537 = vmatprep.subr.bf16.mxu0 %v14984_v39 }
 0x9f9   :  { %11538 = vmatpush3.bf16.msra.mxu0 %v14984_v39 }
 0x9fa   :  { %11539 = vmatprep.subr.bf16.mxu0 %v14982_v55 }
 0x9fd   :  { %11540 = vmatpush3.bf16.msra.mxu0 %v14982_v55 }
 0x9fe   :  { %11581 = vmatprep.subr.bf16.mxu0 %v14916_v38 }
 0xa00   :  { %11542 = vmatmul.mubr.bf16.vlgmr.msra.gmra.mrb[252].mxu0 %v12555_v46 }
 0xa01   :  { %11582 = vmatpush3.bf16.msra.mxu0 %v14916_v38  ;;  %11597 = vmatprep.mubr.bf16.mxu0 %v12576_v33  ;;  %v12585_v33 = vld [vmem:[#allocation14 + $0x18] sm:$0xff]  }
 0xa02   :  { %11583 = vmatprep.subr.bf16.mxu0 %v14914_v54 }
 0xa05   :  { %11584 = vmatpush3.bf16.msra.mxu0 %v14914_v54 }
 0xa06   :  { %11585 = vmatprep.subr.bf16.mxu0 %v14948_v2 }
 0xa09   :  { %11586 = vmatpush3.bf16.msra.mxu0 %v14948_v2 }
 0xa0a   :  { %11587 = vmatprep.subr.bf16.mxu0 %v14944_v53 }
 0xa0d   :  { %11588 = vmatpush3.bf16.msra.mxu0 %v14944_v53 }
 0xa0e   :  { %11589 = vmatprep.subr.bf16.mxu0 %v14972_v47 }
 0xa11   :  { %11590 = vmatpush3.bf16.msra.mxu0 %v14972_v47 }
 0xa12   :  { %11591 = vmatprep.subr.bf16.mxu0 %v14969_v1 }
 0xa15   :  { %11592 = vmatpush3.bf16.msra.mxu0 %v14969_v1 }
 0xa16   :  { %11593 = vmatprep.subr.bf16.mxu0 %v14984_v39 }
 0xa19   :  { %11594 = vmatpush3.bf16.msra.mxu0 %v14984_v39 }
 0xa1a   :  { %11595 = vmatprep.subr.bf16.mxu0 %v14982_v55 }
 0xa1d   :  { %11596 = vmatpush3.bf16.msra.mxu0 %v14982_v55 }
 0xa20   :  { %11598 = vmatmul.mubr.bf16.vlgmr.msra.gmra.mrb[0].mxu0 %v12577_v59 }
 0xa73   :  { %v11395_v7 = vpop.f32.mrb[240].mxu0  ;;  %v11375_v48 = vpop.f32.mrb[96].mxu1 }
 0xa74   :  { %v5571_v60 = vpop.f32.mrb[241].mxu0  ;;  %v5499_v42 = vpop.f32.mrb[97].mxu1 }
 0xa75   :  { %v11396_v25 = vpop.f32.mrb[242].mxu0  ;;  %v11376_v3 = vpop.f32.mrb[98].mxu1 }
 0xa76   :  { %v5587_v20 = vpack.c.bf16 %v11396_v25, %v11395_v7  ;;  %v5574_v9 = vpop.f32.mrb[243].mxu0  ;;  %v5515_v34 = vpack.c.bf16 %v11376_v3, %v11375_v48  ;;  %v5502_v45 = vpop.f32.mrb[99].mxu1 }
 0xa77   :  { %v5586_v12 = vpack.c.bf16 %v5574_v9, %v5571_v60  ;;  %v5514_v15 = vpack.c.bf16 %v5502_v45, %v5499_v42  ;;  %v12573_v60 = vld [vmem:[#allocation10 + $0x68] sm:$0xff]   ;;  %v12574_v42 = vld [vmem:[#allocation8 + $0x70] sm:$0xff]  }
 0xa79   :  { %11401 = vmatprep.mubr.msk.bf16.mxu1 %vm5605_vm2, %v5586_v12 }
 0xa7a   :  { %11402 = vmatmul.mubr.msk.bf16.vlgmr.msra.gmra.mrb[100].mxu1 %vm5605_vm2, %v5587_v20 }
 0xa7b   :  { %11406 = vmatpush3.bf16.msra.mxu1 %v12558_v28  ;;  %11409 = vmatprep.mubr.msk.bf16.mxu1 %vm5605_vm2, %v5514_v15 }
 0xa7c   :  { %11407 = vmatprep.subr.bf16.mxu1 %v12559_v62 }
 0xa7f   :  { %11408 = vmatpush3.bf16.msra.mxu1 %v12559_v62  ;;  %v12581_v62 = vld [vmem:[#allocation10 + $0x88] sm:$0xff]  }
 0xa80   :  { %11413 = vmatprep.subr.bf16.mxu1 %v14916_v38 }
 0xa86   :  { %11410 = vmatmul.mubr.msk.bf16.vlgmr.msra.gmra.mrb[100].mxu1 %vm5605_vm2, %v5515_v34 }
 0xa87   :  { %11414 = vmatpush3.bf16.msra.mxu1 %v14916_v38  ;;  %11429 = vmatprep.mubr.bf16.mxu1 %v12560_v5  ;;  %v13190_v5 = vmov 0.0  }
 0xa88   :  { %11415 = vmatprep.subr.bf16.mxu1 %v14914_v54  ;;  %11633 = vmatprep.subr.bf16.mxu0 %v13190_v5 }
 0xa89   :  { %11637 = vmatprep.mubr.msk.bf16.mxu0 %vm13191_vm3, %v13190_v5 }
 0xa8b   :  { %11416 = vmatpush3.bf16.msra.mxu1 %v14914_v54 }
 0xa8c   :  { %11417 = vmatprep.subr.bf16.mxu1 %v14948_v2 }
 0xa8f   :  { %11418 = vmatpush3.bf16.msra.mxu1 %v14948_v2 }
 0xa90   :  { %11419 = vmatprep.subr.bf16.mxu1 %v14944_v53 }
 0xa93   :  { %11420 = vmatpush3.bf16.msra.mxu1 %v14944_v53  ;;  %v11459_v52 = vpop.f32.mrb[244].mxu0 }
 0xa94   :  { %11421 = vmatprep.subr.bf16.mxu1 %v14972_v47  ;;  %v5923_v16 = vpop.f32.mrb[245].mxu0 }
 0xa95   :  { %v11460_v35 = vpop.f32.mrb[246].mxu0 }
 0xa96   :  { %v5939_v18 = vpack.c.bf16 %v11460_v35, %v11459_v52  ;;  %v5926_v10 = vpop.f32.mrb[247].mxu0  ;;  %v12582_v52 = vld [vmem:[#allocation14] sm:$0xff]  }
 0xa97   :  { %11422 = vmatpush3.bf16.msra.mxu1 %v14972_v47  ;;  %v5938_v27 = vpack.c.bf16 %v5926_v10, %v5923_v16  ;;  %11634 = vmatpush3.bf16.msra.mxu0 %v12582_v52  ;;  %v9597_v16 = vld [vmem:[#allocation11] ss:$0 sm:$0xff] }
 0xa98   :  { %11423 = vmatprep.subr.bf16.mxu1 %v14969_v1  ;;  %11635 = vmatprep.subr.bf16.mxu0 %v13190_v5 }
 0xa9b   :  { %11424 = vmatpush3.bf16.msra.mxu1 %v14969_v1 }
 0xa9c   :  { %11425 = vmatprep.subr.bf16.mxu1 %v14984_v39 }
 0xa9f   :  { %11426 = vmatpush3.bf16.msra.mxu1 %v14984_v39 }
 0xaa0   :  { %11427 = vmatprep.subr.bf16.mxu1 %v14982_v55 }
 0xaa3   :  { %11428 = vmatpush3.bf16.msra.mxu1 %v14982_v55 }
 0xaa4   :  { %11433 = vmatprep.subr.bf16.mxu1 %v12562_v58 }
 0xaa6   :  { %11430 = vmatmul.mubr.bf16.vlgmr.msra.gmra.mrb[104].mxu1 %v12561_v21 }
 0xaa7   :  { %11434 = vmatpush3.bf16.msra.mxu1 %v12562_v58 }
 0xaa8   :  { %11435 = vmatprep.subr.bf16.mxu1 %v12563_v36 }
 0xaab   :  { %11436 = vmatpush3.bf16.msra.mxu1 %v12563_v36 }
 0xaac   :  { %11461 = vmatprep.subr.bf16.mxu1 %v12564_v31 }
 0xab3   :  { %v11487_v17 = vpop.f32.mrb[248].mxu0 }
 0xab4   :  { %v6067_v23 = vpop.f32.mrb[249].mxu0 }
 0xab5   :  { %v11488_v41 = vpop.f32.mrb[250].mxu0 }
 0xab6   :  { %v6083_v13 = vpack.c.bf16 %v11488_v41, %v11487_v17  ;;  %v6070_v51 = vpop.f32.mrb[251].mxu0 }
 0xab7   :  { %v6082_v24 = vpack.c.bf16 %v6070_v51, %v6067_v23 }
 0xad3   :  { %v11543_v40 = vpop.f32.mrb[252].mxu0 }
 0xad4   :  { %v6355_v57 = vpop.f32.mrb[253].mxu0 }
 0xad5   :  { %v11544_v44 = vpop.f32.mrb[254].mxu0 }
 0xad6   :  { %v6371_v37 = vpack.c.bf16 %v11544_v44, %v11543_v40  ;;  %v6358_v8 = vpop.f32.mrb[255].mxu0  ;;  %v6773_v44 = vld [vmem:[#allocation13] sm:$0xf] }
 0xad7   :  { %v6370_v11 = vpack.c.bf16 %v6358_v8, %v6355_v57  ;;  %v12583_v8 = vld [vmem:[#allocation14 + $0x8] sm:$0xff]  }
 0xad8   :  { %11636 = vmatpush3.bf16.msra.mxu0 %v12583_v8 }
 0xad9   :  { %11649 = vmatprep.subr.bf16.mxu0 %v13190_v5 }
 0xb79   :  { %v11431_v29 = vpop.f32.mrb[104].mxu1 }
 0xb7a   :  { %v5779_v4 = vpop.f32.mrb[105].mxu1 }
 0xb7b   :  { %v11432_v22 = vpop.f32.mrb[106].mxu1 }
 0xb7c   :  { %v5795_v14 = vpack.c.bf16 %v11432_v22, %v11431_v29  ;;  %v5782_v32 = vpop.f32.mrb[107].mxu1 }
 0xb7d   :  { %v5794_v63 = vpack.c.bf16 %v5782_v32, %v5779_v4 }
 0xb7f   :  { %11437 = vmatprep.mubr.msk.bf16.mxu1 %vm5605_vm2, %v5794_v63 }
 0xb80   :  { %11438 = vmatmul.mubr.msk.bf16.vlgmr.msra.gmra.mrb[100].mxu1 %vm5605_vm2, %v5795_v14 }
 0xb81   :  { %11465 = vmatprep.mubr.msk.bf16.mxu1 %vm5605_vm2, %v5938_v27  ;;  %11462 = vmatpush3.bf16.msra.mxu1 %v12564_v31 }
 0xb82   :  { %11463 = vmatprep.subr.bf16.mxu1 %v12565_v50 }
 0xb85   :  { %11464 = vmatpush3.bf16.msra.mxu1 %v12565_v50 }
 0xb86   :  { %11489 = vmatprep.subr.bf16.mxu1 %v12566_v61 }
 0xb8c   :  { %11466 = vmatmul.mubr.msk.bf16.vlgmr.msra.gmra.mrb[100].mxu1 %vm5605_vm2, %v5939_v18 }
 0xb8d   :  { %11490 = vmatpush3.bf16.msra.mxu1 %v12566_v61  ;;  %11493 = vmatprep.mubr.msk.bf16.mxu1 %vm5605_vm2, %v6082_v24 }
 0xb8e   :  { %11491 = vmatprep.subr.bf16.mxu1 %v12567_v0 }
 0xb91   :  { %11492 = vmatpush3.bf16.msra.mxu1 %v12567_v0 }
 0xb92   :  { %11497 = vmatprep.subr.bf16.mxu1 %v14916_v38 }
 0xb98   :  { %11494 = vmatmul.mubr.msk.bf16.vlgmr.msra.gmra.mrb[100].mxu1 %vm5605_vm2, %v6083_v13 }
 0xb99   :  { %11498 = vmatpush3.bf16.msra.mxu1 %v14916_v38  ;;  %11513 = vmatprep.mubr.bf16.mxu1 %v12568_v49 }
 0xb9a   :  { %11499 = vmatprep.subr.bf16.mxu1 %v14914_v54 }
 0xb9d   :  { %11500 = vmatpush3.bf16.msra.mxu1 %v14914_v54 }
 0xb9e   :  { %11501 = vmatprep.subr.bf16.mxu1 %v14948_v2 }
 0xba1   :  { %11502 = vmatpush3.bf16.msra.mxu1 %v14948_v2 }
 0xba2   :  { %11503 = vmatprep.subr.bf16.mxu1 %v14944_v53 }
 0xba5   :  { %11504 = vmatpush3.bf16.msra.mxu1 %v14944_v53 }
 0xba6   :  { %11505 = vmatprep.subr.bf16.mxu1 %v14972_v47 }
 0xba9   :  { %11506 = vmatpush3.bf16.msra.mxu1 %v14972_v47 }
 0xbaa   :  { %11507 = vmatprep.subr.bf16.mxu1 %v14969_v1 }
 0xbad   :  { %11508 = vmatpush3.bf16.msra.mxu1 %v14969_v1 }
 0xbae   :  { %11509 = vmatprep.subr.bf16.mxu1 %v14984_v39 }
 0xbb1   :  { %11510 = vmatpush3.bf16.msra.mxu1 %v14984_v39 }
 0xbb2   :  { %11511 = vmatprep.subr.bf16.mxu1 %v14982_v55 }
 0xbb5   :  { %11512 = vmatpush3.bf16.msra.mxu1 %v14982_v55 }
 0xbb6   :  { %11517 = vmatprep.subr.bf16.mxu1 %v12570_v43 }
 0xbb8   :  { %11514 = vmatmul.mubr.bf16.vlgmr.msra.gmra.mrb[108].mxu1 %v12569_v19 }
 0xbb9   :  { %11518 = vmatpush3.bf16.msra.mxu1 %v12570_v43 }
 0xbba   :  { %11519 = vmatprep.subr.bf16.mxu1 %v12571_v26 }
 0xbbd   :  { %11520 = vmatpush3.bf16.msra.mxu1 %v12571_v26 }
 0xbbe   :  { %11545 = vmatprep.subr.bf16.mxu1 %v12572_v56 }
 0xc8b   :  { %v11515_v6 = vpop.f32.mrb[108].mxu1 }
 0xc8c   :  { %v6211_v30 = vpop.f32.mrb[109].mxu1 }
 0xc8d   :  { %v11516_v28 = vpop.f32.mrb[110].mxu1 }
 0xc8e   :  { %v6227_v46 = vpack.c.bf16 %v11516_v28, %v11515_v6  ;;  %v6214_v7 = vpop.f32.mrb[111].mxu1 }
 0xc8f   :  { %v6226_v48 = vpack.c.bf16 %v6214_v7, %v6211_v30 }
 0xc91   :  { %11521 = vmatprep.mubr.msk.bf16.mxu1 %vm5605_vm2, %v6226_v48 }
 0xc92   :  { %11522 = vmatmul.mubr.msk.bf16.vlgmr.msra.gmra.mrb[100].mxu1 %vm5605_vm2, %v6227_v46 }
 0xc93   :  { %11546 = vmatpush3.bf16.msra.mxu1 %v12572_v56  ;;  %11549 = vmatprep.mubr.msk.bf16.mxu1 %vm5605_vm2, %v6370_v11  ;;  %v12584_v11 = vld [vmem:[#allocation14 + $0x10] sm:$0xff]  }
 0xc94   :  { %11547 = vmatprep.subr.bf16.mxu1 %v12573_v60 }
 0xc97   :  { %11548 = vmatpush3.bf16.msra.mxu1 %v12573_v60 }
 0xc98   :  { %11553 = vmatprep.subr.bf16.mxu1 %v14916_v38 }
 0xc9e   :  { %11550 = vmatmul.mubr.msk.bf16.vlgmr.msra.gmra.mrb[100].mxu1 %vm5605_vm2, %v6371_v37  ;;  %v6823_v37 = vld [vmem:[#allocation13 + $0x4] sm:$0xf] }
 0xc9f   :  { %11554 = vmatpush3.bf16.msra.mxu1 %v14916_v38  ;;  %11569 = vmatprep.mubr.bf16.mxu1 %v12574_v42  ;;  %v12575_v38 = vld [vmem:[#allocation8 + $0x78] sm:$0xff]  }
 0xca0   :  { %11555 = vmatprep.subr.bf16.mxu1 %v14914_v54 }
 0xca3   :  { %11556 = vmatpush3.bf16.msra.mxu1 %v14914_v54  ;;  %v12578_v54 = vld [vmem:[#allocation10 + $0x70] sm:$0xff]  }
 0xca4   :  { %11557 = vmatprep.subr.bf16.mxu1 %v14948_v2 }
 0xca7   :  { %11558 = vmatpush3.bf16.msra.mxu1 %v14948_v2  ;;  %v11599_v2 = vpop.f32.mrb[0].mxu0 }
 0xca8   :  { %11559 = vmatprep.subr.bf16.mxu1 %v14944_v53  ;;  %v6643_v25 = vpop.f32.mrb[1].mxu0 }
 0xcab   :  { %11560 = vmatpush3.bf16.msra.mxu1 %v14944_v53  ;;  %v12579_v53 = vld [vmem:[#allocation10 + $0x78] sm:$0xff]  }
 0xcac   :  { %11561 = vmatprep.subr.bf16.mxu1 %v14972_v47 }
 0xcaf   :  { %11562 = vmatpush3.bf16.msra.mxu1 %v14972_v47  ;;  %v12580_v47 = vld [vmem:[#allocation10 + $0x80] sm:$0xff]  }
 0xcb0   :  { %11563 = vmatprep.subr.bf16.mxu1 %v14969_v1 }
 0xcb3   :  { %11564 = vmatpush3.bf16.msra.mxu1 %v14969_v1  ;;  %v11600_v1 = vpop.f32.mrb[2].mxu0 }
 0xcb4   :  { %11565 = vmatprep.subr.bf16.mxu1 %v14984_v39  ;;  %v6659_v3 = vpack.c.bf16 %v11600_v1, %v11599_v2  ;;  %v6646_v20 = vpop.f32.mrb[3].mxu0  ;;  %v7198_v2 = vld [vmem:[#allocation13 + $0x10] sm:$0xf]  ;;  %v7519_v1 = vld [vmem:[#allocation13 + $0x1c] sm:$0xf] }
 0xcb7   :  { %11566 = vmatpush3.bf16.msra.mxu1 %v14984_v39  ;;  %v6658_v39 = vpack.c.bf16 %v6646_v20, %v6643_v25  ;;  %v7412_v25 = vld [vmem:[#allocation13 + $0x18] sm:$0xf]  ;;  %v12586_v20 = vld [vmem:[#allocation14 + $0x20] sm:$0xff]  }
 0xcb8   :  { %11567 = vmatprep.subr.bf16.mxu1 %v14982_v55 }
 0xcbb   :  { %11568 = vmatpush3.bf16.msra.mxu1 %v14982_v55 }
 0xcbc   :  { %11573 = vmatprep.subr.bf16.mxu1 %v12578_v54 }
 0xcbe   :  { %11570 = vmatmul.mubr.bf16.vlgmr.msra.gmra.mrb[112].mxu1 %v12575_v38  ;;  %v6984_v38 = vld [vmem:[#allocation13 + $0x8] sm:$0xf] }
 0xcbf   :  { %11574 = vmatpush3.bf16.msra.mxu1 %v12578_v54 }
 0xcc0   :  { %11575 = vmatprep.subr.bf16.mxu1 %v12579_v53 }
 0xcc3   :  { %11576 = vmatpush3.bf16.msra.mxu1 %v12579_v53  ;;  %v7091_v53 = vld [vmem:[#allocation13 + $0xc] sm:$0xf] }
 0xcc4   :  { %11601 = vmatprep.subr.bf16.mxu1 %v12580_v47 }
 0xd91   :  { %v11571_v9 = vpop.f32.mrb[112].mxu1 }
 0xd92   :  { %v6499_v34 = vpop.f32.mrb[113].mxu1 }
 0xd93   :  { %v11572_v45 = vpop.f32.mrb[114].mxu1 }
 0xd94   :  { %v6515_v12 = vpack.c.bf16 %v11572_v45, %v11571_v9  ;;  %v6502_v15 = vpop.f32.mrb[115].mxu1 }
 0xd95   :  { %v6514_v55 = vpack.c.bf16 %v6502_v15, %v6499_v34 }
 0xd97   :  { %11577 = vmatprep.mubr.msk.bf16.mxu1 %vm5605_vm2, %v6514_v55 }
 0xd98   :  { %11578 = vmatmul.mubr.msk.bf16.vlgmr.msra.gmra.mrb[100].mxu1 %vm5605_vm2, %v6515_v12 }
 0xd99   :  { %11602 = vmatpush3.bf16.msra.mxu1 %v12580_v47  ;;  %11605 = vmatprep.mubr.msk.bf16.mxu1 %vm5605_vm2, %v6658_v39  ;;  %v7305_v47 = vld [vmem:[#allocation13 + $0x14] sm:$0xf]  ;;  %v12587_v39 = vld [vmem:[#allocation14 + $0x28] sm:$0xff]  }
 0xd9a   :  { %11603 = vmatprep.subr.bf16.mxu1 %v12581_v62 }
 0xd9d   :  { %11604 = vmatpush3.bf16.msra.mxu1 %v12581_v62 }
 0xd9e   :  { %11609 = vmatprep.subr.bf16.mxu1 %v13190_v5 }
 0xda4   :  { %11606 = vmatmul.mubr.msk.bf16.vlgmr.msra.gmra.mrb[100].mxu1 %vm5605_vm2, %v6659_v3  ;;  %v7626_v3 = vld [vmem:[#allocation13 + $0x20] sm:$0xf] }
 0xda5   :  { %11613 = vmatprep.mubr.msk.bf16.mxu1 %vm13191_vm3, %v13190_v5 }
 0xe77   :  { %v11607_v35 = vpop.f32.mrb[100].mxu1 }
 0xe78   :  { %v6745_v18 = vadd.f32 %v11607_v35, %v9597_v16  ;;  %v6717_v10 = vpop.f32.mrb[101].mxu1 }
 0xe79   :  { %v6743_v27 = vadd.f32 %v9597_v16, %v6717_v10  ;;  %v11608_v58 = vpop.f32.mrb[102].mxu1 }
 0xe7a   :  { %v6753_v21 = vmin.f32 %v6745_v18, 0.0  ;;  %v6746_v36 = vadd.f32 %v11608_v58, %v9597_v16  ;;  %v6720_v31 = vpop.f32.mrb[103].mxu1  ;;  %vm6749_vm4 = vcmp.gt.f32.partialorder %v6745_v18, 0.0 }
 0xe7b   :  { %v6751_v17 = vmin.f32 %v6743_v27, 0.0  ;;  %v6744_v23 = vadd.f32 %v9597_v16, %v6720_v31  ;;  %vm6747_vm6 = vcmp.gt.f32.partialorder %v6743_v27, 0.0 }
 0xe7c   :  { %v6759_v41 = vmul.f32 1.442695, %v6753_v21  ;;  %v6754_v13 = vmin.f32 %v6746_v36, 0.0  ;;  %vm6750_vm5 = vcmp.gt.f32.partialorder %v6746_v36, 0.0 }
 0xe7d   :  { %v6755_v51 = vmul.f32 1.442695, %v6751_v17  ;;  %v6752_v24 = vmin.f32 %v6744_v23, 0.0  ;;  %vm6748_vm7 = vcmp.gt.f32.partialorder %v6744_v23, 0.0  ;;  %v12590_v17 = vld [vmem:[#allocation14 + $0x40] sm:$0xff]  }
 0xe7e   :  { %12672 = vpow2.f32 %v6759_v41  ;;  %v6761_v29 = vmul.f32 1.442695, %v6754_v13 }
 0xe7f   :  { %12674 = vpow2.f32 %v6755_v51  ;;  %v6757_v4 = vmul.f32 1.442695, %v6752_v24  ;;  %v12591_v24 = vld [vmem:[#allocation14 + $0x48] sm:$0xff]  }
 0xe80   :  { %12676 = vpow2.f32 %v6761_v29 }
 0xe81   :  { %12678 = vpow2.f32 %v6757_v4  ;;  %v12592_v4 = vld [vmem:[#allocation14 + $0x50] sm:$0xff]  }
 0xe88   :  { %v12673_v22 = vpop.eup %12672 }
 0xe89   :  { %v12675_v14 = vpop.eup %12674  ;;  %v9600_v32 = vadd.f32 -1.0, %v12673_v22 }
 0xe8a   :  { %v12677_v63 = vpop.eup %12676  ;;  %v9598_v50 = vadd.f32 -1.0, %v12675_v14 }
 0xe8b   :  { %v12679_v61 = vpop.eup %12678  ;;  %v9601_v0 = vadd.f32 -1.0, %v12677_v63  ;;  %v6769_v43 = vsel %vm6749_vm4, %v6745_v18, %v9600_v32  ;;  %v12588_v18 = vld [vmem:[#allocation14 + $0x30] sm:$0xff]  }
 0xe8c   :  { %v9599_v49 = vadd.f32 -1.0, %v12679_v61  ;;  %v6767_v26 = vsel %vm6747_vm6, %v6743_v27, %v9598_v50  ;;  %v12593_v50 = vld [vmem:[#allocation14 + $0x58] sm:$0xff]  }
 0xe8d   :  { %v6770_v19 = vsel %vm6750_vm5, %v6746_v36, %v9601_v0  ;;  %v12589_v36 = vld [vmem:[#allocation14 + $0x38] sm:$0xff]   ;;  %v12594_v0 = vld [vmem:[#allocation14 + $0x60] sm:$0xff]  }
 0xe8e   :  { %v15131_v56 = vpack.c.bf16 %v6770_v19, %v6769_v43  ;;  %v6768_v40 = vsel %vm6748_vm7, %v6744_v23, %v9599_v49 }
 0xe8f   :  { %v15133_v57 = vpack.c.bf16 %v6768_v40, %v6767_v26 }
 0xe91   :  { %11610 = vmatpush3.bf16.msra.mxu1 %v15133_v57 }
 0xe92   :  { %11611 = vmatprep.subr.bf16.mxu1 %v13190_v5 }
 0xe95   :  { %11612 = vmatpush3.bf16.msra.mxu1 %v15131_v56 }
 0xe96   :  { %11617 = vmatprep.subr.bf16.mxu1 %v13190_v5 }
 0xe98   :  { %11614 = vmatmul.mubr.msk.bf16.vlgmr.msra.gmra.mrb[116].mxu1 %vm5605_vm2, %v6773_v44 }
 0xe99   :  { %11618 = vmatpush3.bf16.msra.mxu1 %v15133_v57  ;;  %11621 = vmatprep.mubr.msk.bf16.mxu1 %vm13191_vm3, %v13190_v5 }
 0xe9a   :  { %11619 = vmatprep.subr.bf16.mxu1 %v13190_v5 }
 0xe9d   :  { %11620 = vmatpush3.bf16.msra.mxu1 %v15131_v56 }
 0xe9e   :  { %11625 = vmatprep.subr.bf16.mxu1 %v13190_v5 }
 0xea0   :  { %11622 = vmatmul.mubr.msk.bf16.vlgmr.msra.gmra.mrb[120].mxu1 %vm5605_vm2, %v6823_v37 }
 0xea1   :  { %11629 = vmatprep.mubr.msk.bf16.mxu1 %vm13191_vm3, %v13190_v5  ;;  %11626 = vmatpush3.bf16.msra.mxu1 %v12584_v11 }
 0xea2   :  { %11627 = vmatprep.subr.bf16.mxu1 %v13190_v5 }
 0xea5   :  { %11628 = vmatpush3.bf16.msra.mxu1 %v12585_v33  ;;  %v12597_v33 = vld [vmem:[#allocation14 + $0x78] sm:$0xff]  }
 0xea6   :  { %11641 = vmatprep.subr.bf16.mxu1 %v13190_v5 }
 0xf6b   :  { %v6811_v59 = vpop.f32.mrb[116].mxu1 }
 0xf6c   :  { %v6817_v6 = vpack.c.bf16 %v6811_v59, %v6811_v59  ;;  %v11615_v30 = vpop.f32.mrb[117].mxu1 }
 0xf6d   :  { %v6814_v28 = vpop.f32.mrb[118].mxu1 }
 0xf6e   :  { %v11616_v46 = vpop.f32.mrb[119].mxu1  ;;  %11638 = vmatmul.mubr.msk.bf16.vlgmr.msra.gmra.mrb[4].mxu0 %vm5605_vm2, %v6817_v6  ;;  %v12598_v6 = vld [vmem:[#allocation14 + $0x80] sm:$0xff]  }
 0xf6f   :  { %11653 = vmatprep.mubr.msk.bf16.mxu0 %vm13191_vm3, %v13190_v5  ;;  %11650 = vmatpush3.bf16.msra.mxu0 %v12586_v20 }
 0xf70   :  { %11651 = vmatprep.subr.bf16.mxu0 %v13190_v5 }
 0xf73   :  { %v6861_v7 = vpop.f32.mrb[120].mxu1  ;;  %11652 = vmatpush3.bf16.msra.mxu0 %v12587_v39 }
 0xf74   :  { %v6867_v48 = vpack.c.bf16 %v6861_v7, %v6861_v7  ;;  %v11623_v60 = vpop.f32.mrb[121].mxu1  ;;  %11665 = vmatprep.subr.bf16.mxu0 %v13190_v5 }
 0xf75   :  { %v6864_v42 = vpop.f32.mrb[122].mxu1 }
 0xf76   :  { %v11624_v54 = vpop.f32.mrb[123].mxu1  ;;  %11630 = vmatmul.mubr.msk.bf16.vlgmr.msra.gmra.mrb[124].mxu1 %vm5605_vm2, %v6867_v48  ;;  %v12599_v48 = vld [vmem:[#allocation14 + $0x88] sm:$0xff]  }
 0xf77   :  { %11642 = vmatpush3.bf16.msra.mxu1 %v15133_v57  ;;  %11645 = vmatprep.mubr.msk.bf16.mxu1 %vm13191_vm3, %v13190_v5 }
 0xf78   :  { %11643 = vmatprep.subr.bf16.mxu1 %v13190_v5 }
 0xf7b   :  { %11644 = vmatpush3.bf16.msra.mxu1 %v15131_v56 }
 0xf7c   :  { %11657 = vmatprep.subr.bf16.mxu1 %v13190_v5 }
 0xf7e   :  { %11646 = vmatmul.mubr.msk.bf16.vlgmr.msra.gmra.mrb[128].mxu1 %vm5605_vm2, %v6984_v38 }
 0xf7f   :  { %11658 = vmatpush3.bf16.msra.mxu1 %v15133_v57  ;;  %11661 = vmatprep.mubr.msk.bf16.mxu1 %vm13191_vm3, %v13190_v5 }
 0xf80   :  { %11659 = vmatprep.subr.bf16.mxu1 %v13190_v5 }
 0xf83   :  { %11660 = vmatpush3.bf16.msra.mxu1 %v15131_v56 }
 0xf84   :  { %11673 = vmatprep.subr.bf16.mxu1 %v13190_v5 }
 0xf86   :  { %11662 = vmatmul.mubr.msk.bf16.vlgmr.msra.gmra.mrb[132].mxu1 %vm5605_vm2, %v7091_v53 }
 0xf87   :  { %11674 = vmatpush3.bf16.msra.mxu1 %v15133_v57  ;;  %11677 = vmatprep.mubr.msk.bf16.mxu1 %vm13191_vm3, %v13190_v5 }
 0xf88   :  { %11675 = vmatprep.subr.bf16.mxu1 %v13190_v5 }
 0xf8b   :  { %11676 = vmatpush3.bf16.msra.mxu1 %v15131_v56 }
 0xf8c   :  { %11689 = vmatprep.subr.bf16.mxu1 %v13190_v5 }
 0xf8e   :  { %11678 = vmatmul.mubr.msk.bf16.vlgmr.msra.gmra.mrb[136].mxu1 %vm5605_vm2, %v7198_v2 }
 0xf8f   :  { %11690 = vmatpush3.bf16.msra.mxu1 %v15133_v57  ;;  %11693 = vmatprep.mubr.msk.bf16.mxu1 %vm13191_vm3, %v13190_v5 }
 0xf90   :  { %11691 = vmatprep.subr.bf16.mxu1 %v13190_v5 }
 0xf93   :  { %11692 = vmatpush3.bf16.msra.mxu1 %v15131_v56 }
 0xf94   :  { %11705 = vmatprep.subr.bf16.mxu1 %v13190_v5 }
 0xf96   :  { %11694 = vmatmul.mubr.msk.bf16.vlgmr.msra.gmra.mrb[140].mxu1 %vm5605_vm2, %v7305_v47 }
 0xf97   :  { %11706 = vmatpush3.bf16.msra.mxu1 %v15133_v57  ;;  %11709 = vmatprep.mubr.msk.bf16.mxu1 %vm13191_vm3, %v13190_v5 }
 0xf98   :  { %11707 = vmatprep.subr.bf16.mxu1 %v13190_v5 }
 0xf9b   :  { %11708 = vmatpush3.bf16.msra.mxu1 %v15131_v56 }
 0xf9c   :  { %11721 = vmatprep.subr.bf16.mxu1 %v13190_v5 }
 0xf9e   :  { %11710 = vmatmul.mubr.msk.bf16.vlgmr.msra.gmra.mrb[144].mxu1 %vm5605_vm2, %v7412_v25 }
 0xf9f   :  { %11722 = vmatpush3.bf16.msra.mxu1 %v15133_v57  ;;  %11725 = vmatprep.mubr.msk.bf16.mxu1 %vm13191_vm3, %v13190_v5 }
 0xfa0   :  { %11723 = vmatprep.subr.bf16.mxu1 %v13190_v5 }
 0xfa3   :  { %11724 = vmatpush3.bf16.msra.mxu1 %v15131_v56 }
 0xfa4   :  { %11737 = vmatprep.subr.bf16.mxu1 %v13190_v5 }
 0xfa6   :  { %11726 = vmatmul.mubr.msk.bf16.vlgmr.msra.gmra.mrb[148].mxu1 %vm5605_vm2, %v7519_v1 }
 0xfa7   :  { %11738 = vmatpush3.bf16.msra.mxu1 %v15133_v57  ;;  %11741 = vmatprep.mubr.msk.bf16.mxu1 %vm13191_vm3, %v13190_v5  ;;  %v12596_v57 = vld [vmem:[#allocation14 + $0x70] sm:$0xff]  }
 0xfa8   :  { %11739 = vmatprep.subr.bf16.mxu1 %v13190_v5 }
 0xfab   :  { %11740 = vmatpush3.bf16.msra.mxu1 %v15131_v56  ;;  %v12595_v56 = vld [vmem:[#allocation14 + $0x68] sm:$0xff]  }
 0xfac   :  { %11753 = vmatprep.subr.bf16.mxu1 %v13190_v5 }
 0xfae   :  { %11742 = vmatmul.mubr.msk.bf16.vlgmr.msra.gmra.mrb[152].mxu1 %vm5605_vm2, %v7626_v3 }
 0xfaf   :  { %11755 = vmatprep.mubr.msk.bf16.mxu1 %vm13191_vm3, %v13190_v5 }
0x1041   :  { %v6977_v9 = vpop.f32.mrb[4].mxu0 }
0x1042   :  { %v11639_v34 = vpop.f32.mrb[5].mxu0 }
0x1043   :  { %v6980_v45 = vpop.f32.mrb[6].mxu0 }
0x1044   :  { %v11640_v12 = vpop.f32.mrb[7].mxu0 }
0x1049   :  { %v6922_v15 = vpop.f32.mrb[124].mxu1 }
0x104a   :  { %v15209_v55 = vadd.f32 %v6977_v9, %v6922_v15  ;;  %v11631_v62 = vpop.f32.mrb[125].mxu1 }
0x104b   :  { %v6925_v52 = vpop.f32.mrb[126].mxu1 }
0x104c   :  { %v11632_v16 = vpop.f32.mrb[127].mxu1 }
0x1051   :  { %v7022_v35 = vpop.f32.mrb[128].mxu1 }
0x1052   :  { %v7028_v10 = vpack.c.bf16 %v7022_v35, %v7022_v35  ;;  %v11647_v27 = vpop.f32.mrb[129].mxu1 }
0x1053   :  { %v7025_v58 = vpop.f32.mrb[130].mxu1 }
0x1054   :  { %v11648_v21 = vpop.f32.mrb[131].mxu1  ;;  %11654 = vmatmul.mubr.msk.bf16.vlgmr.msra.gmra.mrb[8].mxu0 %vm5605_vm2, %v7028_v10 }
0x1055   :  { %11666 = vmatpush3.bf16.msra.mxu0 %v12588_v18  ;;  %11669 = vmatprep.mubr.msk.bf16.mxu0 %vm13191_vm3, %v13190_v5 }
0x1056   :  { %11667 = vmatprep.subr.bf16.mxu0 %v13190_v5 }
0x1059   :  { %v7129_v31 = vpop.f32.mrb[132].mxu1  ;;  %11668 = vmatpush3.bf16.msra.mxu0 %v12589_v36 }
0x105a   :  { %v7135_v23 = vpack.c.bf16 %v7129_v31, %v7129_v31  ;;  %v11663_v41 = vpop.f32.mrb[133].mxu1  ;;  %11681 = vmatprep.subr.bf16.mxu0 %v13190_v5 }
0x105b   :  { %v7132_v13 = vpop.f32.mrb[134].mxu1 }
0x105c   :  { %v11664_v51 = vpop.f32.mrb[135].mxu1  ;;  %11670 = vmatmul.mubr.msk.bf16.vlgmr.msra.gmra.mrb[12].mxu0 %vm5605_vm2, %v7135_v23 }
0x105d   :  { %11682 = vmatpush3.bf16.msra.mxu0 %v12590_v17  ;;  %11685 = vmatprep.mubr.msk.bf16.mxu0 %vm13191_vm3, %v13190_v5 }
0x105e   :  { %11683 = vmatprep.subr.bf16.mxu0 %v13190_v5 }
0x1061   :  { %v7236_v29 = vpop.f32.mrb[136].mxu1  ;;  %11684 = vmatpush3.bf16.msra.mxu0 %v12591_v24 }
0x1062   :  { %v7242_v22 = vpack.c.bf16 %v7236_v29, %v7236_v29  ;;  %v11679_v14 = vpop.f32.mrb[137].mxu1  ;;  %11697 = vmatprep.subr.bf16.mxu0 %v13190_v5 }
0x1063   :  { %v7239_v32 = vpop.f32.mrb[138].mxu1 }
0x1064   :  { %v11680_v63 = vpop.f32.mrb[139].mxu1  ;;  %11686 = vmatmul.mubr.msk.bf16.vlgmr.msra.gmra.mrb[16].mxu0 %vm5605_vm2, %v7242_v22 }
0x1065   :  { %11698 = vmatpush3.bf16.msra.mxu0 %v12592_v4  ;;  %11701 = vmatprep.mubr.msk.bf16.mxu0 %vm13191_vm3, %v13190_v5  ;;  %v9638_v4 = vld [vmem:[#allocation16] ss:$0 sm:$0xff] }
0x1066   :  { %11699 = vmatprep.subr.bf16.mxu0 %v13190_v5 }
0x1069   :  { %v7343_v61 = vpop.f32.mrb[140].mxu1  ;;  %11700 = vmatpush3.bf16.msra.mxu0 %v12593_v50 }
0x106a   :  { %v7349_v49 = vpack.c.bf16 %v7343_v61, %v7343_v61  ;;  %v11695_v43 = vpop.f32.mrb[141].mxu1  ;;  %11713 = vmatprep.subr.bf16.mxu0 %v13190_v5 }
0x106b   :  { %v7346_v19 = vpop.f32.mrb[142].mxu1 }
0x106c   :  { %v11696_v26 = vpop.f32.mrb[143].mxu1  ;;  %11702 = vmatmul.mubr.msk.bf16.vlgmr.msra.gmra.mrb[20].mxu0 %vm5605_vm2, %v7349_v49 }
0x106d   :  { %11714 = vmatpush3.bf16.msra.mxu0 %v12594_v0  ;;  %11717 = vmatprep.mubr.msk.bf16.mxu0 %vm13191_vm3, %v13190_v5 }
0x106e   :  { %11715 = vmatprep.subr.bf16.mxu0 %v13190_v5 }
0x1071   :  { %v7450_v40 = vpop.f32.mrb[144].mxu1  ;;  %11716 = vmatpush3.bf16.msra.mxu0 %v12595_v56 }
0x1072   :  { %v7456_v44 = vpack.c.bf16 %v7450_v40, %v7450_v40  ;;  %v11711_v37 = vpop.f32.mrb[145].mxu1  ;;  %11729 = vmatprep.subr.bf16.mxu0 %v13190_v5  ;;  %v7747_v40 = vld [vmem:[%s15443_s10] sm:$0x1] }
0x1073   :  { %v7453_v8 = vpop.f32.mrb[146].mxu1  ;;  %v12601_v37 = vld [vmem:[#allocation17] sm:$0xff]  }
0x1074   :  { %v11712_v11 = vpop.f32.mrb[147].mxu1  ;;  %11718 = vmatmul.mubr.msk.bf16.vlgmr.msra.gmra.mrb[24].mxu0 %vm5605_vm2, %v7456_v44  ;;  %v12600_v44 = vld [vmem:[#allocation17 + $0x10] sm:$0xff]   ;;  %v12602_v8 = vld [vmem:[#allocation17 + $0x18] sm:$0xff]  }
0x1075   :  { %11730 = vmatpush3.bf16.msra.mxu0 %v12596_v57  ;;  %11733 = vmatprep.mubr.msk.bf16.mxu0 %vm13191_vm3, %v13190_v5  ;;  %v9641_v57 = vld [vmem:[%s15443_s10 + $0x1] sm:$0x1]  ;;  %v12603_v11 = vld [vmem:[#allocation17 + $0x8] sm:$0xff]  }
0x1076   :  { %11731 = vmatprep.subr.bf16.mxu0 %v13190_v5 }
0x1079   :  { %v7557_v59 = vpop.f32.mrb[148].mxu1  ;;  %11732 = vmatpush3.bf16.msra.mxu0 %v12597_v33 }
0x107a   :  { %v7563_v30 = vpack.c.bf16 %v7557_v59, %v7557_v59  ;;  %v11727_v28 = vpop.f32.mrb[149].mxu1  ;;  %11745 = vmatprep.subr.bf16.mxu0 %v13190_v5 }
0x107b   :  { %v7560_v46 = vpop.f32.mrb[150].mxu1 }
0x107c   :  { %v11728_v7 = vpop.f32.mrb[151].mxu1  ;;  %11734 = vmatmul.mubr.msk.bf16.vlgmr.msra.gmra.mrb[28].mxu0 %vm5605_vm2, %v7563_v30 }
0x107d   :  { %11746 = vmatpush3.bf16.msra.mxu0 %v12598_v6  ;;  %11749 = vmatprep.mubr.msk.bf16.mxu0 %vm13191_vm3, %v13190_v5 }
0x107e   :  { %11747 = vmatprep.subr.bf16.mxu0 %v13190_v5 }
0x1081   :  { %v7664_v60 = vpop.f32.mrb[152].mxu1  ;;  %11748 = vmatpush3.bf16.msra.mxu0 %v12599_v48 }
0x1082   :  { %v7670_v42 = vpack.c.bf16 %v7664_v60, %v7664_v60  ;;  %v11743_v54 = vpop.f32.mrb[153].mxu1  ;;  %11759 = vmatprep.subr.bf16.mxu0 %v13190_v5 }
0x1083   :  { %v7667_v38 = vpop.f32.mrb[154].mxu1  ;;  %v9649_v54 = vld [vmem:[%s15443_s10 + $0x2] sm:$0x1] }
0x1084   :  { %v11744_v53 = vpop.f32.mrb[155].mxu1  ;;  %11750 = vmatmul.mubr.msk.bf16.vlgmr.msra.gmra.mrb[32].mxu0 %vm5605_vm2, %v7670_v42  ;;  %v9654_v38 = vld [vmem:[%s15443_s10 + $0x3] sm:$0x1] }
0x1085   :  { %11761 = vmatprep.mubr.msk.bf16.mxu0 %vm13191_vm3, %v13190_v5  ;;  %v9659_v53 = vld [vmem:[%s15443_s10 + $0x4] sm:$0x1] }
0x1127   :  { %v7083_v2 = vpop.f32.mrb[8].mxu0 }
0x1128   :  { %v7089_v47 = vadd.f32 %v7083_v2, %v15209_v55  ;;  %v11655_v25 = vpop.f32.mrb[9].mxu0  ;;  %v9664_v2 = vld [vmem:[%s15443_s10 + $0x5] sm:$0x1] }
0x1129   :  { %v7086_v1 = vpop.f32.mrb[10].mxu0  ;;  %v9674_v25 = vld [vmem:[%s15443_s10 + $0x7] sm:$0x1] }
0x112a   :  { %v11656_v3 = vpop.f32.mrb[11].mxu0  ;;  %v9679_v1 = vld [vmem:[%s15443_s10 + $0x8] sm:$0x1] }
0x112b   :  { %v12604_v3 = vld [vmem:[#allocation17 + $0x20] sm:$0xff]  }
0x112f   :  { %v7190_v20 = vpop.f32.mrb[12].mxu0 }
0x1130   :  { %v7196_v39 = vadd.f32 %v7190_v20, %v7089_v47  ;;  %v11671_v9 = vpop.f32.mrb[13].mxu0  ;;  %v9669_v47 = vld [vmem:[%s15443_s10 + $0x6] sm:$0x1]  ;;  %v12605_v20 = vld [vmem:[#allocation17 + $0x28] sm:$0xff]  }
0x1131   :  { %v7193_v34 = vpop.f32.mrb[14].mxu0 }
0x1132   :  { %v11672_v45 = vpop.f32.mrb[15].mxu0 }
0x1137   :  { %v7297_v12 = vpop.f32.mrb[16].mxu0 }
0x1138   :  { %v7303_v15 = vadd.f32 %v7297_v12, %v7196_v39  ;;  %v11687_v62 = vpop.f32.mrb[17].mxu0 }
0x1139   :  { %v7300_v52 = vpop.f32.mrb[18].mxu0 }
0x113a   :  { %v11688_v16 = vpop.f32.mrb[19].mxu0 }
0x113f   :  { %v7404_v35 = vpop.f32.mrb[20].mxu0 }
0x1140   :  { %v7410_v18 = vadd.f32 %v7404_v35, %v7303_v15  ;;  %v11703_v10 = vpop.f32.mrb[21].mxu0 }
0x1141   :  { %v7407_v27 = vpop.f32.mrb[22].mxu0 }
0x1142   :  { %v11704_v58 = vpop.f32.mrb[23].mxu0 }
0x1147   :  { %v7511_v21 = vpop.f32.mrb[24].mxu0 }
0x1148   :  { %v7517_v55 = vadd.f32 %v7511_v21, %v7410_v18  ;;  %v11719_v36 = vpop.f32.mrb[25].mxu0  ;;  %v12606_v18 = vld [vmem:[#allocation17 + $0x30] sm:$0xff]  }
0x1149   :  { %v7514_v31 = vpop.f32.mrb[26].mxu0 }
0x114a   :  { %v11720_v17 = vpop.f32.mrb[27].mxu0  ;;  %v12608_v31 = vld [vmem:[#allocation17 + $0x40] sm:$0xff]  }
0x114f   :  { %v7618_v23 = vpop.f32.mrb[28].mxu0 }
0x1150   :  { %v7624_v41 = vadd.f32 %v7618_v23, %v7517_v55  ;;  %v11735_v13 = vpop.f32.mrb[29].mxu0  ;;  %v12607_v55 = vld [vmem:[#allocation17 + $0x38] sm:$0xff]  }
0x1151   :  { %v7621_v51 = vpop.f32.mrb[30].mxu0 }
0x1152   :  { %v11736_v24 = vpop.f32.mrb[31].mxu0  ;;  %v12609_v51 = vld [vmem:[#allocation17 + $0x48] sm:$0xff]  }
0x1157   :  { %v7725_v29 = vpop.f32.mrb[32].mxu0 }
0x1158   :  { %v7731_v22 = vadd.f32 %v7725_v29, %v7624_v41  ;;  %v11751_v14 = vpop.f32.mrb[33].mxu0  ;;  %v12610_v29 = vld [vmem:[#allocation17 + $0x50] sm:$0xff]  }
0x1159   :  { %v7728_v32 = vpop.f32.mrb[34].mxu0 }
0x115a   :  { %v7739_v63 = vadd.f32 %v9638_v4, %v7731_v22  ;;  %v11752_v50 = vpop.f32.mrb[35].mxu0 }
0x115c   :  { %v7741_v61 = vmin.f32 %v7739_v63, 0.0  ;;  %vm7740_vm8 = vcmp.gt.f32.partialorder %v7739_v63, 0.0 }
0x115e   :  { %v7742_v0 = vmul.f32 1.442695, %v7741_v61  ;;  %v12612_v61 = vld [vmem:[#allocation17 + $0x60] sm:$0xff]  }
0x1160   :  { %12680 = vpow2.f32 %v7742_v0 }
0x116a   :  { %v12681_v49 = vpop.eup %12680 }
0x116b   :  { %v9639_v43 = vadd.f32 -1.0, %v12681_v49 }
0x116d   :  { %v7745_v19 = vsel %vm7740_vm8, %v7739_v63, %v9639_v43  ;;  %v12611_v63 = vld [vmem:[#allocation17 + $0x58] sm:$0xff]  }
0x116e   :  { %v7746_v26 = vpack.c.bf16 %v7745_v19, %v7745_v19 }
0x1170   :  { %v15245_v56 = vsel %vm7752_vm9, %v7746_v26, 0  ;;  %v12613_v26 = vld [vmem:[#allocation17 + $0x68] sm:$0xff]  }
0x1171   :  { %11754 = vmatpush3.bf16.msra.mxu1 %v15245_v56  ;;  %11760 = vmatpush3.bf16.msra.mxu0 %v15245_v56 }
0x1172   :  { %11765 = vmatprep.subr.bf16.mxu1 %v13190_v5  ;;  %11773 = vmatprep.subr.bf16.mxu0 %v13190_v5 }
0x1174   :  { %11756 = vmatmul.mubr.msk.bf16.vlgmr.msra.gmra.mrb[156].mxu1 %vm7748_vm10, %v7747_v40  ;;  %11762 = vmatmul.mubr.msk.bf16.vlgmr.msra.gmra.mrb[36].mxu0 %vm7748_vm10, %v9641_v57  ;;  %v12614_v40 = vld [vmem:[#allocation17 + $0x70] sm:$0xff]  }
0x1175   :  { %11766 = vmatpush3.bf16.msra.mxu1 %v12600_v44  ;;  %11774 = vmatpush3.bf16.msra.mxu0 %v12601_v37 }
0x1176   :  { %11767 = vmatprep.subr.bf16.mxu1 %v13190_v5  ;;  %11775 = vmatprep.subr.bf16.mxu0 %v13190_v5 }
0x1177   :  { %11769 = vmatprep.mubr.msk.bf16.mxu1 %vm13191_vm3, %v13190_v5  ;;  %11777 = vmatprep.mubr.msk.bf16.mxu0 %vm13191_vm3, %v13190_v5 }
0x1179   :  { %11768 = vmatpush3.bf16.msra.mxu1 %v12602_v8  ;;  %11776 = vmatpush3.bf16.msra.mxu0 %v12603_v11  ;;  %v12615_v11 = vld [vmem:[#allocation17 + $0x78] sm:$0xff]  }
0x117a   :  { %11781 = vmatprep.subr.bf16.mxu1 %v13190_v5  ;;  %11787 = vmatprep.subr.bf16.mxu0 %v13190_v5 }
0x1247   :  { %v7790_v33 = vpop.f32.mrb[156].mxu1  ;;  %v7840_v59 = vpop.f32.mrb[36].mxu0 }
0x1248   :  { %v7796_v6 = vpack.c.bf16 %v7790_v33, %v7790_v33  ;;  %v7846_v30 = vpack.c.bf16 %v7840_v59, %v7840_v59  ;;  %v11763_v28 = vpop.f32.mrb[37].mxu0  ;;  %v11757_v46 = vpop.f32.mrb[157].mxu1  ;;  %v12616_v59 = vld [vmem:[#allocation17 + $0x80] sm:$0xff]  }
0x1249   :  { %v7843_v7 = vpop.f32.mrb[38].mxu0  ;;  %v7793_v48 = vpop.f32.mrb[158].mxu1 }
0x124a   :  { %v11764_v60 = vpop.f32.mrb[39].mxu0  ;;  %11770 = vmatmul.mubr.msk.bf16.vlgmr.msra.gmra.mrb[160].mxu1 %vm5605_vm2, %v7846_v30  ;;  %11778 = vmatmul.mubr.msk.bf16.vlgmr.msra.gmra.mrb[40].mxu0 %vm5605_vm2, %v7796_v6  ;;  %v11758_v42 = vpop.f32.mrb[159].mxu1  ;;  %v12617_v7 = vld [vmem:[#allocation17 + $0x88] sm:$0xff]  }
0x124b   :  { %11782 = vmatpush3.bf16.msra.mxu1 %v15245_v56  ;;  %11783 = vmatprep.mubr.msk.bf16.mxu1 %vm13191_vm3, %v13190_v5 }
0x124c   :  { %11795 = vmatprep.subr.bf16.mxu1 %v13190_v5  ;;  %11791 = vmatprep.mubr.msk.bf16.mxu0 %vm13191_vm3, %v13190_v5 }
0x124d   :  { %11788 = vmatpush3.bf16.msra.mxu0 %v12604_v3 }
0x124e   :  { %11789 = vmatprep.subr.bf16.mxu0 %v13190_v5 }
0x1251   :  { %11790 = vmatpush3.bf16.msra.mxu0 %v12605_v20 }
0x1252   :  { %11784 = vmatmul.mubr.msk.bf16.vlgmr.msra.gmra.mrb[164].mxu1 %vm7748_vm10, %v9649_v54  ;;  %11801 = vmatprep.subr.bf16.mxu0 %v13190_v5 }
0x1253   :  { %11796 = vmatpush3.bf16.msra.mxu1 %v15245_v56  ;;  %11797 = vmatprep.mubr.msk.bf16.mxu1 %vm13191_vm3, %v13190_v5 }
0x1254   :  { %11809 = vmatprep.subr.bf16.mxu1 %v13190_v5 }
0x125a   :  { %11798 = vmatmul.mubr.msk.bf16.vlgmr.msra.gmra.mrb[168].mxu1 %vm7748_vm10, %v9654_v38 }
0x125b   :  { %11810 = vmatpush3.bf16.msra.mxu1 %v15245_v56  ;;  %11811 = vmatprep.mubr.msk.bf16.mxu1 %vm13191_vm3, %v13190_v5 }
0x125c   :  { %11823 = vmatprep.subr.bf16.mxu1 %v13190_v5 }
0x1262   :  { %11812 = vmatmul.mubr.msk.bf16.vlgmr.msra.gmra.mrb[172].mxu1 %vm7748_vm10, %v9659_v53  ;;  %v12618_v53 = vld [vmem:[#allocation22] ss:$8 sps:$4 sm:$0xff]  }
0x1263   :  { %11824 = vmatpush3.bf16.msra.mxu1 %v15245_v56  ;;  %11825 = vmatprep.mubr.msk.bf16.mxu1 %vm13191_vm3, %v13190_v5 }
0x1264   :  { %11837 = vmatprep.subr.bf16.mxu1 %v13190_v5 }
0x126a   :  { %11826 = vmatmul.mubr.msk.bf16.vlgmr.msra.gmra.mrb[176].mxu1 %vm7748_vm10, %v9664_v2  ;;  %v12620_v2 = vld [vmem:[#allocation22 + $0x4] ss:$8 sps:$4 sm:$0xff]  }
0x126b   :  { %11838 = vmatpush3.bf16.msra.mxu1 %v15245_v56  ;;  %11839 = vmatprep.mubr.msk.bf16.mxu1 %vm13191_vm3, %v13190_v5 }
0x126c   :  { %11851 = vmatprep.subr.bf16.mxu1 %v13190_v5 }
0x1272   :  { %11840 = vmatmul.mubr.msk.bf16.vlgmr.msra.gmra.mrb[180].mxu1 %vm7748_vm10, %v9669_v47  ;;  %v12623_v47 = vld [vmem:[#allocation22 + $0x14] ss:$8 sps:$4 sm:$0xff]  }
0x1273   :  { %11852 = vmatpush3.bf16.msra.mxu1 %v15245_v56  ;;  %11853 = vmatprep.mubr.msk.bf16.mxu1 %vm13191_vm3, %v13190_v5 }
0x1274   :  { %11865 = vmatprep.subr.bf16.mxu1 %v13190_v5 }
0x127a   :  { %11854 = vmatmul.mubr.msk.bf16.vlgmr.msra.gmra.mrb[184].mxu1 %vm7748_vm10, %v9674_v25  ;;  %v12621_v25 = vld [vmem:[#allocation22 + $0x10] ss:$8 sps:$4 sm:$0xff]  }
0x127b   :  { %11866 = vmatpush3.bf16.msra.mxu1 %v15245_v56  ;;  %11867 = vmatprep.mubr.msk.bf16.mxu1 %vm13191_vm3, %v13190_v5 }
0x127c   :  { %11879 = vmatprep.subr.bf16.mxu1 %v13190_v5 }
0x1282   :  { %11868 = vmatmul.mubr.msk.bf16.vlgmr.msra.gmra.mrb[188].mxu1 %vm7748_vm10, %v9679_v1 }
0x1283   :  { %11881 = vmatprep.mubr.msk.bf16.mxu1 %vm13191_vm3, %v13190_v5 }
0x131d   :  { %v7901_v39 = vpop.f32.mrb[160].mxu1  ;;  %v7956_v9 = vpop.f32.mrb[40].mxu0 }
0x131e   :  { %v15331_v34 = vadd.f32 %v7956_v9, %v7901_v39  ;;  %v11771_v45 = vpop.f32.mrb[161].mxu1  ;;  %v11779_v12 = vpop.f32.mrb[41].mxu0 }
0x131f   :  { %v7904_v15 = vpop.f32.mrb[162].mxu1  ;;  %v7959_v62 = vpop.f32.mrb[42].mxu0 }
0x1320   :  { %v11772_v52 = vpop.f32.mrb[163].mxu1  ;;  %v11780_v16 = vpop.f32.mrb[43].mxu0 }
0x1325   :  { %v8001_v35 = vpop.f32.mrb[164].mxu1 }
0x1326   :  { %v8007_v10 = vpack.c.bf16 %v8001_v35, %v8001_v35  ;;  %v11785_v27 = vpop.f32.mrb[165].mxu1 }
0x1327   :  { %v8004_v58 = vpop.f32.mrb[166].mxu1 }
0x1328   :  { %v11786_v21 = vpop.f32.mrb[167].mxu1  ;;  %11792 = vmatmul.mubr.msk.bf16.vlgmr.msra.gmra.mrb[44].mxu0 %vm5605_vm2, %v8007_v10 }
0x1329   :  { %11802 = vmatpush3.bf16.msra.mxu0 %v12606_v18  ;;  %11805 = vmatprep.mubr.msk.bf16.mxu0 %vm13191_vm3, %v13190_v5 }
0x132a   :  { %11803 = vmatprep.subr.bf16.mxu0 %v13190_v5 }
0x132d   :  { %v8108_v36 = vpop.f32.mrb[168].mxu1  ;;  %11804 = vmatpush3.bf16.msra.mxu0 %v12607_v55 }
0x132e   :  { %v8114_v17 = vpack.c.bf16 %v8108_v36, %v8108_v36  ;;  %v11799_v23 = vpop.f32.mrb[169].mxu1  ;;  %11815 = vmatprep.subr.bf16.mxu0 %v13190_v5 }
0x132f   :  { %v8111_v41 = vpop.f32.mrb[170].mxu1 }
0x1330   :  { %v11800_v13 = vpop.f32.mrb[171].mxu1  ;;  %11806 = vmatmul.mubr.msk.bf16.vlgmr.msra.gmra.mrb[48].mxu0 %vm5605_vm2, %v8114_v17 }
0x1331   :  { %11816 = vmatpush3.bf16.msra.mxu0 %v12608_v31  ;;  %11819 = vmatprep.mubr.msk.bf16.mxu0 %vm13191_vm3, %v13190_v5 }
0x1332   :  { %11817 = vmatprep.subr.bf16.mxu0 %v13190_v5 }
0x1335   :  { %v8215_v24 = vpop.f32.mrb[172].mxu1  ;;  %11818 = vmatpush3.bf16.msra.mxu0 %v12609_v51 }
0x1336   :  { %v8221_v4 = vpack.c.bf16 %v8215_v24, %v8215_v24  ;;  %v11813_v22 = vpop.f32.mrb[173].mxu1  ;;  %11829 = vmatprep.subr.bf16.mxu0 %v13190_v5 }
0x1337   :  { %v8218_v14 = vpop.f32.mrb[174].mxu1 }
0x1338   :  { %v11814_v32 = vpop.f32.mrb[175].mxu1  ;;  %11820 = vmatmul.mubr.msk.bf16.vlgmr.msra.gmra.mrb[52].mxu0 %vm5605_vm2, %v8221_v4  ;;  %v9684_v14 = vld [vmem:[#allocation19] ss:$0 sm:$0xff] }
0x1339   :  { %11830 = vmatpush3.bf16.msra.mxu0 %v12610_v29  ;;  %11833 = vmatprep.mubr.msk.bf16.mxu0 %vm13191_vm3, %v13190_v5 }
0x133a   :  { %11831 = vmatprep.subr.bf16.mxu0 %v13190_v5 }
0x133d   :  { %v8322_v50 = vpop.f32.mrb[176].mxu1  ;;  %11832 = vmatpush3.bf16.msra.mxu0 %v12611_v63 }
0x133e   :  { %v8328_v0 = vpack.c.bf16 %v8322_v50, %v8322_v50  ;;  %v11827_v49 = vpop.f32.mrb[177].mxu1  ;;  %11843 = vmatprep.subr.bf16.mxu0 %v13190_v5 }
0x133f   :  { %v8325_v43 = vpop.f32.mrb[178].mxu1 }
0x1340   :  { %v11828_v19 = vpop.f32.mrb[179].mxu1  ;;  %11834 = vmatmul.mubr.msk.bf16.vlgmr.msra.gmra.mrb[56].mxu0 %vm5605_vm2, %v8328_v0 }
0x1341   :  { %11844 = vmatpush3.bf16.msra.mxu0 %v12612_v61  ;;  %11847 = vmatprep.mubr.msk.bf16.mxu0 %vm13191_vm3, %v13190_v5 }
0x1342   :  { %11845 = vmatprep.subr.bf16.mxu0 %v13190_v5 }
0x1345   :  { %v8429_v56 = vpop.f32.mrb[180].mxu1  ;;  %11846 = vmatpush3.bf16.msra.mxu0 %v12613_v26 }
0x1346   :  { %v8435_v57 = vpack.c.bf16 %v8429_v56, %v8429_v56  ;;  %v11841_v44 = vpop.f32.mrb[181].mxu1  ;;  %11857 = vmatprep.subr.bf16.mxu0 %v13190_v5 }
0x1347   :  { %v8432_v37 = vpop.f32.mrb[182].mxu1  ;;  %v8726_v44 = vld [vmem:[#allocation20] sm:$0x1] }
0x1348   :  { %v11842_v8 = vpop.f32.mrb[183].mxu1  ;;  %11848 = vmatmul.mubr.msk.bf16.vlgmr.msra.gmra.mrb[60].mxu0 %vm5605_vm2, %v8435_v57  ;;  %v13192_v37 = vmov 0  }
0x1349   :  { %11858 = vmatpush3.bf16.msra.mxu0 %v12614_v40  ;;  %11861 = vmatprep.mubr.msk.bf16.mxu0 %vm13191_vm3, %v13190_v5 }
0x134a   :  { %11859 = vmatprep.subr.bf16.mxu0 %v13190_v5 }
0x134d   :  { %v8536_v33 = vpop.f32.mrb[184].mxu1  ;;  %11860 = vmatpush3.bf16.msra.mxu0 %v12615_v11 }
0x134e   :  { %v8542_v6 = vpack.c.bf16 %v8536_v33, %v8536_v33  ;;  %v11855_v30 = vpop.f32.mrb[185].mxu1  ;;  %11871 = vmatprep.subr.bf16.mxu0 %v13190_v5 }
0x134f   :  { %v8539_v28 = vpop.f32.mrb[186].mxu1  ;;  %v12624_v30 = vld [vmem:[%s15450_s17 + $0x40] sm:$0xff]  }
0x1350   :  { %v11856_v46 = vpop.f32.mrb[187].mxu1  ;;  %11862 = vmatmul.mubr.msk.bf16.vlgmr.msra.gmra.mrb[80].mxu0 %vm5605_vm2, %v8542_v6  ;;  %v12625_v28 = vld [vmem:[%s15450_s17] sm:$0xff]  }
0x1351   :  { %11872 = vmatpush3.bf16.msra.mxu0 %v12616_v59  ;;  %11875 = vmatprep.mubr.msk.bf16.mxu0 %vm13191_vm3, %v13190_v5  ;;  %v12626_v46 = vld [vmem:[%s15450_s17 + $0x48] sm:$0xff]  }
0x1352   :  { %11873 = vmatprep.subr.bf16.mxu0 %v13190_v5 }
0x1355   :  { %v8643_v48 = vpop.f32.mrb[188].mxu1  ;;  %11874 = vmatpush3.bf16.msra.mxu0 %v12617_v7  ;;  %v12627_v7 = vld [vmem:[%s15450_s17 + $0x8] sm:$0xff]  }
0x1356   :  { %v8649_v60 = vpack.c.bf16 %v8643_v48, %v8643_v48  ;;  %v11869_v42 = vpop.f32.mrb[189].mxu1  ;;  %8815 = vmatprep.subr.bf16.mxu0 %v12620_v2  ;;  %v12628_v48 = vld [vmem:[%s15450_s17 + $0x50] sm:$0xff]   ;;  %v12634_v2 = vld [vmem:[%s15450_s17 + $0x68] sm:$0xff]  }
0x1357   :  { %v8646_v54 = vpop.f32.mrb[190].mxu1  ;;  %v12630_v42 = vld [vmem:[%s15450_s17 + $0x58] sm:$0xff]  }
0x1358   :  { %v11870_v38 = vpop.f32.mrb[191].mxu1  ;;  %11876 = vmatmul.mubr.msk.bf16.vlgmr.msra.gmra.mrb[84].mxu0 %vm5605_vm2, %v8649_v60  ;;  %v12629_v60 = vld [vmem:[%s15450_s17 + $0x10] sm:$0xff]   ;;  %v12631_v54 = vld [vmem:[%s15450_s17 + $0x18] sm:$0xff]  }
0x1359   :  { %8816 = vmatpush1.bf16.msra.mxu0 %v12618_v53  ;;  %8847 = vmatprep.mubr.bf16.mxu0 %v13192_v37  ;;  %v12632_v38 = vld [vmem:[%s15450_s17 + $0x60] sm:$0xff]  }
0x135a   :  { %8817 = vmatprep.subr.bf16.mxu0 %v12623_v47  ;;  %v12633_v53 = vld [vmem:[%s15450_s17 + $0x20] sm:$0xff]   ;;  %v12635_v47 = vld [vmem:[%s15450_s17 + $0x28] sm:$0xff]  }
0x135d   :  { %8818 = vmatpush1.bf16.msra.mxu0 %v12621_v25  ;;  %v12636_v25 = vld [vmem:[%s15450_s17 + $0x70] sm:$0xff]  }
0x135e   :  { %11173 = vmatprep.subr.bf16.mxu0 %v12624_v30 }
0x13fb   :  { %v8062_v1 = vpop.f32.mrb[44].mxu0 }
0x13fc   :  { %v8068_v3 = vadd.f32 %v8062_v1, %v15331_v34  ;;  %v11793_v5 = vpop.f32.mrb[45].mxu0  ;;  %v12637_v1 = vld [vmem:[%s15450_s17 + $0x30] sm:$0xff]  }
0x13fd   :  { %v8065_v20 = vpop.f32.mrb[46].mxu0 }
0x13fe   :  { %v11794_v39 = vpop.f32.mrb[47].mxu0 }
0x13ff   :  { %v8780_v39 = vld [vmem:[#allocation23] sm:$0x3] }
0x1403   :  { %v8169_v9 = vpop.f32.mrb[48].mxu0 }
0x1404   :  { %v8175_v45 = vadd.f32 %v8169_v9, %v8068_v3  ;;  %v11807_v12 = vpop.f32.mrb[49].mxu0  ;;  %v8782_v3 = vlaneseq }
0x1405   :  { %v8172_v15 = vpop.f32.mrb[50].mxu0 }
0x1406   :  { %v11808_v62 = vpop.f32.mrb[51].mxu0  ;;  %v8783_v5 = vshrl.u32 %v8782_v3, 7 }
0x1408   :  { %v8784_v20 = vsub.s32 0, %v8783_v5  ;;  %v8788_v9 = vsub.s32 1, %v8783_v5 }
0x140a   :  { %v8789_v12 = vrot.slane %v8780_v39, %v8788_v9 }
0x140b   :  { %v8276_v52 = vpop.f32.mrb[52].mxu0 }
0x140c   :  { %v8282_v16 = vadd.f32 %v8276_v52, %v8175_v45  ;;  %v11821_v35 = vpop.f32.mrb[53].mxu0  ;;  %v8785_v45 = vrot.slane %v8780_v39, %v8784_v20 }
0x140d   :  { %v8279_v18 = vpop.f32.mrb[54].mxu0 }
0x140e   :  { %v11822_v10 = vpop.f32.mrb[55].mxu0 }
0x1413   :  { %v8383_v27 = vpop.f32.mrb[56].mxu0 }
0x1414   :  { %v8389_v58 = vadd.f32 %v8383_v27, %v8282_v16  ;;  %v11835_v21 = vpop.f32.mrb[57].mxu0 }
0x1415   :  { %v8386_v55 = vpop.f32.mrb[58].mxu0 }
0x1416   :  { %v11836_v36 = vpop.f32.mrb[59].mxu0 }
0x141b   :  { %v8490_v31 = vpop.f32.mrb[60].mxu0 }
0x141c   :  { %v8496_v34 = vadd.f32 %v8490_v31, %v8389_v58  ;;  %v11849_v17 = vpop.f32.mrb[61].mxu0 }
0x141d   :  { %v8493_v23 = vpop.f32.mrb[62].mxu0 }
0x141e   :  { %v11850_v41 = vpop.f32.mrb[63].mxu0 }
0x1423   :  { %v8597_v13 = vpop.f32.mrb[80].mxu0 }
0x1424   :  { %v8603_v51 = vadd.f32 %v8597_v13, %v8496_v34  ;;  %v11863_v24 = vpop.f32.mrb[81].mxu0 }
0x1425   :  { %v8600_v29 = vpop.f32.mrb[82].mxu0  ;;  %v8870_v24 = vld [vmem:[#allocation25] sm:$0x1] }
0x1426   :  { %v11864_v4 = vpop.f32.mrb[83].mxu0  ;;  %v12638_v29 = vld [vmem:[%s15450_s17 + $0x78] sm:$0xff]  }
0x1427   :  { %v12639_v4 = vld [vmem:[%s15450_s17 + $0x38] sm:$0xff]   ;;  %s13193_s17 = smov [#allocation28]  }
0x1428   :  { %s9117_s20 = sshll.u32 %s13193_s17, 4  ;;  %s9118_s20 = int_to_ptr.vmem [resolvable:$true] %s9117_s20 }
0x1429   :  { %s13124_s26 = scalar_lea.vmem %s9118_s20, 32  ;;  %p13129_p3 = scmp.lt.s32.totalorder %s9118_s20, %s9118_s20 }
0x142a   :  { %p13125_p2 = scmp.ne.s32.totalorder %s9118_s20, %s13124_s26  ;;  %p13130_p4 = scmp.lt.s32.totalorder %s13124_s26, %s13124_s26 }
0x142b   :  { %v8704_v22 = vpop.f32.mrb[84].mxu0 }
0x142c   :  { %v8710_v32 = vadd.f32 %v8704_v22, %v8603_v51  ;;  %v11877_v63 = vpop.f32.mrb[85].mxu0  ;;  %p13131_p5 = por %p13130_p4, %p13129_p3 }
0x142d   :  { %v8707_v50 = vpop.f32.mrb[86].mxu0 }
0x142e   :  { %v8718_v61 = vadd.f32 %v9684_v14, %v8710_v32  ;;  %v11878_v0 = vpop.f32.mrb[87].mxu0  ;;  %p13132_p6 = pnand %p13131_p5, %p13125_p2 }
0x1430   :  { %v8720_v49 = vmin.f32 %v8718_v61, 0.0  ;;  %vm8719_vm11 = vcmp.gt.f32.partialorder %v8718_v61, 0.0 }
0x1432   :  { %v8721_v43 = vmul.f32 1.442695, %v8720_v49 }
0x1434   :  { %12682 = vpow2.f32 %v8721_v43  ;;  %v9696_v43 = vld [vmem:[#allocation26] ss:$0 sm:$0xff] }
0x143e   :  { %v12683_v19 = vpop.eup %12682 }
0x143f   :  { %v9685_v26 = vadd.f32 -1.0, %v12683_v19 }
0x1441   :  { %v8724_v56 = vsel %vm8719_vm11, %v8718_v61, %v9685_v26 }
0x1442   :  { %v8725_v40 = vpack.c.bf16 %v8724_v56, %v8724_v56 }
0x1444   :  { %v8733_v57 = vsel %vm8731_vm12, %v8725_v40, 0 }
0x1445   :  { %11880 = vmatpush3.bf16.msra.mxu1 %v8733_v57 }
0x1448   :  { %11882 = vmatmul.mubr.msk.bf16.vlgmr.msra.gmra.mrb[192].mxu1 %vm8727_vm13, %v8726_v44 }
0x1449   :  { %8912 = vmatprep.mubr.bf16.mxu1 %v13192_v37 }
0x151b   :  { %v8769_v8 = vpop.f32.mrb[192].mxu1 }
0x151c   :  { %v8775_v11 = vpack.c.bf16 %v8769_v8, %v8769_v8  ;;  %v11883_v33 = vpop.f32.mrb[193].mxu1 }
0x151d   :  { %v8772_v59 = vpop.f32.mrb[194].mxu1 }
0x151e   :  { %v11884_v6 = vpop.f32.mrb[195].mxu1  ;;  %9691 = vmatmul.mubr.msk.bf16.vlgmr.msra.gmra.mrb[88].mxu0 %vm5605_vm2, %v8775_v11 }
0x151f   :  { %11174 = vmatpush3.bf16.msra.mxu0 %v12625_v28 }
0x1520   :  { %11175 = vmatprep.subr.bf16.mxu0 %v12626_v46 }
0x1523   :  { %11176 = vmatpush3.bf16.msra.mxu0 %v12627_v7 }
0x1524   :  { %11177 = vmatprep.subr.bf16.mxu0 %v12628_v48 }
0x1527   :  { %11178 = vmatpush3.bf16.msra.mxu0 %v12629_v60 }
0x1528   :  { %11179 = vmatprep.subr.bf16.mxu0 %v12630_v42 }
0x152b   :  { %11180 = vmatpush3.bf16.msra.mxu0 %v12631_v54 }
0x152c   :  { %11181 = vmatprep.subr.bf16.mxu0 %v12632_v38 }
0x152f   :  { %11182 = vmatpush3.bf16.msra.mxu0 %v12633_v53 }
0x1530   :  { %11183 = vmatprep.subr.bf16.mxu0 %v12634_v2 }
0x1533   :  { %11184 = vmatpush3.bf16.msra.mxu0 %v12635_v47 }
0x1534   :  { %11185 = vmatprep.subr.bf16.mxu0 %v12636_v25 }
0x1537   :  { %11186 = vmatpush3.bf16.msra.mxu0 %v12637_v1 }
0x1538   :  { %11187 = vmatprep.subr.bf16.mxu0 %v12638_v29 }
0x153b   :  { %11188 = vmatpush3.bf16.msra.mxu0 %v12639_v4 }
0x15f1   :  { %v8849_v15 = vpop.f32.mrb[88].mxu0 }
0x15f2   :  { %v8850_v62 = vadd.f32 %v8849_v15, %v8785_v45  ;;  %v8851_v52 = vpop.f32.mrb[89].mxu0 }
0x15f3   :  { %v8852_v16 = vadd.f32 %v8851_v52, %v8789_v12  ;;  %v8853_v35 = vpop.f32.mrb[90].mxu0 }
0x15f4   :  { %v8858_v18 = vmin.f32 %v8850_v62, 0.0  ;;  %v8854_v10 = vpop.f32.mrb[91].mxu0  ;;  %vm8856_vm14 = vcmp.gt.f32.partialorder %v8850_v62, 0.0 }
0x15f5   :  { %v8859_v27 = vmin.f32 %v8852_v16, 0.0  ;;  %vm8857_vm15 = vcmp.gt.f32.partialorder %v8852_v16, 0.0 }
0x15f6   :  { %v8860_v58 = vmul.f32 1.442695, %v8858_v18 }
0x15f7   :  { %v8862_v21 = vmul.f32 1.442695, %v8859_v27 }
0x15f8   :  { %12684 = vpow2.f32 %v8860_v58 }
0x15f9   :  { %12686 = vpow2.f32 %v8862_v21 }
0x1602   :  { %v12685_v55 = vpop.eup %12684 }
0x1603   :  { %v12687_v36 = vpop.eup %12686  ;;  %v9692_v31 = vadd.f32 -1.0, %v12685_v55 }
0x1604   :  { %v9693_v34 = vadd.f32 -1.0, %v12687_v36 }
0x1605   :  { %v8866_v17 = vsel %vm8856_vm14, %v8850_v62, %v9692_v31 }
0x1606   :  { %v8868_v23 = vpack.c.bf16 %v8866_v17, %v8866_v17  ;;  %v8867_v41 = vsel %vm8857_vm15, %v8852_v16, %v9693_v34 }
0x1607   :  { %v8869_v13 = vpack.c.bf16 %v8867_v41, %v8867_v41 }
0x1608   :  { %v8875_v51 = vsel %vm8731_vm12, %v8868_v23, 0 }
0x1609   :  { %9694 = vmatprep.subr.msk.bf16.mxu1 %vm8731_vm12, %v8869_v13 }
0x160a   :  { %8881 = vmatpush1.bf16.msra.mxu1 %v8875_v51 }
0x160d   :  { %9695 = vmatmul.mubr.msk.bf16.vlgmr.msra.gmra.mrb[196].mxu1 %vm8727_vm13, %v8870_v24 }
0x16e0   :  { %v8914_v22 = vpop.f32.mrb[196].mxu1 }
0x16e1   :  { %v8916_v14 = vpop.f32.mrb[197].mxu1  ;;  %v8921_v50 = vpack.c.bf16 %v8914_v22, %v8914_v22 }
0x16e2   :  { %v8922_v32 = vpack.c.bf16 %v8916_v14, %v8916_v14  ;;  %v8918_v63 = vpop.f32.mrb[198].mxu1 }
0x16e3   :  { %v8919_v61 = vpop.f32.mrb[199].mxu1 }
0x16e4   :  { %9090 = vmatprep.mubr.bf16.mxu0 %v8922_v32 }
0x16e5   :  { %9091 = vmatmul.mubr.bf16.vlgmr.msra.gmra.mrb[92].mxu0 %v8921_v50 }
0x17b8   :  { %v11189_v0 = vpop.f32.mrb[92].mxu0 }
0x17b9   :  { %v11190_v49 = vpop.f32.mrb[93].mxu0 }
0x17ba   :  { %v11191_v19 = vadd.f32 %v11190_v49, %v11189_v0  ;;  %v11192_v26 = vpop.f32.mrb[94].mxu0 }
0x17bb   :  { %v11193_v56 = vpop.f32.mrb[95].mxu0 }
0x17bc   :  { %v9093_v40 = vadd.f32 %v11191_v19, %v9696_v43 }
0x17be   :  { %v9099_v57 = vsel %vm9098_vm0, %v9093_v40, -inf }
0x17bf   :  { %9100 = vmax.xlane.f32.xlu0 %v9099_v57 }
0x184c   :  { %v9101_v44 = vpop.xlane.xlu0 %9100 }
0x184d   :  { %v9102_v37 = vsub.f32 %v9093_v40, %v9101_v44 }
0x184f   :  { %v9103_v8 = vmul.f32 1.442695, %v9102_v37 }
0x1851   :  { %12688 = vpow2.f32 %v9103_v8 }
0x185b   :  { %v12689_v11 = vpop.eup %12688 }
0x185c   :  { %v9105_v33 = vsel %vm9098_vm0, %v12689_v11, 0.0 }
0x185d   :  { %9106 = vadd.xlane.f32.xlu0 %v9105_v33 }
0x18ea   :  { %v9107_v59 = vpop.xlane.xlu0 %9106 }
0x18eb   :  { %12690 = vrcp.f32 %v9107_v59 }
0x18f5   :  { %v12691_v6 = vpop.eup %12690 }
0x18f6   :  { %v9109_v30 = vmul.f32 %v12691_v6, %v12689_v11 }
0x18f8   :  { %9110 = vst.msk [vmem:[#allocation28] sm:$0x3] %vm9098_vm0, %v9109_v30 }
0x18f9   :  { %13135 = shalt.err (!%p13132_p6)
}
0x18fa   :  { %s15475_s28 = sld [smem:[#allocation43_spill]] }
0x1900   :  { %s13136_s0 = scalar_lea.hbm %s15475_s28, 32 }
0x1901   :  { %p13137_p7 = scmp.ne.s32.totalorder %s15475_s28, %s13136_s0  ;;  %p13140_p8 = scmp.lt.u32.totalorder %s13136_s0, %s15475_s28 }
0x1903   :  { %p13142_p9 = pnand %p13140_p8, %p13137_p7 }
0x1905   :  { %13145 = shalt.err (!%p13142_p9)
}
0x1906   :  { %9120 = dma.vmem_to_hbm [thread:$0]  %s9118_s20, 32, %s15475_s28, [#allocation4]  }
0x1907   :  { %13164 = dma.done.wait [#allocation4], 32  }
0x1908   :  { %13165 = vsyncadd [#allocation4], 4294967264 }
0x1909   :  { %9124 = vsyncpa [#allocation3], 1 }
0x190a   :  { %9125 = vsyncpa [#allocation6], 1 }
0x190b   :  { %9126 = vsyncpa [#allocation9], 1 }
0x190c   :  { %9127 = vsyncpa [#allocation12], 1 }
0x190d   :  { %9128 = vsyncpa [#allocation15], 1 }
0x190e   :  { %9129 = vsyncpa [#allocation18], 1 }
0x190f   :  { %9130 = vsyncpa [#allocation21], 1 }
0x1910   :  { %9131 = vsyncpa [#allocation24], 1 }
0x1911   :  { %9132 = vsyncpa [#allocation27], 1 }
0x1912   :  { %9133 = vsyncpa [#allocation4], 1 }

</bundles_post_ra>
